<compile_context>
chip_gen: v6e
topology: v6e:2x2x1
jax: 0.10.0
libtpu: 0.0.40
codegen_flags: <defaults>
</compile_context>

<pallas_src>
import functools
import math

import jax
import jax.numpy as jnp
from jax.experimental import pallas as pl
from jax.experimental.pallas import tpu as pltpu


TM = 256                          # M tile when M is large (multiple of MXU rows)
TK_MAX = 4096                     # largest single-step K tile
VMEM_LIMIT = 64 * 1024 * 1024     # explicit scoped-VMEM budget (<= v7x physical)


def _round_up(x, m):
    return (x + m - 1) // m * m


@functools.lru_cache(maxsize=1)
def _mxu_lane_tile():
    """256-wide B tiles for the 256x256 MXUs (v6e/v7x); 128 otherwise (v5e, ...)."""
    try:
        kind = jax.devices()[0].device_kind.lower()
    except Exception:
        return 128
    return 256 if ("v6" in kind or "v7" in kind) else 128


def _apply_act(r, act):
    if act == "leaky":
        return jnp.where(r >= 0.0, r, 0.2 * r)
    if act == "sigmoid":
        return jax.nn.sigmoid(r)
    return r  # "none"


# ---------------------------------------------------------------------------
# Pallas kernels
# ---------------------------------------------------------------------------
def _matmul_act_kernel_1step(a_ref, b_ref, o_ref, *, act):
    # Single K step: no accumulator scratch, write straight to the output tile.
    r = jnp.dot(a_ref[...], b_ref[...], preferred_element_type=jnp.float32)
    o_ref[...] = _apply_act(r, act).astype(o_ref.dtype)


def _matmul_act_kernel_ksteps(a_ref, b_ref, o_ref, acc_ref, *, act):
    # Generic K-tiled path (only used when K > TK_MAX).
    k = pl.program_id(2)

    @pl.when(k == 0)
    def _():
        acc_ref[...] = jnp.zeros_like(acc_ref)

    acc_ref[...] += jnp.dot(a_ref[...], b_ref[...],
                            preferred_element_type=jnp.float32)

    @pl.when(k == pl.num_programs(2) - 1)
    def _():
        o_ref[...] = _apply_act(acc_ref[...], act).astype(o_ref.dtype)


def _matvec_act_kernel(a_ref, b_ref, o_ref, *, act):
    # o[m, 0] = act(sum_k a[m, k] * b[0, k]) — single step, full K resident.
    a = a_ref[...].astype(jnp.float32)
    b = b_ref[...].astype(jnp.float32)
    r = jnp.sum(a * b, axis=-1, keepdims=True)
    o_ref[...] = _apply_act(r, act)


# ---------------------------------------------------------------------------
# Pallas wrappers
# ---------------------------------------------------------------------------
def _tile_m(a):
    """Choose the M tile. Small M -> one full-M block, no padding / slicing."""
    M = a.shape[0]
    if M <= TM:
        return a, M, M, M
    Mp = _round_up(M, TM)
    if Mp != M:
        a = jnp.pad(a, ((0, Mp - M), (0, 0)))
    return a, M, Mp, TM


def matmul_act(a, b, act, out_dtype=jnp.bfloat16):
    """act(A @ B). A: [M, K] bf16, B: [K, N] bf16; f32 accumulation on the MXU."""
    a, M, Mp, tm = _tile_m(a)
    K, N = b.shape
    assert a.shape[1] == K
    nm = Mp // tm

    tn = math.gcd(N, _mxu_lane_tile())
    nn = N // tn

    tk = K if K <= TK_MAX else TK_MAX
    if K % tk != 0:
        tk = K  # fall back to a single full-K step for odd K (not hit by this net)
    nk = K // tk

    if nk == 1:
        out = pl.pallas_call(
            functools.partial(_matmul_act_kernel_1step, act=act),
            out_shape=jax.ShapeDtypeStruct((Mp, N), out_dtype),
            grid=(nm, nn),
            in_specs=[
                pl.BlockSpec((tm, K), lambda i, j: (i, 0)),
                pl.BlockSpec((K, tn), lambda i, j: (0, j)),
            ],
            out_specs=pl.BlockSpec((tm, tn), lambda i, j: (i, j)),
            compiler_params=pltpu.CompilerParams(
                dimension_semantics=("parallel", "parallel"),
                vmem_limit_bytes=VMEM_LIMIT),
        )(a, b)
    else:
        out = pl.pallas_call(
            functools.partial(_matmul_act_kernel_ksteps, act=act),
            out_shape=jax.ShapeDtypeStruct((Mp, N), out_dtype),
            grid=(nm, nn, nk),
            in_specs=[
                pl.BlockSpec((tm, tk), lambda i, j, k: (i, k)),
                pl.BlockSpec((tk, tn), lambda i, j, k: (k, j)),
            ],
            out_specs=pl.BlockSpec((tm, tn), lambda i, j, k: (i, j)),
            scratch_shapes=[pltpu.VMEM((tm, tn), jnp.float32)],
            compiler_params=pltpu.CompilerParams(
                dimension_semantics=("parallel", "parallel", "arbitrary"),
                vmem_limit_bytes=VMEM_LIMIT),
        )(a, b)

    return out[:M] if Mp != M else out


def matvec_act(a, b_row, act):
    """act(A @ b) for a single output channel. A: [M, K] bf16, b_row: [1, K] bf16."""
    a, M, Mp, tm = _tile_m(a)
    K = a.shape[1]
    assert b_row.shape == (1, K)
    nm = Mp // tm

    out = pl.pallas_call(
        functools.partial(_matvec_act_kernel, act=act),
        out_shape=jax.ShapeDtypeStruct((Mp, 1), jnp.float32),
        grid=(nm,),
        in_specs=[
            pl.BlockSpec((tm, K), lambda i: (i, 0)),
            pl.BlockSpec((1, K), lambda i: (0, 0)),
        ],
        out_specs=pl.BlockSpec((tm, 1), lambda i: (i, 0)),
        compiler_params=pltpu.CompilerParams(
            dimension_semantics=("parallel",),
            vmem_limit_bytes=VMEM_LIMIT),
    )(a, b_row)
    return out[:M] if Mp != M else out


# ---------------------------------------------------------------------------
# Conv2d = im2col (glue) + Pallas matmul / matvec (hot path)
# ---------------------------------------------------------------------------
def _im2col(x_nhwc, kh, kw, stride, pad):
    # TODO(synk): im2col is still jit-fused XLA glue; moving the shifted-window
    # reads into the Pallas kernel (and fusing layers 3-5 into one pallas_call
    # with VMEM-resident activations) is the remaining optimization.
    N, H, W, C = x_nhwc.shape
    xp = jnp.pad(x_nhwc, ((0, 0), (pad, pad), (pad, pad), (0, 0)))
    Ho = (H + 2 * pad - kh) // stride + 1
    Wo = (W + 2 * pad - kw) // stride + 1
    cols = []
    for di in range(kh):
        for dj in range(kw):
            cols.append(
                xp[:, di:di + stride * Ho:stride, dj:dj + stride * Wo:stride, :])
    patches = jnp.stack(cols, axis=3)                  # (N, Ho, Wo, kh*kw, C)
    a = patches.reshape(N * Ho * Wo, kh * kw * C)      # K ordering: (di, dj, c)
    return a, Ho, Wo


def conv2d_pallas(x_nhwc, w_kc, *, stride, pad, act, kh=4, kw=4):
    N = x_nhwc.shape[0]
    Co = w_kc.shape[1]
    a, Ho, Wo = _im2col(x_nhwc, kh, kw, stride, pad)
    out = matmul_act(a, w_kc, act)                     # (M, Co) bf16
    return out.reshape(N, Ho, Wo, Co)


def conv2d_single_channel_pallas(x_nhwc, w_1k, *, stride, pad, act, kh=4, kw=4):
    N = x_nhwc.shape[0]
    a, Ho, Wo = _im2col(x_nhwc, kh, kw, stride, pad)
    out = matvec_act(a, w_1k, act)                     # (M, 1) f32
    return out.reshape(N, Ho, Wo, 1)


# ---------------------------------------------------------------------------
# Spectral normalization + parameter preparation (plain JAX, done once)
# ---------------------------------------------------------------------------
def spectral_normalize(w, n_iters=30):
    # TODO(synk): PyTorch's spectral_norm runs ONE power iteration per forward from
    # a random persistent `u`; here sigma is estimated once with a fixed number of
    # deterministic power iterations, so values won't match PyTorch bit-for-bit.
    Co = w.shape[0]
    wm = w.reshape(Co, -1).astype(jnp.float32)
    u = jnp.ones((Co,), jnp.float32) / jnp.sqrt(jnp.float32(Co))

    def step(u, _):
        v = wm.T @ u
        v = v / (jnp.linalg.norm(v) + 1e-12)
        u2 = wm @ v
        u2 = u2 / (jnp.linalg.norm(u2) + 1e-12)
        return u2, None

    u, _ = jax.lax.scan(step, u, None, length=n_iters)
    v = wm.T @ u
    v = v / (jnp.linalg.norm(v) + 1e-12)
    sigma = u @ (wm @ v)
    return w / sigma


def init_discriminator_params(key, in_channels, gain=0.02):
    # Conv2d(in, out, kernel=4); bias=False on the spectral-norm branch.
    chans = [in_channels, 64, 128, 256, 512, 1]
    params = []
    for i in range(5):
        key, sub = jax.random.split(key)
        w = gain * jax.random.normal(
            sub, (chans[i + 1], chans[i], 4, 4), dtype=jnp.float32)
        params.append(w)
    return params


def prepare_params(raw_params):
    """Spectral-normalize, reshape to matmul layout and cast to bf16 (once)."""
    prepared = []
    n = len(raw_params)
    for i, w in enumerate(raw_params):
        Co, Ci, kh, kw = w.shape
        wn = spectral_normalize(w)
        # (Co, Ci, kh, kw) -> (kh, kw, Ci, Co) -> (kh*kw*Ci, Co): matches the
        # (di, dj, c) K-ordering produced by _im2col.
        wm = jnp.transpose(wn, (2, 3, 1, 0)).reshape(kh * kw * Ci, Co)
        if i == n - 1 and Co == 1:
            wm = wm.T                    # (1, K) row vector for the matvec kernel
        prepared.append(wm.astype(jnp.bfloat16))
    return prepared


# ---------------------------------------------------------------------------
# Discriminator forward
# ---------------------------------------------------------------------------
def discriminator_forward(x_nchw, prepared_params, use_sigmoid=True):
    # TODO(synk): inter-layer activations are bf16 (PyTorch reference is f32);
    # MXU accumulation is f32 but rounding compounds slightly over the 5 layers.
    x = jnp.transpose(x_nchw, (0, 2, 3, 1)).astype(jnp.bfloat16)   # NCHW -> NHWC
    strides = [2, 2, 2, 1]
    for w_kc, s in zip(prepared_params[:4], strides):
        x = conv2d_pallas(x, w_kc, stride=s, pad=1, act="leaky")
    out = conv2d_single_channel_pallas(
        x, prepared_params[4], stride=1, pad=1,
        act="sigmoid" if use_sigmoid else "none")
    return jnp.transpose(out, (0, 3, 1, 2))                        # NHWC -> NCHW


if __name__ == "__main__":
    key = jax.random.PRNGKey(0)
    k_param, k_x = jax.random.split(key)

    batch, in_channels, spatial = 2, 4, 32
    raw_params = init_discriminator_params(k_param, in_channels)
    params = prepare_params(raw_params)
    x = jax.random.normal(k_x, (batch, in_channels, spatial, spatial), jnp.float32)

    fwd = jax.jit(functools.partial(discriminator_forward, use_sigmoid=True))
    out = fwd(x, params)
    jax.block_until_ready(out)

    # sanity: spatial path 32 -> 16 -> 8 -> 4 -> 3 -> 2, channels -> 1
    assert out.shape == (batch, 1, 2, 2), out.shape
    assert bool(jnp.all(jnp.isfinite(out)))
    assert bool(jnp.all((out >= 0.0) & (out <= 1.0)))

    print("KERNEL_OK")
</pallas_src>

<mosaic_0001>
module attributes {stable_mosaic.version = 11 : i64} {
  func.func @_matmul_act_kernel_1step(%arg0: i32, %arg1: i32, %arg2: memref<256x64xbf16, #tpu.memory_space<vmem>>, %arg3: memref<64x64xbf16, #tpu.memory_space<vmem>>, %arg4: memref<256x64xbf16, #tpu.memory_space<vmem>>) attributes {dimension_semantics = [#tpu.dimension_semantics<parallel>, #tpu.dimension_semantics<parallel>], iteration_bounds = array<i64: 2, 1>, scalar_prefetch = 0 : i64, scratch_operands = 0 : i64, tpu.core_type = #tpu.core_type<tc>, window_params = [{transform_indices = @transform_0, window_bounds = array<i64: 256, 64>}, {transform_indices = @transform_1, window_bounds = array<i64: 64, 64>}, {transform_indices = @transform_2, window_bounds = array<i64: 256, 64>}]} {
    %c0 = arith.constant 0 : index
    %c0_0 = arith.constant 0 : index
    %0 = vector.load %arg2[%c0, %c0_0] : memref<256x64xbf16, #tpu.memory_space<vmem>>, vector<256x64xbf16>
    %c0_1 = arith.constant 0 : index
    %c0_2 = arith.constant 0 : index
    %1 = vector.load %arg3[%c0_1, %c0_2] : memref<64x64xbf16, #tpu.memory_space<vmem>>, vector<64x64xbf16>
    %cst = arith.constant dense<0.000000e+00> : vector<256x64xf32>
    %2 = tpu.matmul %0, %1, %cst {dimension_numbers = #tpu.dot_dimension_numbers<[1], [0], [0], [1], [0, 0, 1, 1], [], []>} : vector<256x64xbf16>, vector<64x64xbf16>, vector<256x64xf32> -> vector<256x64xf32>
    %cst_3 = arith.constant 0.000000e+00 : f32
    %3 = vector.broadcast %cst_3 : f32 to vector<256x64xf32>
    %4 = arith.cmpf oge, %2, %3 : vector<256x64xf32>
    %cst_4 = arith.constant 2.000000e-01 : f32
    %5 = vector.broadcast %cst_4 : f32 to vector<256x64xf32>
    %6 = arith.mulf %5, %2 : vector<256x64xf32>
    %7 = arith.select %4, %2, %6 : vector<256x64xi1>, vector<256x64xf32>
    %8 = arith.truncf %7 : vector<256x64xf32> to vector<256x64xbf16>
    %c0_5 = arith.constant 0 : index
    %c0_6 = arith.constant 0 : index
    %9 = vector.load %arg4[%c0_5, %c0_6] : memref<256x64xbf16, #tpu.memory_space<vmem>>, vector<256x64xbf16>
    tpu.vector_store %arg4[%c0_5, %c0_6], %8 {strides = array<i32>} : memref<256x64xbf16, #tpu.memory_space<vmem>>, vector<256x64xbf16>,
    return
  }
  func.func @transform_0(%arg0: i32, %arg1: i32) -> (i32, i32) {
    %c0_i32 = arith.constant 0 : i32
    %c0_i32_0 = arith.constant 0 : i32
    return %arg0, %c0_i32 : i32, i32
  }
  func.func @transform_1(%arg0: i32, %arg1: i32) -> (i32, i32) {
    %c0_i32 = arith.constant 0 : i32
    %c0_i32_0 = arith.constant 0 : i32
    return %c0_i32, %arg1 : i32, i32
  }
  func.func @transform_2(%arg0: i32, %arg1: i32) -> (i32, i32) {
    %c0_i32 = arith.constant 0 : i32
    return %arg0, %arg1 : i32, i32
  }
}

module attributes {stable_mosaic.version = 11 : i64} {
  func.func @_matmul_act_kernel_1step(%arg0: i32, %arg1: i32, %arg2: memref<128x1024xbf16, #tpu.memory_space<vmem>>, %arg3: memref<1024x128xbf16, #tpu.memory_space<vmem>>, %arg4: memref<128x128xbf16, #tpu.memory_space<vmem>>) attributes {dimension_semantics = [#tpu.dimension_semantics<parallel>, #tpu.dimension_semantics<parallel>], iteration_bounds = array<i64: 1, 1>, scalar_prefetch = 0 : i64, scratch_operands = 0 : i64, tpu.core_type = #tpu.core_type<tc>, window_params = [{transform_indices = @transform_0, window_bounds = array<i64: 128, 1024>}, {transform_indices = @transform_1, window_bounds = array<i64: 1024, 128>}, {transform_indices = @transform_2, window_bounds = array<i64: 128, 128>}]} {
    %c0 = arith.constant 0 : index
    %c0_0 = arith.constant 0 : index
    %0 = vector.load %arg2[%c0, %c0_0] : memref<128x1024xbf16, #tpu.memory_space<vmem>>, vector<128x1024xbf16>
    %c0_1 = arith.constant 0 : index
    %c0_2 = arith.constant 0 : index
    %1 = vector.load %arg3[%c0_1, %c0_2] : memref<1024x128xbf16, #tpu.memory_space<vmem>>, vector<1024x128xbf16>
    %cst = arith.constant dense<0.000000e+00> : vector<128x128xf32>
    %2 = tpu.matmul %0, %1, %cst {dimension_numbers = #tpu.dot_dimension_numbers<[1], [0], [0], [1], [0, 0, 1, 1], [], []>} : vector<128x1024xbf16>, vector<1024x128xbf16>, vector<128x128xf32> -> vector<128x128xf32>
    %cst_3 = arith.constant 0.000000e+00 : f32
    %3 = vector.broadcast %cst_3 : f32 to vector<128x128xf32>
    %4 = arith.cmpf oge, %2, %3 : vector<128x128xf32>
    %cst_4 = arith.constant 2.000000e-01 : f32
    %5 = vector.broadcast %cst_4 : f32 to vector<128x128xf32>
    %6 = arith.mulf %5, %2 : vector<128x128xf32>
    %7 = arith.select %4, %2, %6 : vector<128x128xi1>, vector<128x128xf32>
    %8 = arith.truncf %7 : vector<128x128xf32> to vector<128x128xbf16>
    %c0_5 = arith.constant 0 : index
    %c0_6 = arith.constant 0 : index
    %9 = vector.load %arg4[%c0_5, %c0_6] : memref<128x128xbf16, #tpu.memory_space<vmem>>, vector<128x128xbf16>
    tpu.vector_store %arg4[%c0_5, %c0_6], %8 {strides = array<i32>} : memref<128x128xbf16, #tpu.memory_space<vmem>>, vector<128x128xbf16>,
    return
  }
  func.func @transform_0(%arg0: i32, %arg1: i32) -> (i32, i32) {
    %c0_i32 = arith.constant 0 : i32
    %c0_i32_0 = arith.constant 0 : i32
    return %arg0, %c0_i32 : i32, i32
  }
  func.func @transform_1(%arg0: i32, %arg1: i32) -> (i32, i32) {
    %c0_i32 = arith.constant 0 : i32
    %c0_i32_0 = arith.constant 0 : i32
    return %c0_i32, %arg1 : i32, i32
  }
  func.func @transform_2(%arg0: i32, %arg1: i32) -> (i32, i32) {
    %c0_i32 = arith.constant 0 : i32
    return %arg0, %arg1 : i32, i32
  }
}

module attributes {stable_mosaic.version = 11 : i64} {
  func.func @_matmul_act_kernel_1step(%arg0: i32, %arg1: i32, %arg2: memref<32x2048xbf16, #tpu.memory_space<vmem>>, %arg3: memref<2048x128xbf16, #tpu.memory_space<vmem>>, %arg4: memref<32x128xbf16, #tpu.memory_space<vmem>>) attributes {dimension_semantics = [#tpu.dimension_semantics<parallel>, #tpu.dimension_semantics<parallel>], iteration_bounds = array<i64: 1, 2>, scalar_prefetch = 0 : i64, scratch_operands = 0 : i64, tpu.core_type = #tpu.core_type<tc>, window_params = [{transform_indices = @transform_0, window_bounds = array<i64: 32, 2048>}, {transform_indices = @transform_1, window_bounds = array<i64: 2048, 128>}, {transform_indices = @transform_2, window_bounds = array<i64: 32, 128>}]} {
    %c0 = arith.constant 0 : index
    %c0_0 = arith.constant 0 : index
    %0 = vector.load %arg2[%c0, %c0_0] : memref<32x2048xbf16, #tpu.memory_space<vmem>>, vector<32x2048xbf16>
    %c0_1 = arith.constant 0 : index
    %c0_2 = arith.constant 0 : index
    %1 = vector.load %arg3[%c0_1, %c0_2] : memref<2048x128xbf16, #tpu.memory_space<vmem>>, vector<2048x128xbf16>
    %cst = arith.constant dense<0.000000e+00> : vector<32x128xf32>
    %2 = tpu.matmul %0, %1, %cst {dimension_numbers = #tpu.dot_dimension_numbers<[1], [0], [0], [1], [0, 0, 1, 1], [], []>} : vector<32x2048xbf16>, vector<2048x128xbf16>, vector<32x128xf32> -> vector<32x128xf32>
    %cst_3 = arith.constant 0.000000e+00 : f32
    %3 = vector.broadcast %cst_3 : f32 to vector<32x128xf32>
    %4 = arith.cmpf oge, %2, %3 : vector<32x128xf32>
    %cst_4 = arith.constant 2.000000e-01 : f32
    %5 = vector.broadcast %cst_4 : f32 to vector<32x128xf32>
    %6 = arith.mulf %5, %2 : vector<32x128xf32>
    %7 = arith.select %4, %2, %6 : vector<32x128xi1>, vector<32x128xf32>
    %8 = arith.truncf %7 : vector<32x128xf32> to vector<32x128xbf16>
    %c0_5 = arith.constant 0 : index
    %c0_6 = arith.constant 0 : index
    %9 = vector.load %arg4[%c0_5, %c0_6] : memref<32x128xbf16, #tpu.memory_space<vmem>>, vector<32x128xbf16>
    tpu.vector_store %arg4[%c0_5, %c0_6], %8 {strides = array<i32>} : memref<32x128xbf16, #tpu.memory_space<vmem>>, vector<32x128xbf16>,
    return
  }
  func.func @transform_0(%arg0: i32, %arg1: i32) -> (i32, i32) {
    %c0_i32 = arith.constant 0 : i32
    %c0_i32_0 = arith.constant 0 : i32
    return %arg0, %c0_i32 : i32, i32
  }
  func.func @transform_1(%arg0: i32, %arg1: i32) -> (i32, i32) {
    %c0_i32 = arith.constant 0 : i32
    %c0_i32_0 = arith.constant 0 : i32
    return %c0_i32, %arg1 : i32, i32
  }
  func.func @transform_2(%arg0: i32, %arg1: i32) -> (i32, i32) {
    %c0_i32 = arith.constant 0 : i32
    return %arg0, %arg1 : i32, i32
  }
}

module attributes {stable_mosaic.version = 11 : i64} {
  func.func @_matmul_act_kernel_1step(%arg0: i32, %arg1: i32, %arg2: memref<18x4096xbf16, #tpu.memory_space<vmem>>, %arg3: memref<4096x128xbf16, #tpu.memory_space<vmem>>, %arg4: memref<18x128xbf16, #tpu.memory_space<vmem>>) attributes {dimension_semantics = [#tpu.dimension_semantics<parallel>, #tpu.dimension_semantics<parallel>], iteration_bounds = array<i64: 1, 4>, scalar_prefetch = 0 : i64, scratch_operands = 0 : i64, tpu.core_type = #tpu.core_type<tc>, window_params = [{transform_indices = @transform_0, window_bounds = array<i64: 18, 4096>}, {transform_indices = @transform_1, window_bounds = array<i64: 4096, 128>}, {transform_indices = @transform_2, window_bounds = array<i64: 18, 128>}]} {
    %c0 = arith.constant 0 : index
    %c0_0 = arith.constant 0 : index
    %0 = vector.load %arg2[%c0, %c0_0] : memref<18x4096xbf16, #tpu.memory_space<vmem>>, vector<18x4096xbf16>
    %c0_1 = arith.constant 0 : index
    %c0_2 = arith.constant 0 : index
    %1 = vector.load %arg3[%c0_1, %c0_2] : memref<4096x128xbf16, #tpu.memory_space<vmem>>, vector<4096x128xbf16>
    %cst = arith.constant dense<0.000000e+00> : vector<18x128xf32>
    %2 = tpu.matmul %0, %1, %cst {dimension_numbers = #tpu.dot_dimension_numbers<[1], [0], [0], [1], [0, 0, 1, 1], [], []>} : vector<18x4096xbf16>, vector<4096x128xbf16>, vector<18x128xf32> -> vector<18x128xf32>
    %cst_3 = arith.constant 0.000000e+00 : f32
    %3 = vector.broadcast %cst_3 : f32 to vector<18x128xf32>
    %4 = arith.cmpf oge, %2, %3 : vector<18x128xf32>
    %cst_4 = arith.constant 2.000000e-01 : f32
    %5 = vector.broadcast %cst_4 : f32 to vector<18x128xf32>
    %6 = arith.mulf %5, %2 : vector<18x128xf32>
    %7 = arith.select %4, %2, %6 : vector<18x128xi1>, vector<18x128xf32>
    %8 = arith.truncf %7 : vector<18x128xf32> to vector<18x128xbf16>
    %c0_5 = arith.constant 0 : index
    %c0_6 = arith.constant 0 : index
    %9 = vector.load %arg4[%c0_5, %c0_6] : memref<18x128xbf16, #tpu.memory_space<vmem>>, vector<18x128xbf16>
    tpu.vector_store %arg4[%c0_5, %c0_6], %8 {strides = array<i32>} : memref<18x128xbf16, #tpu.memory_space<vmem>>, vector<18x128xbf16>,
    return
  }
  func.func @transform_0(%arg0: i32, %arg1: i32) -> (i32, i32) {
    %c0_i32 = arith.constant 0 : i32
    %c0_i32_0 = arith.constant 0 : i32
    return %arg0, %c0_i32 : i32, i32
  }
  func.func @transform_1(%arg0: i32, %arg1: i32) -> (i32, i32) {
    %c0_i32 = arith.constant 0 : i32
    %c0_i32_0 = arith.constant 0 : i32
    return %c0_i32, %arg1 : i32, i32
  }
  func.func @transform_2(%arg0: i32, %arg1: i32) -> (i32, i32) {
    %c0_i32 = arith.constant 0 : i32
    return %arg0, %arg1 : i32, i32
  }
}

module attributes {stable_mosaic.version = 11 : i64} {
  func.func @_matvec_act_kernel(%arg0: i32, %arg1: memref<8x8192xbf16, #tpu.memory_space<vmem>>, %arg2: memref<1x8192xbf16, #tpu.memory_space<vmem>>, %arg3: memref<8x1xf32, #tpu.memory_space<vmem>>) attributes {dimension_semantics = [#tpu.dimension_semantics<parallel>], iteration_bounds = array<i64: 1>, scalar_prefetch = 0 : i64, scratch_operands = 0 : i64, tpu.core_type = #tpu.core_type<tc>, window_params = [{transform_indices = @transform_0, window_bounds = array<i64: 8, 8192>}, {pipeline_mode = #tpu.pipeline_mode<synchronous>, transform_indices = @transform_1, window_bounds = array<i64: 1, 8192>}, {transform_indices = @transform_2, window_bounds = array<i64: 8, 1>}]} {
    %c0 = arith.constant 0 : index
    %c0_0 = arith.constant 0 : index
    %0 = vector.load %arg1[%c0, %c0_0] : memref<8x8192xbf16, #tpu.memory_space<vmem>>, vector<8x8192xbf16>
    %1 = arith.extf %0 : vector<8x8192xbf16> to vector<8x8192xf32>
    %c0_1 = arith.constant 0 : index
    %c0_2 = arith.constant 0 : index
    %2 = vector.load %arg2[%c0_1, %c0_2] : memref<1x8192xbf16, #tpu.memory_space<vmem>>, vector<1x8192xbf16>
    %3 = arith.extf %2 : vector<1x8192xbf16> to vector<1x8192xf32>
    %4 = vector.broadcast %3 : vector<1x8192xf32> to vector<8x8192xf32>
    %5 = arith.mulf %1, %4 : vector<8x8192xf32>
    %cst = arith.constant dense<0.000000e+00> : vector<8xf32>
    %6 = vector.multi_reduction <add>, %5, %cst [1] : vector<8x8192xf32> to vector<8xf32>
    %7 = vector.shape_cast %6 : vector<8xf32> to vector<8x1xf32>
    %8 = arith.negf %7 : vector<8x1xf32>
    %9 = math.exp %8 : vector<8x1xf32>
    %cst_3 = arith.constant 1.000000e+00 : f32
    %10 = vector.broadcast %cst_3 : f32 to vector<8x1xf32>
    %11 = arith.addf %10, %9 : vector<8x1xf32>
    %12 = arith.divf %10, %11 : vector<8x1xf32>
    %c0_4 = arith.constant 0 : index
    %c0_5 = arith.constant 0 : index
    %13 = vector.load %arg3[%c0_4, %c0_5] : memref<8x1xf32, #tpu.memory_space<vmem>>, vector<8x1xf32>
    tpu.vector_store %arg3[%c0_4, %c0_5], %12 {strides = array<i32>} : memref<8x1xf32, #tpu.memory_space<vmem>>, vector<8x1xf32>,
    return
  }
  func.func @transform_0(%arg0: i32) -> (i32, i32) {
    %c0_i32 = arith.constant 0 : i32
    %c0_i32_0 = arith.constant 0 : i32
    return %arg0, %c0_i32 : i32, i32
  }
  func.func @transform_1(%arg0: i32) -> (i32, i32) {
    %c0_i32 = arith.constant 0 : i32
    %c0_i32_0 = arith.constant 0 : i32
    %c0_i32_1 = arith.constant 0 : i32
    return %c0_i32, %c0_i32_0 : i32, i32
  }
  func.func @transform_2(%arg0: i32) -> (i32, i32) {
    %c0_i32 = arith.constant 0 : i32
    %c0_i32_0 = arith.constant 0 : i32
    return %arg0, %c0_i32 : i32, i32
  }
}

</mosaic_0001>

<bundles_post_ra>
// kernel: discriminator_forward.5
= control target key start
LH: loop header
LB: loop body
LE: loop exit
PB: predicated region body
PF: predicated region fallthrough
CT: control target
= control target key end

     0   :  { %s1149_s9 = smov 0   ;;  %s1151_s10 = smov 0   ;;  %s1301_s0 = inlined_call_operand.vmem [shape: bf16[512,64], index: 0, kind: input, shape index: {}]   ;;  %s1302_s1 = inlined_call_operand.vmem [shape: bf16[64,64], index: 1, kind: input, shape index: {}]   ;;  %s1303_s2 = inlined_call_operand.vmem [shape: bf16[512,64], index: 2, kind: output, shape index: {}]  }
   0x1   :  { %s1153_s11 = smov 0  }
   0x2 LB: > { %s24_s12 = sadd.s32 1, %s1128_s10  ;;  %p891_p0 = scmp.ge.s32.totalorder %s1132_s11, 1  ;;  %s1132_s11 = sphi %s1153_s11, %s12_s11   ;;  %s1128_s10 = sphi %s1151_s10, %s1305_s10   ;;  %s1124_s9 = sphi %s1149_s9, %s1304_s9  }
   0x3   : > { %p26_p1 = scmp.ge.s32.totalorder %s24_s12, 2  ;;  %p136_p2 = scmp.lt.s32.totalorder %s1132_s11, 3 }
   0x5   : > { %s1307_s12 = smov (%p26_p1, %s24_s12), 0  ;;  %p137_p3 = pnand %p891_p0, %p136_p2 }
   0x6   : > { %s892_s15 = sshll.u32 (!%p137_p3), %s1124_s9, 5 }
   0x7   : > { %140 = sbr.rel (%p137_p3) target bundleno = 259 (0x103), region = 28  ;;  %p166_p4 = scmp.lt.s32.totalorder (!%p137_p3), %s892_s15, 63 }
   0xc   : > { %v1090_v0 = vld [vmem:[%s1302_s1 + $0x18] sm:$0xff]   ;;  %v1091_v1 = vld [vmem:[%s1302_s1 + $0x10] sm:$0xff]   ;;  %s1309_s15 = smov (!%p166_p4, %s892_s15), 63  ;;  %v1092_v2 = vld [vmem:[%s1302_s1 + $0x8] sm:$0xff]   ;;  %vm329_vm0 = vcmask 523264   ;;  %vm763_vm3 = vcmask 519168  }
   0xd   : > { %1018 = vmatprep.subr.bf16.mxu0 %v1090_v0  ;;  %1058 = vmatprep.subr.bf16.mxu1 %v1090_v0  ;;  %s893_s20 = sshll.u32 %s1309_s15, 2  ;;  %v1093_v3 = vld [vmem:[%s1302_s1] sm:$0xff]  }
   0xe   : > { %1019 = vmatpush3.bf16.msra.mxu0 %v1090_v0  ;;  %1062 = vmatpush3.bf16.msra.mxu1 %v1090_v0  ;;  %s1187_s25 = scalar_lea.vmem %s1301_s0, %s893_s20  ;;  %s1226_s28 = scalar_lea.vmem %s1303_s2, %s893_s20 }
   0xf   : > { %1020 = vmatprep.subr.bf16.mxu0 %v1091_v1  ;;  %1059 = vmatprep.subr.bf16.mxu1 %v1091_v1  ;;  %v1094_v4 = vld [vmem:[%s1187_s25] sm:$0xff]   ;;  %v1096_v6 = vld [vmem:[%s1187_s25 + $0x8] sm:$0xff]   ;;  %v1098_v8 = vld [vmem:[%s1187_s25 + $0x10] sm:$0xff]  }
  0x10   : > { %v1095_v5 = vld [vmem:[%s1187_s25 + $0x40] sm:$0xff]   ;;  %1026 = vmatprep.mubr.msk.bf16.mxu0 %vm329_vm0, %v1094_v4  ;;  %v1097_v7 = vld [vmem:[%s1187_s25 + $0x48] sm:$0xff]   ;;  %v1099_v9 = vld [vmem:[%s1187_s25 + $0x50] sm:$0xff]  }
  0x11   : > { %1042 = vmatprep.mubr.msk.bf16.mxu1 %vm329_vm0, %v1095_v5  ;;  %v1100_v10 = vld [vmem:[%s1187_s25 + $0x18] sm:$0xff]   ;;  %v1102_v12 = vld [vmem:[%s1187_s25 + $0x20] sm:$0xff]   ;;  %v1104_v14 = vld [vmem:[%s1187_s25 + $0x28] sm:$0xff]  }
  0x12   : > { %1021 = vmatpush3.bf16.msra.mxu0 %v1091_v1  ;;  %1063 = vmatpush3.bf16.msra.mxu1 %v1091_v1  ;;  %v1101_v11 = vld [vmem:[%s1187_s25 + $0x58] sm:$0xff]   ;;  %v1103_v13 = vld [vmem:[%s1187_s25 + $0x60] sm:$0xff]   ;;  %v1105_v15 = vld [vmem:[%s1187_s25 + $0x68] sm:$0xff]  }
  0x13   : > { %1022 = vmatprep.subr.bf16.mxu0 %v1092_v2  ;;  %1060 = vmatprep.subr.bf16.mxu1 %v1092_v2  ;;  %v1106_v16 = vld [vmem:[%s1187_s25 + $0x30] sm:$0xff]   ;;  %v1108_v18 = vld [vmem:[%s1187_s25 + $0x38] sm:$0xff]  }
  0x14   : > { %v1107_v17 = vld [vmem:[%s1187_s25 + $0x70] sm:$0xff]   ;;  %v1109_v19 = vld [vmem:[%s1187_s25 + $0x78] sm:$0xff]  }
  0x16   : > { %1023 = vmatpush3.bf16.msra.mxu0 %v1092_v2  ;;  %1064 = vmatpush3.bf16.msra.mxu1 %v1092_v2 }
  0x17   : > { %1024 = vmatprep.subr.bf16.mxu0 %v1093_v3  ;;  %1061 = vmatprep.subr.bf16.mxu1 %v1093_v3 }
  0x1a   : > { %1025 = vmatpush3.bf16.msra.mxu0 %v1093_v3  ;;  %1065 = vmatpush3.bf16.msra.mxu1 %v1093_v3 }
  0x1d   : > { %1027 = vmatmul.mubr.msk.bf16.vlgmr.msra.gmra.mxu0 %vm329_vm0, %v1096_v6  ;;  %1043 = vmatmul.mubr.msk.bf16.vlgmr.msra.gmra.mxu1 %vm329_vm0, %v1097_v7 }
  0x1e   : > { %1030 = vmatprep.mubr.msk.bf16.mxu0 %vm329_vm0, %v1098_v8  ;;  %1046 = vmatprep.mubr.msk.bf16.mxu1 %vm329_vm0, %v1099_v9 }
  0x25   : > { %1031 = vmatmul.mubr.msk.bf16.gmra.mxu0 %vm329_vm0, %v1100_v10  ;;  %1047 = vmatmul.mubr.msk.bf16.gmra.mxu1 %vm329_vm0, %v1101_v11 }
  0x26   : > { %1034 = vmatprep.mubr.msk.bf16.mxu0 %vm329_vm0, %v1102_v12  ;;  %1050 = vmatprep.mubr.msk.bf16.mxu1 %vm329_vm0, %v1103_v13 }
  0x2d   : > { %1035 = vmatmul.mubr.msk.bf16.gmra.mxu0 %vm329_vm0, %v1104_v14  ;;  %1051 = vmatmul.mubr.msk.bf16.gmra.mxu1 %vm329_vm0, %v1105_v15 }
  0x2e   : > { %1038 = vmatprep.mubr.msk.bf16.mxu0 %vm329_vm0, %v1106_v16  ;;  %1054 = vmatprep.mubr.msk.bf16.mxu1 %vm329_vm0, %v1107_v17 }
  0x35   : > { %1039 = vmatmul.mubr.msk.bf16.gmra.mxu0 %vm329_vm0, %v1108_v18  ;;  %1055 = vmatmul.mubr.msk.bf16.gmra.mxu1 %vm329_vm0, %v1109_v19 }
  0xdd   : > { %v1028_v20 = vpop.f32.mrf.mxu0  ;;  %v1044_v21 = vpop.f32.mrf.mxu1 }
  0xde   : > { %vm541_vm1 = vcmp.ge.f32.partialorder %v1028_v20, 0.0  ;;  %v573_v22 = vmul.f32 0.2, %v1028_v20  ;;  %vm557_vm2 = vcmp.ge.f32.partialorder %v1044_v21, 0.0  ;;  %v589_v23 = vmul.f32 0.2, %v1044_v21 }
  0xdf   : > { %v412_v24 = vpop.f32.mrf.mxu0  ;;  %v476_v25 = vpop.f32.mrf.mxu1 }
  0xe0   : > { %v605_v26 = vsel %vm541_vm1, %v1028_v20, %v573_v22  ;;  %v621_v27 = vsel %vm557_vm2, %v1044_v21, %v589_v23  ;;  %vm539_vm4 = vcmp.ge.f32.partialorder %v412_v24, 0.0  ;;  %v571_v28 = vmul.f32 0.2, %v412_v24 }
  0xe1   : > { %v968_v29 = vpack.c.bf16 %v605_v26, %v605_v26  ;;  %v984_v30 = vpack.c.bf16 %v621_v27, %v621_v27  ;;  %vm555_vm5 = vcmp.ge.f32.partialorder %v476_v25, 0.0  ;;  %v587_v31 = vmul.f32 0.2, %v476_v25  ;;  %v1029_v32 = vpop.f32.mrf.mxu0  ;;  %v1045_v33 = vpop.f32.mrf.mxu1 }
  0xe2   : > { %v603_v34 = vsel %vm539_vm4, %v412_v24, %v571_v28  ;;  %vm542_vm6 = vcmp.ge.f32.partialorder %v1029_v32, 0.0  ;;  %v574_v35 = vmul.f32 0.2, %v1029_v32  ;;  %vm558_vm7 = vcmp.ge.f32.partialorder %v1045_v33, 0.0 }
  0xe3   : > { %766 = vst.msk [vmem:[%s1226_s28 + $0x8] sm:$0xf] %vm763_vm3, %v968_v29  ;;  %782 = vst.msk [vmem:[%s1226_s28 + $0x48] sm:$0xf] %vm763_vm3, %v984_v30  ;;  %v966_v36 = vpack.c.bf16 %v603_v34, %v603_v34  ;;  %v619_v37 = vsel %vm555_vm5, %v476_v25, %v587_v31  ;;  %v590_v38 = vmul.f32 0.2, %v1045_v33  ;;  %v415_v39 = vpop.f32.mrf.mxu0  ;;  %v479_v40 = vpop.f32.mrf.mxu1 }
  0xe4   : > { %v982_v41 = vpack.c.bf16 %v619_v37, %v619_v37  ;;  %v606_v42 = vsel %vm542_vm6, %v1029_v32, %v574_v35  ;;  %vm540_vm8 = vcmp.ge.f32.partialorder %v415_v39, 0.0  ;;  %v572_v43 = vmul.f32 0.2, %v415_v39 }
  0xe5   : > { %764 = vst.msk [vmem:[%s1226_s28] sm:$0xf] %vm763_vm3, %v966_v36  ;;  %v969_v44 = vpack.c.bf16 %v606_v42, %v606_v42  ;;  %v622_v45 = vsel %vm558_vm7, %v1045_v33, %v590_v38  ;;  %vm556_vm9 = vcmp.ge.f32.partialorder %v479_v40, 0.0  ;;  %v588_v46 = vmul.f32 0.2, %v479_v40  ;;  %v1032_v47 = vpop.f32.mrf.mxu0  ;;  %v1048_v48 = vpop.f32.mrf.mxu1 }
  0xe6   : > { %780 = vst.msk [vmem:[%s1226_s28 + $0x40] sm:$0xf] %vm763_vm3, %v982_v41  ;;  %v985_v49 = vpack.c.bf16 %v622_v45, %v622_v45  ;;  %v604_v50 = vsel %vm540_vm8, %v415_v39, %v572_v43  ;;  %vm545_vm10 = vcmp.ge.f32.partialorder %v1032_v47, 0.0  ;;  %v577_v51 = vmul.f32 0.2, %v1032_v47 }
  0xe7   : > { %767 = vst.msk [vmem:[%s1226_s28 + $0xc] sm:$0xf] %vm763_vm3, %v969_v44  ;;  %v967_v52 = vpack.c.bf16 %v604_v50, %v604_v50  ;;  %v620_v53 = vsel %vm556_vm9, %v479_v40, %v588_v46  ;;  %vm561_vm11 = vcmp.ge.f32.partialorder %v1048_v48, 0.0  ;;  %v593_v54 = vmul.f32 0.2, %v1048_v48  ;;  %v428_v55 = vpop.f32.mrf.mxu0  ;;  %v492_v56 = vpop.f32.mrf.mxu1 }
  0xe8   : > { %783 = vst.msk [vmem:[%s1226_s28 + $0x4c] sm:$0xf] %vm763_vm3, %v985_v49  ;;  %v983_v57 = vpack.c.bf16 %v620_v53, %v620_v53  ;;  %v609_v58 = vsel %vm545_vm10, %v1032_v47, %v577_v51  ;;  %vm543_vm12 = vcmp.ge.f32.partialorder %v428_v55, 0.0  ;;  %v575_v59 = vmul.f32 0.2, %v428_v55 }
  0xe9   : > { %765 = vst.msk [vmem:[%s1226_s28 + $0x4] sm:$0xf] %vm763_vm3, %v967_v52  ;;  %v972_v60 = vpack.c.bf16 %v609_v58, %v609_v58  ;;  %v625_v61 = vsel %vm561_vm11, %v1048_v48, %v593_v54  ;;  %vm559_vm13 = vcmp.ge.f32.partialorder %v492_v56, 0.0  ;;  %v591_v62 = vmul.f32 0.2, %v492_v56  ;;  %v1033_v63 = vpop.f32.mrf.mxu0  ;;  %v1049_v0 = vpop.f32.mrf.mxu1 }
  0xea   : > { %781 = vst.msk [vmem:[%s1226_s28 + $0x44] sm:$0xf] %vm763_vm3, %v983_v57  ;;  %v988_v1 = vpack.c.bf16 %v625_v61, %v625_v61  ;;  %v607_v2 = vsel %vm543_vm12, %v428_v55, %v575_v59  ;;  %vm546_vm14 = vcmp.ge.f32.partialorder %v1033_v63, 0.0  ;;  %v578_v3 = vmul.f32 0.2, %v1033_v63 }
  0xeb   : > { %770 = vst.msk [vmem:[%s1226_s28 + $0x18] sm:$0xf] %vm763_vm3, %v972_v60  ;;  %v970_v4 = vpack.c.bf16 %v607_v2, %v607_v2  ;;  %v623_v5 = vsel %vm559_vm13, %v492_v56, %v591_v62  ;;  %vm562_vm15 = vcmp.ge.f32.partialorder %v1049_v0, 0.0  ;;  %v594_v6 = vmul.f32 0.2, %v1049_v0  ;;  %v431_v7 = vpop.f32.mrf.mxu0  ;;  %v495_v8 = vpop.f32.mrf.mxu1 }
  0xec   : > { %786 = vst.msk [vmem:[%s1226_s28 + $0x58] sm:$0xf] %vm763_vm3, %v988_v1  ;;  %v986_v9 = vpack.c.bf16 %v623_v5, %v623_v5  ;;  %v610_v10 = vsel %vm546_vm14, %v1033_v63, %v578_v3  ;;  %vm544_vm0 = vcmp.ge.f32.partialorder %v431_v7, 0.0  ;;  %v576_v11 = vmul.f32 0.2, %v431_v7 }
  0xed   : > { %768 = vst.msk [vmem:[%s1226_s28 + $0x10] sm:$0xf] %vm763_vm3, %v970_v4  ;;  %v973_v12 = vpack.c.bf16 %v610_v10, %v610_v10  ;;  %v626_v13 = vsel %vm562_vm15, %v1049_v0, %v594_v6  ;;  %vm560_vm1 = vcmp.ge.f32.partialorder %v495_v8, 0.0  ;;  %v592_v14 = vmul.f32 0.2, %v495_v8  ;;  %v1036_v15 = vpop.f32.mrf.mxu0  ;;  %v1052_v16 = vpop.f32.mrf.mxu1 }
  0xee   : > { %784 = vst.msk [vmem:[%s1226_s28 + $0x50] sm:$0xf] %vm763_vm3, %v986_v9  ;;  %v989_v17 = vpack.c.bf16 %v626_v13, %v626_v13  ;;  %v608_v18 = vsel %vm544_vm0, %v431_v7, %v576_v11  ;;  %vm549_vm2 = vcmp.ge.f32.partialorder %v1036_v15, 0.0  ;;  %v581_v19 = vmul.f32 0.2, %v1036_v15 }
  0xef   : > { %771 = vst.msk [vmem:[%s1226_s28 + $0x1c] sm:$0xf] %vm763_vm3, %v973_v12  ;;  %v971_v20 = vpack.c.bf16 %v608_v18, %v608_v18  ;;  %v624_v21 = vsel %vm560_vm1, %v495_v8, %v592_v14  ;;  %vm565_vm4 = vcmp.ge.f32.partialorder %v1052_v16, 0.0  ;;  %v597_v22 = vmul.f32 0.2, %v1052_v16  ;;  %v444_v23 = vpop.f32.mrf.mxu0  ;;  %v508_v24 = vpop.f32.mrf.mxu1 }
  0xf0   : > { %787 = vst.msk [vmem:[%s1226_s28 + $0x5c] sm:$0xf] %vm763_vm3, %v989_v17  ;;  %v987_v25 = vpack.c.bf16 %v624_v21, %v624_v21  ;;  %v613_v26 = vsel %vm549_vm2, %v1036_v15, %v581_v19  ;;  %vm547_vm5 = vcmp.ge.f32.partialorder %v444_v23, 0.0  ;;  %v579_v27 = vmul.f32 0.2, %v444_v23 }
  0xf1   : > { %769 = vst.msk [vmem:[%s1226_s28 + $0x14] sm:$0xf] %vm763_vm3, %v971_v20  ;;  %v976_v28 = vpack.c.bf16 %v613_v26, %v613_v26  ;;  %v629_v29 = vsel %vm565_vm4, %v1052_v16, %v597_v22  ;;  %vm563_vm6 = vcmp.ge.f32.partialorder %v508_v24, 0.0  ;;  %v595_v30 = vmul.f32 0.2, %v508_v24  ;;  %v1037_v31 = vpop.f32.mrf.mxu0  ;;  %v1053_v32 = vpop.f32.mrf.mxu1 }
  0xf2   : > { %785 = vst.msk [vmem:[%s1226_s28 + $0x54] sm:$0xf] %vm763_vm3, %v987_v25  ;;  %v992_v33 = vpack.c.bf16 %v629_v29, %v629_v29  ;;  %v611_v34 = vsel %vm547_vm5, %v444_v23, %v579_v27  ;;  %vm550_vm7 = vcmp.ge.f32.partialorder %v1037_v31, 0.0  ;;  %v582_v35 = vmul.f32 0.2, %v1037_v31 }
  0xf3   : > { %774 = vst.msk [vmem:[%s1226_s28 + $0x28] sm:$0xf] %vm763_vm3, %v976_v28  ;;  %v974_v36 = vpack.c.bf16 %v611_v34, %v611_v34  ;;  %v627_v37 = vsel %vm563_vm6, %v508_v24, %v595_v30  ;;  %vm566_vm8 = vcmp.ge.f32.partialorder %v1053_v32, 0.0  ;;  %v598_v38 = vmul.f32 0.2, %v1053_v32  ;;  %v447_v39 = vpop.f32.mrf.mxu0  ;;  %v511_v40 = vpop.f32.mrf.mxu1 }
  0xf4   : > { %790 = vst.msk [vmem:[%s1226_s28 + $0x68] sm:$0xf] %vm763_vm3, %v992_v33  ;;  %v990_v41 = vpack.c.bf16 %v627_v37, %v627_v37  ;;  %v614_v42 = vsel %vm550_vm7, %v1037_v31, %v582_v35  ;;  %vm548_vm9 = vcmp.ge.f32.partialorder %v447_v39, 0.0  ;;  %v580_v43 = vmul.f32 0.2, %v447_v39 }
  0xf5   : > { %772 = vst.msk [vmem:[%s1226_s28 + $0x20] sm:$0xf] %vm763_vm3, %v974_v36  ;;  %v977_v44 = vpack.c.bf16 %v614_v42, %v614_v42  ;;  %v630_v45 = vsel %vm566_vm8, %v1053_v32, %v598_v38  ;;  %vm564_vm10 = vcmp.ge.f32.partialorder %v511_v40, 0.0  ;;  %v596_v46 = vmul.f32 0.2, %v511_v40  ;;  %v1040_v47 = vpop.f32.mrf.mxu0  ;;  %v1056_v48 = vpop.f32.mrf.mxu1 }
  0xf6   : > { %788 = vst.msk [vmem:[%s1226_s28 + $0x60] sm:$0xf] %vm763_vm3, %v990_v41  ;;  %v993_v49 = vpack.c.bf16 %v630_v45, %v630_v45  ;;  %v612_v50 = vsel %vm548_vm9, %v447_v39, %v580_v43  ;;  %vm553_vm11 = vcmp.ge.f32.partialorder %v1040_v47, 0.0  ;;  %v585_v51 = vmul.f32 0.2, %v1040_v47 }
  0xf7   : > { %775 = vst.msk [vmem:[%s1226_s28 + $0x2c] sm:$0xf] %vm763_vm3, %v977_v44  ;;  %v975_v52 = vpack.c.bf16 %v612_v50, %v612_v50  ;;  %v628_v53 = vsel %vm564_vm10, %v511_v40, %v596_v46  ;;  %vm569_vm12 = vcmp.ge.f32.partialorder %v1056_v48, 0.0  ;;  %v601_v54 = vmul.f32 0.2, %v1056_v48  ;;  %v460_v55 = vpop.f32.mrf.mxu0  ;;  %v524_v56 = vpop.f32.mrf.mxu1 }
  0xf8   : > { %791 = vst.msk [vmem:[%s1226_s28 + $0x6c] sm:$0xf] %vm763_vm3, %v993_v49  ;;  %v991_v57 = vpack.c.bf16 %v628_v53, %v628_v53  ;;  %v617_v58 = vsel %vm553_vm11, %v1040_v47, %v585_v51  ;;  %vm551_vm13 = vcmp.ge.f32.partialorder %v460_v55, 0.0  ;;  %v583_v59 = vmul.f32 0.2, %v460_v55 }
  0xf9   : > { %773 = vst.msk [vmem:[%s1226_s28 + $0x24] sm:$0xf] %vm763_vm3, %v975_v52  ;;  %v980_v60 = vpack.c.bf16 %v617_v58, %v617_v58  ;;  %v633_v61 = vsel %vm569_vm12, %v1056_v48, %v601_v54  ;;  %vm567_vm14 = vcmp.ge.f32.partialorder %v524_v56, 0.0  ;;  %v599_v62 = vmul.f32 0.2, %v524_v56  ;;  %v1041_v63 = vpop.f32.mrf.mxu0  ;;  %v1057_v0 = vpop.f32.mrf.mxu1 }
  0xfa   : > { %789 = vst.msk [vmem:[%s1226_s28 + $0x64] sm:$0xf] %vm763_vm3, %v991_v57  ;;  %v996_v1 = vpack.c.bf16 %v633_v61, %v633_v61  ;;  %v615_v2 = vsel %vm551_vm13, %v460_v55, %v583_v59  ;;  %vm554_vm15 = vcmp.ge.f32.partialorder %v1041_v63, 0.0  ;;  %v586_v3 = vmul.f32 0.2, %v1041_v63 }
  0xfb   : > { %778 = vst.msk [vmem:[%s1226_s28 + $0x38] sm:$0xf] %vm763_vm3, %v980_v60  ;;  %v978_v4 = vpack.c.bf16 %v615_v2, %v615_v2  ;;  %v631_v5 = vsel %vm567_vm14, %v524_v56, %v599_v62  ;;  %vm570_vm0 = vcmp.ge.f32.partialorder %v1057_v0, 0.0  ;;  %v602_v6 = vmul.f32 0.2, %v1057_v0  ;;  %v463_v7 = vpop.f32.mrf.mxu0  ;;  %v527_v8 = vpop.f32.mrf.mxu1 }
  0xfc   : > { %794 = vst.msk [vmem:[%s1226_s28 + $0x78] sm:$0xf] %vm763_vm3, %v996_v1  ;;  %v994_v9 = vpack.c.bf16 %v631_v5, %v631_v5  ;;  %v618_v10 = vsel %vm554_vm15, %v1041_v63, %v586_v3  ;;  %vm552_vm1 = vcmp.ge.f32.partialorder %v463_v7, 0.0  ;;  %v584_v11 = vmul.f32 0.2, %v463_v7 }
  0xfd   : > { %776 = vst.msk [vmem:[%s1226_s28 + $0x30] sm:$0xf] %vm763_vm3, %v978_v4  ;;  %v981_v12 = vpack.c.bf16 %v618_v10, %v618_v10  ;;  %v634_v13 = vsel %vm570_vm0, %v1057_v0, %v602_v6  ;;  %vm568_vm2 = vcmp.ge.f32.partialorder %v527_v8, 0.0  ;;  %v600_v14 = vmul.f32 0.2, %v527_v8 }
  0xfe   : > { %792 = vst.msk [vmem:[%s1226_s28 + $0x70] sm:$0xf] %vm763_vm3, %v994_v9  ;;  %v997_v15 = vpack.c.bf16 %v634_v13, %v634_v13  ;;  %v616_v16 = vsel %vm552_vm1, %v463_v7, %v584_v11 }
  0xff   : > { %779 = vst.msk [vmem:[%s1226_s28 + $0x3c] sm:$0xf] %vm763_vm3, %v981_v12  ;;  %v979_v17 = vpack.c.bf16 %v616_v16, %v616_v16  ;;  %v632_v18 = vsel %vm568_vm2, %v527_v8, %v600_v14 }
 0x100   : > { %795 = vst.msk [vmem:[%s1226_s28 + $0x7c] sm:$0xf] %vm763_vm3, %v997_v15  ;;  %v995_v19 = vpack.c.bf16 %v632_v18, %v632_v18 }
 0x101   : > { %777 = vst.msk [vmem:[%s1226_s28 + $0x34] sm:$0xf] %vm763_vm3, %v979_v17 }
 0x102   : > { %793 = vst.msk [vmem:[%s1226_s28 + $0x74] sm:$0xf] %vm763_vm3, %v995_v19 }
 0x103 PF: > { %s12_s11 = sadd.s32 1, %s1132_s11   ;;  %s1304_s9 = smov %s1128_s10 }
 0x104   : > { %p9_p5 = scmp.ge.s32.totalorder %s12_s11, 4   ;;  %s1305_s10 = smov %s1307_s12 }
 0x106   :  { %11 = sbr.rel (!%p9_p5) target bundleno = 2 (0x2), region = 61 }

// kernel: discriminator_forward.6
= control target key start
LH: loop header
LB: loop body
LE: loop exit
PB: predicated region body
PF: predicated region fallthrough
CT: control target
= control target key end

     0   :  { %s2498_s1 = inlined_call_operand.vmem [shape: bf16[1024,128], index: 1, kind: input, shape index: {}]   ;;  %s2499_s0 = inlined_call_operand.vmem [shape: bf16[128,1024], index: 0, kind: input, shape index: {}]   ;;  %s2500_s2 = inlined_call_operand.vmem [shape: bf16[128,128], index: 2, kind: output, shape index: {}]  }
   0x1   :  { %v1891_v0 = vld [vmem:[%s2498_s1 + $0x78] sm:$0xff]   ;;  %v1895_v4 = vld [vmem:[%s2498_s1 + $0x70] sm:$0xff]   ;;  %v1899_v8 = vld [vmem:[%s2498_s1 + $0x68] sm:$0xff]  }
   0x2   :  { %v1892_v1 = vld [vmem:[%s2498_s1 + $0xf8] sm:$0xff]   ;;  %1635 = vmatprep.subr.bf16.mxu0 %v1891_v0  ;;  %v1896_v5 = vld [vmem:[%s2498_s1 + $0xf0] sm:$0xff]   ;;  %v1900_v9 = vld [vmem:[%s2498_s1 + $0xe8] sm:$0xff]  }
   0x3   :  { %v1893_v2 = vld [vmem:[%s2498_s1 + $0x38] sm:$0xff]   ;;  %1699 = vmatprep.subr.bf16.mxu1 %v1892_v1  ;;  %v1897_v6 = vld [vmem:[%s2498_s1 + $0x30] sm:$0xff]   ;;  %v1901_v10 = vld [vmem:[%s2498_s1 + $0x28] sm:$0xff]  }
   0x4   :  { %v1894_v3 = vld [vmem:[%s2498_s1 + $0xb8] sm:$0xff]   ;;  %1636 = vmatpush3.bf16.msra.mxu0 %v1893_v2  ;;  %v1898_v7 = vld [vmem:[%s2498_s1 + $0xb0] sm:$0xff]   ;;  %v1902_v11 = vld [vmem:[%s2498_s1 + $0xa8] sm:$0xff]  }
   0x5   :  { %1700 = vmatpush3.bf16.msra.mxu1 %v1894_v3  ;;  %1637 = vmatprep.subr.bf16.mxu0 %v1895_v4  ;;  %v1903_v12 = vld [vmem:[%s2498_s1 + $0x60] sm:$0xff]   ;;  %v1907_v16 = vld [vmem:[%s2498_s1 + $0x58] sm:$0xff]   ;;  %v1911_v20 = vld [vmem:[%s2498_s1 + $0x50] sm:$0xff]  }
   0x6   :  { %1701 = vmatprep.subr.bf16.mxu1 %v1896_v5  ;;  %v1904_v13 = vld [vmem:[%s2498_s1 + $0xe0] sm:$0xff]   ;;  %v1908_v17 = vld [vmem:[%s2498_s1 + $0xd8] sm:$0xff]   ;;  %v1912_v21 = vld [vmem:[%s2498_s1 + $0xd0] sm:$0xff]  }
   0x7   :  { %v1905_v14 = vld [vmem:[%s2498_s1 + $0x20] sm:$0xff]   ;;  %v1909_v18 = vld [vmem:[%s2498_s1 + $0x18] sm:$0xff]   ;;  %v1913_v22 = vld [vmem:[%s2498_s1 + $0x10] sm:$0xff]  }
   0x8   :  { %1638 = vmatpush3.bf16.msra.mxu0 %v1897_v6  ;;  %v1906_v15 = vld [vmem:[%s2498_s1 + $0xa0] sm:$0xff]   ;;  %v1910_v19 = vld [vmem:[%s2498_s1 + $0x98] sm:$0xff]   ;;  %v1914_v23 = vld [vmem:[%s2498_s1 + $0x90] sm:$0xff]  }
   0x9   :  { %1702 = vmatpush3.bf16.msra.mxu1 %v1898_v7  ;;  %1639 = vmatprep.subr.bf16.mxu0 %v1899_v8  ;;  %v1915_v24 = vld [vmem:[%s2498_s1 + $0x48] sm:$0xff]   ;;  %v1919_v28 = vld [vmem:[%s2498_s1 + $0x40] sm:$0xff]   ;;  %v1923_v40 = vld [vmem:[%s2498_s1 + $0x178] sm:$0xff]  }
   0xa   :  { %1703 = vmatprep.subr.bf16.mxu1 %v1900_v9  ;;  %v1916_v25 = vld [vmem:[%s2498_s1 + $0xc8] sm:$0xff]   ;;  %v1920_v29 = vld [vmem:[%s2498_s1 + $0xc0] sm:$0xff]   ;;  %v1924_v41 = vld [vmem:[%s2498_s1 + $0x138] sm:$0xff]  }
   0xb   :  { %v1917_v26 = vld [vmem:[%s2498_s1 + $0x8] sm:$0xff]   ;;  %v1921_v30 = vld [vmem:[%s2498_s1] sm:$0xff]   ;;  %v1925_v42 = vld [vmem:[%s2498_s1 + $0x1f8] sm:$0xff]  }
   0xc   :  { %1640 = vmatpush3.bf16.msra.mxu0 %v1901_v10  ;;  %v1918_v27 = vld [vmem:[%s2498_s1 + $0x88] sm:$0xff]   ;;  %v1922_v31 = vld [vmem:[%s2498_s1 + $0x80] sm:$0xff]   ;;  %v1926_v43 = vld [vmem:[%s2498_s1 + $0x1b8] sm:$0xff]  }
   0xd   :  { %1704 = vmatpush3.bf16.msra.mxu1 %v1902_v11  ;;  %1641 = vmatprep.subr.bf16.mxu0 %v1903_v12  ;;  %v12_v32 = vld [vmem:[%s2499_s0] sm:$0xff]  ;;  %v13_v34 = vld [vmem:[%s2499_s0 + $0x8] sm:$0xff]  ;;  %v1927_v50 = vld [vmem:[%s2498_s1 + $0x170] sm:$0xff]  }
   0xe   :  { %1705 = vmatprep.subr.bf16.mxu1 %v1904_v13  ;;  %v16_v33 = vld [vmem:[%s2499_s0 + $0x20] sm:$0xff]  ;;  %v17_v37 = vld [vmem:[%s2499_s0 + $0x28] sm:$0xff]  ;;  %v1928_v52 = vld [vmem:[%s2498_s1 + $0x130] sm:$0xff]  }
   0xf   :  { %v1428_v35 = vcombine.low %v12_v32, %v16_v33  ;;  %v1429_v36 = vcombine.high %v12_v32, %v16_v33  ;;  %v1430_v38 = vcombine.low %v13_v34, %v17_v37  ;;  %v1431_v39 = vcombine.high %v13_v34, %v17_v37  ;;  %v20_v44 = vld [vmem:[%s2499_s0 + $0x40] sm:$0xff]  ;;  %v21_v47 = vld [vmem:[%s2499_s0 + $0x48] sm:$0xff]  ;;  %v1929_v54 = vld [vmem:[%s2498_s1 + $0x1f0] sm:$0xff]  }
  0x10   :  { %1642 = vmatpush3.bf16.msra.mxu0 %v1905_v14  ;;  %v24_v45 = vld [vmem:[%s2499_s0 + $0x60] sm:$0xff]  ;;  %v25_v48 = vld [vmem:[%s2499_s0 + $0x68] sm:$0xff]  ;;  %v1930_v55 = vld [vmem:[%s2498_s1 + $0x1b0] sm:$0xff]  }
  0x11   :  { %1706 = vmatpush3.bf16.msra.mxu1 %v1906_v15  ;;  %1643 = vmatprep.subr.bf16.mxu0 %v1907_v16  ;;  %v1437_v46 = vcombine.high %v20_v44, %v24_v45  ;;  %v1439_v49 = vcombine.high %v21_v47, %v25_v48  ;;  %v1436_v51 = vcombine.low %v20_v44, %v24_v45  ;;  %v28_v56 = vld [vmem:[%s2499_s0 + $0x80] sm:$0xff]  ;;  %v29_v58 = vld [vmem:[%s2499_s0 + $0x88] sm:$0xff]  ;;  %v1945_v32 = vld [vmem:[%s2498_s1 + $0x1d0] sm:$0xff]  }
  0x12   :  { %1707 = vmatprep.subr.bf16.mxu1 %v1908_v17  ;;  %940 = vmatprep.mubr.bf16.mxu0 %v1429_v36  ;;  %v1438_v53 = vcombine.low %v21_v47, %v25_v48  ;;  %v32_v57 = vld [vmem:[%s2499_s0 + $0xa0] sm:$0xff]  ;;  %v33_v59 = vld [vmem:[%s2499_s0 + $0xa8] sm:$0xff]  ;;  %v1946_v33 = vld [vmem:[%s2498_s1 + $0x190] sm:$0xff]  }
  0x13   :  { %1037 = vmatprep.mubr.bf16.mxu1 %v1431_v39  ;;  %v1445_v60 = vcombine.high %v28_v56, %v32_v57  ;;  %v1447_v61 = vcombine.high %v29_v58, %v33_v59  ;;  %v1931_v62 = vld [vmem:[%s2498_s1 + $0x168] sm:$0xff]   ;;  %v1444_v2 = vcombine.low %v28_v56, %v32_v57  ;;  %v36_v3 = vld [vmem:[%s2499_s0 + $0xc0] sm:$0xff]  ;;  %v1446_v6 = vcombine.low %v29_v58, %v33_v59 }
  0x14   :  { %1644 = vmatpush3.bf16.msra.mxu0 %v1909_v18  ;;  %v1932_v63 = vld [vmem:[%s2498_s1 + $0x128] sm:$0xff]   ;;  %v40_v4 = vld [vmem:[%s2499_s0 + $0xe0] sm:$0xff]  ;;  %v1939_v18 = vld [vmem:[%s2498_s1 + $0x158] sm:$0xff]  }
  0x15   :  { %1708 = vmatpush3.bf16.msra.mxu1 %v1910_v19  ;;  %1645 = vmatprep.subr.bf16.mxu0 %v1911_v20  ;;  %v1933_v0 = vld [vmem:[%s2498_s1 + $0x1e8] sm:$0xff]   ;;  %v1453_v7 = vcombine.high %v36_v3, %v40_v4  ;;  %v1935_v10 = vld [vmem:[%s2498_s1 + $0x160] sm:$0xff]   ;;  %v1452_v19 = vcombine.low %v36_v3, %v40_v4  ;;  %v1940_v20 = vld [vmem:[%s2498_s1 + $0x118] sm:$0xff]  }
  0x16   :  { %1709 = vmatprep.subr.bf16.mxu1 %v1912_v21  ;;  %v1934_v1 = vld [vmem:[%s2498_s1 + $0x1a8] sm:$0xff]   ;;  %v1936_v11 = vld [vmem:[%s2498_s1 + $0x120] sm:$0xff]  }
  0x17   :  { %v37_v5 = vld [vmem:[%s2499_s0 + $0xc8] sm:$0xff]  ;;  %v1937_v12 = vld [vmem:[%s2498_s1 + $0x1e0] sm:$0xff]  }
  0x18   :  { %1646 = vmatpush3.bf16.msra.mxu0 %v1913_v22  ;;  %v41_v8 = vld [vmem:[%s2499_s0 + $0xe8] sm:$0xff]  ;;  %v1938_v13 = vld [vmem:[%s2498_s1 + $0x1a0] sm:$0xff]  }
  0x19   :  { %1710 = vmatpush3.bf16.msra.mxu1 %v1914_v23  ;;  %1647 = vmatprep.subr.bf16.mxu0 %v1915_v24  ;;  %v1455_v9 = vcombine.high %v37_v5, %v41_v8  ;;  %v44_v14 = vld [vmem:[%s2499_s0 + $0x100] sm:$0xff]  ;;  %v45_v16 = vld [vmem:[%s2499_s0 + $0x108] sm:$0xff]  ;;  %v1454_v21 = vcombine.low %v37_v5, %v41_v8  ;;  %v1941_v23 = vld [vmem:[%s2498_s1 + $0x1d8] sm:$0xff]  }
  0x1a   :  { %1711 = vmatprep.subr.bf16.mxu1 %v1916_v25  ;;  %v48_v15 = vld [vmem:[%s2499_s0 + $0x120] sm:$0xff]  ;;  %v49_v17 = vld [vmem:[%s2499_s0 + $0x128] sm:$0xff]  ;;  %v1942_v25 = vld [vmem:[%s2498_s1 + $0x198] sm:$0xff]  }
  0x1b   :  { %v1461_v22 = vcombine.high %v44_v14, %v48_v15  ;;  %v1463_v24 = vcombine.high %v45_v16, %v49_v17  ;;  %v1460_v34 = vcombine.low %v44_v14, %v48_v15  ;;  %v1948_v39 = vld [vmem:[%s2498_s1 + $0x108] sm:$0xff]   ;;  %v1952_v48 = vld [vmem:[%s2498_s1 + $0x100] sm:$0xff]   ;;  %v23_v8 = vld [vmem:[%s2499_s0 + $0x58] sm:$0xff] }
  0x1c   :  { %1648 = vmatpush3.bf16.msra.mxu0 %v1917_v26  ;;  %v52_v26 = vld [vmem:[%s2499_s0 + $0x140] sm:$0xff]  ;;  %v61_v44 = vld [vmem:[%s2499_s0 + $0x188] sm:$0xff]  ;;  %v30_v14 = vld [vmem:[%s2499_s0 + $0x90] sm:$0xff] }
  0x1d   :  { %1712 = vmatpush3.bf16.msra.mxu1 %v1918_v27  ;;  %1649 = vmatprep.subr.bf16.mxu0 %v1919_v28  ;;  %v56_v27 = vld [vmem:[%s2499_s0 + $0x160] sm:$0xff]  ;;  %v1943_v28 = vld [vmem:[%s2498_s1 + $0x150] sm:$0xff]   ;;  %v65_v45 = vld [vmem:[%s2499_s0 + $0x1a8] sm:$0xff] }
  0x1e   :  { %1713 = vmatprep.subr.bf16.mxu1 %v1920_v29  ;;  %v53_v29 = vld [vmem:[%s2499_s0 + $0x148] sm:$0xff]  ;;  %v1469_v36 = vcombine.high %v52_v26, %v56_v27  ;;  %v1468_v47 = vcombine.low %v52_v26, %v56_v27  ;;  %v1478_v59 = vcombine.low %v61_v44, %v65_v45  ;;  %v34_v15 = vld [vmem:[%s2499_s0 + $0xb0] sm:$0xff] }
  0x1f   :  { %v69_v56 = vld [vmem:[%s2499_s0 + $0x1c8] sm:$0xff]  ;;  %v1448_v26 = vcombine.low %v30_v14, %v34_v15 }
  0x20   :  { %1650 = vmatpush3.bf16.msra.mxu0 %v1921_v30  ;;  %v57_v30 = vld [vmem:[%s2499_s0 + $0x168] sm:$0xff] }
  0x21   :  { %1714 = vmatpush3.bf16.msra.mxu1 %v1922_v31  ;;  %1763 = vmatprep.subr.bf16.mxu0 %v1923_v40  ;;  %v1944_v31 = vld [vmem:[%s2498_s1 + $0x110] sm:$0xff]   ;;  %v1471_v37 = vcombine.high %v53_v29, %v57_v30  ;;  %v1949_v40 = vld [vmem:[%s2498_s1 + $0x1c8] sm:$0xff]  }
  0x22   :  { %1827 = vmatprep.subr.bf16.mxu1 %v1925_v42  ;;  %v64_v42 = vld [vmem:[%s2499_s0 + $0x1a0] sm:$0xff]  ;;  %v73_v57 = vld [vmem:[%s2499_s0 + $0x1e8] sm:$0xff] }
  0x23   :  { %941 = vmatmul.mubr.bf16.vlgmr.msra.gmra.mxu0 %v1428_v35  ;;  %v1462_v35 = vcombine.low %v45_v16, %v49_v17  ;;  %v1486_v3 = vcombine.low %v69_v56, %v73_v57  ;;  %v31_v16 = vld [vmem:[%s2499_s0 + $0x98] sm:$0xff] }
  0x24   :  { %1038 = vmatmul.mubr.bf16.vlgmr.msra.gmra.mxu1 %v1430_v38  ;;  %1764 = vmatpush3.bf16.msra.mxu0 %v1924_v41  ;;  %v1947_v38 = vld [vmem:[%s2498_s1 + $0x148] sm:$0xff]   ;;  %v60_v41 = vld [vmem:[%s2499_s0 + $0x180] sm:$0xff]  ;;  %v35_v17 = vld [vmem:[%s2499_s0 + $0xb8] sm:$0xff] }
  0x25   :  { %1828 = vmatpush3.bf16.msra.mxu1 %v1926_v43  ;;  %948 = vmatprep.mubr.bf16.mxu0 %v1437_v46  ;;  %v1950_v43 = vld [vmem:[%s2498_s1 + $0x188] sm:$0xff]   ;;  %v1951_v46 = vld [vmem:[%s2498_s1 + $0x140] sm:$0xff]   ;;  %v1476_v58 = vcombine.low %v60_v41, %v64_v42  ;;  %v1450_v27 = vcombine.low %v31_v16, %v35_v17 }
  0x26   :  { %1045 = vmatprep.mubr.bf16.mxu1 %v1439_v49  ;;  %1765 = vmatprep.subr.bf16.mxu0 %v1927_v50  ;;  %v1470_v49 = vcombine.low %v53_v29, %v57_v30  ;;  %v1477_v50 = vcombine.high %v60_v41, %v64_v42  ;;  %v46_v30 = vld [vmem:[%s2499_s0 + $0x110] sm:$0xff]  ;;  %v59_v41 = vld [vmem:[%s2499_s0 + $0x178] sm:$0xff] }
  0x27   :  { %1829 = vmatprep.subr.bf16.mxu1 %v1929_v54  ;;  %v68_v54 = vld [vmem:[%s2499_s0 + $0x1c0] sm:$0xff] }
  0x28   :  { %1766 = vmatpush3.bf16.msra.mxu0 %v1928_v52  ;;  %v1479_v52 = vcombine.high %v61_v44, %v65_v45 }
  0x29   :  { %1830 = vmatpush3.bf16.msra.mxu1 %v1930_v55  ;;  %1767 = vmatprep.subr.bf16.mxu0 %v1931_v62  ;;  %v72_v55 = vld [vmem:[%s2499_s0 + $0x1e0] sm:$0xff]  ;;  %v14_v62 = vld [vmem:[%s2499_s0 + $0x10] sm:$0xff] }
  0x2a   :  { %1831 = vmatprep.subr.bf16.mxu1 %v1933_v0  ;;  %v15_v0 = vld [vmem:[%s2499_s0 + $0x18] sm:$0xff] }
  0x2b   :  { %949 = vmatmul.mubr.bf16.gmra.mxu0 %v1436_v51  ;;  %v1953_v51 = vld [vmem:[%s2498_s1 + $0x1c0] sm:$0xff]  }
  0x2c   :  { %1046 = vmatmul.mubr.bf16.gmra.mxu1 %v1438_v53  ;;  %956 = vmatprep.mubr.bf16.mxu0 %v1445_v60  ;;  %v1954_v53 = vld [vmem:[%s2498_s1 + $0x180] sm:$0xff]   ;;  %v1485_v60 = vcombine.high %v68_v54, %v72_v55 }
  0x2d   :  { %1053 = vmatprep.mubr.bf16.mxu1 %v1447_v61  ;;  %1768 = vmatpush3.bf16.msra.mxu0 %v1932_v63  ;;  %v1487_v61 = vcombine.high %v69_v56, %v73_v57  ;;  %v18_v63 = vld [vmem:[%s2499_s0 + $0x30] sm:$0xff]  ;;  %v71_v56 = vld [vmem:[%s2499_s0 + $0x1d8] sm:$0xff] }
  0x2e   :  { %1832 = vmatpush3.bf16.msra.mxu1 %v1934_v1  ;;  %1769 = vmatprep.subr.bf16.mxu0 %v1935_v10  ;;  %v19_v1 = vld [vmem:[%s2499_s0 + $0x38] sm:$0xff]  ;;  %v1433_v4 = vcombine.high %v14_v62, %v18_v63  ;;  %v1432_v10 = vcombine.low %v14_v62, %v18_v63 }
  0x2f   :  { %1833 = vmatprep.subr.bf16.mxu1 %v1937_v12  ;;  %v1435_v5 = vcombine.high %v15_v0, %v19_v1  ;;  %v75_v57 = vld [vmem:[%s2499_s0 + $0x1f8] sm:$0xff] }
  0x30   :  { %v1490_v63 = vcombine.low %v71_v56, %v75_v57 }
  0x31   :  { %1770 = vmatpush3.bf16.msra.mxu0 %v1936_v11  ;;  %v1434_v11 = vcombine.low %v15_v0, %v19_v1 }
  0x32   :  { %1834 = vmatpush3.bf16.msra.mxu1 %v1938_v13  ;;  %1771 = vmatprep.subr.bf16.mxu0 %v1939_v18 }
  0x33   :  { %957 = vmatmul.mubr.bf16.gmra.mxu0 %v1444_v2  ;;  %1835 = vmatprep.subr.bf16.mxu1 %v1941_v23  ;;  %v1484_v2 = vcombine.low %v68_v54, %v72_v55  ;;  %v42_v23 = vld [vmem:[%s2499_s0 + $0xf0] sm:$0xff] }
  0x34   :  { %1054 = vmatmul.mubr.bf16.gmra.mxu1 %v1446_v6  ;;  %964 = vmatprep.mubr.bf16.mxu0 %v1453_v7  ;;  %v22_v6 = vld [vmem:[%s2499_s0 + $0x50] sm:$0xff] }
  0x35   :  { %1061 = vmatprep.mubr.bf16.mxu1 %v1455_v9  ;;  %1772 = vmatpush3.bf16.msra.mxu0 %v1940_v20  ;;  %v26_v7 = vld [vmem:[%s2499_s0 + $0x70] sm:$0xff]  ;;  %v27_v9 = vld [vmem:[%s2499_s0 + $0x78] sm:$0xff]  ;;  %v1449_v20 = vcombine.high %v30_v14, %v34_v15 }
  0x36   :  { %1836 = vmatpush3.bf16.msra.mxu1 %v1942_v25  ;;  %1773 = vmatprep.subr.bf16.mxu0 %v1943_v28  ;;  %v1441_v12 = vcombine.high %v22_v6, %v26_v7  ;;  %v1443_v13 = vcombine.high %v23_v8, %v27_v9  ;;  %v1440_v18 = vcombine.low %v22_v6, %v26_v7  ;;  %v43_v25 = vld [vmem:[%s2499_s0 + $0xf8] sm:$0xff]  ;;  %v70_v54 = vld [vmem:[%s2499_s0 + $0x1d0] sm:$0xff] }
  0x37   :  { %1837 = vmatprep.subr.bf16.mxu1 %v1945_v32  ;;  %v47_v32 = vld [vmem:[%s2499_s0 + $0x118] sm:$0xff]  ;;  %v74_v55 = vld [vmem:[%s2499_s0 + $0x1f0] sm:$0xff] }
  0x38   :  { %v1488_v62 = vcombine.low %v70_v54, %v74_v55 }
  0x39   :  { %1774 = vmatpush3.bf16.msra.mxu0 %v1944_v31  ;;  %v50_v31 = vld [vmem:[%s2499_s0 + $0x130] sm:$0xff] }
  0x3a   :  { %1838 = vmatpush3.bf16.msra.mxu1 %v1946_v33  ;;  %1775 = vmatprep.subr.bf16.mxu0 %v1947_v38  ;;  %v51_v33 = vld [vmem:[%s2499_s0 + $0x138] sm:$0xff]  ;;  %v54_v38 = vld [vmem:[%s2499_s0 + $0x150] sm:$0xff]  ;;  %v1464_v42 = vcombine.low %v46_v30, %v50_v31 }
  0x3b   :  { %965 = vmatmul.mubr.bf16.gmra.mxu0 %v1452_v19  ;;  %1839 = vmatprep.subr.bf16.mxu1 %v1949_v40  ;;  %v1442_v19 = vcombine.low %v23_v8, %v27_v9  ;;  %v55_v40 = vld [vmem:[%s2499_s0 + $0x158] sm:$0xff] }
  0x3c   :  { %1062 = vmatmul.mubr.bf16.gmra.mxu1 %v1454_v21  ;;  %972 = vmatprep.mubr.bf16.mxu0 %v1461_v22  ;;  %v1451_v21 = vcombine.high %v31_v16, %v35_v17  ;;  %v38_v22 = vld [vmem:[%s2499_s0 + $0xd0] sm:$0xff]  ;;  %v1475_v45 = vcombine.high %v55_v40, %v59_v41 }
  0x3d   :  { %1069 = vmatprep.mubr.bf16.mxu1 %v1463_v24  ;;  %1776 = vmatpush3.bf16.msra.mxu0 %v1948_v39  ;;  %v39_v24 = vld [vmem:[%s2499_s0 + $0xd8] sm:$0xff]  ;;  %v1457_v28 = vcombine.high %v38_v22, %v42_v23  ;;  %v58_v39 = vld [vmem:[%s2499_s0 + $0x170] sm:$0xff] }
  0x3e   :  { %1840 = vmatpush3.bf16.msra.mxu1 %v1950_v43  ;;  %1777 = vmatprep.subr.bf16.mxu0 %v1951_v46  ;;  %v1459_v29 = vcombine.high %v39_v24, %v43_v25  ;;  %v1466_v43 = vcombine.low %v47_v32, %v51_v33  ;;  %v1473_v44 = vcombine.high %v54_v38, %v58_v39  ;;  %v62_v46 = vld [vmem:[%s2499_s0 + $0x190] sm:$0xff] }
  0x3f   :  { %1841 = vmatprep.subr.bf16.mxu1 %v1953_v51  ;;  %v1474_v51 = vcombine.low %v55_v40, %v59_v41 }
  0x41   :  { %1778 = vmatpush3.bf16.msra.mxu0 %v1952_v48  ;;  %v63_v48 = vld [vmem:[%s2499_s0 + $0x198] sm:$0xff] }
  0x42   :  { %1842 = vmatpush3.bf16.msra.mxu1 %v1954_v53 }
  0x43   :  { %973 = vmatmul.mubr.bf16.gmra.mxu0 %v1460_v34  ;;  %v1456_v34 = vcombine.low %v38_v22, %v42_v23 }
  0x44   :  { %1070 = vmatmul.mubr.bf16.gmra.mxu1 %v1462_v35  ;;  %980 = vmatprep.mubr.bf16.mxu0 %v1469_v36  ;;  %v1458_v35 = vcombine.low %v39_v24, %v43_v25  ;;  %v1465_v36 = vcombine.high %v46_v30, %v50_v31 }
  0x45   :  { %1077 = vmatprep.mubr.bf16.mxu1 %v1471_v37  ;;  %v1467_v37 = vcombine.high %v47_v32, %v51_v33 }
  0x4b   :  { %981 = vmatmul.mubr.bf16.gmra.mxu0 %v1468_v47  ;;  %v66_v47 = vld [vmem:[%s2499_s0 + $0x1b0] sm:$0xff] }
  0x4c   :  { %1078 = vmatmul.mubr.bf16.gmra.mxu1 %v1470_v49  ;;  %988 = vmatprep.mubr.bf16.mxu0 %v1477_v50  ;;  %v67_v49 = vld [vmem:[%s2499_s0 + $0x1b8] sm:$0xff]  ;;  %v1472_v50 = vcombine.low %v54_v38, %v58_v39 }
  0x4d   :  { %1085 = vmatprep.mubr.bf16.mxu1 %v1479_v52  ;;  %v1481_v52 = vcombine.high %v62_v46, %v66_v47  ;;  %v1483_v53 = vcombine.high %v63_v48, %v67_v49 }
  0x53   :  { %989 = vmatmul.mubr.bf16.gmra.mxu0 %v1476_v58  ;;  %v1480_v58 = vcombine.low %v62_v46, %v66_v47 }
  0x54   :  { %1086 = vmatmul.mubr.bf16.gmra.mxu1 %v1478_v59  ;;  %996 = vmatprep.mubr.bf16.mxu0 %v1485_v60  ;;  %v1482_v59 = vcombine.low %v63_v48, %v67_v49  ;;  %v1489_v60 = vcombine.high %v70_v54, %v74_v55 }
  0x55   :  { %1093 = vmatprep.mubr.bf16.mxu1 %v1487_v61  ;;  %v1491_v61 = vcombine.high %v71_v56, %v75_v57 }
  0x5b   :  { %997 = vmatmul.mubr.bf16.gmra.mxu0 %v1484_v2 }
  0x5c   :  { %1094 = vmatmul.mubr.bf16.gmra.mxu1 %v1486_v3  ;;  %1134 = vmatprep.mubr.bf16.mxu0 %v1433_v4 }
  0x5d   :  { %1231 = vmatprep.mubr.bf16.mxu1 %v1435_v5 }
  0x63   :  { %1135 = vmatmul.mubr.bf16.vlgmr.msra.gmra.mxu0 %v1432_v10 }
  0x64   :  { %1232 = vmatmul.mubr.bf16.vlgmr.msra.gmra.mxu1 %v1434_v11  ;;  %1142 = vmatprep.mubr.bf16.mxu0 %v1441_v12 }
  0x65   :  { %1239 = vmatprep.mubr.bf16.mxu1 %v1443_v13 }
  0x6b   :  { %1143 = vmatmul.mubr.bf16.gmra.mxu0 %v1440_v18 }
  0x6c   :  { %1240 = vmatmul.mubr.bf16.gmra.mxu1 %v1442_v19  ;;  %1150 = vmatprep.mubr.bf16.mxu0 %v1449_v20 }
  0x6d   :  { %1247 = vmatprep.mubr.bf16.mxu1 %v1451_v21 }
  0x73   :  { %1151 = vmatmul.mubr.bf16.gmra.mxu0 %v1448_v26 }
  0x74   :  { %1248 = vmatmul.mubr.bf16.gmra.mxu1 %v1450_v27  ;;  %1158 = vmatprep.mubr.bf16.mxu0 %v1457_v28 }
  0x75   :  { %1255 = vmatprep.mubr.bf16.mxu1 %v1459_v29 }
  0x7b   :  { %1159 = vmatmul.mubr.bf16.gmra.mxu0 %v1456_v34 }
  0x7c   :  { %1256 = vmatmul.mubr.bf16.gmra.mxu1 %v1458_v35  ;;  %1166 = vmatprep.mubr.bf16.mxu0 %v1465_v36 }
  0x7d   :  { %1263 = vmatprep.mubr.bf16.mxu1 %v1467_v37 }
  0x83   :  { %1167 = vmatmul.mubr.bf16.gmra.mxu0 %v1464_v42 }
  0x84   :  { %1264 = vmatmul.mubr.bf16.gmra.mxu1 %v1466_v43  ;;  %1174 = vmatprep.mubr.bf16.mxu0 %v1473_v44 }
  0x85   :  { %1271 = vmatprep.mubr.bf16.mxu1 %v1475_v45 }
  0x8b   :  { %1175 = vmatmul.mubr.bf16.gmra.mxu0 %v1472_v50 }
  0x8c   :  { %1272 = vmatmul.mubr.bf16.gmra.mxu1 %v1474_v51  ;;  %1182 = vmatprep.mubr.bf16.mxu0 %v1481_v52 }
  0x8d   :  { %1279 = vmatprep.mubr.bf16.mxu1 %v1483_v53 }
  0x93   :  { %1183 = vmatmul.mubr.bf16.gmra.mxu0 %v1480_v58 }
  0x94   :  { %1280 = vmatmul.mubr.bf16.gmra.mxu1 %v1482_v59  ;;  %1190 = vmatprep.mubr.bf16.mxu0 %v1489_v60 }
  0x95   :  { %1287 = vmatprep.mubr.bf16.mxu1 %v1491_v61 }
  0x9b   :  { %1191 = vmatmul.mubr.bf16.gmra.mxu0 %v1488_v62 }
  0x9c   :  { %1288 = vmatmul.mubr.bf16.gmra.mxu1 %v1490_v63 }
  0xe3   :  { %v1651_v0 = vpop.f32.mrf.mxu0 }
  0xe4   :  { %v1715_v1 = vpop.f32.mrf.mxu1 }
  0xe5   :  { %v1652_v2 = vpop.f32.mrf.mxu0 }
  0xe6   :  { %v1653_v3 = vadd.f32 %v1652_v2, %v1651_v0  ;;  %v1716_v4 = vpop.f32.mrf.mxu1 }
  0xe7   :  { %v1717_v5 = vadd.f32 %v1716_v4, %v1715_v1  ;;  %v2354_v6 = vpop.f32.mrf.mxu0 }
  0xe8   :  { %v2356_v7 = vpop.f32.mrf.mxu1 }
  0xe9   :  { %v2358_v8 = vadd.f32 %v1717_v5, %v1653_v3  ;;  %v2360_v9 = vpop.f32.mrf.mxu0 }
  0xea   :  { %v2362_v10 = vpop.f32.mrf.mxu1 }
  0xeb   :  { %v1657_v11 = vpop.f32.mrf.mxu0 }
  0xec   :  { %v1721_v12 = vpop.f32.mrf.mxu1 }
  0xed   :  { %v1658_v13 = vpop.f32.mrf.mxu0 }
  0xee   :  { %v1659_v14 = vadd.f32 %v1658_v13, %v1657_v11  ;;  %v1722_v15 = vpop.f32.mrf.mxu1 }
  0xef   :  { %v1723_v16 = vadd.f32 %v1722_v15, %v1721_v12  ;;  %v2364_v17 = vpop.f32.mrf.mxu0 }
  0xf0   :  { %v2366_v18 = vpop.f32.mrf.mxu1 }
  0xf1   :  { %v2368_v19 = vadd.f32 %v1723_v16, %v1659_v14  ;;  %v2370_v20 = vpop.f32.mrf.mxu0 }
  0xf2   :  { %v2372_v21 = vpop.f32.mrf.mxu1 }
  0xf3   :  { %v1663_v22 = vpop.f32.mrf.mxu0 }
  0xf4   :  { %v1727_v23 = vpop.f32.mrf.mxu1 }
  0xf5   :  { %v1664_v24 = vpop.f32.mrf.mxu0 }
  0xf6   :  { %v1665_v25 = vadd.f32 %v1664_v24, %v1663_v22  ;;  %v1728_v26 = vpop.f32.mrf.mxu1 }
  0xf7   :  { %v1729_v27 = vadd.f32 %v1728_v26, %v1727_v23  ;;  %v2374_v28 = vpop.f32.mrf.mxu0 }
  0xf8   :  { %v2376_v29 = vpop.f32.mrf.mxu1 }
  0xf9   :  { %v2378_v30 = vadd.f32 %v1729_v27, %v1665_v25  ;;  %v2380_v31 = vpop.f32.mrf.mxu0 }
  0xfa   :  { %v2382_v32 = vpop.f32.mrf.mxu1 }
  0xfb   :  { %v1669_v33 = vpop.f32.mrf.mxu0 }
  0xfc   :  { %v1733_v34 = vpop.f32.mrf.mxu1 }
  0xfd   :  { %v1670_v35 = vpop.f32.mrf.mxu0 }
  0xfe   :  { %v1671_v36 = vadd.f32 %v1670_v35, %v1669_v33  ;;  %v1734_v37 = vpop.f32.mrf.mxu1 }
  0xff   :  { %v1735_v38 = vadd.f32 %v1734_v37, %v1733_v34  ;;  %v2384_v39 = vpop.f32.mrf.mxu0 }
 0x100   :  { %v2386_v40 = vpop.f32.mrf.mxu1 }
 0x101   :  { %v2388_v41 = vadd.f32 %v1735_v38, %v1671_v36  ;;  %v2390_v42 = vpop.f32.mrf.mxu0 }
 0x102   :  { %v2392_v43 = vpop.f32.mrf.mxu1 }
 0x103   :  { %v1675_v44 = vpop.f32.mrf.mxu0 }
 0x104   :  { %v1739_v45 = vpop.f32.mrf.mxu1 }
 0x105   :  { %v1676_v46 = vpop.f32.mrf.mxu0 }
 0x106   :  { %v1677_v47 = vadd.f32 %v1676_v46, %v1675_v44  ;;  %v1740_v48 = vpop.f32.mrf.mxu1 }
 0x107   :  { %v1741_v49 = vadd.f32 %v1740_v48, %v1739_v45  ;;  %v2394_v50 = vpop.f32.mrf.mxu0  ;;  %v1720_v48 = vadd.f32 %v2362_v10, %v2356_v7  ;;  %v1726_v7 = vadd.f32 %v2372_v21, %v2366_v18 }
 0x108   :  { %v2396_v51 = vpop.f32.mrf.mxu1 }
 0x109   :  { %v2398_v52 = vadd.f32 %v1741_v49, %v1677_v47  ;;  %v2400_v53 = vpop.f32.mrf.mxu0  ;;  %v1656_v47 = vadd.f32 %v2360_v9, %v2354_v6  ;;  %v1662_v6 = vadd.f32 %v2370_v20, %v2364_v17 }
 0x10a   :  { %v2402_v54 = vpop.f32.mrf.mxu1 }
 0x10b   :  { %v1681_v55 = vpop.f32.mrf.mxu0 }
 0x10c   :  { %v1745_v56 = vpop.f32.mrf.mxu1 }
 0x10d   :  { %v1682_v57 = vpop.f32.mrf.mxu0 }
 0x10e   :  { %v1683_v58 = vadd.f32 %v1682_v57, %v1681_v55  ;;  %v1746_v59 = vpop.f32.mrf.mxu1 }
 0x10f   :  { %v1747_v60 = vadd.f32 %v1746_v59, %v1745_v56  ;;  %v2404_v61 = vpop.f32.mrf.mxu0 }
 0x110   :  { %v2406_v62 = vpop.f32.mrf.mxu1 }
 0x111   :  { %v2408_v63 = vadd.f32 %v1747_v60, %v1683_v58  ;;  %v2410_v0 = vpop.f32.mrf.mxu0 }
 0x112   :  { %v2412_v1 = vpop.f32.mrf.mxu1 }
 0x113   :  { %v1687_v2 = vpop.f32.mrf.mxu0 }
 0x114   :  { %v1751_v3 = vpop.f32.mrf.mxu1 }
 0x115   :  { %v1688_v4 = vpop.f32.mrf.mxu0 }
 0x116   :  { %v1689_v5 = vadd.f32 %v1688_v4, %v1687_v2  ;;  %v1752_v11 = vpop.f32.mrf.mxu1  ;;  %v1043_v2 = vadd.f32 %v1720_v48, %v1656_v47  ;;  %v1051_v47 = vadd.f32 %v1726_v7, %v1662_v6 }
 0x117   :  { %v1753_v12 = vadd.f32 %v1752_v11, %v1751_v3  ;;  %v2414_v13 = vpop.f32.mrf.mxu0 }
 0x118   :  { %v2416_v14 = vpop.f32.mrf.mxu1 }
 0x119   :  { %v2418_v15 = vadd.f32 %v1753_v12, %v1689_v5  ;;  %v2420_v16 = vpop.f32.mrf.mxu0 }
 0x11a   :  { %v2422_v22 = vpop.f32.mrf.mxu1 }
 0x11b   :  { %v1693_v23 = vpop.f32.mrf.mxu0 }
 0x11c   :  { %v1757_v24 = vpop.f32.mrf.mxu1 }
 0x11d   :  { %v1694_v25 = vpop.f32.mrf.mxu0 }
 0x11e   :  { %v1695_v26 = vadd.f32 %v1694_v25, %v1693_v23  ;;  %v1758_v27 = vpop.f32.mrf.mxu1 }
 0x11f   :  { %v1759_v33 = vadd.f32 %v1758_v27, %v1757_v24  ;;  %v2424_v34 = vpop.f32.mrf.mxu0 }
 0x120   :  { %v2426_v35 = vpop.f32.mrf.mxu1 }
 0x121   :  { %v2428_v36 = vadd.f32 %v1759_v33, %v1695_v26  ;;  %v2430_v37 = vpop.f32.mrf.mxu0 }
 0x122   :  { %v2432_v38 = vpop.f32.mrf.mxu1 }
 0x123   :  { %v1779_v44 = vpop.f32.mrf.mxu0 }
 0x124   :  { %v1843_v45 = vpop.f32.mrf.mxu1 }
 0x125   :  { %v1780_v46 = vpop.f32.mrf.mxu0 }
 0x126   :  { %v1781_v49 = vadd.f32 %v1780_v46, %v1779_v44  ;;  %v1844_v55 = vpop.f32.mrf.mxu1 }
 0x127   :  { %v1782_v56 = vpop.f32.mrf.mxu0  ;;  %v1845_v58 = vadd.f32 %v1844_v55, %v1843_v45 }
 0x128   :  { %v1137_v57 = vadd.f32 %v1781_v49, %v2358_v8  ;;  %v1846_v59 = vpop.f32.mrf.mxu1 }
 0x129   :  { %v1783_v60 = vpop.f32.mrf.mxu0 }
 0x12a   :  { %v1234_v3 = vadd.f32 %v1845_v58, %v1137_v57  ;;  %v1784_v4 = vadd.f32 %v1783_v60, %v1782_v56  ;;  %v1847_v5 = vpop.f32.mrf.mxu1  ;;  %v1668_v60 = vadd.f32 %v2380_v31, %v2374_v28 }
 0x12b   :  { %v1785_v11 = vpop.f32.mrf.mxu0  ;;  %v1848_v23 = vadd.f32 %v1847_v5, %v1846_v59 }
 0x12c   :  { %v1140_v12 = vadd.f32 %v1784_v4, %v1043_v2  ;;  %v1849_v24 = vpop.f32.mrf.mxu1  ;;  %v1312_v10 = vmul.f32 0.2, %v1234_v3  ;;  %vm1296_vm0 = vcmp.ge.f32.partialorder %v1234_v3, 0.0 }
 0x12d   :  { %v1786_v9 = vpop.f32.mrf.mxu0 }
 0x12e   :  { %v1237_v8 = vadd.f32 %v1848_v23, %v1140_v12  ;;  %v1787_v25 = vadd.f32 %v1786_v9, %v1785_v11  ;;  %v1850_v26 = vpop.f32.mrf.mxu1  ;;  %v1328_v49 = vsel %vm1296_vm0, %v1234_v3, %v1312_v10 }
 0x12f   :  { %v1788_v27 = vpop.f32.mrf.mxu0  ;;  %v1851_v45 = vadd.f32 %v1850_v26, %v1849_v24 }
 0x130   :  { %vm1297_vm1 = vcmp.ge.f32.partialorder %v1237_v8, 0.0  ;;  %v1313_v33 = vmul.f32 0.2, %v1237_v8  ;;  %v1145_v44 = vadd.f32 %v1787_v25, %v2368_v19  ;;  %v1852_v46 = vpop.f32.mrf.mxu1  ;;  %v1732_v19 = vadd.f32 %v2382_v32, %v2376_v29 }
 0x131   :  { %v1789_v48 = vpop.f32.mrf.mxu0 }
 0x132   :  { %v1329_v17 = vsel %vm1297_vm1, %v1237_v8, %v1313_v33  ;;  %v1242_v20 = vadd.f32 %v1851_v45, %v1145_v44  ;;  %v1790_v55 = vadd.f32 %v1789_v48, %v1788_v27  ;;  %v1853_v18 = vpop.f32.mrf.mxu1  ;;  %v1059_v31 = vadd.f32 %v1732_v19, %v1668_v60 }
 0x133   :  { %v1591_v21 = vpack.c.bf16 %v1329_v17, %v1328_v49  ;;  %v1791_v56 = vpop.f32.mrf.mxu0  ;;  %v1854_v58 = vadd.f32 %v1853_v18, %v1852_v46  ;;  %v1674_v45 = vadd.f32 %v2390_v42, %v2384_v39 }
 0x134   :  { %v1148_v57 = vadd.f32 %v1790_v55, %v1051_v47  ;;  %v1855_v59 = vpop.f32.mrf.mxu1  ;;  %v1314_v3 = vmul.f32 0.2, %v1242_v20  ;;  %vm1298_vm2 = vcmp.ge.f32.partialorder %v1242_v20, 0.0 }
 0x135   :  { %1592 = vst [vmem:[%s2500_s2] sm:$0xff] %v1591_v21   ;;  %v1792_v2 = vpop.f32.mrf.mxu0 }
 0x136   :  { %v1245_v4 = vadd.f32 %v1854_v58, %v1148_v57  ;;  %v1793_v5 = vadd.f32 %v1792_v2, %v1791_v56  ;;  %v1856_v11 = vpop.f32.mrf.mxu1  ;;  %v1330_v29 = vsel %vm1298_vm2, %v1242_v20, %v1314_v3 }
 0x137   :  { %v1794_v12 = vpop.f32.mrf.mxu0  ;;  %v1857_v6 = vadd.f32 %v1856_v11, %v1855_v59 }
 0x138   :  { %vm1299_vm3 = vcmp.ge.f32.partialorder %v1245_v4, 0.0  ;;  %v1315_v23 = vmul.f32 0.2, %v1245_v4  ;;  %v1153_v24 = vadd.f32 %v1793_v5, %v2378_v30  ;;  %v1858_v28 = vpop.f32.mrf.mxu1  ;;  %v1738_v30 = vadd.f32 %v2392_v43, %v2386_v40 }
 0x139   :  { %v1795_v7 = vpop.f32.mrf.mxu0  ;;  %v1680_v5 = vadd.f32 %v2400_v53, %v2394_v50 }
 0x13a   :  { %v1331_v32 = vsel %vm1299_vm3, %v1245_v4, %v1315_v23  ;;  %v1250_v9 = vadd.f32 %v1857_v6, %v1153_v24  ;;  %v1796_v10 = vadd.f32 %v1795_v7, %v1794_v12  ;;  %v1859_v8 = vpop.f32.mrf.mxu1  ;;  %v1067_v42 = vadd.f32 %v1738_v30, %v1674_v45 }
 0x13b   :  { %v1596_v25 = vpack.c.bf16 %v1331_v32, %v1330_v29  ;;  %v1797_v26 = vpop.f32.mrf.mxu0  ;;  %v1860_v33 = vadd.f32 %v1859_v8, %v1858_v28  ;;  %v1686_v45 = vadd.f32 %v2410_v0, %v2404_v61 }
 0x13c   :  { %v1156_v27 = vadd.f32 %v1796_v10, %v1059_v31  ;;  %v1861_v44 = vpop.f32.mrf.mxu1  ;;  %v1316_v47 = vmul.f32 0.2, %v1250_v9  ;;  %vm1300_vm4 = vcmp.ge.f32.partialorder %v1250_v9, 0.0 }
 0x13d   :  { %1628 = vst [vmem:[%s2500_s2 + $0x8] sm:$0xff] %v1596_v25   ;;  %v1798_v46 = vpop.f32.mrf.mxu0 }
 0x13e   :  { %v1253_v48 = vadd.f32 %v1860_v33, %v1156_v27  ;;  %v1799_v49 = vadd.f32 %v1798_v46, %v1797_v26  ;;  %v1862_v17 = vpop.f32.mrf.mxu1  ;;  %v1332_v40 = vsel %vm1300_vm4, %v1250_v9, %v1316_v47 }
 0x13f   :  { %v1800_v20 = vpop.f32.mrf.mxu0  ;;  %v1863_v21 = vadd.f32 %v1862_v17, %v1861_v44 }
 0x140   :  { %vm1301_vm5 = vcmp.ge.f32.partialorder %v1253_v48, 0.0  ;;  %v1317_v55 = vmul.f32 0.2, %v1253_v48  ;;  %v1161_v18 = vadd.f32 %v1799_v49, %v2388_v41  ;;  %v1864_v39 = vpop.f32.mrf.mxu1  ;;  %v1744_v41 = vadd.f32 %v2402_v54, %v2396_v51 }
 0x141   :  { %v1801_v56 = vpop.f32.mrf.mxu0 }
 0x142   :  { %v1333_v43 = vsel %vm1301_vm5, %v1253_v48, %v1317_v55  ;;  %v1258_v57 = vadd.f32 %v1863_v21, %v1161_v18  ;;  %v1802_v58 = vadd.f32 %v1801_v56, %v1800_v20  ;;  %v1865_v59 = vpop.f32.mrf.mxu1  ;;  %v1075_v53 = vadd.f32 %v1744_v41, %v1680_v5 }
 0x143   :  { %v1601_v60 = vpack.c.bf16 %v1333_v43, %v1332_v40  ;;  %v1803_v19 = vpop.f32.mrf.mxu0  ;;  %v1866_v3 = vadd.f32 %v1865_v59, %v1864_v39 }
 0x144   :  { %v1164_v2 = vadd.f32 %v1802_v58, %v1067_v42  ;;  %v1867_v4 = vpop.f32.mrf.mxu1  ;;  %v1318_v12 = vmul.f32 0.2, %v1258_v57  ;;  %vm1302_vm6 = vcmp.ge.f32.partialorder %v1258_v57, 0.0 }
 0x145   :  { %1629 = vst [vmem:[%s2500_s2 + $0x10] sm:$0xff] %v1601_v60   ;;  %v1804_v11 = vpop.f32.mrf.mxu0  ;;  %v1692_v60 = vadd.f32 %v2420_v16, %v2414_v13 }
 0x146   :  { %v1261_v23 = vadd.f32 %v1866_v3, %v1164_v2  ;;  %v1805_v24 = vadd.f32 %v1804_v11, %v1803_v19  ;;  %v1868_v6 = vpop.f32.mrf.mxu1  ;;  %v1334_v51 = vsel %vm1302_vm6, %v1258_v57, %v1318_v12 }
 0x147   :  { %v1806_v28 = vpop.f32.mrf.mxu0  ;;  %v1869_v29 = vadd.f32 %v1868_v6, %v1867_v4 }
 0x148   :  { %vm1303_vm7 = vcmp.ge.f32.partialorder %v1261_v23, 0.0  ;;  %v1319_v31 = vmul.f32 0.2, %v1261_v23  ;;  %v1169_v7 = vadd.f32 %v1805_v24, %v2398_v52  ;;  %v1870_v50 = vpop.f32.mrf.mxu1  ;;  %v1750_v52 = vadd.f32 %v2412_v1, %v2406_v62 }
 0x149   :  { %v1807_v32 = vpop.f32.mrf.mxu0 }
 0x14a   :  { %v1335_v54 = vsel %vm1303_vm7, %v1261_v23, %v1319_v31  ;;  %v1266_v9 = vadd.f32 %v1869_v29, %v1169_v7  ;;  %v1808_v10 = vadd.f32 %v1807_v32, %v1806_v28  ;;  %v1871_v8 = vpop.f32.mrf.mxu1  ;;  %v1083_v0 = vadd.f32 %v1750_v52, %v1686_v45 }
 0x14b   :  { %v1606_v25 = vpack.c.bf16 %v1335_v54, %v1334_v51  ;;  %v1809_v26 = vpop.f32.mrf.mxu0  ;;  %v1872_v33 = vadd.f32 %v1871_v8, %v1870_v50  ;;  %v1698_v51 = vadd.f32 %v2430_v37, %v2424_v34 }
 0x14c   :  { %v1172_v27 = vadd.f32 %v1808_v10, %v1075_v53  ;;  %v1873_v44 = vpop.f32.mrf.mxu1  ;;  %v1320_v46 = vmul.f32 0.2, %v1266_v9  ;;  %vm1304_vm8 = vcmp.ge.f32.partialorder %v1266_v9, 0.0 }
 0x14d   :  { %1630 = vst [vmem:[%s2500_s2 + $0x18] sm:$0xff] %v1606_v25   ;;  %v1810_v30 = vpop.f32.mrf.mxu0 }
 0x14e   :  { %v1269_v47 = vadd.f32 %v1872_v33, %v1172_v27  ;;  %v1811_v48 = vadd.f32 %v1810_v30, %v1809_v26  ;;  %v1874_v49 = vpop.f32.mrf.mxu1  ;;  %v1336_v62 = vsel %vm1304_vm8, %v1266_v9, %v1320_v46 }
 0x14f   :  { %v1812_v17 = vpop.f32.mrf.mxu0  ;;  %v1875_v18 = vadd.f32 %v1874_v49, %v1873_v44 }
 0x150   :  { %vm1305_vm9 = vcmp.ge.f32.partialorder %v1269_v47, 0.0  ;;  %v1321_v20 = vmul.f32 0.2, %v1269_v47  ;;  %v1177_v55 = vadd.f32 %v1811_v48, %v2408_v63  ;;  %v1876_v61 = vpop.f32.mrf.mxu1  ;;  %v1756_v63 = vadd.f32 %v2422_v22, %v2416_v14 }
 0x151   :  { %v1813_v21 = vpop.f32.mrf.mxu0 }
 0x152   :  { %v1337_v1 = vsel %vm1305_vm9, %v1269_v47, %v1321_v20  ;;  %v1274_v39 = vadd.f32 %v1875_v18, %v1177_v55  ;;  %v1814_v42 = vadd.f32 %v1813_v21, %v1812_v17  ;;  %v1877_v56 = vpop.f32.mrf.mxu1  ;;  %v1091_v16 = vadd.f32 %v1756_v63, %v1692_v60 }
 0x153   :  { %v1611_v40 = vpack.c.bf16 %v1337_v1, %v1336_v62  ;;  %v1815_v43 = vpop.f32.mrf.mxu0  ;;  %v1878_v58 = vadd.f32 %v1877_v56, %v1876_v61 }
 0x154   :  { %v1180_v57 = vadd.f32 %v1814_v42, %v1083_v0  ;;  %v1879_v59 = vpop.f32.mrf.mxu1  ;;  %v1322_v2 = vmul.f32 0.2, %v1274_v39  ;;  %vm1306_vm10 = vcmp.ge.f32.partialorder %v1274_v39, 0.0 }
 0x155   :  { %1631 = vst [vmem:[%s2500_s2 + $0x20] sm:$0xff] %v1611_v40   ;;  %v1816_v19 = vpop.f32.mrf.mxu0 }
 0x156   :  { %v1277_v3 = vadd.f32 %v1878_v58, %v1180_v57  ;;  %v1817_v4 = vadd.f32 %v1816_v19, %v1815_v43  ;;  %v1880_v5 = vpop.f32.mrf.mxu1  ;;  %v1338_v14 = vsel %vm1306_vm10, %v1274_v39, %v1322_v2 }
 0x157   :  { %v1818_v41 = vpop.f32.mrf.mxu0  ;;  %v1881_v23 = vadd.f32 %v1880_v5, %v1879_v59 }
 0x158   :  { %vm1307_vm11 = vcmp.ge.f32.partialorder %v1277_v3, 0.0  ;;  %v1323_v11 = vmul.f32 0.2, %v1277_v3  ;;  %v1185_v12 = vadd.f32 %v1817_v4, %v2418_v15  ;;  %v1882_v13 = vpop.f32.mrf.mxu1  ;;  %v1762_v15 = vadd.f32 %v2432_v38, %v2426_v35 }
 0x159   :  { %v1819_v24 = vpop.f32.mrf.mxu0 }
 0x15a   :  { %v1339_v22 = vsel %vm1307_vm11, %v1277_v3, %v1323_v11  ;;  %v1282_v6 = vadd.f32 %v1881_v23, %v1185_v12  ;;  %v1820_v28 = vadd.f32 %v1819_v24, %v1818_v41  ;;  %v1883_v31 = vpop.f32.mrf.mxu1  ;;  %v1099_v37 = vadd.f32 %v1762_v15, %v1698_v51 }
 0x15b   :  { %v1616_v7 = vpack.c.bf16 %v1339_v22, %v1338_v14  ;;  %v1821_v29 = vpop.f32.mrf.mxu0  ;;  %v1884_v53 = vadd.f32 %v1883_v31, %v1882_v13 }
 0x15c   :  { %v1188_v50 = vadd.f32 %v1820_v28, %v1091_v16  ;;  %v1885_v32 = vpop.f32.mrf.mxu1  ;;  %v1324_v9 = vmul.f32 0.2, %v1282_v6  ;;  %vm1308_vm12 = vcmp.ge.f32.partialorder %v1282_v6, 0.0 }
 0x15d   :  { %1632 = vst [vmem:[%s2500_s2 + $0x28] sm:$0xff] %v1616_v7   ;;  %v1822_v54 = vpop.f32.mrf.mxu0 }
 0x15e   :  { %v1285_v10 = vadd.f32 %v1884_v53, %v1188_v50  ;;  %v1823_v8 = vadd.f32 %v1822_v54, %v1821_v29  ;;  %v1886_v25 = vpop.f32.mrf.mxu1  ;;  %v1340_v35 = vsel %vm1308_vm12, %v1282_v6, %v1324_v9 }
 0x15f   :  { %v1824_v26 = vpop.f32.mrf.mxu0  ;;  %v1887_v44 = vadd.f32 %v1886_v25, %v1885_v32 }
 0x160   :  { %vm1309_vm13 = vcmp.ge.f32.partialorder %v1285_v10, 0.0  ;;  %v1325_v27 = vmul.f32 0.2, %v1285_v10  ;;  %v1193_v33 = vadd.f32 %v1823_v8, %v2428_v36  ;;  %v1888_v34 = vpop.f32.mrf.mxu1 }
 0x161   :  { %v1825_v45 = vpop.f32.mrf.mxu0 }
 0x162   :  { %v1341_v38 = vsel %vm1309_vm13, %v1285_v10, %v1325_v27  ;;  %v1290_v52 = vadd.f32 %v1887_v44, %v1193_v33  ;;  %v1826_v30 = vadd.f32 %v1825_v45, %v1824_v26  ;;  %v1889_v46 = vpop.f32.mrf.mxu1 }
 0x163   :  { %v1621_v47 = vpack.c.bf16 %v1341_v38, %v1340_v35  ;;  %v1890_v49 = vadd.f32 %v1889_v46, %v1888_v34 }
 0x164   :  { %v1196_v48 = vadd.f32 %v1826_v30, %v1099_v37  ;;  %v1326_v17 = vmul.f32 0.2, %v1290_v52  ;;  %vm1310_vm14 = vcmp.ge.f32.partialorder %v1290_v52, 0.0 }
 0x165   :  { %1633 = vst [vmem:[%s2500_s2 + $0x30] sm:$0xff] %v1621_v47  }
 0x166   :  { %v1293_v20 = vadd.f32 %v1890_v49, %v1196_v48  ;;  %v1342_v55 = vsel %vm1310_vm14, %v1290_v52, %v1326_v17 }
 0x168   :  { %vm1311_vm15 = vcmp.ge.f32.partialorder %v1293_v20, 0.0  ;;  %v1327_v36 = vmul.f32 0.2, %v1293_v20 }
 0x16a   :  { %v1343_v18 = vsel %vm1311_vm15, %v1293_v20, %v1327_v36 }
 0x16b   :  { %v1626_v61 = vpack.c.bf16 %v1343_v18, %v1342_v55 }
 0x16d   :  { %1634 = vst [vmem:[%s2500_s2 + $0x38] sm:$0xff] %v1626_v61  }

// kernel: discriminator_forward.7
= control target key start
LH: loop header
LB: loop body
LE: loop exit
PB: predicated region body
PF: predicated region fallthrough
CT: control target
= control target key end

     0   :  { %s3669_s9 = smov 0   ;;  %s3671_s10 = smov 0   ;;  %s4503_s0 = inlined_call_operand.vmem [shape: bf16[32,2048], index: 0, kind: input, shape index: {}]   ;;  %s4504_s1 = inlined_call_operand.vmem [shape: bf16[2048,256], index: 1, kind: input, shape index: {}]   ;;  %s4505_s2 = inlined_call_operand.vmem [shape: bf16[32,256], index: 2, kind: output, shape index: {}]  }
   0x1   :  { %s3673_s11 = smov 0   ;;  %s3675_s12 = smov 0  }
   0x2   :  { %s3677_s13 = smov 0  }
   0x3 LB: > { %s21_s14 = sadd.s32 1, %s3648_s12  ;;  %s3029_s15 = sadd.s32 4294967295, %s3652_s13   ;;  %s3652_s13 = sphi %s3677_s13, %s12_s13   ;;  %s3648_s12 = sphi %s3675_s12, %s4510_s12   ;;  %s3644_s11 = sphi %s3673_s11, %s4509_s11   ;;  %s3640_s10 = sphi %s3671_s10, %s4508_s10   ;;  %s3636_s9 = sphi %s3669_s9, %s4507_s9  }
   0x4   : > { %p22_p0 = scmp.ge.s32.totalorder %s21_s14, 2  ;;  %p64_p1 = scmp.ne.s32.totalorder %s3640_s10, %s3636_s9 }
   0x5   : > { %p65_p2 = scmp.eq.s32.totalorder %s3652_s13, 0  ;;  %p96_p4 = scmp.eq.s32.totalorder %s3029_s15, 1 }
   0x6   : > { %s4512_s14 = smov (%p22_p0, %s21_s14), 0  ;;  %s57_s17 = sadd.s32 1, %s3640_s10 }
   0x7   : > { %p66_p3 = por %p65_p2, %p64_p1  ;;  %s54_s16 = ssub.s32 %s3648_s12, %s4512_s14 }
   0x8   : > { %p55_p5 = scmp.eq.s32.totalorder %s54_s16, 0  ;;  %p3704_p6 = por %p96_p4, %p64_p1 }
   0x9   : > { %p3033_p7 = scmp.ge.s32.totalorder %s3652_s13, 2 }
   0xa   : > { %s3709_s19 = scalar_select %p55_p5, %s3640_s10, %s57_s17  }
   0xb   : > { %128 = sbr.rel (%p3033_p7) target bundleno = 190 (0xbe), region = 20 }
  0x10   : > { %131 = sbr.rel (!%p66_p3) target bundleno = 190 (0xbe), region = 24  ;;  %s133_s20 = sand.u32 (%p66_p3), 1, %s3640_s10  }
  0x11   : > { %s3035_s21 = sshll.u32 (%p66_p3), %s3648_s12, 2  ;;  %s3034_s22 = sshll.u32 (%p66_p3), %s133_s20, 10 }
  0x12   : > { %s3717_s25 = scalar_lea.vmem (%p66_p3), %s4504_s1, %s3035_s21  ;;  %s3721_s26 = scalar_lea.vmem (%p66_p3), [#allocation2], %s3034_s22 }
  0x13   : > { %v154_v0 = vld [vmem:[%s3717_s25] sm:$0xf] (%p66_p3)  ;;  %v156_v1 = vld [vmem:[%s3717_s25 + $0x8] sm:$0xf] (%p66_p3)  ;;  %v158_v2 = vld [vmem:[%s3717_s25 + $0x10] sm:$0xf] (%p66_p3) }
  0x14   : > { %155 = vst [vmem:[%s3721_s26] sm:$0xf] (%p66_p3), %v154_v0  ;;  %157 = vst [vmem:[%s3721_s26 + $0x4] sm:$0xf] (%p66_p3), %v156_v1  ;;  %v160_v3 = vld [vmem:[%s3717_s25 + $0x18] sm:$0xf] (%p66_p3) }
  0x15   : > { %v162_v4 = vld [vmem:[%s3717_s25 + $0x20] sm:$0xf]  ;;  %159 = vst [vmem:[%s3721_s26 + $0x8] sm:$0xf] %v158_v2  ;;  %161 = vst [vmem:[%s3721_s26 + $0xc] sm:$0xf] %v160_v3 }
  0x16   : > { %163 = vst [vmem:[%s3721_s26 + $0x10] sm:$0xf] %v162_v4  ;;  %v164_v5 = vld [vmem:[%s3717_s25 + $0x28] sm:$0xf]  ;;  %v166_v6 = vld [vmem:[%s3717_s25 + $0x30] sm:$0xf] }
  0x17   : > { %v168_v7 = vld [vmem:[%s3717_s25 + $0x38] sm:$0xf]  ;;  %165 = vst [vmem:[%s3721_s26 + $0x14] sm:$0xf] %v164_v5  ;;  %167 = vst [vmem:[%s3721_s26 + $0x18] sm:$0xf] %v166_v6 }
  0x18   : > { %169 = vst [vmem:[%s3721_s26 + $0x1c] sm:$0xf] %v168_v7  ;;  %v170_v8 = vld [vmem:[%s3717_s25 + $0x40] sm:$0xf]  ;;  %v172_v9 = vld [vmem:[%s3717_s25 + $0x48] sm:$0xf] }
  0x19   : > { %v174_v10 = vld [vmem:[%s3717_s25 + $0x50] sm:$0xf]  ;;  %171 = vst [vmem:[%s3721_s26 + $0x20] sm:$0xf] %v170_v8  ;;  %173 = vst [vmem:[%s3721_s26 + $0x24] sm:$0xf] %v172_v9 }
  0x1a   : > { %175 = vst [vmem:[%s3721_s26 + $0x28] sm:$0xf] %v174_v10  ;;  %v176_v11 = vld [vmem:[%s3717_s25 + $0x58] sm:$0xf]  ;;  %v178_v12 = vld [vmem:[%s3717_s25 + $0x60] sm:$0xf] }
  0x1b   : > { %v180_v13 = vld [vmem:[%s3717_s25 + $0x68] sm:$0xf]  ;;  %177 = vst [vmem:[%s3721_s26 + $0x2c] sm:$0xf] %v176_v11  ;;  %179 = vst [vmem:[%s3721_s26 + $0x30] sm:$0xf] %v178_v12 }
  0x1c   : > { %181 = vst [vmem:[%s3721_s26 + $0x34] sm:$0xf] %v180_v13  ;;  %v182_v14 = vld [vmem:[%s3717_s25 + $0x70] sm:$0xf]  ;;  %v184_v15 = vld [vmem:[%s3717_s25 + $0x78] sm:$0xf] }
  0x1d   : > { %v186_v16 = vld [vmem:[%s3717_s25 + $0x80] sm:$0xf]  ;;  %183 = vst [vmem:[%s3721_s26 + $0x38] sm:$0xf] %v182_v14  ;;  %185 = vst [vmem:[%s3721_s26 + $0x3c] sm:$0xf] %v184_v15 }
  0x1e   : > { %187 = vst [vmem:[%s3721_s26 + $0x40] sm:$0xf] %v186_v16  ;;  %v188_v17 = vld [vmem:[%s3717_s25 + $0x88] sm:$0xf]  ;;  %v190_v18 = vld [vmem:[%s3717_s25 + $0x90] sm:$0xf] }
  0x1f   : > { %v192_v19 = vld [vmem:[%s3717_s25 + $0x98] sm:$0xf]  ;;  %189 = vst [vmem:[%s3721_s26 + $0x44] sm:$0xf] %v188_v17  ;;  %191 = vst [vmem:[%s3721_s26 + $0x48] sm:$0xf] %v190_v18 }
  0x20   : > { %193 = vst [vmem:[%s3721_s26 + $0x4c] sm:$0xf] %v192_v19  ;;  %v194_v20 = vld [vmem:[%s3717_s25 + $0xa0] sm:$0xf]  ;;  %v196_v21 = vld [vmem:[%s3717_s25 + $0xa8] sm:$0xf] }
  0x21   : > { %v198_v22 = vld [vmem:[%s3717_s25 + $0xb0] sm:$0xf]  ;;  %195 = vst [vmem:[%s3721_s26 + $0x50] sm:$0xf] %v194_v20  ;;  %197 = vst [vmem:[%s3721_s26 + $0x54] sm:$0xf] %v196_v21 }
  0x22   : > { %199 = vst [vmem:[%s3721_s26 + $0x58] sm:$0xf] %v198_v22  ;;  %v200_v23 = vld [vmem:[%s3717_s25 + $0xb8] sm:$0xf]  ;;  %v202_v24 = vld [vmem:[%s3717_s25 + $0xc0] sm:$0xf] }
  0x23   : > { %v204_v25 = vld [vmem:[%s3717_s25 + $0xc8] sm:$0xf]  ;;  %201 = vst [vmem:[%s3721_s26 + $0x5c] sm:$0xf] %v200_v23  ;;  %203 = vst [vmem:[%s3721_s26 + $0x60] sm:$0xf] %v202_v24 }
  0x24   : > { %205 = vst [vmem:[%s3721_s26 + $0x64] sm:$0xf] %v204_v25  ;;  %v206_v26 = vld [vmem:[%s3717_s25 + $0xd0] sm:$0xf]  ;;  %v208_v27 = vld [vmem:[%s3717_s25 + $0xd8] sm:$0xf] }
  0x25   : > { %v210_v28 = vld [vmem:[%s3717_s25 + $0xe0] sm:$0xf]  ;;  %207 = vst [vmem:[%s3721_s26 + $0x68] sm:$0xf] %v206_v26  ;;  %209 = vst [vmem:[%s3721_s26 + $0x6c] sm:$0xf] %v208_v27 }
  0x26   : > { %211 = vst [vmem:[%s3721_s26 + $0x70] sm:$0xf] %v210_v28  ;;  %v212_v29 = vld [vmem:[%s3717_s25 + $0xe8] sm:$0xf]  ;;  %v214_v30 = vld [vmem:[%s3717_s25 + $0xf0] sm:$0xf] }
  0x27   : > { %v216_v31 = vld [vmem:[%s3717_s25 + $0xf8] sm:$0xf]  ;;  %213 = vst [vmem:[%s3721_s26 + $0x74] sm:$0xf] %v212_v29  ;;  %215 = vst [vmem:[%s3721_s26 + $0x78] sm:$0xf] %v214_v30 }
  0x28   : > { %217 = vst [vmem:[%s3721_s26 + $0x7c] sm:$0xf] %v216_v31  ;;  %v218_v32 = vld [vmem:[%s3717_s25 + $0x100] sm:$0xf]  ;;  %v220_v33 = vld [vmem:[%s3717_s25 + $0x108] sm:$0xf] }
  0x29   : > { %v222_v34 = vld [vmem:[%s3717_s25 + $0x110] sm:$0xf]  ;;  %219 = vst [vmem:[%s3721_s26 + $0x80] sm:$0xf] %v218_v32  ;;  %221 = vst [vmem:[%s3721_s26 + $0x84] sm:$0xf] %v220_v33 }
  0x2a   : > { %223 = vst [vmem:[%s3721_s26 + $0x88] sm:$0xf] %v222_v34  ;;  %v224_v35 = vld [vmem:[%s3717_s25 + $0x118] sm:$0xf]  ;;  %v226_v36 = vld [vmem:[%s3717_s25 + $0x120] sm:$0xf] }
  0x2b   : > { %v228_v37 = vld [vmem:[%s3717_s25 + $0x128] sm:$0xf]  ;;  %225 = vst [vmem:[%s3721_s26 + $0x8c] sm:$0xf] %v224_v35  ;;  %227 = vst [vmem:[%s3721_s26 + $0x90] sm:$0xf] %v226_v36 }
  0x2c   : > { %229 = vst [vmem:[%s3721_s26 + $0x94] sm:$0xf] %v228_v37  ;;  %v230_v38 = vld [vmem:[%s3717_s25 + $0x130] sm:$0xf]  ;;  %v232_v39 = vld [vmem:[%s3717_s25 + $0x138] sm:$0xf] }
  0x2d   : > { %v234_v40 = vld [vmem:[%s3717_s25 + $0x140] sm:$0xf]  ;;  %231 = vst [vmem:[%s3721_s26 + $0x98] sm:$0xf] %v230_v38  ;;  %233 = vst [vmem:[%s3721_s26 + $0x9c] sm:$0xf] %v232_v39 }
  0x2e   : > { %235 = vst [vmem:[%s3721_s26 + $0xa0] sm:$0xf] %v234_v40  ;;  %v236_v41 = vld [vmem:[%s3717_s25 + $0x148] sm:$0xf]  ;;  %v238_v42 = vld [vmem:[%s3717_s25 + $0x150] sm:$0xf] }
  0x2f   : > { %v240_v43 = vld [vmem:[%s3717_s25 + $0x158] sm:$0xf]  ;;  %237 = vst [vmem:[%s3721_s26 + $0xa4] sm:$0xf] %v236_v41  ;;  %239 = vst [vmem:[%s3721_s26 + $0xa8] sm:$0xf] %v238_v42 }
  0x30   : > { %241 = vst [vmem:[%s3721_s26 + $0xac] sm:$0xf] %v240_v43  ;;  %v242_v44 = vld [vmem:[%s3717_s25 + $0x160] sm:$0xf]  ;;  %v244_v45 = vld [vmem:[%s3717_s25 + $0x168] sm:$0xf] }
  0x31   : > { %v246_v46 = vld [vmem:[%s3717_s25 + $0x170] sm:$0xf]  ;;  %243 = vst [vmem:[%s3721_s26 + $0xb0] sm:$0xf] %v242_v44  ;;  %245 = vst [vmem:[%s3721_s26 + $0xb4] sm:$0xf] %v244_v45 }
  0x32   : > { %247 = vst [vmem:[%s3721_s26 + $0xb8] sm:$0xf] %v246_v46  ;;  %v248_v47 = vld [vmem:[%s3717_s25 + $0x178] sm:$0xf]  ;;  %v250_v48 = vld [vmem:[%s3717_s25 + $0x180] sm:$0xf] }
  0x33   : > { %v252_v49 = vld [vmem:[%s3717_s25 + $0x188] sm:$0xf]  ;;  %249 = vst [vmem:[%s3721_s26 + $0xbc] sm:$0xf] %v248_v47  ;;  %251 = vst [vmem:[%s3721_s26 + $0xc0] sm:$0xf] %v250_v48 }
  0x34   : > { %253 = vst [vmem:[%s3721_s26 + $0xc4] sm:$0xf] %v252_v49  ;;  %v254_v50 = vld [vmem:[%s3717_s25 + $0x190] sm:$0xf]  ;;  %v256_v51 = vld [vmem:[%s3717_s25 + $0x198] sm:$0xf] }
  0x35   : > { %v258_v52 = vld [vmem:[%s3717_s25 + $0x1a0] sm:$0xf]  ;;  %255 = vst [vmem:[%s3721_s26 + $0xc8] sm:$0xf] %v254_v50  ;;  %257 = vst [vmem:[%s3721_s26 + $0xcc] sm:$0xf] %v256_v51 }
  0x36   : > { %259 = vst [vmem:[%s3721_s26 + $0xd0] sm:$0xf] %v258_v52  ;;  %v260_v53 = vld [vmem:[%s3717_s25 + $0x1a8] sm:$0xf]  ;;  %v262_v54 = vld [vmem:[%s3717_s25 + $0x1b0] sm:$0xf] }
  0x37   : > { %v264_v55 = vld [vmem:[%s3717_s25 + $0x1b8] sm:$0xf]  ;;  %261 = vst [vmem:[%s3721_s26 + $0xd4] sm:$0xf] %v260_v53  ;;  %263 = vst [vmem:[%s3721_s26 + $0xd8] sm:$0xf] %v262_v54 }
  0x38   : > { %265 = vst [vmem:[%s3721_s26 + $0xdc] sm:$0xf] %v264_v55  ;;  %v266_v56 = vld [vmem:[%s3717_s25 + $0x1c0] sm:$0xf]  ;;  %v268_v57 = vld [vmem:[%s3717_s25 + $0x1c8] sm:$0xf] }
  0x39   : > { %v270_v58 = vld [vmem:[%s3717_s25 + $0x1d0] sm:$0xf]  ;;  %267 = vst [vmem:[%s3721_s26 + $0xe0] sm:$0xf] %v266_v56  ;;  %269 = vst [vmem:[%s3721_s26 + $0xe4] sm:$0xf] %v268_v57 }
  0x3a   : > { %271 = vst [vmem:[%s3721_s26 + $0xe8] sm:$0xf] %v270_v58  ;;  %v272_v59 = vld [vmem:[%s3717_s25 + $0x1d8] sm:$0xf]  ;;  %v274_v60 = vld [vmem:[%s3717_s25 + $0x1e0] sm:$0xf] }
  0x3b   : > { %v276_v61 = vld [vmem:[%s3717_s25 + $0x1e8] sm:$0xf]  ;;  %273 = vst [vmem:[%s3721_s26 + $0xec] sm:$0xf] %v272_v59  ;;  %275 = vst [vmem:[%s3721_s26 + $0xf0] sm:$0xf] %v274_v60 }
  0x3c   : > { %277 = vst [vmem:[%s3721_s26 + $0xf4] sm:$0xf] %v276_v61  ;;  %v278_v62 = vld [vmem:[%s3717_s25 + $0x1f0] sm:$0xf]  ;;  %v280_v63 = vld [vmem:[%s3717_s25 + $0x1f8] sm:$0xf] }
  0x3d   : > { %v282_v0 = vld [vmem:[%s3717_s25 + $0x200] sm:$0xf]  ;;  %279 = vst [vmem:[%s3721_s26 + $0xf8] sm:$0xf] %v278_v62  ;;  %281 = vst [vmem:[%s3721_s26 + $0xfc] sm:$0xf] %v280_v63 }
  0x3e   : > { %283 = vst [vmem:[%s3721_s26 + $0x100] sm:$0xf] %v282_v0  ;;  %v284_v1 = vld [vmem:[%s3717_s25 + $0x208] sm:$0xf]  ;;  %v286_v2 = vld [vmem:[%s3717_s25 + $0x210] sm:$0xf] }
  0x3f   : > { %v288_v3 = vld [vmem:[%s3717_s25 + $0x218] sm:$0xf]  ;;  %285 = vst [vmem:[%s3721_s26 + $0x104] sm:$0xf] %v284_v1  ;;  %287 = vst [vmem:[%s3721_s26 + $0x108] sm:$0xf] %v286_v2 }
  0x40   : > { %289 = vst [vmem:[%s3721_s26 + $0x10c] sm:$0xf] %v288_v3  ;;  %v290_v4 = vld [vmem:[%s3717_s25 + $0x220] sm:$0xf]  ;;  %v292_v5 = vld [vmem:[%s3717_s25 + $0x228] sm:$0xf] }
  0x41   : > { %v294_v6 = vld [vmem:[%s3717_s25 + $0x230] sm:$0xf]  ;;  %291 = vst [vmem:[%s3721_s26 + $0x110] sm:$0xf] %v290_v4  ;;  %293 = vst [vmem:[%s3721_s26 + $0x114] sm:$0xf] %v292_v5 }
  0x42   : > { %295 = vst [vmem:[%s3721_s26 + $0x118] sm:$0xf] %v294_v6  ;;  %v296_v7 = vld [vmem:[%s3717_s25 + $0x238] sm:$0xf]  ;;  %v298_v8 = vld [vmem:[%s3717_s25 + $0x240] sm:$0xf] }
  0x43   : > { %v300_v9 = vld [vmem:[%s3717_s25 + $0x248] sm:$0xf]  ;;  %297 = vst [vmem:[%s3721_s26 + $0x11c] sm:$0xf] %v296_v7  ;;  %299 = vst [vmem:[%s3721_s26 + $0x120] sm:$0xf] %v298_v8 }
  0x44   : > { %301 = vst [vmem:[%s3721_s26 + $0x124] sm:$0xf] %v300_v9  ;;  %v302_v10 = vld [vmem:[%s3717_s25 + $0x250] sm:$0xf]  ;;  %v304_v11 = vld [vmem:[%s3717_s25 + $0x258] sm:$0xf] }
  0x45   : > { %v306_v12 = vld [vmem:[%s3717_s25 + $0x260] sm:$0xf]  ;;  %303 = vst [vmem:[%s3721_s26 + $0x128] sm:$0xf] %v302_v10  ;;  %305 = vst [vmem:[%s3721_s26 + $0x12c] sm:$0xf] %v304_v11 }
  0x46   : > { %307 = vst [vmem:[%s3721_s26 + $0x130] sm:$0xf] %v306_v12  ;;  %v308_v13 = vld [vmem:[%s3717_s25 + $0x268] sm:$0xf]  ;;  %v310_v14 = vld [vmem:[%s3717_s25 + $0x270] sm:$0xf] }
  0x47   : > { %v312_v15 = vld [vmem:[%s3717_s25 + $0x278] sm:$0xf]  ;;  %309 = vst [vmem:[%s3721_s26 + $0x134] sm:$0xf] %v308_v13  ;;  %311 = vst [vmem:[%s3721_s26 + $0x138] sm:$0xf] %v310_v14 }
  0x48   : > { %313 = vst [vmem:[%s3721_s26 + $0x13c] sm:$0xf] %v312_v15  ;;  %v314_v16 = vld [vmem:[%s3717_s25 + $0x280] sm:$0xf]  ;;  %v316_v17 = vld [vmem:[%s3717_s25 + $0x288] sm:$0xf] }
  0x49   : > { %v318_v18 = vld [vmem:[%s3717_s25 + $0x290] sm:$0xf]  ;;  %315 = vst [vmem:[%s3721_s26 + $0x140] sm:$0xf] %v314_v16  ;;  %317 = vst [vmem:[%s3721_s26 + $0x144] sm:$0xf] %v316_v17 }
  0x4a   : > { %319 = vst [vmem:[%s3721_s26 + $0x148] sm:$0xf] %v318_v18  ;;  %v320_v19 = vld [vmem:[%s3717_s25 + $0x298] sm:$0xf]  ;;  %v322_v20 = vld [vmem:[%s3717_s25 + $0x2a0] sm:$0xf] }
  0x4b   : > { %v324_v21 = vld [vmem:[%s3717_s25 + $0x2a8] sm:$0xf]  ;;  %321 = vst [vmem:[%s3721_s26 + $0x14c] sm:$0xf] %v320_v19  ;;  %323 = vst [vmem:[%s3721_s26 + $0x150] sm:$0xf] %v322_v20 }
  0x4c   : > { %325 = vst [vmem:[%s3721_s26 + $0x154] sm:$0xf] %v324_v21  ;;  %v326_v22 = vld [vmem:[%s3717_s25 + $0x2b0] sm:$0xf]  ;;  %v328_v23 = vld [vmem:[%s3717_s25 + $0x2b8] sm:$0xf] }
  0x4d   : > { %v330_v24 = vld [vmem:[%s3717_s25 + $0x2c0] sm:$0xf]  ;;  %327 = vst [vmem:[%s3721_s26 + $0x158] sm:$0xf] %v326_v22  ;;  %329 = vst [vmem:[%s3721_s26 + $0x15c] sm:$0xf] %v328_v23 }
  0x4e   : > { %331 = vst [vmem:[%s3721_s26 + $0x160] sm:$0xf] %v330_v24  ;;  %v332_v25 = vld [vmem:[%s3717_s25 + $0x2c8] sm:$0xf]  ;;  %v334_v26 = vld [vmem:[%s3717_s25 + $0x2d0] sm:$0xf] }
  0x4f   : > { %v336_v27 = vld [vmem:[%s3717_s25 + $0x2d8] sm:$0xf]  ;;  %333 = vst [vmem:[%s3721_s26 + $0x164] sm:$0xf] %v332_v25  ;;  %335 = vst [vmem:[%s3721_s26 + $0x168] sm:$0xf] %v334_v26 }
  0x50   : > { %337 = vst [vmem:[%s3721_s26 + $0x16c] sm:$0xf] %v336_v27  ;;  %v338_v28 = vld [vmem:[%s3717_s25 + $0x2e0] sm:$0xf]  ;;  %v340_v29 = vld [vmem:[%s3717_s25 + $0x2e8] sm:$0xf] }
  0x51   : > { %v342_v30 = vld [vmem:[%s3717_s25 + $0x2f0] sm:$0xf]  ;;  %339 = vst [vmem:[%s3721_s26 + $0x170] sm:$0xf] %v338_v28  ;;  %341 = vst [vmem:[%s3721_s26 + $0x174] sm:$0xf] %v340_v29 }
  0x52   : > { %343 = vst [vmem:[%s3721_s26 + $0x178] sm:$0xf] %v342_v30  ;;  %v344_v31 = vld [vmem:[%s3717_s25 + $0x2f8] sm:$0xf]  ;;  %v346_v32 = vld [vmem:[%s3717_s25 + $0x300] sm:$0xf] }
  0x53   : > { %v348_v33 = vld [vmem:[%s3717_s25 + $0x308] sm:$0xf]  ;;  %345 = vst [vmem:[%s3721_s26 + $0x17c] sm:$0xf] %v344_v31  ;;  %347 = vst [vmem:[%s3721_s26 + $0x180] sm:$0xf] %v346_v32 }
  0x54   : > { %349 = vst [vmem:[%s3721_s26 + $0x184] sm:$0xf] %v348_v33  ;;  %v350_v34 = vld [vmem:[%s3717_s25 + $0x310] sm:$0xf]  ;;  %v352_v35 = vld [vmem:[%s3717_s25 + $0x318] sm:$0xf] }
  0x55   : > { %v354_v36 = vld [vmem:[%s3717_s25 + $0x320] sm:$0xf]  ;;  %351 = vst [vmem:[%s3721_s26 + $0x188] sm:$0xf] %v350_v34  ;;  %353 = vst [vmem:[%s3721_s26 + $0x18c] sm:$0xf] %v352_v35 }
  0x56   : > { %355 = vst [vmem:[%s3721_s26 + $0x190] sm:$0xf] %v354_v36  ;;  %v356_v37 = vld [vmem:[%s3717_s25 + $0x328] sm:$0xf]  ;;  %v358_v38 = vld [vmem:[%s3717_s25 + $0x330] sm:$0xf] }
  0x57   : > { %v360_v39 = vld [vmem:[%s3717_s25 + $0x338] sm:$0xf]  ;;  %357 = vst [vmem:[%s3721_s26 + $0x194] sm:$0xf] %v356_v37  ;;  %359 = vst [vmem:[%s3721_s26 + $0x198] sm:$0xf] %v358_v38 }
  0x58   : > { %361 = vst [vmem:[%s3721_s26 + $0x19c] sm:$0xf] %v360_v39  ;;  %v362_v40 = vld [vmem:[%s3717_s25 + $0x340] sm:$0xf]  ;;  %v364_v41 = vld [vmem:[%s3717_s25 + $0x348] sm:$0xf] }
  0x59   : > { %v366_v42 = vld [vmem:[%s3717_s25 + $0x350] sm:$0xf]  ;;  %363 = vst [vmem:[%s3721_s26 + $0x1a0] sm:$0xf] %v362_v40  ;;  %365 = vst [vmem:[%s3721_s26 + $0x1a4] sm:$0xf] %v364_v41 }
  0x5a   : > { %367 = vst [vmem:[%s3721_s26 + $0x1a8] sm:$0xf] %v366_v42  ;;  %v368_v43 = vld [vmem:[%s3717_s25 + $0x358] sm:$0xf]  ;;  %v370_v44 = vld [vmem:[%s3717_s25 + $0x360] sm:$0xf] }
  0x5b   : > { %v372_v45 = vld [vmem:[%s3717_s25 + $0x368] sm:$0xf]  ;;  %369 = vst [vmem:[%s3721_s26 + $0x1ac] sm:$0xf] %v368_v43  ;;  %371 = vst [vmem:[%s3721_s26 + $0x1b0] sm:$0xf] %v370_v44 }
  0x5c   : > { %373 = vst [vmem:[%s3721_s26 + $0x1b4] sm:$0xf] %v372_v45  ;;  %v374_v46 = vld [vmem:[%s3717_s25 + $0x370] sm:$0xf]  ;;  %v376_v47 = vld [vmem:[%s3717_s25 + $0x378] sm:$0xf] }
  0x5d   : > { %v378_v48 = vld [vmem:[%s3717_s25 + $0x380] sm:$0xf]  ;;  %375 = vst [vmem:[%s3721_s26 + $0x1b8] sm:$0xf] %v374_v46  ;;  %377 = vst [vmem:[%s3721_s26 + $0x1bc] sm:$0xf] %v376_v47 }
  0x5e   : > { %379 = vst [vmem:[%s3721_s26 + $0x1c0] sm:$0xf] %v378_v48  ;;  %v380_v49 = vld [vmem:[%s3717_s25 + $0x388] sm:$0xf]  ;;  %v382_v50 = vld [vmem:[%s3717_s25 + $0x390] sm:$0xf] }
  0x5f   : > { %v384_v51 = vld [vmem:[%s3717_s25 + $0x398] sm:$0xf]  ;;  %381 = vst [vmem:[%s3721_s26 + $0x1c4] sm:$0xf] %v380_v49  ;;  %383 = vst [vmem:[%s3721_s26 + $0x1c8] sm:$0xf] %v382_v50 }
  0x60   : > { %385 = vst [vmem:[%s3721_s26 + $0x1cc] sm:$0xf] %v384_v51  ;;  %v386_v52 = vld [vmem:[%s3717_s25 + $0x3a0] sm:$0xf]  ;;  %v388_v53 = vld [vmem:[%s3717_s25 + $0x3a8] sm:$0xf] }
  0x61   : > { %v390_v54 = vld [vmem:[%s3717_s25 + $0x3b0] sm:$0xf]  ;;  %387 = vst [vmem:[%s3721_s26 + $0x1d0] sm:$0xf] %v386_v52  ;;  %389 = vst [vmem:[%s3721_s26 + $0x1d4] sm:$0xf] %v388_v53 }
  0x62   : > { %391 = vst [vmem:[%s3721_s26 + $0x1d8] sm:$0xf] %v390_v54  ;;  %v392_v55 = vld [vmem:[%s3717_s25 + $0x3b8] sm:$0xf]  ;;  %v394_v56 = vld [vmem:[%s3717_s25 + $0x3c0] sm:$0xf] }
  0x63   : > { %v396_v57 = vld [vmem:[%s3717_s25 + $0x3c8] sm:$0xf]  ;;  %393 = vst [vmem:[%s3721_s26 + $0x1dc] sm:$0xf] %v392_v55  ;;  %395 = vst [vmem:[%s3721_s26 + $0x1e0] sm:$0xf] %v394_v56 }
  0x64   : > { %397 = vst [vmem:[%s3721_s26 + $0x1e4] sm:$0xf] %v396_v57  ;;  %v398_v58 = vld [vmem:[%s3717_s25 + $0x3d0] sm:$0xf]  ;;  %v400_v59 = vld [vmem:[%s3717_s25 + $0x3d8] sm:$0xf] }
  0x65   : > { %v402_v60 = vld [vmem:[%s3717_s25 + $0x3e0] sm:$0xf]  ;;  %399 = vst [vmem:[%s3721_s26 + $0x1e8] sm:$0xf] %v398_v58  ;;  %401 = vst [vmem:[%s3721_s26 + $0x1ec] sm:$0xf] %v400_v59 }
  0x66   : > { %403 = vst [vmem:[%s3721_s26 + $0x1f0] sm:$0xf] %v402_v60  ;;  %v404_v61 = vld [vmem:[%s3717_s25 + $0x3e8] sm:$0xf]  ;;  %v406_v62 = vld [vmem:[%s3717_s25 + $0x3f0] sm:$0xf] }
  0x67   : > { %v408_v63 = vld [vmem:[%s3717_s25 + $0x3f8] sm:$0xf]  ;;  %405 = vst [vmem:[%s3721_s26 + $0x1f4] sm:$0xf] %v404_v61  ;;  %407 = vst [vmem:[%s3721_s26 + $0x1f8] sm:$0xf] %v406_v62 }
  0x68   : > { %409 = vst [vmem:[%s3721_s26 + $0x1fc] sm:$0xf] %v408_v63  ;;  %v410_v0 = vld [vmem:[%s3717_s25 + $0x400] sm:$0xf]  ;;  %v412_v1 = vld [vmem:[%s3717_s25 + $0x408] sm:$0xf] }
  0x69   : > { %v414_v2 = vld [vmem:[%s3717_s25 + $0x410] sm:$0xf]  ;;  %411 = vst [vmem:[%s3721_s26 + $0x200] sm:$0xf] %v410_v0  ;;  %413 = vst [vmem:[%s3721_s26 + $0x204] sm:$0xf] %v412_v1 }
  0x6a   : > { %415 = vst [vmem:[%s3721_s26 + $0x208] sm:$0xf] %v414_v2  ;;  %v416_v3 = vld [vmem:[%s3717_s25 + $0x418] sm:$0xf]  ;;  %v418_v4 = vld [vmem:[%s3717_s25 + $0x420] sm:$0xf] }
  0x6b   : > { %v420_v5 = vld [vmem:[%s3717_s25 + $0x428] sm:$0xf]  ;;  %417 = vst [vmem:[%s3721_s26 + $0x20c] sm:$0xf] %v416_v3  ;;  %419 = vst [vmem:[%s3721_s26 + $0x210] sm:$0xf] %v418_v4 }
  0x6c   : > { %421 = vst [vmem:[%s3721_s26 + $0x214] sm:$0xf] %v420_v5  ;;  %v422_v6 = vld [vmem:[%s3717_s25 + $0x430] sm:$0xf]  ;;  %v424_v7 = vld [vmem:[%s3717_s25 + $0x438] sm:$0xf] }
  0x6d   : > { %v426_v8 = vld [vmem:[%s3717_s25 + $0x440] sm:$0xf]  ;;  %423 = vst [vmem:[%s3721_s26 + $0x218] sm:$0xf] %v422_v6  ;;  %425 = vst [vmem:[%s3721_s26 + $0x21c] sm:$0xf] %v424_v7 }
  0x6e   : > { %427 = vst [vmem:[%s3721_s26 + $0x220] sm:$0xf] %v426_v8  ;;  %v428_v9 = vld [vmem:[%s3717_s25 + $0x448] sm:$0xf]  ;;  %v430_v10 = vld [vmem:[%s3717_s25 + $0x450] sm:$0xf] }
  0x6f   : > { %v432_v11 = vld [vmem:[%s3717_s25 + $0x458] sm:$0xf]  ;;  %429 = vst [vmem:[%s3721_s26 + $0x224] sm:$0xf] %v428_v9  ;;  %431 = vst [vmem:[%s3721_s26 + $0x228] sm:$0xf] %v430_v10 }
  0x70   : > { %433 = vst [vmem:[%s3721_s26 + $0x22c] sm:$0xf] %v432_v11  ;;  %v434_v12 = vld [vmem:[%s3717_s25 + $0x460] sm:$0xf]  ;;  %v436_v13 = vld [vmem:[%s3717_s25 + $0x468] sm:$0xf] }
  0x71   : > { %v438_v14 = vld [vmem:[%s3717_s25 + $0x470] sm:$0xf]  ;;  %435 = vst [vmem:[%s3721_s26 + $0x230] sm:$0xf] %v434_v12  ;;  %437 = vst [vmem:[%s3721_s26 + $0x234] sm:$0xf] %v436_v13 }
  0x72   : > { %439 = vst [vmem:[%s3721_s26 + $0x238] sm:$0xf] %v438_v14  ;;  %v440_v15 = vld [vmem:[%s3717_s25 + $0x478] sm:$0xf]  ;;  %v442_v16 = vld [vmem:[%s3717_s25 + $0x480] sm:$0xf] }
  0x73   : > { %v444_v17 = vld [vmem:[%s3717_s25 + $0x488] sm:$0xf]  ;;  %441 = vst [vmem:[%s3721_s26 + $0x23c] sm:$0xf] %v440_v15  ;;  %443 = vst [vmem:[%s3721_s26 + $0x240] sm:$0xf] %v442_v16 }
  0x74   : > { %445 = vst [vmem:[%s3721_s26 + $0x244] sm:$0xf] %v444_v17  ;;  %v446_v18 = vld [vmem:[%s3717_s25 + $0x490] sm:$0xf]  ;;  %v448_v19 = vld [vmem:[%s3717_s25 + $0x498] sm:$0xf] }
  0x75   : > { %v450_v20 = vld [vmem:[%s3717_s25 + $0x4a0] sm:$0xf]  ;;  %447 = vst [vmem:[%s3721_s26 + $0x248] sm:$0xf] %v446_v18  ;;  %449 = vst [vmem:[%s3721_s26 + $0x24c] sm:$0xf] %v448_v19 }
  0x76   : > { %451 = vst [vmem:[%s3721_s26 + $0x250] sm:$0xf] %v450_v20  ;;  %v452_v21 = vld [vmem:[%s3717_s25 + $0x4a8] sm:$0xf]  ;;  %v454_v22 = vld [vmem:[%s3717_s25 + $0x4b0] sm:$0xf] }
  0x77   : > { %v456_v23 = vld [vmem:[%s3717_s25 + $0x4b8] sm:$0xf]  ;;  %453 = vst [vmem:[%s3721_s26 + $0x254] sm:$0xf] %v452_v21  ;;  %455 = vst [vmem:[%s3721_s26 + $0x258] sm:$0xf] %v454_v22 }
  0x78   : > { %457 = vst [vmem:[%s3721_s26 + $0x25c] sm:$0xf] %v456_v23  ;;  %v458_v24 = vld [vmem:[%s3717_s25 + $0x4c0] sm:$0xf]  ;;  %v460_v25 = vld [vmem:[%s3717_s25 + $0x4c8] sm:$0xf] }
  0x79   : > { %v462_v26 = vld [vmem:[%s3717_s25 + $0x4d0] sm:$0xf]  ;;  %459 = vst [vmem:[%s3721_s26 + $0x260] sm:$0xf] %v458_v24  ;;  %461 = vst [vmem:[%s3721_s26 + $0x264] sm:$0xf] %v460_v25 }
  0x7a   : > { %463 = vst [vmem:[%s3721_s26 + $0x268] sm:$0xf] %v462_v26  ;;  %v464_v27 = vld [vmem:[%s3717_s25 + $0x4d8] sm:$0xf]  ;;  %v466_v28 = vld [vmem:[%s3717_s25 + $0x4e0] sm:$0xf] }
  0x7b   : > { %v468_v29 = vld [vmem:[%s3717_s25 + $0x4e8] sm:$0xf]  ;;  %465 = vst [vmem:[%s3721_s26 + $0x26c] sm:$0xf] %v464_v27  ;;  %467 = vst [vmem:[%s3721_s26 + $0x270] sm:$0xf] %v466_v28 }
  0x7c   : > { %469 = vst [vmem:[%s3721_s26 + $0x274] sm:$0xf] %v468_v29  ;;  %v470_v30 = vld [vmem:[%s3717_s25 + $0x4f0] sm:$0xf]  ;;  %v472_v31 = vld [vmem:[%s3717_s25 + $0x4f8] sm:$0xf] }
  0x7d   : > { %v474_v32 = vld [vmem:[%s3717_s25 + $0x500] sm:$0xf]  ;;  %471 = vst [vmem:[%s3721_s26 + $0x278] sm:$0xf] %v470_v30  ;;  %473 = vst [vmem:[%s3721_s26 + $0x27c] sm:$0xf] %v472_v31 }
  0x7e   : > { %475 = vst [vmem:[%s3721_s26 + $0x280] sm:$0xf] %v474_v32  ;;  %v476_v33 = vld [vmem:[%s3717_s25 + $0x508] sm:$0xf]  ;;  %v478_v34 = vld [vmem:[%s3717_s25 + $0x510] sm:$0xf] }
  0x7f   : > { %v480_v35 = vld [vmem:[%s3717_s25 + $0x518] sm:$0xf]  ;;  %477 = vst [vmem:[%s3721_s26 + $0x284] sm:$0xf] %v476_v33  ;;  %479 = vst [vmem:[%s3721_s26 + $0x288] sm:$0xf] %v478_v34 }
  0x80   : > { %481 = vst [vmem:[%s3721_s26 + $0x28c] sm:$0xf] %v480_v35  ;;  %v482_v36 = vld [vmem:[%s3717_s25 + $0x520] sm:$0xf]  ;;  %v484_v37 = vld [vmem:[%s3717_s25 + $0x528] sm:$0xf] }
  0x81   : > { %v486_v38 = vld [vmem:[%s3717_s25 + $0x530] sm:$0xf]  ;;  %483 = vst [vmem:[%s3721_s26 + $0x290] sm:$0xf] %v482_v36  ;;  %485 = vst [vmem:[%s3721_s26 + $0x294] sm:$0xf] %v484_v37 }
  0x82   : > { %487 = vst [vmem:[%s3721_s26 + $0x298] sm:$0xf] %v486_v38  ;;  %v488_v39 = vld [vmem:[%s3717_s25 + $0x538] sm:$0xf]  ;;  %v490_v40 = vld [vmem:[%s3717_s25 + $0x540] sm:$0xf] }
  0x83   : > { %v492_v41 = vld [vmem:[%s3717_s25 + $0x548] sm:$0xf]  ;;  %489 = vst [vmem:[%s3721_s26 + $0x29c] sm:$0xf] %v488_v39  ;;  %491 = vst [vmem:[%s3721_s26 + $0x2a0] sm:$0xf] %v490_v40 }
  0x84   : > { %493 = vst [vmem:[%s3721_s26 + $0x2a4] sm:$0xf] %v492_v41  ;;  %v494_v42 = vld [vmem:[%s3717_s25 + $0x550] sm:$0xf]  ;;  %v496_v43 = vld [vmem:[%s3717_s25 + $0x558] sm:$0xf] }
  0x85   : > { %v498_v44 = vld [vmem:[%s3717_s25 + $0x560] sm:$0xf]  ;;  %495 = vst [vmem:[%s3721_s26 + $0x2a8] sm:$0xf] %v494_v42  ;;  %497 = vst [vmem:[%s3721_s26 + $0x2ac] sm:$0xf] %v496_v43 }
  0x86   : > { %499 = vst [vmem:[%s3721_s26 + $0x2b0] sm:$0xf] %v498_v44  ;;  %v500_v45 = vld [vmem:[%s3717_s25 + $0x568] sm:$0xf]  ;;  %v502_v46 = vld [vmem:[%s3717_s25 + $0x570] sm:$0xf] }
  0x87   : > { %v504_v47 = vld [vmem:[%s3717_s25 + $0x578] sm:$0xf]  ;;  %501 = vst [vmem:[%s3721_s26 + $0x2b4] sm:$0xf] %v500_v45  ;;  %503 = vst [vmem:[%s3721_s26 + $0x2b8] sm:$0xf] %v502_v46 }
  0x88   : > { %505 = vst [vmem:[%s3721_s26 + $0x2bc] sm:$0xf] %v504_v47  ;;  %v506_v48 = vld [vmem:[%s3717_s25 + $0x580] sm:$0xf]  ;;  %v508_v49 = vld [vmem:[%s3717_s25 + $0x588] sm:$0xf] }
  0x89   : > { %v510_v50 = vld [vmem:[%s3717_s25 + $0x590] sm:$0xf]  ;;  %507 = vst [vmem:[%s3721_s26 + $0x2c0] sm:$0xf] %v506_v48  ;;  %509 = vst [vmem:[%s3721_s26 + $0x2c4] sm:$0xf] %v508_v49 }
  0x8a   : > { %511 = vst [vmem:[%s3721_s26 + $0x2c8] sm:$0xf] %v510_v50  ;;  %v512_v51 = vld [vmem:[%s3717_s25 + $0x598] sm:$0xf]  ;;  %v514_v52 = vld [vmem:[%s3717_s25 + $0x5a0] sm:$0xf] }
  0x8b   : > { %v516_v53 = vld [vmem:[%s3717_s25 + $0x5a8] sm:$0xf]  ;;  %513 = vst [vmem:[%s3721_s26 + $0x2cc] sm:$0xf] %v512_v51  ;;  %515 = vst [vmem:[%s3721_s26 + $0x2d0] sm:$0xf] %v514_v52 }
  0x8c   : > { %517 = vst [vmem:[%s3721_s26 + $0x2d4] sm:$0xf] %v516_v53  ;;  %v518_v54 = vld [vmem:[%s3717_s25 + $0x5b0] sm:$0xf]  ;;  %v520_v55 = vld [vmem:[%s3717_s25 + $0x5b8] sm:$0xf] }
  0x8d   : > { %v522_v56 = vld [vmem:[%s3717_s25 + $0x5c0] sm:$0xf]  ;;  %519 = vst [vmem:[%s3721_s26 + $0x2d8] sm:$0xf] %v518_v54  ;;  %521 = vst [vmem:[%s3721_s26 + $0x2dc] sm:$0xf] %v520_v55 }
  0x8e   : > { %523 = vst [vmem:[%s3721_s26 + $0x2e0] sm:$0xf] %v522_v56  ;;  %v524_v57 = vld [vmem:[%s3717_s25 + $0x5c8] sm:$0xf]  ;;  %v526_v58 = vld [vmem:[%s3717_s25 + $0x5d0] sm:$0xf] }
  0x8f   : > { %v528_v59 = vld [vmem:[%s3717_s25 + $0x5d8] sm:$0xf]  ;;  %525 = vst [vmem:[%s3721_s26 + $0x2e4] sm:$0xf] %v524_v57  ;;  %527 = vst [vmem:[%s3721_s26 + $0x2e8] sm:$0xf] %v526_v58 }
  0x90   : > { %529 = vst [vmem:[%s3721_s26 + $0x2ec] sm:$0xf] %v528_v59  ;;  %v530_v60 = vld [vmem:[%s3717_s25 + $0x5e0] sm:$0xf]  ;;  %v532_v61 = vld [vmem:[%s3717_s25 + $0x5e8] sm:$0xf] }
  0x91   : > { %v534_v62 = vld [vmem:[%s3717_s25 + $0x5f0] sm:$0xf]  ;;  %531 = vst [vmem:[%s3721_s26 + $0x2f0] sm:$0xf] %v530_v60  ;;  %533 = vst [vmem:[%s3721_s26 + $0x2f4] sm:$0xf] %v532_v61 }
  0x92   : > { %535 = vst [vmem:[%s3721_s26 + $0x2f8] sm:$0xf] %v534_v62  ;;  %v536_v63 = vld [vmem:[%s3717_s25 + $0x5f8] sm:$0xf]  ;;  %v538_v0 = vld [vmem:[%s3717_s25 + $0x600] sm:$0xf] }
  0x93   : > { %v540_v1 = vld [vmem:[%s3717_s25 + $0x608] sm:$0xf]  ;;  %537 = vst [vmem:[%s3721_s26 + $0x2fc] sm:$0xf] %v536_v63  ;;  %539 = vst [vmem:[%s3721_s26 + $0x300] sm:$0xf] %v538_v0 }
  0x94   : > { %541 = vst [vmem:[%s3721_s26 + $0x304] sm:$0xf] %v540_v1  ;;  %v542_v2 = vld [vmem:[%s3717_s25 + $0x610] sm:$0xf]  ;;  %v544_v3 = vld [vmem:[%s3717_s25 + $0x618] sm:$0xf] }
  0x95   : > { %v546_v4 = vld [vmem:[%s3717_s25 + $0x620] sm:$0xf]  ;;  %543 = vst [vmem:[%s3721_s26 + $0x308] sm:$0xf] %v542_v2  ;;  %545 = vst [vmem:[%s3721_s26 + $0x30c] sm:$0xf] %v544_v3 }
  0x96   : > { %547 = vst [vmem:[%s3721_s26 + $0x310] sm:$0xf] %v546_v4  ;;  %v548_v5 = vld [vmem:[%s3717_s25 + $0x628] sm:$0xf]  ;;  %v550_v6 = vld [vmem:[%s3717_s25 + $0x630] sm:$0xf] }
  0x97   : > { %v552_v7 = vld [vmem:[%s3717_s25 + $0x638] sm:$0xf]  ;;  %549 = vst [vmem:[%s3721_s26 + $0x314] sm:$0xf] %v548_v5  ;;  %551 = vst [vmem:[%s3721_s26 + $0x318] sm:$0xf] %v550_v6 }
  0x98   : > { %553 = vst [vmem:[%s3721_s26 + $0x31c] sm:$0xf] %v552_v7  ;;  %v554_v8 = vld [vmem:[%s3717_s25 + $0x640] sm:$0xf]  ;;  %v556_v9 = vld [vmem:[%s3717_s25 + $0x648] sm:$0xf] }
  0x99   : > { %v558_v10 = vld [vmem:[%s3717_s25 + $0x650] sm:$0xf]  ;;  %555 = vst [vmem:[%s3721_s26 + $0x320] sm:$0xf] %v554_v8  ;;  %557 = vst [vmem:[%s3721_s26 + $0x324] sm:$0xf] %v556_v9 }
  0x9a   : > { %559 = vst [vmem:[%s3721_s26 + $0x328] sm:$0xf] %v558_v10  ;;  %v560_v11 = vld [vmem:[%s3717_s25 + $0x658] sm:$0xf]  ;;  %v562_v12 = vld [vmem:[%s3717_s25 + $0x660] sm:$0xf] }
  0x9b   : > { %v564_v13 = vld [vmem:[%s3717_s25 + $0x668] sm:$0xf]  ;;  %561 = vst [vmem:[%s3721_s26 + $0x32c] sm:$0xf] %v560_v11  ;;  %563 = vst [vmem:[%s3721_s26 + $0x330] sm:$0xf] %v562_v12 }
  0x9c   : > { %565 = vst [vmem:[%s3721_s26 + $0x334] sm:$0xf] %v564_v13  ;;  %v566_v14 = vld [vmem:[%s3717_s25 + $0x670] sm:$0xf]  ;;  %v568_v15 = vld [vmem:[%s3717_s25 + $0x678] sm:$0xf] }
  0x9d   : > { %v570_v16 = vld [vmem:[%s3717_s25 + $0x680] sm:$0xf]  ;;  %567 = vst [vmem:[%s3721_s26 + $0x338] sm:$0xf] %v566_v14  ;;  %569 = vst [vmem:[%s3721_s26 + $0x33c] sm:$0xf] %v568_v15 }
  0x9e   : > { %571 = vst [vmem:[%s3721_s26 + $0x340] sm:$0xf] %v570_v16  ;;  %v572_v17 = vld [vmem:[%s3717_s25 + $0x688] sm:$0xf]  ;;  %v574_v18 = vld [vmem:[%s3717_s25 + $0x690] sm:$0xf] }
  0x9f   : > { %v576_v19 = vld [vmem:[%s3717_s25 + $0x698] sm:$0xf]  ;;  %573 = vst [vmem:[%s3721_s26 + $0x344] sm:$0xf] %v572_v17  ;;  %575 = vst [vmem:[%s3721_s26 + $0x348] sm:$0xf] %v574_v18 }
  0xa0   : > { %577 = vst [vmem:[%s3721_s26 + $0x34c] sm:$0xf] %v576_v19  ;;  %v578_v20 = vld [vmem:[%s3717_s25 + $0x6a0] sm:$0xf]  ;;  %v580_v21 = vld [vmem:[%s3717_s25 + $0x6a8] sm:$0xf] }
  0xa1   : > { %v582_v22 = vld [vmem:[%s3717_s25 + $0x6b0] sm:$0xf]  ;;  %579 = vst [vmem:[%s3721_s26 + $0x350] sm:$0xf] %v578_v20  ;;  %581 = vst [vmem:[%s3721_s26 + $0x354] sm:$0xf] %v580_v21 }
  0xa2   : > { %583 = vst [vmem:[%s3721_s26 + $0x358] sm:$0xf] %v582_v22  ;;  %v584_v23 = vld [vmem:[%s3717_s25 + $0x6b8] sm:$0xf]  ;;  %v586_v24 = vld [vmem:[%s3717_s25 + $0x6c0] sm:$0xf] }
  0xa3   : > { %v588_v25 = vld [vmem:[%s3717_s25 + $0x6c8] sm:$0xf]  ;;  %585 = vst [vmem:[%s3721_s26 + $0x35c] sm:$0xf] %v584_v23  ;;  %587 = vst [vmem:[%s3721_s26 + $0x360] sm:$0xf] %v586_v24 }
  0xa4   : > { %589 = vst [vmem:[%s3721_s26 + $0x364] sm:$0xf] %v588_v25  ;;  %v590_v26 = vld [vmem:[%s3717_s25 + $0x6d0] sm:$0xf]  ;;  %v592_v27 = vld [vmem:[%s3717_s25 + $0x6d8] sm:$0xf] }
  0xa5   : > { %v594_v28 = vld [vmem:[%s3717_s25 + $0x6e0] sm:$0xf]  ;;  %591 = vst [vmem:[%s3721_s26 + $0x368] sm:$0xf] %v590_v26  ;;  %593 = vst [vmem:[%s3721_s26 + $0x36c] sm:$0xf] %v592_v27 }
  0xa6   : > { %595 = vst [vmem:[%s3721_s26 + $0x370] sm:$0xf] %v594_v28  ;;  %v596_v29 = vld [vmem:[%s3717_s25 + $0x6e8] sm:$0xf]  ;;  %v598_v30 = vld [vmem:[%s3717_s25 + $0x6f0] sm:$0xf] }
  0xa7   : > { %v600_v31 = vld [vmem:[%s3717_s25 + $0x6f8] sm:$0xf]  ;;  %597 = vst [vmem:[%s3721_s26 + $0x374] sm:$0xf] %v596_v29  ;;  %599 = vst [vmem:[%s3721_s26 + $0x378] sm:$0xf] %v598_v30 }
  0xa8   : > { %601 = vst [vmem:[%s3721_s26 + $0x37c] sm:$0xf] %v600_v31  ;;  %v602_v32 = vld [vmem:[%s3717_s25 + $0x700] sm:$0xf]  ;;  %v604_v33 = vld [vmem:[%s3717_s25 + $0x708] sm:$0xf] }
  0xa9   : > { %v606_v34 = vld [vmem:[%s3717_s25 + $0x710] sm:$0xf]  ;;  %603 = vst [vmem:[%s3721_s26 + $0x380] sm:$0xf] %v602_v32  ;;  %605 = vst [vmem:[%s3721_s26 + $0x384] sm:$0xf] %v604_v33 }
  0xaa   : > { %607 = vst [vmem:[%s3721_s26 + $0x388] sm:$0xf] %v606_v34  ;;  %v608_v35 = vld [vmem:[%s3717_s25 + $0x718] sm:$0xf]  ;;  %v610_v36 = vld [vmem:[%s3717_s25 + $0x720] sm:$0xf] }
  0xab   : > { %v612_v37 = vld [vmem:[%s3717_s25 + $0x728] sm:$0xf]  ;;  %609 = vst [vmem:[%s3721_s26 + $0x38c] sm:$0xf] %v608_v35  ;;  %611 = vst [vmem:[%s3721_s26 + $0x390] sm:$0xf] %v610_v36 }
  0xac   : > { %613 = vst [vmem:[%s3721_s26 + $0x394] sm:$0xf] %v612_v37  ;;  %v614_v38 = vld [vmem:[%s3717_s25 + $0x730] sm:$0xf]  ;;  %v616_v39 = vld [vmem:[%s3717_s25 + $0x738] sm:$0xf] }
  0xad   : > { %v618_v40 = vld [vmem:[%s3717_s25 + $0x740] sm:$0xf]  ;;  %615 = vst [vmem:[%s3721_s26 + $0x398] sm:$0xf] %v614_v38  ;;  %617 = vst [vmem:[%s3721_s26 + $0x39c] sm:$0xf] %v616_v39 }
  0xae   : > { %619 = vst [vmem:[%s3721_s26 + $0x3a0] sm:$0xf] %v618_v40  ;;  %v620_v41 = vld [vmem:[%s3717_s25 + $0x748] sm:$0xf]  ;;  %v622_v42 = vld [vmem:[%s3717_s25 + $0x750] sm:$0xf] }
  0xaf   : > { %v624_v43 = vld [vmem:[%s3717_s25 + $0x758] sm:$0xf]  ;;  %621 = vst [vmem:[%s3721_s26 + $0x3a4] sm:$0xf] %v620_v41  ;;  %623 = vst [vmem:[%s3721_s26 + $0x3a8] sm:$0xf] %v622_v42 }
  0xb0   : > { %625 = vst [vmem:[%s3721_s26 + $0x3ac] sm:$0xf] %v624_v43  ;;  %v626_v44 = vld [vmem:[%s3717_s25 + $0x760] sm:$0xf]  ;;  %v628_v45 = vld [vmem:[%s3717_s25 + $0x768] sm:$0xf] }
  0xb1   : > { %v630_v46 = vld [vmem:[%s3717_s25 + $0x770] sm:$0xf]  ;;  %627 = vst [vmem:[%s3721_s26 + $0x3b0] sm:$0xf] %v626_v44  ;;  %629 = vst [vmem:[%s3721_s26 + $0x3b4] sm:$0xf] %v628_v45 }
  0xb2   : > { %631 = vst [vmem:[%s3721_s26 + $0x3b8] sm:$0xf] %v630_v46  ;;  %v632_v47 = vld [vmem:[%s3717_s25 + $0x778] sm:$0xf]  ;;  %v634_v48 = vld [vmem:[%s3717_s25 + $0x780] sm:$0xf] }
  0xb3   : > { %v636_v49 = vld [vmem:[%s3717_s25 + $0x788] sm:$0xf]  ;;  %633 = vst [vmem:[%s3721_s26 + $0x3bc] sm:$0xf] %v632_v47  ;;  %635 = vst [vmem:[%s3721_s26 + $0x3c0] sm:$0xf] %v634_v48 }
  0xb4   : > { %637 = vst [vmem:[%s3721_s26 + $0x3c4] sm:$0xf] %v636_v49  ;;  %v638_v50 = vld [vmem:[%s3717_s25 + $0x790] sm:$0xf]  ;;  %v640_v51 = vld [vmem:[%s3717_s25 + $0x798] sm:$0xf] }
  0xb5   : > { %v642_v52 = vld [vmem:[%s3717_s25 + $0x7a0] sm:$0xf]  ;;  %639 = vst [vmem:[%s3721_s26 + $0x3c8] sm:$0xf] %v638_v50  ;;  %641 = vst [vmem:[%s3721_s26 + $0x3cc] sm:$0xf] %v640_v51 }
  0xb6   : > { %643 = vst [vmem:[%s3721_s26 + $0x3d0] sm:$0xf] %v642_v52  ;;  %v644_v53 = vld [vmem:[%s3717_s25 + $0x7a8] sm:$0xf]  ;;  %v646_v54 = vld [vmem:[%s3717_s25 + $0x7b0] sm:$0xf] }
  0xb7   : > { %v648_v55 = vld [vmem:[%s3717_s25 + $0x7b8] sm:$0xf]  ;;  %645 = vst [vmem:[%s3721_s26 + $0x3d4] sm:$0xf] %v644_v53  ;;  %647 = vst [vmem:[%s3721_s26 + $0x3d8] sm:$0xf] %v646_v54 }
  0xb8   : > { %649 = vst [vmem:[%s3721_s26 + $0x3dc] sm:$0xf] %v648_v55  ;;  %v650_v56 = vld [vmem:[%s3717_s25 + $0x7c0] sm:$0xf]  ;;  %v652_v57 = vld [vmem:[%s3717_s25 + $0x7c8] sm:$0xf] }
  0xb9   : > { %v654_v58 = vld [vmem:[%s3717_s25 + $0x7d0] sm:$0xf]  ;;  %651 = vst [vmem:[%s3721_s26 + $0x3e0] sm:$0xf] %v650_v56  ;;  %653 = vst [vmem:[%s3721_s26 + $0x3e4] sm:$0xf] %v652_v57 }
  0xba   : > { %655 = vst [vmem:[%s3721_s26 + $0x3e8] sm:$0xf] %v654_v58  ;;  %v656_v59 = vld [vmem:[%s3717_s25 + $0x7d8] sm:$0xf]  ;;  %v658_v60 = vld [vmem:[%s3717_s25 + $0x7e0] sm:$0xf] }
  0xbb   : > { %v660_v61 = vld [vmem:[%s3717_s25 + $0x7e8] sm:$0xf]  ;;  %657 = vst [vmem:[%s3721_s26 + $0x3ec] sm:$0xf] %v656_v59  ;;  %659 = vst [vmem:[%s3721_s26 + $0x3f0] sm:$0xf] %v658_v60 }
  0xbc   : > { %661 = vst [vmem:[%s3721_s26 + $0x3f4] sm:$0xf] %v660_v61  ;;  %v662_v62 = vld [vmem:[%s3717_s25 + $0x7f0] sm:$0xf]  ;;  %v664_v63 = vld [vmem:[%s3717_s25 + $0x7f8] sm:$0xf] }
  0xbd   : > { %663 = vst [vmem:[%s3721_s26 + $0x3f8] sm:$0xf] %v662_v62  ;;  %665 = vst [vmem:[%s3721_s26 + $0x3fc] sm:$0xf] %v664_v63 }
  0xbe PF: > { %p3036_p8 = scmp.ge.s32.totalorder %s3652_s13, 1  ;;  %p1200_p9 = scmp.lt.s32.totalorder %s3652_s13, 3 }
  0xc0   : > { %p1201_p10 = pnand %p3036_p8, %p1200_p9 }
  0xc1   : > { %s1207_s27 = sand.u32 (!%p1201_p10), 1, %s3636_s9  }
  0xc2   : > { %1204 = sbr.rel (%p1201_p10) target bundleno = 556 (0x22c), region = 65  ;;  %s3037_s6 = sshll.u32 (!%p1201_p10), %s1207_s27, 10 }
  0xc3   : > { %s4262_s15 = scalar_lea.vmem (!%p1201_p10), [#allocation2], %s3037_s6  ;;  %s3038_s17 = sshll.u32 (!%p1201_p10), %s1207_s27, 4 }
  0xc4   : > { %s1232_s20 = scalar_lea.vmem (!%p1201_p10), [#allocation3], %s3038_s17 }
  0xc7   : > { %v4239_v0 = vld [vmem:[%s4503_s0] sm:$0xff]  ;;  %v4249_v2 = vld [vmem:[%s4503_s0 + $0x8] sm:$0xff]  ;;  %v3486_v6 = vld [vmem:[%s4262_s15 + $0x78] sm:$0xff]   ;;  %s3204_s9 = sshll.u32 (%p3704_p6), %s3644_s11, 2 }
  0xc8   : > { %v4244_v1 = vld [vmem:[%s4503_s0 + $0x40] sm:$0xff]  ;;  %v4258_v4 = vld [vmem:[%s4503_s0 + $0x48] sm:$0xff]  ;;  %v3487_v7 = vld [vmem:[%s4262_s15 + $0xf8] sm:$0xff]   ;;  %3222 = vmatprep.subr.bf16.mxu0 %v3486_v6  ;;  %s2893_s22 = scalar_lea.vmem (%p3704_p6), %s4505_s2, %s3204_s9 }
  0xc9   : > { %v3040_v3 = vcombine.high %v4239_v0, %v4244_v1  ;;  %v3042_v5 = vcombine.high %v4249_v2, %v4258_v4  ;;  %v3488_v8 = vld [vmem:[%s4262_s15 + $0x38] sm:$0xff]   ;;  %3250 = vmatprep.subr.bf16.mxu1 %v3487_v7  ;;  %v3490_v10 = vld [vmem:[%s4262_s15 + $0x70] sm:$0xff]   ;;  %v3494_v14 = vld [vmem:[%s4262_s15 + $0x68] sm:$0xff]   ;;  %v3039_v42 = vcombine.low %v4239_v0, %v4244_v1  ;;  %v3041_v43 = vcombine.low %v4249_v2, %v4258_v4 }
  0xca   : > { %v3489_v9 = vld [vmem:[%s4262_s15 + $0xb8] sm:$0xff]   ;;  %3223 = vmatpush3.bf16.msra.mxu0 %v3488_v8  ;;  %v3491_v11 = vld [vmem:[%s4262_s15 + $0xf0] sm:$0xff]   ;;  %v3495_v15 = vld [vmem:[%s4262_s15 + $0xe8] sm:$0xff]  }
  0xcb   : > { %2490 = vmatprep.mubr.bf16.mxu0 %v3040_v3  ;;  %2539 = vmatprep.mubr.bf16.mxu1 %v3042_v5  ;;  %v3492_v12 = vld [vmem:[%s4262_s15 + $0x30] sm:$0xff]   ;;  %v3496_v16 = vld [vmem:[%s4262_s15 + $0x28] sm:$0xff]   ;;  %v3498_v18 = vld [vmem:[%s4262_s15 + $0x60] sm:$0xff]  }
  0xcc   : > { %3251 = vmatpush3.bf16.msra.mxu1 %v3489_v9  ;;  %3224 = vmatprep.subr.bf16.mxu0 %v3490_v10  ;;  %v3493_v13 = vld [vmem:[%s4262_s15 + $0xb0] sm:$0xff]   ;;  %v3497_v17 = vld [vmem:[%s4262_s15 + $0xa8] sm:$0xff]   ;;  %v3499_v19 = vld [vmem:[%s4262_s15 + $0xe0] sm:$0xff]  }
  0xcd   : > { %3252 = vmatprep.subr.bf16.mxu1 %v3491_v11  ;;  %v3500_v20 = vld [vmem:[%s4262_s15 + $0x20] sm:$0xff]   ;;  %v3502_v22 = vld [vmem:[%s4262_s15 + $0x58] sm:$0xff]   ;;  %v3506_v26 = vld [vmem:[%s4262_s15 + $0x50] sm:$0xff]  }
  0xce   : > { %3225 = vmatpush3.bf16.msra.mxu0 %v3492_v12  ;;  %v3501_v21 = vld [vmem:[%s4262_s15 + $0xa0] sm:$0xff]   ;;  %v3503_v23 = vld [vmem:[%s4262_s15 + $0xd8] sm:$0xff]   ;;  %v3507_v27 = vld [vmem:[%s4262_s15 + $0xd0] sm:$0xff]  }
  0xcf   : > { %3226 = vmatprep.subr.bf16.mxu0 %v3494_v14  ;;  %v3504_v24 = vld [vmem:[%s4262_s15 + $0x18] sm:$0xff]   ;;  %v3508_v28 = vld [vmem:[%s4262_s15 + $0x10] sm:$0xff]   ;;  %v3510_v30 = vld [vmem:[%s4262_s15 + $0x48] sm:$0xff]  }
  0xd0   : > { %3253 = vmatpush3.bf16.msra.mxu1 %v3493_v13  ;;  %v3505_v25 = vld [vmem:[%s4262_s15 + $0x98] sm:$0xff]   ;;  %v3509_v29 = vld [vmem:[%s4262_s15 + $0x90] sm:$0xff]   ;;  %v3511_v31 = vld [vmem:[%s4262_s15 + $0xc8] sm:$0xff]  }
  0xd1   : > { %3254 = vmatprep.subr.bf16.mxu1 %v3495_v15  ;;  %v3512_v32 = vld [vmem:[%s4262_s15 + $0x8] sm:$0xff]   ;;  %v3514_v34 = vld [vmem:[%s4262_s15 + $0x40] sm:$0xff]   ;;  %v3518_v44 = vld [vmem:[%s4262_s15 + $0x178] sm:$0xff]  }
  0xd2   : > { %3227 = vmatpush3.bf16.msra.mxu0 %v3496_v16  ;;  %v3513_v33 = vld [vmem:[%s4262_s15 + $0x88] sm:$0xff]   ;;  %v1258_v35 = vld [vmem:[%s4503_s0 + $0x80] sm:$0xff]  ;;  %v3519_v45 = vld [vmem:[%s4262_s15 + $0x1f8] sm:$0xff]  }
  0xd3   : > { %3228 = vmatprep.subr.bf16.mxu0 %v3498_v18  ;;  %v1266_v36 = vld [vmem:[%s4503_s0 + $0xc0] sm:$0xff]  ;;  %v1259_v38 = vld [vmem:[%s4503_s0 + $0x88] sm:$0xff]  ;;  %v3520_v47 = vld [vmem:[%s4262_s15 + $0x138] sm:$0xff]  }
  0xd4   : > { %3255 = vmatpush3.bf16.msra.mxu1 %v3497_v17  ;;  %v3515_v37 = vld [vmem:[%s4262_s15 + $0xc0] sm:$0xff]   ;;  %v1267_v39 = vld [vmem:[%s4503_s0 + $0xc8] sm:$0xff]  ;;  %v3056_v46 = vcombine.high %v1258_v35, %v1266_v36  ;;  %v3521_v49 = vld [vmem:[%s4262_s15 + $0x1b8] sm:$0xff]   ;;  %v3055_v54 = vcombine.low %v1258_v35, %v1266_v36 }
  0xd5   : > { %3256 = vmatprep.subr.bf16.mxu1 %v3499_v19  ;;  %v3516_v40 = vld [vmem:[%s4262_s15] sm:$0xff]   ;;  %v3058_v48 = vcombine.high %v1259_v38, %v1267_v39  ;;  %v3522_v50 = vld [vmem:[%s4262_s15 + $0x170] sm:$0xff]   ;;  %v3526_v55 = vld [vmem:[%s4262_s15 + $0x168] sm:$0xff]   ;;  %v3057_v56 = vcombine.low %v1259_v38, %v1267_v39 }
  0xd6   : > { %3229 = vmatpush3.bf16.msra.mxu0 %v3500_v20  ;;  %v3517_v41 = vld [vmem:[%s4262_s15 + $0x80] sm:$0xff]   ;;  %v3523_v51 = vld [vmem:[%s4262_s15 + $0x1f0] sm:$0xff]   ;;  %v3527_v57 = vld [vmem:[%s4262_s15 + $0x1e8] sm:$0xff]  }
  0xd7   : > { %3230 = vmatprep.subr.bf16.mxu0 %v3502_v22  ;;  %v3524_v52 = vld [vmem:[%s4262_s15 + $0x130] sm:$0xff]   ;;  %v3528_v58 = vld [vmem:[%s4262_s15 + $0x128] sm:$0xff]   ;;  %v3530_v60 = vld [vmem:[%s4262_s15 + $0x160] sm:$0xff]  }
  0xd8   : > { %3257 = vmatpush3.bf16.msra.mxu1 %v3501_v21  ;;  %v3525_v53 = vld [vmem:[%s4262_s15 + $0x1b0] sm:$0xff]   ;;  %v3529_v59 = vld [vmem:[%s4262_s15 + $0x1a8] sm:$0xff]   ;;  %v3531_v61 = vld [vmem:[%s4262_s15 + $0x1e0] sm:$0xff]  }
  0xd9   : > { %3258 = vmatprep.subr.bf16.mxu1 %v3503_v23  ;;  %v3532_v62 = vld [vmem:[%s4262_s15 + $0x120] sm:$0xff]   ;;  %v3534_v0 = vld [vmem:[%s4262_s15 + $0x158] sm:$0xff]   ;;  %v3538_v4 = vld [vmem:[%s4262_s15 + $0x150] sm:$0xff]  }
  0xda   : > { %3231 = vmatpush3.bf16.msra.mxu0 %v3504_v24  ;;  %v3533_v63 = vld [vmem:[%s4262_s15 + $0x1a0] sm:$0xff]   ;;  %v3535_v1 = vld [vmem:[%s4262_s15 + $0x1d8] sm:$0xff]   ;;  %v3539_v5 = vld [vmem:[%s4262_s15 + $0x1d0] sm:$0xff]  }
  0xdb   : > { %3232 = vmatprep.subr.bf16.mxu0 %v3506_v26  ;;  %v3536_v2 = vld [vmem:[%s4262_s15 + $0x118] sm:$0xff]   ;;  %v3540_v6 = vld [vmem:[%s4262_s15 + $0x110] sm:$0xff]   ;;  %v3542_v8 = vld [vmem:[%s4262_s15 + $0x148] sm:$0xff]  }
  0xdc   : > { %3259 = vmatpush3.bf16.msra.mxu1 %v3505_v25  ;;  %v3537_v3 = vld [vmem:[%s4262_s15 + $0x198] sm:$0xff]   ;;  %v3541_v7 = vld [vmem:[%s4262_s15 + $0x190] sm:$0xff]   ;;  %v3543_v9 = vld [vmem:[%s4262_s15 + $0x1c8] sm:$0xff]  }
  0xdd   : > { %3260 = vmatprep.subr.bf16.mxu1 %v3507_v27  ;;  %v3544_v10 = vld [vmem:[%s4262_s15 + $0x108] sm:$0xff]   ;;  %v3546_v12 = vld [vmem:[%s4262_s15 + $0x140] sm:$0xff]   ;;  %v1244_v13 = vld [vmem:[%s4503_s0 + $0x10] sm:$0xff] }
  0xde   : > { %3233 = vmatpush3.bf16.msra.mxu0 %v3508_v28  ;;  %v3545_v11 = vld [vmem:[%s4262_s15 + $0x188] sm:$0xff]   ;;  %v3547_v14 = vld [vmem:[%s4262_s15 + $0x1c0] sm:$0xff]   ;;  %v1252_v17 = vld [vmem:[%s4503_s0 + $0x50] sm:$0xff] }
  0xdf   : > { %3234 = vmatprep.subr.bf16.mxu0 %v3510_v30  ;;  %v3548_v15 = vld [vmem:[%s4262_s15 + $0x100] sm:$0xff]   ;;  %v1245_v18 = vld [vmem:[%s4503_s0 + $0x18] sm:$0xff]  ;;  %v3043_v20 = vcombine.low %v1244_v13, %v1252_v17  ;;  %v3044_v21 = vcombine.high %v1244_v13, %v1252_v17  ;;  %v3554_v28 = vld [vmem:[%s4262_s15 + $0x270] sm:$0xff]  }
  0xe0   : > { %3261 = vmatpush3.bf16.msra.mxu1 %v3509_v29  ;;  %v3549_v16 = vld [vmem:[%s4262_s15 + $0x180] sm:$0xff]   ;;  %v1253_v19 = vld [vmem:[%s4503_s0 + $0x58] sm:$0xff]  ;;  %v3555_v29 = vld [vmem:[%s4262_s15 + $0x2f0] sm:$0xff]  }
  0xe1   : > { %3262 = vmatprep.subr.bf16.mxu1 %v3511_v31  ;;  %v3045_v22 = vcombine.low %v1245_v18, %v1253_v19  ;;  %v3046_v23 = vcombine.high %v1245_v18, %v1253_v19  ;;  %v3550_v24 = vld [vmem:[%s4262_s15 + $0x278] sm:$0xff]   ;;  %v3556_v30 = vld [vmem:[%s4262_s15 + $0x230] sm:$0xff]   ;;  %v3558_v36 = vld [vmem:[%s4262_s15 + $0x268] sm:$0xff]  }
  0xe2   : > { %3235 = vmatpush3.bf16.msra.mxu0 %v3512_v32  ;;  %v3551_v25 = vld [vmem:[%s4262_s15 + $0x2f8] sm:$0xff]   ;;  %v3557_v31 = vld [vmem:[%s4262_s15 + $0x2b0] sm:$0xff]   ;;  %v1270_v17 = vld [vmem:[%s4503_s0 + $0xe0] sm:$0xff] }
  0xe3   : > { %3236 = vmatprep.subr.bf16.mxu0 %v3514_v34  ;;  %v3552_v26 = vld [vmem:[%s4262_s15 + $0x238] sm:$0xff]   ;;  %v1260_v32 = vld [vmem:[%s4503_s0 + $0x90] sm:$0xff] }
  0xe4   : > { %3263 = vmatpush3.bf16.msra.mxu1 %v3513_v33  ;;  %v3553_v27 = vld [vmem:[%s4262_s15 + $0x2b8] sm:$0xff]   ;;  %v1268_v33 = vld [vmem:[%s4503_s0 + $0xd0] sm:$0xff] }
  0xe5   : > { %3264 = vmatprep.subr.bf16.mxu1 %v3515_v37  ;;  %v3060_v34 = vcombine.high %v1260_v32, %v1268_v33  ;;  %v3059_v35 = vcombine.low %v1260_v32, %v1268_v33  ;;  %v3559_v37 = vld [vmem:[%s4262_s15 + $0x2e8] sm:$0xff]   ;;  %v1261_v38 = vld [vmem:[%s4503_s0 + $0x98] sm:$0xff]  ;;  %v3587_v13 = vld [vmem:[%s4262_s15 + $0x3f0] sm:$0xff]  }
  0xe6   : > { %3237 = vmatpush3.bf16.msra.mxu0 %v3516_v40  ;;  %v1269_v39 = vld [vmem:[%s4503_s0 + $0xd8] sm:$0xff] }
  0xe7   : > { %3278 = vmatprep.subr.bf16.mxu0 %v3518_v44  ;;  %v3062_v40 = vcombine.high %v1261_v38, %v1269_v39  ;;  %v3562_v44 = vld [vmem:[%s4262_s15 + $0x260] sm:$0xff]   ;;  %v3598_v32 = vld [vmem:[%s4262_s15 + $0x358] sm:$0xff]  }
  0xe8   : > { %3265 = vmatpush3.bf16.msra.mxu1 %v3517_v41  ;;  %v3560_v41 = vld [vmem:[%s4262_s15 + $0x228] sm:$0xff]   ;;  %v3599_v33 = vld [vmem:[%s4262_s15 + $0x3d8] sm:$0xff]  }
  0xe9   : > { %2491 = vmatmul.mubr.bf16.vlgmr.msra.gmra.mxu0 %v3039_v42  ;;  %3306 = vmatprep.subr.bf16.mxu1 %v3519_v45  ;;  %v3061_v42 = vcombine.low %v1261_v38, %v1269_v39  ;;  %v3563_v45 = vld [vmem:[%s4262_s15 + $0x2e0] sm:$0xff]   ;;  %v3604_v38 = vld [vmem:[%s4262_s15 + $0x310] sm:$0xff]  }
  0xea   : > { %3279 = vmatpush3.bf16.msra.mxu0 %v3520_v47  ;;  %2498 = vmatprep.mubr.bf16.mxu0 %v3056_v46  ;;  %v3564_v46 = vld [vmem:[%s4262_s15 + $0x220] sm:$0xff]   ;;  %v3605_v39 = vld [vmem:[%s4262_s15 + $0x390] sm:$0xff]  }
  0xeb   : > { %2540 = vmatmul.mubr.bf16.vlgmr.msra.gmra.mxu1 %v3041_v43  ;;  %3280 = vmatprep.subr.bf16.mxu0 %v3522_v50  ;;  %v3561_v43 = vld [vmem:[%s4262_s15 + $0x2a8] sm:$0xff]   ;;  %v3565_v47 = vld [vmem:[%s4262_s15 + $0x2a0] sm:$0xff]   ;;  %v3568_v50 = vld [vmem:[%s4262_s15 + $0x218] sm:$0xff]  }
  0xec   : > { %3307 = vmatpush3.bf16.msra.mxu1 %v3521_v49  ;;  %2547 = vmatprep.mubr.bf16.mxu1 %v3058_v48  ;;  %v3566_v48 = vld [vmem:[%s4262_s15 + $0x258] sm:$0xff]  }
  0xed   : > { %3308 = vmatprep.subr.bf16.mxu1 %v3523_v51  ;;  %v3567_v49 = vld [vmem:[%s4262_s15 + $0x2d8] sm:$0xff]  }
  0xee   : > { %3281 = vmatpush3.bf16.msra.mxu0 %v3524_v52  ;;  %v3569_v51 = vld [vmem:[%s4262_s15 + $0x298] sm:$0xff]   ;;  %v3570_v52 = vld [vmem:[%s4262_s15 + $0x250] sm:$0xff]  }
  0xef   : > { %3282 = vmatprep.subr.bf16.mxu0 %v3526_v55  ;;  %v3573_v55 = vld [vmem:[%s4262_s15 + $0x290] sm:$0xff]  }
  0xf0   : > { %3309 = vmatpush3.bf16.msra.mxu1 %v3525_v53  ;;  %v3571_v53 = vld [vmem:[%s4262_s15 + $0x2d0] sm:$0xff]  }
  0xf1   : > { %3310 = vmatprep.subr.bf16.mxu1 %v3527_v57  ;;  %2499 = vmatmul.mubr.bf16.gmra.mxu0 %v3055_v54  ;;  %v3572_v54 = vld [vmem:[%s4262_s15 + $0x210] sm:$0xff]   ;;  %v3575_v57 = vld [vmem:[%s4262_s15 + $0x2c8] sm:$0xff]  }
  0xf2   : > { %3283 = vmatpush3.bf16.msra.mxu0 %v3528_v58  ;;  %2588 = vmatprep.mubr.bf16.mxu0 %v3044_v21  ;;  %v3576_v58 = vld [vmem:[%s4262_s15 + $0x208] sm:$0xff]  }
  0xf3   : > { %2548 = vmatmul.mubr.bf16.gmra.mxu1 %v3057_v56  ;;  %3284 = vmatprep.subr.bf16.mxu0 %v3530_v60  ;;  %v3574_v56 = vld [vmem:[%s4262_s15 + $0x248] sm:$0xff]   ;;  %v3578_v60 = vld [vmem:[%s4262_s15 + $0x240] sm:$0xff]  }
  0xf4   : > { %3311 = vmatpush3.bf16.msra.mxu1 %v3529_v59  ;;  %2637 = vmatprep.mubr.bf16.mxu1 %v3046_v23  ;;  %v3577_v59 = vld [vmem:[%s4262_s15 + $0x288] sm:$0xff]  }
  0xf5   : > { %3312 = vmatprep.subr.bf16.mxu1 %v3531_v61  ;;  %v3579_v61 = vld [vmem:[%s4262_s15 + $0x2c0] sm:$0xff]   ;;  %v3591_v21 = vld [vmem:[%s4262_s15 + $0x3e8] sm:$0xff]  }
  0xf6   : > { %3285 = vmatpush3.bf16.msra.mxu0 %v3532_v62  ;;  %v3580_v62 = vld [vmem:[%s4262_s15 + $0x200] sm:$0xff]   ;;  %v1271_v23 = vld [vmem:[%s4503_s0 + $0xe8] sm:$0xff] }
  0xf7   : > { %3286 = vmatprep.subr.bf16.mxu0 %v3534_v0  ;;  %v1246_v0 = vld [vmem:[%s4503_s0 + $0x20] sm:$0xff] }
  0xf8   : > { %3313 = vmatpush3.bf16.msra.mxu1 %v3533_v63  ;;  %v3581_v63 = vld [vmem:[%s4262_s15 + $0x280] sm:$0xff]  }
  0xf9   : > { %3314 = vmatprep.subr.bf16.mxu1 %v3535_v1  ;;  %v1254_v1 = vld [vmem:[%s4503_s0 + $0x60] sm:$0xff] }
  0xfa   : > { %3287 = vmatpush3.bf16.msra.mxu0 %v3536_v2  ;;  %v3047_v2 = vcombine.low %v1246_v0, %v1254_v1 }
  0xfb   : > { %3288 = vmatprep.subr.bf16.mxu0 %v3538_v4  ;;  %v1247_v4 = vld [vmem:[%s4503_s0 + $0x28] sm:$0xff] }
  0xfc   : > { %3315 = vmatpush3.bf16.msra.mxu1 %v3537_v3  ;;  %v3048_v3 = vcombine.high %v1246_v0, %v1254_v1 }
  0xfd   : > { %3316 = vmatprep.subr.bf16.mxu1 %v3539_v5  ;;  %v1255_v5 = vld [vmem:[%s4503_s0 + $0x68] sm:$0xff] }
  0xfe   : > { %3289 = vmatpush3.bf16.msra.mxu0 %v3540_v6  ;;  %v3049_v6 = vcombine.low %v1247_v4, %v1255_v5 }
  0xff   : > { %3290 = vmatprep.subr.bf16.mxu0 %v3542_v8  ;;  %v3582_v8 = vld [vmem:[%s4262_s15 + $0x378] sm:$0xff]  }
 0x100   : > { %3317 = vmatpush3.bf16.msra.mxu1 %v3541_v7  ;;  %v3050_v7 = vcombine.high %v1247_v4, %v1255_v5 }
 0x101   : > { %3318 = vmatprep.subr.bf16.mxu1 %v3543_v9  ;;  %v3583_v9 = vld [vmem:[%s4262_s15 + $0x3f8] sm:$0xff]  }
 0x102   : > { %3291 = vmatpush3.bf16.msra.mxu0 %v3544_v10  ;;  %v3584_v10 = vld [vmem:[%s4262_s15 + $0x338] sm:$0xff]  }
 0x103   : > { %3292 = vmatprep.subr.bf16.mxu0 %v3546_v12  ;;  %v3586_v12 = vld [vmem:[%s4262_s15 + $0x370] sm:$0xff]  }
 0x104   : > { %3319 = vmatpush3.bf16.msra.mxu1 %v3545_v11  ;;  %v3585_v11 = vld [vmem:[%s4262_s15 + $0x3b8] sm:$0xff]  }
 0x105   : > { %3320 = vmatprep.subr.bf16.mxu1 %v3547_v14  ;;  %v3588_v14 = vld [vmem:[%s4262_s15 + $0x330] sm:$0xff]  }
 0x106   : > { %3293 = vmatpush3.bf16.msra.mxu0 %v3548_v15  ;;  %v3589_v15 = vld [vmem:[%s4262_s15 + $0x3b0] sm:$0xff]  }
 0x107   : > { %3334 = vmatprep.subr.bf16.mxu0 %v3550_v24 }
 0x108   : > { %3321 = vmatpush3.bf16.msra.mxu1 %v3549_v16  ;;  %v1262_v16 = vld [vmem:[%s4503_s0 + $0xa0] sm:$0xff] }
 0x109   : > { %2589 = vmatmul.mubr.bf16.vlgmr.msra.gmra.mxu0 %v3043_v20  ;;  %3362 = vmatprep.subr.bf16.mxu1 %v3551_v25  ;;  %v3064_v18 = vcombine.high %v1262_v16, %v1270_v17  ;;  %v3063_v19 = vcombine.low %v1262_v16, %v1270_v17  ;;  %v3590_v20 = vld [vmem:[%s4262_s15 + $0x368] sm:$0xff]  }
 0x10a   : > { %3335 = vmatpush3.bf16.msra.mxu0 %v3552_v26  ;;  %2596 = vmatprep.mubr.bf16.mxu0 %v3060_v34  ;;  %v3592_v25 = vld [vmem:[%s4262_s15 + $0x328] sm:$0xff]   ;;  %v3600_v34 = vld [vmem:[%s4262_s15 + $0x318] sm:$0xff]  }
 0x10b   : > { %2638 = vmatmul.mubr.bf16.vlgmr.msra.gmra.mxu1 %v3045_v22  ;;  %3336 = vmatprep.subr.bf16.mxu0 %v3554_v28  ;;  %v1263_v22 = vld [vmem:[%s4503_s0 + $0xa8] sm:$0xff]  ;;  %v3594_v28 = vld [vmem:[%s4262_s15 + $0x360] sm:$0xff]  }
 0x10c   : > { %3363 = vmatpush3.bf16.msra.mxu1 %v3553_v27  ;;  %2645 = vmatprep.mubr.bf16.mxu1 %v3062_v40  ;;  %v3066_v24 = vcombine.high %v1263_v22, %v1271_v23  ;;  %v3065_v26 = vcombine.low %v1263_v22, %v1271_v23  ;;  %v3593_v27 = vld [vmem:[%s4262_s15 + $0x3a8] sm:$0xff]  }
 0x10d   : > { %3364 = vmatprep.subr.bf16.mxu1 %v3555_v29  ;;  %v3595_v29 = vld [vmem:[%s4262_s15 + $0x3e0] sm:$0xff]   ;;  %v3606_v40 = vld [vmem:[%s4262_s15 + $0x348] sm:$0xff]  }
 0x10e   : > { %3337 = vmatpush3.bf16.msra.mxu0 %v3556_v30  ;;  %v3596_v30 = vld [vmem:[%s4262_s15 + $0x320] sm:$0xff]  }
 0x10f   : > { %3338 = vmatprep.subr.bf16.mxu0 %v3558_v36  ;;  %v3602_v36 = vld [vmem:[%s4262_s15 + $0x350] sm:$0xff]  }
 0x110   : > { %3365 = vmatpush3.bf16.msra.mxu1 %v3557_v31  ;;  %v3597_v31 = vld [vmem:[%s4262_s15 + $0x3a0] sm:$0xff]  }
 0x111   : > { %2597 = vmatmul.mubr.bf16.gmra.mxu0 %v3059_v35  ;;  %3366 = vmatprep.subr.bf16.mxu1 %v3559_v37  ;;  %v3601_v35 = vld [vmem:[%s4262_s15 + $0x398] sm:$0xff]   ;;  %v3603_v37 = vld [vmem:[%s4262_s15 + $0x3d0] sm:$0xff]  }
 0x112   : > { %3339 = vmatpush3.bf16.msra.mxu0 %v3560_v41  ;;  %2686 = vmatprep.mubr.bf16.mxu0 %v3048_v3  ;;  %v3607_v41 = vld [vmem:[%s4262_s15 + $0x3c8] sm:$0xff]  }
 0x113   : > { %2646 = vmatmul.mubr.bf16.gmra.mxu1 %v3061_v42  ;;  %3340 = vmatprep.subr.bf16.mxu0 %v3562_v44  ;;  %v3608_v42 = vld [vmem:[%s4262_s15 + $0x308] sm:$0xff]   ;;  %v3610_v44 = vld [vmem:[%s4262_s15 + $0x340] sm:$0xff]  }
 0x114   : > { %3367 = vmatpush3.bf16.msra.mxu1 %v3561_v43  ;;  %2735 = vmatprep.mubr.bf16.mxu1 %v3050_v7  ;;  %v3609_v43 = vld [vmem:[%s4262_s15 + $0x388] sm:$0xff]  }
 0x115   : > { %3368 = vmatprep.subr.bf16.mxu1 %v3563_v45  ;;  %v3611_v45 = vld [vmem:[%s4262_s15 + $0x3c0] sm:$0xff]  }
 0x116   : > { %3341 = vmatpush3.bf16.msra.mxu0 %v3564_v46  ;;  %v3612_v46 = vld [vmem:[%s4262_s15 + $0x300] sm:$0xff]  }
 0x117   : > { %3342 = vmatprep.subr.bf16.mxu0 %v3566_v48  ;;  %v1248_v48 = vld [vmem:[%s4503_s0 + $0x30] sm:$0xff] }
 0x118   : > { %3369 = vmatpush3.bf16.msra.mxu1 %v3565_v47  ;;  %v3613_v47 = vld [vmem:[%s4262_s15 + $0x380] sm:$0xff]  }
 0x119   : > { %3370 = vmatprep.subr.bf16.mxu1 %v3567_v49  ;;  %v1256_v49 = vld [vmem:[%s4503_s0 + $0x70] sm:$0xff] }
 0x11a   : > { %3343 = vmatpush3.bf16.msra.mxu0 %v3568_v50  ;;  %v1249_v50 = vld [vmem:[%s4503_s0 + $0x38] sm:$0xff] }
 0x11b   : > { %3344 = vmatprep.subr.bf16.mxu0 %v3570_v52  ;;  %v3052_v52 = vcombine.high %v1248_v48, %v1256_v49 }
 0x11c   : > { %3371 = vmatpush3.bf16.msra.mxu1 %v3569_v51  ;;  %v3051_v51 = vcombine.low %v1248_v48, %v1256_v49 }
 0x11d   : > { %3372 = vmatprep.subr.bf16.mxu1 %v3571_v53  ;;  %v1257_v53 = vld [vmem:[%s4503_s0 + $0x78] sm:$0xff] }
 0x11e   : > { %3345 = vmatpush3.bf16.msra.mxu0 %v3572_v54  ;;  %v1264_v54 = vld [vmem:[%s4503_s0 + $0xb0] sm:$0xff] }
 0x11f   : > { %3346 = vmatprep.subr.bf16.mxu0 %v3574_v56  ;;  %v3053_v56 = vcombine.low %v1249_v50, %v1257_v53 }
 0x120   : > { %3373 = vmatpush3.bf16.msra.mxu1 %v3573_v55  ;;  %v1272_v55 = vld [vmem:[%s4503_s0 + $0xf0] sm:$0xff] }
 0x121   : > { %3374 = vmatprep.subr.bf16.mxu1 %v3575_v57  ;;  %v3054_v57 = vcombine.high %v1249_v50, %v1257_v53 }
 0x122   : > { %3347 = vmatpush3.bf16.msra.mxu0 %v3576_v58  ;;  %v3068_v58 = vcombine.high %v1264_v54, %v1272_v55 }
 0x123   : > { %3348 = vmatprep.subr.bf16.mxu0 %v3578_v60  ;;  %v1273_v60 = vld [vmem:[%s4503_s0 + $0xf8] sm:$0xff] }
 0x124   : > { %3375 = vmatpush3.bf16.msra.mxu1 %v3577_v59  ;;  %v1265_v59 = vld [vmem:[%s4503_s0 + $0xb8] sm:$0xff] }
 0x125   : > { %3376 = vmatprep.subr.bf16.mxu1 %v3579_v61  ;;  %v3070_v61 = vcombine.high %v1265_v59, %v1273_v60 }
 0x126   : > { %3349 = vmatpush3.bf16.msra.mxu0 %v3580_v62  ;;  %v3067_v62 = vcombine.low %v1264_v54, %v1272_v55 }
 0x127   : > { %3390 = vmatprep.subr.bf16.mxu0 %v3582_v8 }
 0x128   : > { %3377 = vmatpush3.bf16.msra.mxu1 %v3581_v63  ;;  %v3069_v63 = vcombine.low %v1265_v59, %v1273_v60 }
 0x129   : > { %2687 = vmatmul.mubr.bf16.vlgmr.msra.gmra.mxu0 %v3047_v2  ;;  %3418 = vmatprep.subr.bf16.mxu1 %v3583_v9 }
 0x12a   : > { %3391 = vmatpush3.bf16.msra.mxu0 %v3584_v10  ;;  %2694 = vmatprep.mubr.bf16.mxu0 %v3064_v18 }
 0x12b   : > { %2736 = vmatmul.mubr.bf16.vlgmr.msra.gmra.mxu1 %v3049_v6  ;;  %3392 = vmatprep.subr.bf16.mxu0 %v3586_v12 }
 0x12c   : > { %3419 = vmatpush3.bf16.msra.mxu1 %v3585_v11  ;;  %2743 = vmatprep.mubr.bf16.mxu1 %v3066_v24 }
 0x12d   : > { %3420 = vmatprep.subr.bf16.mxu1 %v3587_v13 }
 0x12e   : > { %3393 = vmatpush3.bf16.msra.mxu0 %v3588_v14 }
 0x12f   : > { %3394 = vmatprep.subr.bf16.mxu0 %v3590_v20 }
 0x130   : > { %3421 = vmatpush3.bf16.msra.mxu1 %v3589_v15 }
 0x131   : > { %2695 = vmatmul.mubr.bf16.gmra.mxu0 %v3063_v19  ;;  %3422 = vmatprep.subr.bf16.mxu1 %v3591_v21 }
 0x132   : > { %3395 = vmatpush3.bf16.msra.mxu0 %v3592_v25  ;;  %2784 = vmatprep.mubr.bf16.mxu0 %v3052_v52 }
 0x133   : > { %2744 = vmatmul.mubr.bf16.gmra.mxu1 %v3065_v26  ;;  %3396 = vmatprep.subr.bf16.mxu0 %v3594_v28 }
 0x134   : > { %3423 = vmatpush3.bf16.msra.mxu1 %v3593_v27  ;;  %2833 = vmatprep.mubr.bf16.mxu1 %v3054_v57 }
 0x135   : > { %3424 = vmatprep.subr.bf16.mxu1 %v3595_v29 }
 0x136   : > { %3397 = vmatpush3.bf16.msra.mxu0 %v3596_v30 }
 0x137   : > { %3398 = vmatprep.subr.bf16.mxu0 %v3598_v32 }
 0x138   : > { %3425 = vmatpush3.bf16.msra.mxu1 %v3597_v31 }
 0x139   : > { %3426 = vmatprep.subr.bf16.mxu1 %v3599_v33 }
 0x13a   : > { %3399 = vmatpush3.bf16.msra.mxu0 %v3600_v34 }
 0x13b   : > { %3400 = vmatprep.subr.bf16.mxu0 %v3602_v36 }
 0x13c   : > { %3427 = vmatpush3.bf16.msra.mxu1 %v3601_v35 }
 0x13d   : > { %3428 = vmatprep.subr.bf16.mxu1 %v3603_v37 }
 0x13e   : > { %3401 = vmatpush3.bf16.msra.mxu0 %v3604_v38 }
 0x13f   : > { %3402 = vmatprep.subr.bf16.mxu0 %v3606_v40 }
 0x140   : > { %3429 = vmatpush3.bf16.msra.mxu1 %v3605_v39 }
 0x141   : > { %3430 = vmatprep.subr.bf16.mxu1 %v3607_v41 }
 0x142   : > { %3403 = vmatpush3.bf16.msra.mxu0 %v3608_v42 }
 0x143   : > { %3404 = vmatprep.subr.bf16.mxu0 %v3610_v44 }
 0x144   : > { %3431 = vmatpush3.bf16.msra.mxu1 %v3609_v43 }
 0x145   : > { %3432 = vmatprep.subr.bf16.mxu1 %v3611_v45 }
 0x146   : > { %3405 = vmatpush3.bf16.msra.mxu0 %v3612_v46 }
 0x148   : > { %3433 = vmatpush3.bf16.msra.mxu1 %v3613_v47 }
 0x149   : > { %2785 = vmatmul.mubr.bf16.vlgmr.msra.gmra.mxu0 %v3051_v51 }
 0x14a   : > { %2792 = vmatprep.mubr.bf16.mxu0 %v3068_v58 }
 0x14b   : > { %2834 = vmatmul.mubr.bf16.vlgmr.msra.gmra.mxu1 %v3053_v56 }
 0x14c   : > { %2841 = vmatprep.mubr.bf16.mxu1 %v3070_v61 }
 0x151   : > { %2793 = vmatmul.mubr.bf16.gmra.mxu0 %v3067_v62 }
 0x153   : > { %2842 = vmatmul.mubr.bf16.gmra.mxu1 %v3069_v63 }
 0x1a9   : > { %v3238_v0 = vpop.f32.mrf.mxu0 }
 0x1ab   : > { %v3239_v1 = vpop.f32.mrf.mxu0  ;;  %v3266_v2 = vpop.f32.mrf.mxu1 }
 0x1ac   : > { %v3240_v41 = vadd.f32 %v3239_v1, %v3238_v0 }
 0x1ad   : > { %v3241_v3 = vpop.f32.mrf.mxu0  ;;  %v3267_v4 = vpop.f32.mrf.mxu1 }
 0x1ae   : > { %v3268_v42 = vadd.f32 %v3267_v4, %v3266_v2 }
 0x1af   : > { %v3242_v5 = vpop.f32.mrf.mxu0  ;;  %v3269_v6 = vpop.f32.mrf.mxu1 }
 0x1b0   : > { %v3243_v45 = vadd.f32 %v3242_v5, %v3241_v3  ;;  %v2542_v48 = vadd.f32 %v3268_v42, %v3240_v41 }
 0x1b1   : > { %v3244_v7 = vpop.f32.mrf.mxu0  ;;  %v3270_v8 = vpop.f32.mrf.mxu1 }
 0x1b2   : > { %v3271_v46 = vadd.f32 %v3270_v8, %v3269_v6 }
 0x1b3   : > { %v3245_v9 = vpop.f32.mrf.mxu0  ;;  %v3272_v10 = vpop.f32.mrf.mxu1 }
 0x1b4   : > { %v2545_v53 = vadd.f32 %v3271_v46, %v3243_v45  ;;  %v3246_v55 = vadd.f32 %v3245_v9, %v3244_v7 }
 0x1b5   : > { %v3247_v11 = vpop.f32.mrf.mxu0  ;;  %v3273_v12 = vpop.f32.mrf.mxu1 }
 0x1b6   : > { %v3274_v56 = vadd.f32 %v3273_v12, %v3272_v10 }
 0x1b7   : > { %v3248_v13 = vpop.f32.mrf.mxu0  ;;  %v3275_v14 = vpop.f32.mrf.mxu1 }
 0x1b8   : > { %v3249_v62 = vadd.f32 %v3248_v13, %v3247_v11  ;;  %v2550_v3 = vadd.f32 %v3274_v56, %v3246_v55 }
 0x1b9   : > { %v3276_v16 = vpop.f32.mrf.mxu1 }
 0x1ba   : > { %v3277_v63 = vadd.f32 %v3276_v16, %v3275_v14 }
 0x1bc   : > { %v2553_v10 = vadd.f32 %v3277_v63, %v3249_v62 }
 0x1c9   : > { %v3294_v15 = vpop.f32.mrf.mxu0 }
 0x1cb   : > { %v3295_v17 = vpop.f32.mrf.mxu0  ;;  %v3322_v18 = vpop.f32.mrf.mxu1 }
 0x1cc   : > { %v3296_v44 = vadd.f32 %v3295_v17, %v3294_v15 }
 0x1cd   : > { %v3297_v19 = vpop.f32.mrf.mxu0  ;;  %v3323_v20 = vpop.f32.mrf.mxu1 }
 0x1ce   : > { %v2591_v51 = vadd.f32 %v3296_v44, %v2542_v48  ;;  %v3324_v52 = vadd.f32 %v3323_v20, %v3322_v18 }
 0x1cf   : > { %v3298_v21 = vpop.f32.mrf.mxu0  ;;  %v3325_v22 = vpop.f32.mrf.mxu1 }
 0x1d0   : > { %v3299_v50 = vadd.f32 %v3298_v21, %v3297_v19  ;;  %v2640_v60 = vadd.f32 %v3324_v52, %v2591_v51 }
 0x1d1   : > { %v3300_v23 = vpop.f32.mrf.mxu0  ;;  %v3326_v24 = vpop.f32.mrf.mxu1 }
 0x1d2   : > { %v2594_v59 = vadd.f32 %v3299_v50, %v2545_v53  ;;  %v3327_v0 = vadd.f32 %v3326_v24, %v3325_v22 }
 0x1d3   : > { %v3328_v25 = vpop.f32.mrf.mxu1  ;;  %v3301_v26 = vpop.f32.mrf.mxu0 }
 0x1d4   : > { %v3302_v61 = vadd.f32 %v3301_v26, %v3300_v23  ;;  %v2643_v8 = vadd.f32 %v3327_v0, %v2594_v59 }
 0x1d5   : > { %v3329_v27 = vpop.f32.mrf.mxu1  ;;  %v3303_v28 = vpop.f32.mrf.mxu0 }
 0x1d6   : > { %v2599_v18 = vadd.f32 %v3302_v61, %v2550_v3  ;;  %v3330_v7 = vadd.f32 %v3329_v27, %v3328_v25 }
 0x1d7   : > { %v3331_v29 = vpop.f32.mrf.mxu1  ;;  %v3304_v30 = vpop.f32.mrf.mxu0 }
 0x1d8   : > { %v3305_v15 = vadd.f32 %v3304_v30, %v3303_v28  ;;  %v2648_v24 = vadd.f32 %v3330_v7, %v2599_v18 }
 0x1d9   : > { %v3332_v32 = vpop.f32.mrf.mxu1 }
 0x1da   : > { %v2602_v14 = vadd.f32 %v3305_v15, %v2553_v10  ;;  %v3333_v16 = vadd.f32 %v3332_v32, %v3331_v29 }
 0x1e9   : > { %v3350_v31 = vpop.f32.mrf.mxu0 }
 0x1eb   : > { %v3378_v33 = vpop.f32.mrf.mxu1  ;;  %v3351_v34 = vpop.f32.mrf.mxu0 }
 0x1ec   : > { %v3352_v57 = vadd.f32 %v3351_v34, %v3350_v31 }
 0x1ed   : > { %v3379_v35 = vpop.f32.mrf.mxu1  ;;  %v3353_v36 = vpop.f32.mrf.mxu0 }
 0x1ee   : > { %v2689_v4 = vadd.f32 %v3352_v57, %v2640_v60  ;;  %v3380_v5 = vadd.f32 %v3379_v35, %v3378_v33 }
 0x1ef   : > { %v3381_v37 = vpop.f32.mrf.mxu1  ;;  %v3354_v38 = vpop.f32.mrf.mxu0 }
 0x1f0   : > { %v3355_v1 = vadd.f32 %v3354_v38, %v3353_v36  ;;  %v2738_v20 = vadd.f32 %v3380_v5, %v2689_v4 }
 0x1f1   : > { %v3382_v39 = vpop.f32.mrf.mxu1  ;;  %v3356_v40 = vpop.f32.mrf.mxu0 }
 0x1f2   : > { %v2692_v12 = vadd.f32 %v3355_v1, %v2643_v8  ;;  %v3383_v22 = vadd.f32 %v3382_v39, %v3381_v37 }
 0x1f3   : > { %v3384_v43 = vpop.f32.mrf.mxu1  ;;  %v3357_v47 = vpop.f32.mrf.mxu0 }
 0x1f4   : > { %v3358_v21 = vadd.f32 %v3357_v47, %v3356_v40  ;;  %v2741_v28 = vadd.f32 %v3383_v22, %v2692_v12  ;;  %v2651_v40 = vadd.f32 %v3333_v16, %v2602_v14 }
 0x1f5   : > { %v3385_v49 = vpop.f32.mrf.mxu1  ;;  %v3359_v54 = vpop.f32.mrf.mxu0 }
 0x1f6   : > { %v2697_v25 = vadd.f32 %v3358_v21, %v2648_v24  ;;  %v3386_v27 = vadd.f32 %v3385_v49, %v3384_v43 }
 0x1f7   : > { %v3387_v58 = vpop.f32.mrf.mxu1  ;;  %v3360_v2 = vpop.f32.mrf.mxu0 }
 0x1f8   : > { %v3361_v30 = vadd.f32 %v3360_v2, %v3359_v54  ;;  %v2746_v45 = vadd.f32 %v3386_v27, %v2697_v25 }
 0x1f9   : > { %v3388_v6 = vpop.f32.mrf.mxu1 }
 0x1fa   : > { %v2700_v32 = vadd.f32 %v3361_v30, %v2651_v40  ;;  %v3389_v37 = vadd.f32 %v3388_v6, %v3387_v58 }
 0x1fc   : > { %v2749_v54 = vadd.f32 %v3389_v37, %v2700_v32 }
 0x209   : > { %v3406_v17 = vpop.f32.mrf.mxu0 }
 0x20b   : > { %v3434_v9 = vpop.f32.mrf.mxu1  ;;  %v3407_v19 = vpop.f32.mrf.mxu0 }
 0x20c   : > { %v3408_v11 = vadd.f32 %v3407_v19, %v3406_v17 }
 0x20d   : > { %v3435_v13 = vpop.f32.mrf.mxu1  ;;  %v3409_v23 = vpop.f32.mrf.mxu0 }
 0x20e   : > { %v2787_v26 = vadd.f32 %v3408_v11, %v2738_v20  ;;  %v3436_v31 = vadd.f32 %v3435_v13, %v3434_v9 }
 0x20f   : > { %v3437_v33 = vpop.f32.mrf.mxu1  ;;  %v3410_v34 = vpop.f32.mrf.mxu0 }
 0x210   : > { %v2836_v35 = vadd.f32 %v3436_v31, %v2787_v26  ;;  %v3411_v36 = vadd.f32 %v3410_v34, %v3409_v23 }
 0x211   : > { %v3438_v38 = vpop.f32.mrf.mxu1  ;;  %v3412_v41 = vpop.f32.mrf.mxu0 }
 0x212   : > { %v2790_v42 = vadd.f32 %v3411_v36, %v2741_v28  ;;  %v3439_v44 = vadd.f32 %v3438_v38, %v3437_v33  ;;  %v2854_v46 = vmul.f32 0.2, %v2836_v35  ;;  %vm2850_vm0 = vcmp.ge.f32.partialorder %v2836_v35, 0.0 }
 0x213   : > { %v3440_v29 = vpop.f32.mrf.mxu1  ;;  %v3413_v39 = vpop.f32.mrf.mxu0 }
 0x214   : > { %v2839_v47 = vadd.f32 %v3439_v44, %v2790_v42  ;;  %v3414_v48 = vadd.f32 %v3413_v39, %v3412_v41  ;;  %v2858_v56 = vsel %vm2850_vm0, %v2836_v35, %v2854_v46 }
 0x215   : > { %v3441_v50 = vpop.f32.mrf.mxu1  ;;  %v3415_v43 = vpop.f32.mrf.mxu0 }
 0x216   : > { %vm2851_vm1 = vcmp.ge.f32.partialorder %v2839_v47, 0.0  ;;  %v2855_v49 = vmul.f32 0.2, %v2839_v47  ;;  %v2795_v51 = vadd.f32 %v3414_v48, %v2746_v45  ;;  %v3442_v52 = vadd.f32 %v3441_v50, %v3440_v29 }
 0x217   : > { %v3443_v53 = vpop.f32.mrf.mxu1  ;;  %v3416_v55 = vpop.f32.mrf.mxu0 }
 0x218   : > { %v2859_v57 = vsel %vm2851_vm1, %v2839_v47, %v2855_v49  ;;  %v2844_v58 = vadd.f32 %v3442_v52, %v2795_v51  ;;  %v3417_v59 = vadd.f32 %v3416_v55, %v3415_v43 }
 0x219   : > { %v3444_v60 = vpop.f32.mrf.mxu1  ;;  %v3214_v61 = vpack.c.bf16 %v2859_v57, %v2858_v56 }
 0x21a   : > { %v2798_v62 = vadd.f32 %v3417_v59, %v2749_v54  ;;  %v3445_v63 = vadd.f32 %v3444_v60, %v3443_v53  ;;  %v2856_v0 = vmul.f32 0.2, %v2844_v58  ;;  %vm2852_vm2 = vcmp.ge.f32.partialorder %v2844_v58, 0.0 }
 0x21b   : > { %3215 = vst [vmem:[%s1232_s20] sm:$0xff] %v3214_v61  }
 0x21c   : > { %v2847_v1 = vadd.f32 %v3445_v63, %v2798_v62  ;;  %v2860_v3 = vsel %vm2852_vm2, %v2844_v58, %v2856_v0 }
 0x21e   : > { %vm2853_vm3 = vcmp.ge.f32.partialorder %v2847_v1, 0.0  ;;  %v2857_v2 = vmul.f32 0.2, %v2847_v1 }
 0x21f   : > { %2888 = sbr.rel (!%p3704_p6) target bundleno = 556 (0x22c), region = 73 }
 0x220   : > { %v2861_v4 = vsel %vm2853_vm3, %v2847_v1, %v2857_v2 }
 0x221   : > { %v3219_v5 = vpack.c.bf16 %v2861_v4, %v2860_v3 }
 0x222   : > { %v2910_v6 = vld [vmem:[%s1232_s20] sm:$0xf] (%p3704_p6)  ;;  %v2912_v8 = vld [vmem:[%s1232_s20 + $0x4] sm:$0xf] (%p3704_p6) }
 0x223   : > { %3221 = vst [vmem:[%s1232_s20 + $0x8] sm:$0xff] %v3219_v5   ;;  %2911 = vst [vmem:[%s2893_s22] sm:$0xf] (%p3704_p6), %v2910_v6 }
 0x224   : > { %2913 = vst [vmem:[%s2893_s22 + $0x8] sm:$0xf] %v2912_v8 }
 0x22a   : > { %v2914_v15 = vld [vmem:[%s1232_s20 + $0x8] sm:$0xf]  ;;  %v2916_v17 = vld [vmem:[%s1232_s20 + $0xc] sm:$0xf] }
 0x22b   : > { %2915 = vst [vmem:[%s2893_s22 + $0x10] sm:$0xf] %v2914_v15  ;;  %2917 = vst [vmem:[%s2893_s22 + $0x18] sm:$0xf] %v2916_v17 }
 0x22c PF: > { %s12_s13 = sadd.s32 1, %s3652_s13   ;;  %s4507_s9 = smov %s3640_s10 }
 0x22d   : > { %p9_p11 = scmp.ge.s32.totalorder %s12_s13, 4   ;;  %s4508_s10 = smov %s3709_s19 }
 0x22e   : > { %s4509_s11 = smov %s3648_s12  ;;  %s4510_s12 = smov %s4512_s14 }
 0x22f   :  { %11 = sbr.rel (!%p9_p11) target bundleno = 3 (0x3), region = 148 }

// kernel: discriminator_forward.9
= control target key start
LH: loop header
LB: loop body
LE: loop exit
PB: predicated region body
PF: predicated region fallthrough
CT: control target
= control target key end

     0   :  { %v147_v0 = vlaneseq  ;;  %vm858_vm0 = vcmask 7168   ;;  %s1563_s1 = inlined_call_operand.vmem [shape: bf16[1,8192], index: 1, kind: input, shape index: {}]   ;;  %s1564_s0 = inlined_call_operand.vmem [shape: bf16[8,8192], index: 0, kind: input, shape index: {}]   ;;  %s1565_s2 = inlined_call_operand.vmem [shape: f32[8,1], index: 2, kind: output, shape index: {}]  }
   0x1   :  { %v112_v1 = vld [vmem:[%s1563_s1 + $0x28] sm:$0xff]  ;;  %v113_v2 = vld [vmem:[%s1563_s1 + $0x30] sm:$0xff]  ;;  %v114_v4 = vld [vmem:[%s1563_s1 + $0x38] sm:$0xff] }
   0x2   :  { %v148_v3 = vshrl.u32 %v147_v0, 7  ;;  %v893_v5 = vunpack.c.l.bf16 %v112_v1  ;;  %v895_v6 = vunpack.c.h.bf16 %v112_v1  ;;  %v897_v7 = vunpack.c.l.bf16 %v113_v2  ;;  %v948_v31 = vld [vmem:[%s1564_s0] sm:$0xff]  ;;  %v953_v32 = vld [vmem:[%s1564_s0 + $0x8] sm:$0xff]  ;;  %v966_v37 = vld [vmem:[%s1564_s0 + $0x10] sm:$0xff] }
   0x3   :  { %v907_v12 = vunpack.c.h.bf16 %v113_v2  ;;  %v909_v13 = vunpack.c.l.bf16 %v114_v4  ;;  %v911_v14 = vunpack.c.h.bf16 %v114_v4  ;;  %1583 = vst [vmem:[#allocation6_spill] sm:$0xff] %v966_v37  ;;  %v971_v38 = vld [vmem:[%s1564_s0 + $0x88] sm:$0xff]  ;;  %v111_v39 = vld [vmem:[%s1563_s1 + $0x20] sm:$0xff]  ;;  %v987_v44 = vld [vmem:[%s1564_s0 + $0x90] sm:$0xff] }
   0x4   :  { %v899_v8 = vsub.s32 0, %v148_v3  ;;  %v901_v9 = vsub.s32 2, %v148_v3  ;;  %v903_v10 = vsub.s32 4, %v148_v3  ;;  %v905_v11 = vsub.s32 6, %v148_v3  ;;  %v992_v45 = vld [vmem:[%s1564_s0 + $0x98] sm:$0xff]  ;;  %v107_v53 = vld [vmem:[%s1563_s1] sm:$0xff] }
   0x5   :  { %v1004_v54 = vunpack.c.l.bf16 %v111_v39  ;;  %v1009_v55 = vld [vmem:[%s1564_s0 + $0xa0] sm:$0xff]  ;;  %v1014_v56 = vld [vmem:[%s1564_s0 + $0xa8] sm:$0xff]  ;;  %v1019_v60 = vunpack.c.h.bf16 %v111_v39  ;;  %v1024_v61 = vld [vmem:[%s1564_s0 + $0xb0] sm:$0xff]  ;;  %v1038_v3 = vunpack.c.l.bf16 %v107_v53  ;;  %v1054_v47 = vunpack.c.h.bf16 %v107_v53 }
   0x6   :  { %1579 = vst [vmem:[#allocation2_spill] sm:$0xff] %v899_v8  ;;  %1580 = vst [vmem:[#allocation3_spill] sm:$0xff] %v901_v9  ;;  %v310_v15 = vrot.slane %v893_v5, %v899_v8  ;;  %v314_v16 = vrot.slane %v893_v5, %v901_v9  ;;  %v318_v17 = vrot.slane %v893_v5, %v903_v10  ;;  %v1029_v62 = vld [vmem:[%s1564_s0 + $0xb8] sm:$0xff]  ;;  %v41_v49 = vld [vmem:[%s1564_s0 + $0xf0] sm:$0xff] }
   0x7   :  { %1581 = vst [vmem:[#allocation4_spill] sm:$0xff] %v903_v10  ;;  %1582 = vst [vmem:[#allocation5_spill] sm:$0xff] %v905_v11  ;;  %v322_v18 = vrot.slane %v893_v5, %v905_v11  ;;  %v326_v19 = vrot.slane %v895_v6, %v899_v8  ;;  %v330_v20 = vrot.slane %v895_v6, %v901_v9 }
   0x8   :  { %v334_v21 = vrot.slane %v895_v6, %v903_v10  ;;  %v338_v22 = vrot.slane %v895_v6, %v905_v11  ;;  %v342_v23 = vrot.slane %v897_v7, %v899_v8  ;;  %v346_v24 = vrot.slane %v897_v7, %v901_v9  ;;  %1584 = vst [vmem:[#allocation7_spill] sm:$0xff] %v1004_v54 }
   0x9   :  { %v350_v25 = vrot.slane %v897_v7, %v903_v10  ;;  %v354_v26 = vrot.slane %v897_v7, %v905_v11  ;;  %v358_v27 = vrot.slane %v907_v12, %v899_v8  ;;  %v362_v28 = vrot.slane %v907_v12, %v901_v9 }
   0xa   :  { %v366_v29 = vrot.slane %v907_v12, %v903_v10  ;;  %v370_v30 = vrot.slane %v907_v12, %v905_v11  ;;  %v374_v33 = vrot.slane %v909_v13, %v899_v8  ;;  %v378_v34 = vrot.slane %v909_v13, %v901_v9 }
   0xb   :  { %v382_v35 = vrot.slane %v909_v13, %v903_v10  ;;  %v386_v36 = vrot.slane %v909_v13, %v905_v11  ;;  %v390_v40 = vrot.slane %v911_v14, %v899_v8  ;;  %v394_v41 = vrot.slane %v911_v14, %v901_v9 }
   0xc   :  { %v398_v42 = vrot.slane %v911_v14, %v903_v10  ;;  %v402_v43 = vrot.slane %v911_v14, %v905_v11  ;;  %v282_v0 = vrot.slane %v1004_v54, %v901_v9  ;;  %v286_v1 = vrot.slane %v1004_v54, %v903_v10  ;;  %v40_v14 = vld [vmem:[%s1564_s0 + $0xe8] sm:$0xff] }
   0xd   :  { %v290_v2 = vrot.slane %v1004_v54, %v905_v11  ;;  %v298_v4 = vrot.slane %v1019_v60, %v901_v9  ;;  %v302_v39 = vrot.slane %v1019_v60, %v903_v10  ;;  %v306_v51 = vrot.slane %v1019_v60, %v905_v11 }
   0xe   :  { %v1057_v46 = vrot.slane %v282_v0, %v899_v8  ;;  %v1060_v50 = vrot.slane %v286_v1, %v899_v8  ;;  %v150_v58 = vrot.slane %v1038_v3, %v899_v8  ;;  %v1080_v0 = vrot.slane %v310_v15, %v899_v8 }
   0xf   :  { %v1063_v63 = vrot.slane %v290_v2, %v899_v8  ;;  %v1068_v57 = vrot.slane %v298_v4, %v899_v8  ;;  %v1071_v52 = vrot.slane %v302_v39, %v899_v8  ;;  %v1074_v53 = vrot.slane %v306_v51, %v899_v8 }
  0x10   :  { %1585 = vst [vmem:[#allocation8_spill] sm:$0xff] %v1057_v46  ;;  %v1086_v1 = vrot.slane %v314_v16, %v899_v8  ;;  %v1092_v2 = vrot.slane %v318_v17, %v899_v8  ;;  %v1098_v51 = vrot.slane %v322_v18, %v899_v8  ;;  %v1104_v15 = vrot.slane %v326_v19, %v899_v8 }
  0x11   :  { %v1110_v16 = vrot.slane %v330_v20, %v899_v8  ;;  %v1116_v17 = vrot.slane %v334_v21, %v899_v8  ;;  %v1122_v5 = vrot.slane %v338_v22, %v899_v8  ;;  %v1128_v18 = vrot.slane %v342_v23, %v899_v8  ;;  %v1151_v21 = vld [vmem:[%s1564_s0 + $0xc0] sm:$0xff] }
  0x12   :  { %v1134_v19 = vrot.slane %v346_v24, %v899_v8  ;;  %v1140_v20 = vrot.slane %v350_v25, %v899_v8  ;;  %v1146_v6 = vrot.slane %v354_v26, %v899_v8  ;;  %v1157_v22 = vrot.slane %v358_v27, %v899_v8  ;;  %v1180_v25 = vld [vmem:[%s1564_s0 + $0xc8] sm:$0xff] }
  0x13   :  { %v1163_v23 = vrot.slane %v362_v28, %v899_v8  ;;  %v1169_v7 = vrot.slane %v366_v29, %v899_v8  ;;  %v1175_v24 = vrot.slane %v370_v30, %v899_v8  ;;  %v1186_v26 = vrot.slane %v374_v33, %v899_v8  ;;  %v1209_v29 = vld [vmem:[%s1564_s0 + $0xd0] sm:$0xff]  ;;  %v1214_v30 = vld [vmem:[%s1564_s0 + $0xd8] sm:$0xff] }
  0x14   :  { %1586 = vst [vmem:[#allocation9_spill] sm:$0xff] %v1157_v22  ;;  %v1192_v27 = vrot.slane %v378_v34, %v899_v8  ;;  %v1198_v12 = vrot.slane %v382_v35, %v899_v8  ;;  %v1204_v28 = vrot.slane %v386_v36, %v899_v8  ;;  %v1220_v33 = vrot.slane %v390_v40, %v899_v8  ;;  %v1243_v36 = vld [vmem:[%s1564_s0 + $0xe0] sm:$0xff] }
  0x15   :  { %1587 = vst [vmem:[#allocation10_spill] sm:$0xff] %v1163_v23  ;;  %1588 = vst [vmem:[#allocation11_spill] sm:$0xff] %v1169_v7  ;;  %v1226_v13 = vrot.slane %v394_v41, %v899_v8  ;;  %v1232_v34 = vrot.slane %v398_v42, %v899_v8  ;;  %v1238_v35 = vrot.slane %v402_v43, %v899_v8  ;;  %v90_v40 = vunpack.c.h.bf16 %v1029_v62 }
  0x16   :  { %1589 = vst [vmem:[#allocation12_spill] sm:$0xff] %v1175_v24  ;;  %1590 = vst [vmem:[#allocation13_spill] sm:$0xff] %v1186_v26  ;;  %v91_v41 = vunpack.c.l.bf16 %v1151_v21  ;;  %v154_v4 = vrot.slane %v1038_v3, %v901_v9  ;;  %v158_v42 = vrot.slane %v1038_v3, %v903_v10  ;;  %v92_v43 = vunpack.c.h.bf16 %v1151_v21  ;;  %v42_v21 = vld [vmem:[%s1564_s0 + $0xf8] sm:$0xff] }
  0x17   :  { %1591 = vst [vmem:[#allocation14_spill] sm:$0xff] %v1192_v27  ;;  %1592 = vst [vmem:[#allocation15_spill] sm:$0xff] %v1198_v12  ;;  %v93_v39 = vunpack.c.l.bf16 %v1180_v25  ;;  %v94_v48 = vunpack.c.h.bf16 %v1180_v25  ;;  %v294_v59 = vrot.slane %v1019_v60, %v899_v8  ;;  %v95_v46 = vunpack.c.l.bf16 %v1209_v29  ;;  %v1273_v60 = vld [vmem:[%s1563_s1 + $0x8] sm:$0xff] }
  0x18   :  { %1593 = vst [vmem:[#allocation16_spill] sm:$0xff] %v1204_v28  ;;  %1594 = vst [vmem:[#allocation17_spill] sm:$0xff] %v1220_v33  ;;  %v96_v54 = vunpack.c.h.bf16 %v1209_v29  ;;  %v97_v37 = vunpack.c.l.bf16 %v1214_v30  ;;  %v99_v25 = vunpack.c.l.bf16 %v1243_v36  ;;  %v166_v29 = vrot.slane %v1054_v47, %v899_v8 }
  0x19   :  { %1595 = vst [vmem:[#allocation18_spill] sm:$0xff] %v1226_v13  ;;  %1596 = vst [vmem:[#allocation19_spill] sm:$0xff] %v1232_v34  ;;  %v162_v34 = vrot.slane %v1038_v3, %v905_v11  ;;  %v470_v13 = vrot.slane %v150_v58, %v899_v8  ;;  %v101_v33 = vunpack.c.l.bf16 %v40_v14  ;;  %v474_v28 = vrot.slane %v154_v4, %v899_v8 }
  0x1a   :  { %1597 = vst [vmem:[#allocation20_spill] sm:$0xff] %v1238_v35  ;;  %v98_v35 = vunpack.c.h.bf16 %v1214_v30  ;;  %1598 = vst [vmem:[#allocation21_spill] sm:$0xff] %v1273_v60  ;;  %v100_v30 = vunpack.c.h.bf16 %v1243_v36  ;;  %v478_v12 = vrot.slane %v158_v42, %v899_v8  ;;  %v102_v27 = vunpack.c.h.bf16 %v40_v14 }
  0x1b   :  { %v103_v26 = vunpack.c.l.bf16 %v41_v49  ;;  %v104_v24 = vunpack.c.h.bf16 %v41_v49  ;;  %v614_v7 = vrot.slane %v294_v59, %v899_v8  ;;  %v105_v23 = vunpack.c.l.bf16 %v42_v21 }
  0x1c   :  { %v106_v22 = vunpack.c.h.bf16 %v42_v21  ;;  %v1285_v3 = vunpack.c.l.bf16 %v1273_v60  ;;  %v170_v58 = vrot.slane %v1054_v47, %v901_v9  ;;  %v174_v36 = vrot.slane %v1054_v47, %v903_v10 }
  0x1d   :  { %v482_v4 = vrot.slane %v162_v34, %v899_v8  ;;  %v486_v42 = vrot.slane %v166_v29, %v899_v8  ;;  %v1600_v14 = vunpack.c.l.bf16 %v948_v31  ;;  %v1601_v59 = vunpack.c.h.bf16 %v948_v31 }
  0x1e   :  { %1599 = vst [vmem:[#allocation22_spill] sm:$0xff] %v1285_v3  ;;  %v1602_v21 = vunpack.c.l.bf16 %v953_v32  ;;  %v1603_v3 = vunpack.c.l.bf16 %v971_v38  ;;  %v1604_v10 = vunpack.c.h.bf16 %v971_v38  ;;  %v1605_v29 = vunpack.c.l.bf16 %v987_v44 }
  0x1f   :  { %v723_v49 = vmul.f32 %v470_v13, %v1600_v14  ;;  %v724_v11 = vmul.f32 %v474_v28, %v1601_v59  ;;  %v1606_v31 = vunpack.c.h.bf16 %v987_v44  ;;  %v1610_v44 = vunpack.c.h.bf16 %v1009_v55 }
  0x20   :  { %v725_v60 = vmul.f32 %v478_v12, %v1602_v21  ;;  %v1302_v9 = vmul.f32 %v1060_v50, %v1603_v3  ;;  %v1307_v34 = vmul.f32 %v1063_v63, %v1604_v10  ;;  %v1311_v8 = vmul.f32 %v614_v7, %v1605_v29 }
  0x21   :  { %v1316_v28 = vmul.f32 %v1068_v57, %v1606_v31  ;;  %v1607_v12 = vunpack.c.l.bf16 %v992_v45  ;;  %v1608_v50 = vunpack.c.h.bf16 %v992_v45  ;;  %v1609_v10 = vunpack.c.l.bf16 %v1009_v55 }
  0x22   :  { %v1336_v57 = vmul.f32 %v1086_v1, %v1610_v44  ;;  %v1611_v7 = vunpack.c.l.bf16 %v1014_v56  ;;  %v1612_v45 = vunpack.c.h.bf16 %v1014_v56  ;;  %v1613_v3 = vunpack.c.l.bf16 %v1024_v61 }
  0x23   :  { %v1321_v13 = vmul.f32 %v1071_v52, %v1607_v12  ;;  %v1326_v38 = vmul.f32 %v1074_v53, %v1608_v50  ;;  %v1331_v63 = vmul.f32 %v1080_v0, %v1609_v10  ;;  %v1614_v55 = vunpack.c.h.bf16 %v1024_v61  ;;  %v1626_v50 = vld [vmem:[#allocation19_spill] sm:$0xff] }
  0x24   :  { %v1341_v52 = vmul.f32 %v1092_v2, %v1611_v7  ;;  %v1346_v53 = vmul.f32 %v1098_v51, %v1612_v45  ;;  %v1351_v0 = vmul.f32 %v1104_v15, %v1613_v3  ;;  %v1615_v14 = vunpack.c.l.bf16 %v1029_v62 }
  0x25   :  { %v1356_v1 = vmul.f32 %v1110_v16, %v1614_v55  ;;  %v1364_v56 = vmul.f32 %v1122_v5, %v90_v40  ;;  %v1367_v51 = vmul.f32 %v1128_v18, %v91_v41  ;;  %v1370_v59 = vmul.f32 %v1134_v19, %v92_v43  ;;  %v1616_v16 = vld [vmem:[#allocation9_spill] sm:$0xff]  ;;  %v1618_v5 = vld [vmem:[#allocation11_spill] sm:$0xff]  ;;  %v1619_v18 = vld [vmem:[#allocation12_spill] sm:$0xff] }
  0x26   :  { %v1361_v2 = vmul.f32 %v1116_v17, %v1615_v14  ;;  %v1373_v15 = vmul.f32 %v1140_v20, %v93_v39  ;;  %v1376_v61 = vmul.f32 %v1146_v6, %v94_v48  ;;  %v1379_v62 = vmul.f32 %v1616_v16, %v95_v46  ;;  %v1617_v17 = vld [vmem:[#allocation10_spill] sm:$0xff]  ;;  %v14_v19 = vld [vmem:[%s1564_s0 + $0x18] sm:$0xff]  ;;  %v1622_v46 = vld [vmem:[#allocation15_spill] sm:$0xff] }
  0x27   :  { %v1382_v21 = vmul.f32 %v1617_v17, %v96_v54  ;;  %v1385_v40 = vmul.f32 %v1618_v5, %v97_v37  ;;  %v1388_v41 = vmul.f32 %v1619_v18, %v98_v35  ;;  %v1620_v20 = vld [vmem:[#allocation13_spill] sm:$0xff]  ;;  %v1621_v48 = vld [vmem:[#allocation14_spill] sm:$0xff]  ;;  %v1400_v39 = vmul.f32 %v1622_v46, %v101_v33  ;;  %v1623_v54 = vld [vmem:[#allocation16_spill] sm:$0xff] }
  0x28   :  { %v1394_v43 = vmul.f32 %v1620_v20, %v99_v25  ;;  %v1397_v6 = vmul.f32 %v1621_v48, %v100_v30  ;;  %v1403_v29 = vmul.f32 %v1623_v54, %v102_v27  ;;  %v1624_v37 = vld [vmem:[#allocation17_spill] sm:$0xff]  ;;  %v1625_v35 = vld [vmem:[#allocation18_spill] sm:$0xff]  ;;  %v1412_v10 = vmul.f32 %v1626_v50, %v105_v23  ;;  %v1627_v25 = vld [vmem:[#allocation20_spill] sm:$0xff] }
  0x29   :  { %v1406_v31 = vmul.f32 %v1624_v37, %v103_v26  ;;  %v1409_v12 = vmul.f32 %v1625_v35, %v104_v24  ;;  %v1415_v44 = vmul.f32 %v1627_v25, %v106_v22  ;;  %v1628_v30 = vld [vmem:[#allocation5_spill] sm:$0xff]  ;;  %v1629_v33 = vld [vmem:[#allocation2_spill] sm:$0xff]  ;;  %v1630_v27 = vunpack.c.h.bf16 %v953_v32  ;;  %v1637_v37 = vld [vmem:[#allocation4_spill] sm:$0xff] }
  0x2a   :  { %v178_v7 = vrot.slane %v1054_v47, %v1628_v30  ;;  %v490_v45 = vrot.slane %v170_v58, %v1629_v33  ;;  %v787_v55 = vadd.f32 %v724_v11, %v723_v49  ;;  %v49_v26 = vunpack.c.l.bf16 %v14_v19  ;;  %v15_v24 = vld [vmem:[%s1564_s0 + $0x20] sm:$0xff]  ;;  %v1634_v58 = vld [vmem:[#allocation3_spill] sm:$0xff]  ;;  %v1636_v46 = vld [vmem:[#allocation21_spill] sm:$0xff] }
  0x2b   :  { %v726_v3 = vmul.f32 %v482_v4, %v1630_v27  ;;  %v1631_v23 = vld [vmem:[#allocation22_spill] sm:$0xff]  ;;  %v494_v22 = vrot.slane %v174_v36, %v1629_v33  ;;  %v50_v18 = vunpack.c.h.bf16 %v14_v19  ;;  %v51_v48 = vunpack.c.l.bf16 %v15_v24  ;;  %v16_v36 = vld [vmem:[%s1564_s0 + $0x28] sm:$0xff] }
  0x2c   :  { %v182_v14 = vrot.slane %v1631_v23, %v1629_v33  ;;  %v1632_v16 = vld [vmem:[#allocation6_spill] sm:$0xff]  ;;  %v788_v47 = vadd.f32 %v787_v55, %v725_v60  ;;  %v186_v32 = vrot.slane %v1631_v23, %v1634_v58  ;;  %v498_v11 = vrot.slane %v178_v7, %v1629_v33  ;;  %v17_v55 = vld [vmem:[%s1564_s0 + $0x30] sm:$0xff] }
  0x2d   :  { %v1633_v17 = vunpack.c.l.bf16 %v1632_v16  ;;  %v1635_v4 = vunpack.c.h.bf16 %v1632_v16  ;;  %v118_v54 = vunpack.c.h.bf16 %v1636_v46  ;;  %v190_v60 = vrot.slane %v1631_v23, %v1637_v37  ;;  %v109_v16 = vld [vmem:[%s1563_s1 + $0x10] sm:$0xff] }
  0x2e   :  { %v789_v20 = vadd.f32 %v788_v47, %v726_v3  ;;  %v729_v19 = vmul.f32 %v494_v22, %v49_v26  ;;  %v52_v50 = vunpack.c.h.bf16 %v15_v24  ;;  %v194_v25 = vrot.slane %v1631_v23, %v1628_v30 }
  0x2f   :  { %v727_v5 = vmul.f32 %v486_v42, %v1633_v17  ;;  %v728_v49 = vmul.f32 %v490_v45, %v1635_v4  ;;  %v502_v42 = vrot.slane %v182_v14, %v1629_v33  ;;  %v506_v7 = vrot.slane %v186_v32, %v1629_v33  ;;  %v18_v4 = vld [vmem:[%s1564_s0 + $0x38] sm:$0xff] }
  0x30   :  { %v730_v45 = vmul.f32 %v498_v11, %v50_v18  ;;  %v53_v3 = vunpack.c.l.bf16 %v16_v36  ;;  %v198_v26 = vrot.slane %v118_v54, %v1629_v33  ;;  %v510_v24 = vrot.slane %v190_v60, %v1629_v33 }
  0x31   :  { %v790_v35 = vadd.f32 %v789_v20, %v727_v5  ;;  %v731_v14 = vmul.f32 %v502_v42, %v51_v48  ;;  %v54_v23 = vunpack.c.h.bf16 %v16_v36  ;;  %v202_v17 = vrot.slane %v118_v54, %v1634_v58 }
  0x32   :  { %v514_v5 = vrot.slane %v194_v25, %v1629_v33  ;;  %v732_v47 = vmul.f32 %v506_v7, %v52_v50  ;;  %v55_v32 = vunpack.c.l.bf16 %v17_v55  ;;  %v119_v11 = vunpack.c.l.bf16 %v109_v16  ;;  %v19_v25 = vld [vmem:[%s1564_s0 + $0x40] sm:$0xff] }
  0x33   :  { %v791_v27 = vadd.f32 %v790_v35, %v728_v49  ;;  %v206_v49 = vrot.slane %v118_v54, %v1637_v37  ;;  %v518_v20 = vrot.slane %v198_v26, %v1629_v33  ;;  %v733_v46 = vmul.f32 %v510_v24, %v53_v3 }
  0x34   :  { %v56_v60 = vunpack.c.h.bf16 %v17_v55  ;;  %v210_v36 = vrot.slane %v118_v54, %v1628_v30  ;;  %v522_v42 = vrot.slane %v202_v17, %v1629_v33  ;;  %v57_v50 = vunpack.c.l.bf16 %v18_v4  ;;  %v20_v17 = vld [vmem:[%s1564_s0 + $0x48] sm:$0xff] }
  0x35   :  { %v792_v22 = vadd.f32 %v791_v27, %v729_v19  ;;  %v734_v19 = vmul.f32 %v514_v5, %v54_v23  ;;  %v214_v7 = vrot.slane %v119_v11, %v1629_v33  ;;  %v735_v27 = vmul.f32 %v518_v20, %v55_v32 }
  0x36   :  { %v58_v3 = vunpack.c.h.bf16 %v18_v4  ;;  %v218_v55 = vrot.slane %v119_v11, %v1634_v58  ;;  %v530_v54 = vrot.slane %v210_v36, %v1629_v33  ;;  %v736_v24 = vmul.f32 %v522_v42, %v56_v60  ;;  %v110_v36 = vld [vmem:[%s1563_s1 + $0x18] sm:$0xff] }
  0x37   :  { %v793_v18 = vadd.f32 %v792_v22, %v730_v45  ;;  %v526_v45 = vrot.slane %v206_v49, %v1629_v33  ;;  %v59_v22 = vunpack.c.l.bf16 %v19_v25  ;;  %v120_v23 = vunpack.c.h.bf16 %v109_v16  ;;  %v21_v16 = vld [vmem:[%s1564_s0 + $0x50] sm:$0xff] }
  0x38   :  { %v222_v5 = vrot.slane %v119_v11, %v1637_v37  ;;  %v60_v49 = vunpack.c.h.bf16 %v19_v25  ;;  %v226_v4 = vrot.slane %v119_v11, %v1628_v30  ;;  %v538_v20 = vrot.slane %v218_v55, %v1629_v33  ;;  %v22_v55 = vld [vmem:[%s1564_s0 + $0x58] sm:$0xff] }
  0x39   :  { %v794_v48 = vadd.f32 %v793_v18, %v731_v14  ;;  %v737_v18 = vmul.f32 %v526_v45, %v57_v50  ;;  %v61_v60 = vunpack.c.l.bf16 %v20_v17  ;;  %v230_v42 = vrot.slane %v120_v23, %v1629_v33 }
  0x3a   :  { %v62_v11 = vunpack.c.h.bf16 %v20_v17  ;;  %v234_v25 = vrot.slane %v120_v23, %v1634_v58  ;;  %v740_v45 = vmul.f32 %v538_v20, %v60_v49  ;;  %v242_v17 = vrot.slane %v120_v23, %v1628_v30 }
  0x3b   :  { %v795_v35 = vadd.f32 %v794_v48, %v732_v47  ;;  %v534_v47 = vrot.slane %v214_v7, %v1629_v33  ;;  %v546_v7 = vrot.slane %v226_v4, %v1629_v33  ;;  %v65_v49 = vunpack.c.l.bf16 %v22_v55  ;;  %v23_v4 = vld [vmem:[%s1564_s0 + $0x60] sm:$0xff] }
  0x3d   :  { %v796_v26 = vadd.f32 %v795_v35, %v733_v46  ;;  %v738_v46 = vmul.f32 %v530_v54, %v58_v3  ;;  %v739_v35 = vmul.f32 %v534_v47, %v59_v22  ;;  %v121_v3 = vunpack.c.l.bf16 %v110_v36 }
  0x3e   :  { %v238_v54 = vrot.slane %v120_v23, %v1637_v37  ;;  %v554_v47 = vrot.slane %v234_v25, %v1629_v33  ;;  %v562_v23 = vrot.slane %v242_v17, %v1629_v33  ;;  %v24_v25 = vld [vmem:[%s1564_s0 + $0x68] sm:$0xff] }
  0x3f   :  { %v797_v14 = vadd.f32 %v796_v26, %v734_v19  ;;  %v542_v19 = vrot.slane %v222_v5, %v1629_v33  ;;  %v63_v26 = vunpack.c.l.bf16 %v21_v16  ;;  %v64_v5 = vunpack.c.h.bf16 %v21_v16 }
  0x40   :  { %v246_v20 = vrot.slane %v121_v3, %v1629_v33  ;;  %v250_v16 = vrot.slane %v121_v3, %v1634_v58 }
  0x41   :  { %v798_v32 = vadd.f32 %v797_v14, %v735_v27  ;;  %v741_v14 = vmul.f32 %v542_v19, %v61_v60  ;;  %v66_v60 = vunpack.c.h.bf16 %v22_v55  ;;  %v744_v19 = vmul.f32 %v554_v47, %v64_v5 }
  0x42   :  { %v258_v55 = vrot.slane %v121_v3, %v1628_v30  ;;  %v69_v5 = vunpack.c.l.bf16 %v24_v25 }
  0x43   :  { %v799_v48 = vadd.f32 %v798_v32, %v736_v24  ;;  %v550_v24 = vrot.slane %v230_v42, %v1629_v33 }
  0x45   :  { %v800_v50 = vadd.f32 %v799_v48, %v737_v18  ;;  %v742_v18 = vmul.f32 %v546_v7, %v62_v11  ;;  %v743_v48 = vmul.f32 %v550_v24, %v63_v26  ;;  %v122_v11 = vunpack.c.h.bf16 %v110_v36  ;;  %v25_v36 = vld [vmem:[%s1564_s0 + $0x70] sm:$0xff] }
  0x46   :  { %v254_v7 = vrot.slane %v121_v3, %v1637_v37  ;;  %v570_v24 = vrot.slane %v250_v16, %v1629_v33  ;;  %v578_v3 = vrot.slane %v258_v55, %v1629_v33 }
  0x47   :  { %v801_v27 = vadd.f32 %v800_v50, %v738_v46  ;;  %v558_v46 = vrot.slane %v238_v54, %v1629_v33  ;;  %v67_v50 = vunpack.c.l.bf16 %v23_v4  ;;  %v68_v54 = vunpack.c.h.bf16 %v23_v4 }
  0x48   :  { %v262_v17 = vrot.slane %v122_v11, %v1629_v33  ;;  %v574_v47 = vrot.slane %v254_v7, %v1629_v33  ;;  %v266_v4 = vrot.slane %v122_v11, %v1634_v58 }
  0x49   :  { %v802_v22 = vadd.f32 %v801_v27, %v739_v35  ;;  %v745_v27 = vmul.f32 %v558_v46, %v65_v49  ;;  %v70_v49 = vunpack.c.h.bf16 %v24_v25 }
  0x4a   :  { %v582_v16 = vrot.slane %v262_v17, %v1629_v33  ;;  %v586_v58 = vrot.slane %v266_v4, %v1629_v33 }
  0x4b   :  { %v803_v32 = vadd.f32 %v802_v22, %v740_v45  ;;  %v566_v45 = vrot.slane %v246_v20, %v1629_v33  ;;  %v748_v20 = vmul.f32 %v570_v24, %v68_v54  ;;  %v750_v25 = vmul.f32 %v578_v3, %v70_v49 }
  0x4d   :  { %v804_v42 = vadd.f32 %v803_v32, %v741_v14  ;;  %v746_v14 = vmul.f32 %v562_v23, %v66_v60  ;;  %v270_v60 = vrot.slane %v122_v11, %v1637_v37  ;;  %v749_v23 = vmul.f32 %v574_v47, %v69_v5  ;;  %v27_v37 = vld [vmem:[%s1564_s0 + $0x80] sm:$0xff] }
  0x4e   :  { %v75_v5 = vunpack.c.l.bf16 %v27_v37 }
  0x4f   :  { %v805_v35 = vadd.f32 %v804_v42, %v742_v18  ;;  %v747_v18 = vmul.f32 %v566_v45, %v67_v50  ;;  %v26_v42 = vld [vmem:[%s1564_s0 + $0x78] sm:$0xff]  ;;  %v274_v50 = vrot.slane %v122_v11, %v1628_v30  ;;  %v590_v54 = vrot.slane %v270_v60, %v1629_v33 }
  0x50   :  { %v73_v45 = vunpack.c.l.bf16 %v26_v42 }
  0x51   :  { %v806_v26 = vadd.f32 %v805_v35, %v743_v48  ;;  %v71_v48 = vunpack.c.l.bf16 %v25_v36  ;;  %v72_v35 = vunpack.c.h.bf16 %v25_v36 }
  0x52   :  { %v753_v17 = vmul.f32 %v590_v54, %v73_v45 }
  0x53   :  { %v807_v22 = vadd.f32 %v806_v26, %v744_v19  ;;  %v751_v55 = vmul.f32 %v582_v16, %v71_v48  ;;  %v752_v30 = vmul.f32 %v586_v58, %v72_v35 }
  0x55   :  { %v808_v32 = vadd.f32 %v807_v22, %v745_v27  ;;  %v1638_v27 = vld [vmem:[#allocation7_spill] sm:$0xff]  ;;  %v594_v22 = vrot.slane %v274_v50, %v1629_v33 }
  0x56   :  { %v278_v26 = vrot.slane %v1638_v27, %v1629_v33 }
  0x57   :  { %v809_v46 = vadd.f32 %v808_v32, %v746_v14  ;;  %v74_v14 = vunpack.c.h.bf16 %v26_v42 }
  0x58   :  { %v598_v36 = vrot.slane %v278_v26, %v1629_v33 }
  0x59   :  { %v810_v19 = vadd.f32 %v809_v46, %v747_v18  ;;  %v76_v18 = vunpack.c.h.bf16 %v27_v37  ;;  %v754_v32 = vmul.f32 %v594_v22, %v74_v14 }
  0x5a   :  { %v755_v4 = vmul.f32 %v598_v36, %v75_v5 }
  0x5b   :  { %v811_v7 = vadd.f32 %v810_v19, %v748_v20  ;;  %v1639_v20 = vld [vmem:[#allocation8_spill] sm:$0xff] }
  0x5c   :  { %v756_v46 = vmul.f32 %v1639_v20, %v76_v18 }
  0x5d   :  { %v812_v24 = vadd.f32 %v811_v7, %v749_v23 }
  0x5f   :  { %v813_v11 = vadd.f32 %v812_v24, %v750_v25 }
  0x61   :  { %v814_v47 = vadd.f32 %v813_v11, %v751_v55 }
  0x63   :  { %v815_v49 = vadd.f32 %v814_v47, %v752_v30 }
  0x65   :  { %v816_v3 = vadd.f32 %v815_v49, %v753_v17 }
  0x67   :  { %v817_v48 = vadd.f32 %v816_v3, %v754_v32 }
  0x69   :  { %v818_v60 = vadd.f32 %v817_v48, %v755_v4 }
  0x6b   :  { %v819_v16 = vadd.f32 %v818_v60, %v756_v46 }
  0x6d   :  { %v820_v42 = vadd.f32 %v819_v16, %v1302_v9 }
  0x6f   :  { %v821_v23 = vadd.f32 %v820_v42, %v1307_v34 }
  0x71   :  { %v822_v19 = vadd.f32 %v821_v23, %v1311_v8 }
  0x73   :  { %v823_v33 = vadd.f32 %v822_v19, %v1316_v28 }
  0x75   :  { %v824_v35 = vadd.f32 %v823_v33, %v1321_v13 }
  0x77   :  { %v825_v50 = vadd.f32 %v824_v35, %v1326_v38 }
  0x79   :  { %v826_v58 = vadd.f32 %v825_v50, %v1331_v63 }
  0x7b   :  { %v827_v25 = vadd.f32 %v826_v58, %v1336_v57 }
  0x7d   :  { %v828_v7 = vadd.f32 %v827_v25, %v1341_v52 }
  0x7f   :  { %v829_v45 = vadd.f32 %v828_v7, %v1346_v53 }
  0x81   :  { %v830_v9 = vadd.f32 %v829_v45, %v1351_v0 }
  0x83   :  { %v831_v34 = vadd.f32 %v830_v9, %v1356_v1 }
  0x85   :  { %v832_v8 = vadd.f32 %v831_v34, %v1361_v2 }
  0x87   :  { %v833_v28 = vadd.f32 %v832_v8, %v1364_v56 }
  0x89   :  { %v834_v13 = vadd.f32 %v833_v28, %v1367_v51 }
  0x8b   :  { %v835_v38 = vadd.f32 %v834_v13, %v1370_v59 }
  0x8d   :  { %v836_v63 = vadd.f32 %v835_v38, %v1373_v15 }
  0x8f   :  { %v837_v57 = vadd.f32 %v836_v63, %v1376_v61 }
  0x91   :  { %v838_v52 = vadd.f32 %v837_v57, %v1379_v62 }
  0x93   :  { %v839_v53 = vadd.f32 %v838_v52, %v1382_v21 }
  0x95   :  { %v840_v0 = vadd.f32 %v839_v53, %v1385_v40 }
  0x97   :  { %v841_v1 = vadd.f32 %v840_v0, %v1388_v41 }
  0x99   :  { %v842_v2 = vadd.f32 %v841_v1, %v1394_v43 }
  0x9b   :  { %v843_v56 = vadd.f32 %v842_v2, %v1397_v6 }
  0x9d   :  { %v844_v51 = vadd.f32 %v843_v56, %v1400_v39 }
  0x9f   :  { %v845_v59 = vadd.f32 %v844_v51, %v1403_v29 }
  0xa1   :  { %v846_v15 = vadd.f32 %v845_v59, %v1406_v31 }
  0xa3   :  { %v847_v61 = vadd.f32 %v846_v15, %v1409_v12 }
  0xa5   :  { %v848_v62 = vadd.f32 %v847_v61, %v1412_v10 }
  0xa7   :  { %v849_v21 = vadd.f32 %v848_v62, %v1415_v44 }
  0xa9   :  { %850 = vadd.xlane.f32.xlu0 %v849_v21 }
 0x132   :  { %v851_v40 = vpop.xlane.xlu0 %850 }
 0x133   :  { %v864_v27 = vmul.f32 -1.442695, %v851_v40 }
 0x135   :  { %865 = vpow2.f32 %v864_v27 }
 0x142   :  { %v866_v41 = vpop.eup %865 }
 0x143   :  { %v855_v43 = vadd.f32 1.0, %v866_v41 }
 0x145   :  { %867 = vrcp.f32 %v855_v43 }
 0x152   :  { %v868_v6 = vpop.eup %867 }
 0x153   :  { %859 = vst.msk [vmem:[%s1565_s2] sm:$0xff] %vm858_vm0, %v868_v6 }

// kernel: discriminator_forward.8
= control target key start
LH: loop header
LB: loop body
LE: loop exit
PB: predicated region body
PF: predicated region fallthrough
CT: control target
= control target key end

     0   :  { %s8831_s9 = smov 0   ;;  %s8833_s10 = smov 0   ;;  %s10370_s0 = inlined_call_operand.vmem [shape: bf16[18,4096], index: 0, kind: input, shape index: {}]   ;;  %s10371_s1 = inlined_call_operand.vmem [shape: bf16[4096,512], index: 1, kind: input, shape index: {}]   ;;  %s10372_s2 = inlined_call_operand.vmem [shape: bf16[18,512], index: 2, kind: output, shape index: {}]  }
   0x1   :  { %s8835_s11 = smov 0   ;;  %s8837_s12 = smov 0  }
   0x2   :  { %s8839_s13 = smov 0  }
   0x3 LB: > { %s21_s14 = sadd.s32 1, %s8810_s12  ;;  %s7656_s15 = sadd.s32 4294967295, %s8814_s13   ;;  %s8814_s13 = sphi %s8839_s13, %s12_s13   ;;  %s8810_s12 = sphi %s8837_s12, %s10377_s12   ;;  %s8806_s11 = sphi %s8835_s11, %s10376_s11   ;;  %s8802_s10 = sphi %s8833_s10, %s10375_s10   ;;  %s8798_s9 = sphi %s8831_s9, %s10374_s9  }
   0x4   : > { %p22_p0 = scmp.ge.s32.totalorder %s21_s14, 4  ;;  %p64_p1 = scmp.ne.s32.totalorder %s8802_s10, %s8798_s9 }
   0x5   : > { %p65_p2 = scmp.eq.s32.totalorder %s8814_s13, 0  ;;  %p96_p4 = scmp.eq.s32.totalorder %s7656_s15, 3 }
   0x6   : > { %s10379_s14 = smov (%p22_p0, %s21_s14), 0  ;;  %s57_s17 = sadd.s32 1, %s8802_s10 }
   0x7   : > { %p66_p3 = por %p65_p2, %p64_p1  ;;  %s54_s16 = ssub.s32 %s8810_s12, %s10379_s14 }
   0x8   : > { %p55_p5 = scmp.eq.s32.totalorder %s54_s16, 0  ;;  %p8866_p6 = por %p96_p4, %p64_p1 }
   0x9   : > { %p7660_p7 = scmp.ge.s32.totalorder %s8814_s13, 4 }
   0xa   : > { %s8871_s19 = scalar_select %p55_p5, %s8802_s10, %s57_s17  }
   0xb   : > { %128 = sbr.rel (%p7660_p7) target bundleno = 361 (0x169), region = 20 }
  0x10   : > { %131 = sbr.rel (!%p66_p3) target bundleno = 361 (0x169), region = 24  ;;  %s133_s20 = sand.u32 (%p66_p3), 1, %s8802_s10  }
  0x11   : > { %s7662_s21 = sshll.u32 (%p66_p3), %s8810_s12, 2  ;;  %s7661_s22 = sshll.u32 (%p66_p3), %s133_s20, 11 }
  0x12   : > { %s8879_s25 = scalar_lea.vmem (%p66_p3), %s10371_s1, %s7662_s21  ;;  %s8883_s26 = scalar_lea.vmem (%p66_p3), [#allocation2], %s7661_s22 }
  0x13   : > { %v154_v0 = vld [vmem:[%s8879_s25] sm:$0xf] (%p66_p3)  ;;  %v156_v1 = vld [vmem:[%s8879_s25 + $0x10] sm:$0xf] (%p66_p3) }
  0x14   : > { %155 = vst [vmem:[%s8883_s26] sm:$0xf] (%p66_p3), %v154_v0  ;;  %157 = vst [vmem:[%s8883_s26 + $0x4] sm:$0xf] (%p66_p3), %v156_v1  ;;  %v158_v2 = vld [vmem:[%s8879_s25 + $0x20] sm:$0xf] (%p66_p3) }
  0x15   : > { %v160_v3 = vld [vmem:[%s8879_s25 + $0x30] sm:$0xf]  ;;  %v162_v4 = vld [vmem:[%s8879_s25 + $0x40] sm:$0xf]  ;;  %159 = vst [vmem:[%s8883_s26 + $0x8] sm:$0xf] %v158_v2 }
  0x16   : > { %161 = vst [vmem:[%s8883_s26 + $0xc] sm:$0xf] %v160_v3  ;;  %163 = vst [vmem:[%s8883_s26 + $0x10] sm:$0xf] %v162_v4  ;;  %v164_v5 = vld [vmem:[%s8879_s25 + $0x50] sm:$0xf] }
  0x17   : > { %v166_v6 = vld [vmem:[%s8879_s25 + $0x60] sm:$0xf]  ;;  %v168_v7 = vld [vmem:[%s8879_s25 + $0x70] sm:$0xf]  ;;  %165 = vst [vmem:[%s8883_s26 + $0x14] sm:$0xf] %v164_v5 }
  0x18   : > { %167 = vst [vmem:[%s8883_s26 + $0x18] sm:$0xf] %v166_v6  ;;  %169 = vst [vmem:[%s8883_s26 + $0x1c] sm:$0xf] %v168_v7  ;;  %v170_v8 = vld [vmem:[%s8879_s25 + $0x80] sm:$0xf] }
  0x19   : > { %v172_v9 = vld [vmem:[%s8879_s25 + $0x90] sm:$0xf]  ;;  %v174_v10 = vld [vmem:[%s8879_s25 + $0xa0] sm:$0xf]  ;;  %171 = vst [vmem:[%s8883_s26 + $0x20] sm:$0xf] %v170_v8 }
  0x1a   : > { %173 = vst [vmem:[%s8883_s26 + $0x24] sm:$0xf] %v172_v9  ;;  %175 = vst [vmem:[%s8883_s26 + $0x28] sm:$0xf] %v174_v10  ;;  %v176_v11 = vld [vmem:[%s8879_s25 + $0xb0] sm:$0xf] }
  0x1b   : > { %v178_v12 = vld [vmem:[%s8879_s25 + $0xc0] sm:$0xf]  ;;  %v180_v13 = vld [vmem:[%s8879_s25 + $0xd0] sm:$0xf]  ;;  %177 = vst [vmem:[%s8883_s26 + $0x2c] sm:$0xf] %v176_v11 }
  0x1c   : > { %179 = vst [vmem:[%s8883_s26 + $0x30] sm:$0xf] %v178_v12  ;;  %181 = vst [vmem:[%s8883_s26 + $0x34] sm:$0xf] %v180_v13  ;;  %v182_v14 = vld [vmem:[%s8879_s25 + $0xe0] sm:$0xf] }
  0x1d   : > { %v184_v15 = vld [vmem:[%s8879_s25 + $0xf0] sm:$0xf]  ;;  %v186_v16 = vld [vmem:[%s8879_s25 + $0x100] sm:$0xf]  ;;  %183 = vst [vmem:[%s8883_s26 + $0x38] sm:$0xf] %v182_v14 }
  0x1e   : > { %185 = vst [vmem:[%s8883_s26 + $0x3c] sm:$0xf] %v184_v15  ;;  %187 = vst [vmem:[%s8883_s26 + $0x40] sm:$0xf] %v186_v16  ;;  %v188_v17 = vld [vmem:[%s8879_s25 + $0x110] sm:$0xf] }
  0x1f   : > { %v190_v18 = vld [vmem:[%s8879_s25 + $0x120] sm:$0xf]  ;;  %v192_v19 = vld [vmem:[%s8879_s25 + $0x130] sm:$0xf]  ;;  %189 = vst [vmem:[%s8883_s26 + $0x44] sm:$0xf] %v188_v17 }
  0x20   : > { %191 = vst [vmem:[%s8883_s26 + $0x48] sm:$0xf] %v190_v18  ;;  %193 = vst [vmem:[%s8883_s26 + $0x4c] sm:$0xf] %v192_v19  ;;  %v194_v20 = vld [vmem:[%s8879_s25 + $0x140] sm:$0xf] }
  0x21   : > { %v196_v21 = vld [vmem:[%s8879_s25 + $0x150] sm:$0xf]  ;;  %v198_v22 = vld [vmem:[%s8879_s25 + $0x160] sm:$0xf]  ;;  %195 = vst [vmem:[%s8883_s26 + $0x50] sm:$0xf] %v194_v20 }
  0x22   : > { %197 = vst [vmem:[%s8883_s26 + $0x54] sm:$0xf] %v196_v21  ;;  %199 = vst [vmem:[%s8883_s26 + $0x58] sm:$0xf] %v198_v22  ;;  %v200_v23 = vld [vmem:[%s8879_s25 + $0x170] sm:$0xf] }
  0x23   : > { %v202_v24 = vld [vmem:[%s8879_s25 + $0x180] sm:$0xf]  ;;  %v204_v25 = vld [vmem:[%s8879_s25 + $0x190] sm:$0xf]  ;;  %201 = vst [vmem:[%s8883_s26 + $0x5c] sm:$0xf] %v200_v23 }
  0x24   : > { %203 = vst [vmem:[%s8883_s26 + $0x60] sm:$0xf] %v202_v24  ;;  %205 = vst [vmem:[%s8883_s26 + $0x64] sm:$0xf] %v204_v25  ;;  %v206_v26 = vld [vmem:[%s8879_s25 + $0x1a0] sm:$0xf] }
  0x25   : > { %v208_v27 = vld [vmem:[%s8879_s25 + $0x1b0] sm:$0xf]  ;;  %v210_v28 = vld [vmem:[%s8879_s25 + $0x1c0] sm:$0xf]  ;;  %207 = vst [vmem:[%s8883_s26 + $0x68] sm:$0xf] %v206_v26 }
  0x26   : > { %209 = vst [vmem:[%s8883_s26 + $0x6c] sm:$0xf] %v208_v27  ;;  %211 = vst [vmem:[%s8883_s26 + $0x70] sm:$0xf] %v210_v28  ;;  %v212_v29 = vld [vmem:[%s8879_s25 + $0x1d0] sm:$0xf] }
  0x27   : > { %v214_v30 = vld [vmem:[%s8879_s25 + $0x1e0] sm:$0xf]  ;;  %v216_v31 = vld [vmem:[%s8879_s25 + $0x1f0] sm:$0xf]  ;;  %213 = vst [vmem:[%s8883_s26 + $0x74] sm:$0xf] %v212_v29 }
  0x28   : > { %215 = vst [vmem:[%s8883_s26 + $0x78] sm:$0xf] %v214_v30  ;;  %217 = vst [vmem:[%s8883_s26 + $0x7c] sm:$0xf] %v216_v31  ;;  %v218_v32 = vld [vmem:[%s8879_s25 + $0x200] sm:$0xf] }
  0x29   : > { %v220_v33 = vld [vmem:[%s8879_s25 + $0x210] sm:$0xf]  ;;  %v222_v34 = vld [vmem:[%s8879_s25 + $0x220] sm:$0xf]  ;;  %219 = vst [vmem:[%s8883_s26 + $0x80] sm:$0xf] %v218_v32 }
  0x2a   : > { %221 = vst [vmem:[%s8883_s26 + $0x84] sm:$0xf] %v220_v33  ;;  %223 = vst [vmem:[%s8883_s26 + $0x88] sm:$0xf] %v222_v34  ;;  %v224_v35 = vld [vmem:[%s8879_s25 + $0x230] sm:$0xf] }
  0x2b   : > { %v226_v36 = vld [vmem:[%s8879_s25 + $0x240] sm:$0xf]  ;;  %v228_v37 = vld [vmem:[%s8879_s25 + $0x250] sm:$0xf]  ;;  %225 = vst [vmem:[%s8883_s26 + $0x8c] sm:$0xf] %v224_v35 }
  0x2c   : > { %227 = vst [vmem:[%s8883_s26 + $0x90] sm:$0xf] %v226_v36  ;;  %229 = vst [vmem:[%s8883_s26 + $0x94] sm:$0xf] %v228_v37  ;;  %v230_v38 = vld [vmem:[%s8879_s25 + $0x260] sm:$0xf] }
  0x2d   : > { %v232_v39 = vld [vmem:[%s8879_s25 + $0x270] sm:$0xf]  ;;  %v234_v40 = vld [vmem:[%s8879_s25 + $0x280] sm:$0xf]  ;;  %231 = vst [vmem:[%s8883_s26 + $0x98] sm:$0xf] %v230_v38 }
  0x2e   : > { %233 = vst [vmem:[%s8883_s26 + $0x9c] sm:$0xf] %v232_v39  ;;  %235 = vst [vmem:[%s8883_s26 + $0xa0] sm:$0xf] %v234_v40  ;;  %v236_v41 = vld [vmem:[%s8879_s25 + $0x290] sm:$0xf] }
  0x2f   : > { %v238_v42 = vld [vmem:[%s8879_s25 + $0x2a0] sm:$0xf]  ;;  %v240_v43 = vld [vmem:[%s8879_s25 + $0x2b0] sm:$0xf]  ;;  %237 = vst [vmem:[%s8883_s26 + $0xa4] sm:$0xf] %v236_v41 }
  0x30   : > { %239 = vst [vmem:[%s8883_s26 + $0xa8] sm:$0xf] %v238_v42  ;;  %241 = vst [vmem:[%s8883_s26 + $0xac] sm:$0xf] %v240_v43  ;;  %v242_v44 = vld [vmem:[%s8879_s25 + $0x2c0] sm:$0xf] }
  0x31   : > { %v244_v45 = vld [vmem:[%s8879_s25 + $0x2d0] sm:$0xf]  ;;  %v246_v46 = vld [vmem:[%s8879_s25 + $0x2e0] sm:$0xf]  ;;  %243 = vst [vmem:[%s8883_s26 + $0xb0] sm:$0xf] %v242_v44 }
  0x32   : > { %245 = vst [vmem:[%s8883_s26 + $0xb4] sm:$0xf] %v244_v45  ;;  %247 = vst [vmem:[%s8883_s26 + $0xb8] sm:$0xf] %v246_v46  ;;  %v248_v47 = vld [vmem:[%s8879_s25 + $0x2f0] sm:$0xf] }
  0x33   : > { %v250_v48 = vld [vmem:[%s8879_s25 + $0x300] sm:$0xf]  ;;  %v252_v49 = vld [vmem:[%s8879_s25 + $0x310] sm:$0xf]  ;;  %249 = vst [vmem:[%s8883_s26 + $0xbc] sm:$0xf] %v248_v47 }
  0x34   : > { %251 = vst [vmem:[%s8883_s26 + $0xc0] sm:$0xf] %v250_v48  ;;  %253 = vst [vmem:[%s8883_s26 + $0xc4] sm:$0xf] %v252_v49  ;;  %v254_v50 = vld [vmem:[%s8879_s25 + $0x320] sm:$0xf] }
  0x35   : > { %v256_v51 = vld [vmem:[%s8879_s25 + $0x330] sm:$0xf]  ;;  %v258_v52 = vld [vmem:[%s8879_s25 + $0x340] sm:$0xf]  ;;  %255 = vst [vmem:[%s8883_s26 + $0xc8] sm:$0xf] %v254_v50 }
  0x36   : > { %257 = vst [vmem:[%s8883_s26 + $0xcc] sm:$0xf] %v256_v51  ;;  %259 = vst [vmem:[%s8883_s26 + $0xd0] sm:$0xf] %v258_v52  ;;  %v260_v53 = vld [vmem:[%s8879_s25 + $0x350] sm:$0xf] }
  0x37   : > { %v262_v54 = vld [vmem:[%s8879_s25 + $0x360] sm:$0xf]  ;;  %v264_v55 = vld [vmem:[%s8879_s25 + $0x370] sm:$0xf]  ;;  %261 = vst [vmem:[%s8883_s26 + $0xd4] sm:$0xf] %v260_v53 }
  0x38   : > { %263 = vst [vmem:[%s8883_s26 + $0xd8] sm:$0xf] %v262_v54  ;;  %265 = vst [vmem:[%s8883_s26 + $0xdc] sm:$0xf] %v264_v55  ;;  %v266_v56 = vld [vmem:[%s8879_s25 + $0x380] sm:$0xf] }
  0x39   : > { %v268_v57 = vld [vmem:[%s8879_s25 + $0x390] sm:$0xf]  ;;  %v270_v58 = vld [vmem:[%s8879_s25 + $0x3a0] sm:$0xf]  ;;  %267 = vst [vmem:[%s8883_s26 + $0xe0] sm:$0xf] %v266_v56 }
  0x3a   : > { %269 = vst [vmem:[%s8883_s26 + $0xe4] sm:$0xf] %v268_v57  ;;  %271 = vst [vmem:[%s8883_s26 + $0xe8] sm:$0xf] %v270_v58  ;;  %v272_v59 = vld [vmem:[%s8879_s25 + $0x3b0] sm:$0xf] }
  0x3b   : > { %v274_v60 = vld [vmem:[%s8879_s25 + $0x3c0] sm:$0xf]  ;;  %v276_v61 = vld [vmem:[%s8879_s25 + $0x3d0] sm:$0xf]  ;;  %273 = vst [vmem:[%s8883_s26 + $0xec] sm:$0xf] %v272_v59 }
  0x3c   : > { %275 = vst [vmem:[%s8883_s26 + $0xf0] sm:$0xf] %v274_v60  ;;  %277 = vst [vmem:[%s8883_s26 + $0xf4] sm:$0xf] %v276_v61  ;;  %v278_v62 = vld [vmem:[%s8879_s25 + $0x3e0] sm:$0xf] }
  0x3d   : > { %v280_v63 = vld [vmem:[%s8879_s25 + $0x3f0] sm:$0xf]  ;;  %v282_v0 = vld [vmem:[%s8879_s25 + $0x400] sm:$0xf]  ;;  %279 = vst [vmem:[%s8883_s26 + $0xf8] sm:$0xf] %v278_v62 }
  0x3e   : > { %281 = vst [vmem:[%s8883_s26 + $0xfc] sm:$0xf] %v280_v63  ;;  %283 = vst [vmem:[%s8883_s26 + $0x100] sm:$0xf] %v282_v0  ;;  %v284_v1 = vld [vmem:[%s8879_s25 + $0x410] sm:$0xf] }
  0x3f   : > { %v286_v2 = vld [vmem:[%s8879_s25 + $0x420] sm:$0xf]  ;;  %v288_v3 = vld [vmem:[%s8879_s25 + $0x430] sm:$0xf]  ;;  %285 = vst [vmem:[%s8883_s26 + $0x104] sm:$0xf] %v284_v1 }
  0x40   : > { %287 = vst [vmem:[%s8883_s26 + $0x108] sm:$0xf] %v286_v2  ;;  %289 = vst [vmem:[%s8883_s26 + $0x10c] sm:$0xf] %v288_v3  ;;  %v290_v4 = vld [vmem:[%s8879_s25 + $0x440] sm:$0xf] }
  0x41   : > { %v292_v5 = vld [vmem:[%s8879_s25 + $0x450] sm:$0xf]  ;;  %v294_v6 = vld [vmem:[%s8879_s25 + $0x460] sm:$0xf]  ;;  %291 = vst [vmem:[%s8883_s26 + $0x110] sm:$0xf] %v290_v4 }
  0x42   : > { %293 = vst [vmem:[%s8883_s26 + $0x114] sm:$0xf] %v292_v5  ;;  %295 = vst [vmem:[%s8883_s26 + $0x118] sm:$0xf] %v294_v6  ;;  %v296_v7 = vld [vmem:[%s8879_s25 + $0x470] sm:$0xf] }
  0x43   : > { %v298_v8 = vld [vmem:[%s8879_s25 + $0x480] sm:$0xf]  ;;  %v300_v9 = vld [vmem:[%s8879_s25 + $0x490] sm:$0xf]  ;;  %297 = vst [vmem:[%s8883_s26 + $0x11c] sm:$0xf] %v296_v7 }
  0x44   : > { %299 = vst [vmem:[%s8883_s26 + $0x120] sm:$0xf] %v298_v8  ;;  %301 = vst [vmem:[%s8883_s26 + $0x124] sm:$0xf] %v300_v9  ;;  %v302_v10 = vld [vmem:[%s8879_s25 + $0x4a0] sm:$0xf] }
  0x45   : > { %v304_v11 = vld [vmem:[%s8879_s25 + $0x4b0] sm:$0xf]  ;;  %v306_v12 = vld [vmem:[%s8879_s25 + $0x4c0] sm:$0xf]  ;;  %303 = vst [vmem:[%s8883_s26 + $0x128] sm:$0xf] %v302_v10 }
  0x46   : > { %305 = vst [vmem:[%s8883_s26 + $0x12c] sm:$0xf] %v304_v11  ;;  %307 = vst [vmem:[%s8883_s26 + $0x130] sm:$0xf] %v306_v12  ;;  %v308_v13 = vld [vmem:[%s8879_s25 + $0x4d0] sm:$0xf] }
  0x47   : > { %v310_v14 = vld [vmem:[%s8879_s25 + $0x4e0] sm:$0xf]  ;;  %v312_v15 = vld [vmem:[%s8879_s25 + $0x4f0] sm:$0xf]  ;;  %309 = vst [vmem:[%s8883_s26 + $0x134] sm:$0xf] %v308_v13 }
  0x48   : > { %311 = vst [vmem:[%s8883_s26 + $0x138] sm:$0xf] %v310_v14  ;;  %313 = vst [vmem:[%s8883_s26 + $0x13c] sm:$0xf] %v312_v15  ;;  %v314_v16 = vld [vmem:[%s8879_s25 + $0x500] sm:$0xf] }
  0x49   : > { %v316_v17 = vld [vmem:[%s8879_s25 + $0x510] sm:$0xf]  ;;  %v318_v18 = vld [vmem:[%s8879_s25 + $0x520] sm:$0xf]  ;;  %315 = vst [vmem:[%s8883_s26 + $0x140] sm:$0xf] %v314_v16 }
  0x4a   : > { %317 = vst [vmem:[%s8883_s26 + $0x144] sm:$0xf] %v316_v17  ;;  %319 = vst [vmem:[%s8883_s26 + $0x148] sm:$0xf] %v318_v18  ;;  %v320_v19 = vld [vmem:[%s8879_s25 + $0x530] sm:$0xf] }
  0x4b   : > { %v322_v20 = vld [vmem:[%s8879_s25 + $0x540] sm:$0xf]  ;;  %v324_v21 = vld [vmem:[%s8879_s25 + $0x550] sm:$0xf]  ;;  %321 = vst [vmem:[%s8883_s26 + $0x14c] sm:$0xf] %v320_v19 }
  0x4c   : > { %323 = vst [vmem:[%s8883_s26 + $0x150] sm:$0xf] %v322_v20  ;;  %325 = vst [vmem:[%s8883_s26 + $0x154] sm:$0xf] %v324_v21  ;;  %v326_v22 = vld [vmem:[%s8879_s25 + $0x560] sm:$0xf] }
  0x4d   : > { %v328_v23 = vld [vmem:[%s8879_s25 + $0x570] sm:$0xf]  ;;  %v330_v24 = vld [vmem:[%s8879_s25 + $0x580] sm:$0xf]  ;;  %327 = vst [vmem:[%s8883_s26 + $0x158] sm:$0xf] %v326_v22 }
  0x4e   : > { %329 = vst [vmem:[%s8883_s26 + $0x15c] sm:$0xf] %v328_v23  ;;  %331 = vst [vmem:[%s8883_s26 + $0x160] sm:$0xf] %v330_v24  ;;  %v332_v25 = vld [vmem:[%s8879_s25 + $0x590] sm:$0xf] }
  0x4f   : > { %v334_v26 = vld [vmem:[%s8879_s25 + $0x5a0] sm:$0xf]  ;;  %v336_v27 = vld [vmem:[%s8879_s25 + $0x5b0] sm:$0xf]  ;;  %333 = vst [vmem:[%s8883_s26 + $0x164] sm:$0xf] %v332_v25 }
  0x50   : > { %335 = vst [vmem:[%s8883_s26 + $0x168] sm:$0xf] %v334_v26  ;;  %337 = vst [vmem:[%s8883_s26 + $0x16c] sm:$0xf] %v336_v27  ;;  %v338_v28 = vld [vmem:[%s8879_s25 + $0x5c0] sm:$0xf] }
  0x51   : > { %v340_v29 = vld [vmem:[%s8879_s25 + $0x5d0] sm:$0xf]  ;;  %v342_v30 = vld [vmem:[%s8879_s25 + $0x5e0] sm:$0xf]  ;;  %339 = vst [vmem:[%s8883_s26 + $0x170] sm:$0xf] %v338_v28 }
  0x52   : > { %341 = vst [vmem:[%s8883_s26 + $0x174] sm:$0xf] %v340_v29  ;;  %343 = vst [vmem:[%s8883_s26 + $0x178] sm:$0xf] %v342_v30  ;;  %v344_v31 = vld [vmem:[%s8879_s25 + $0x5f0] sm:$0xf] }
  0x53   : > { %v346_v32 = vld [vmem:[%s8879_s25 + $0x600] sm:$0xf]  ;;  %v348_v33 = vld [vmem:[%s8879_s25 + $0x610] sm:$0xf]  ;;  %345 = vst [vmem:[%s8883_s26 + $0x17c] sm:$0xf] %v344_v31 }
  0x54   : > { %347 = vst [vmem:[%s8883_s26 + $0x180] sm:$0xf] %v346_v32  ;;  %349 = vst [vmem:[%s8883_s26 + $0x184] sm:$0xf] %v348_v33  ;;  %v350_v34 = vld [vmem:[%s8879_s25 + $0x620] sm:$0xf] }
  0x55   : > { %v352_v35 = vld [vmem:[%s8879_s25 + $0x630] sm:$0xf]  ;;  %v354_v36 = vld [vmem:[%s8879_s25 + $0x640] sm:$0xf]  ;;  %351 = vst [vmem:[%s8883_s26 + $0x188] sm:$0xf] %v350_v34 }
  0x56   : > { %353 = vst [vmem:[%s8883_s26 + $0x18c] sm:$0xf] %v352_v35  ;;  %355 = vst [vmem:[%s8883_s26 + $0x190] sm:$0xf] %v354_v36  ;;  %v356_v37 = vld [vmem:[%s8879_s25 + $0x650] sm:$0xf] }
  0x57   : > { %v358_v38 = vld [vmem:[%s8879_s25 + $0x660] sm:$0xf]  ;;  %v360_v39 = vld [vmem:[%s8879_s25 + $0x670] sm:$0xf]  ;;  %357 = vst [vmem:[%s8883_s26 + $0x194] sm:$0xf] %v356_v37 }
  0x58   : > { %359 = vst [vmem:[%s8883_s26 + $0x198] sm:$0xf] %v358_v38  ;;  %361 = vst [vmem:[%s8883_s26 + $0x19c] sm:$0xf] %v360_v39  ;;  %v362_v40 = vld [vmem:[%s8879_s25 + $0x680] sm:$0xf] }
  0x59   : > { %v364_v41 = vld [vmem:[%s8879_s25 + $0x690] sm:$0xf]  ;;  %v366_v42 = vld [vmem:[%s8879_s25 + $0x6a0] sm:$0xf]  ;;  %363 = vst [vmem:[%s8883_s26 + $0x1a0] sm:$0xf] %v362_v40 }
  0x5a   : > { %365 = vst [vmem:[%s8883_s26 + $0x1a4] sm:$0xf] %v364_v41  ;;  %367 = vst [vmem:[%s8883_s26 + $0x1a8] sm:$0xf] %v366_v42  ;;  %v368_v43 = vld [vmem:[%s8879_s25 + $0x6b0] sm:$0xf] }
  0x5b   : > { %v370_v44 = vld [vmem:[%s8879_s25 + $0x6c0] sm:$0xf]  ;;  %v372_v45 = vld [vmem:[%s8879_s25 + $0x6d0] sm:$0xf]  ;;  %369 = vst [vmem:[%s8883_s26 + $0x1ac] sm:$0xf] %v368_v43 }
  0x5c   : > { %371 = vst [vmem:[%s8883_s26 + $0x1b0] sm:$0xf] %v370_v44  ;;  %373 = vst [vmem:[%s8883_s26 + $0x1b4] sm:$0xf] %v372_v45  ;;  %v374_v46 = vld [vmem:[%s8879_s25 + $0x6e0] sm:$0xf] }
  0x5d   : > { %v376_v47 = vld [vmem:[%s8879_s25 + $0x6f0] sm:$0xf]  ;;  %v378_v48 = vld [vmem:[%s8879_s25 + $0x700] sm:$0xf]  ;;  %375 = vst [vmem:[%s8883_s26 + $0x1b8] sm:$0xf] %v374_v46 }
  0x5e   : > { %377 = vst [vmem:[%s8883_s26 + $0x1bc] sm:$0xf] %v376_v47  ;;  %379 = vst [vmem:[%s8883_s26 + $0x1c0] sm:$0xf] %v378_v48  ;;  %v380_v49 = vld [vmem:[%s8879_s25 + $0x710] sm:$0xf] }
  0x5f   : > { %v382_v50 = vld [vmem:[%s8879_s25 + $0x720] sm:$0xf]  ;;  %v384_v51 = vld [vmem:[%s8879_s25 + $0x730] sm:$0xf]  ;;  %381 = vst [vmem:[%s8883_s26 + $0x1c4] sm:$0xf] %v380_v49 }
  0x60   : > { %383 = vst [vmem:[%s8883_s26 + $0x1c8] sm:$0xf] %v382_v50  ;;  %385 = vst [vmem:[%s8883_s26 + $0x1cc] sm:$0xf] %v384_v51  ;;  %v386_v52 = vld [vmem:[%s8879_s25 + $0x740] sm:$0xf] }
  0x61   : > { %v388_v53 = vld [vmem:[%s8879_s25 + $0x750] sm:$0xf]  ;;  %v390_v54 = vld [vmem:[%s8879_s25 + $0x760] sm:$0xf]  ;;  %387 = vst [vmem:[%s8883_s26 + $0x1d0] sm:$0xf] %v386_v52 }
  0x62   : > { %389 = vst [vmem:[%s8883_s26 + $0x1d4] sm:$0xf] %v388_v53  ;;  %391 = vst [vmem:[%s8883_s26 + $0x1d8] sm:$0xf] %v390_v54  ;;  %v392_v55 = vld [vmem:[%s8879_s25 + $0x770] sm:$0xf] }
  0x63   : > { %v394_v56 = vld [vmem:[%s8879_s25 + $0x780] sm:$0xf]  ;;  %v396_v57 = vld [vmem:[%s8879_s25 + $0x790] sm:$0xf]  ;;  %393 = vst [vmem:[%s8883_s26 + $0x1dc] sm:$0xf] %v392_v55 }
  0x64   : > { %395 = vst [vmem:[%s8883_s26 + $0x1e0] sm:$0xf] %v394_v56  ;;  %397 = vst [vmem:[%s8883_s26 + $0x1e4] sm:$0xf] %v396_v57  ;;  %v398_v58 = vld [vmem:[%s8879_s25 + $0x7a0] sm:$0xf] }
  0x65   : > { %v400_v59 = vld [vmem:[%s8879_s25 + $0x7b0] sm:$0xf]  ;;  %v402_v60 = vld [vmem:[%s8879_s25 + $0x7c0] sm:$0xf]  ;;  %399 = vst [vmem:[%s8883_s26 + $0x1e8] sm:$0xf] %v398_v58 }
  0x66   : > { %401 = vst [vmem:[%s8883_s26 + $0x1ec] sm:$0xf] %v400_v59  ;;  %403 = vst [vmem:[%s8883_s26 + $0x1f0] sm:$0xf] %v402_v60  ;;  %v404_v61 = vld [vmem:[%s8879_s25 + $0x7d0] sm:$0xf] }
  0x67   : > { %v406_v62 = vld [vmem:[%s8879_s25 + $0x7e0] sm:$0xf]  ;;  %v408_v63 = vld [vmem:[%s8879_s25 + $0x7f0] sm:$0xf]  ;;  %405 = vst [vmem:[%s8883_s26 + $0x1f4] sm:$0xf] %v404_v61 }
  0x68   : > { %407 = vst [vmem:[%s8883_s26 + $0x1f8] sm:$0xf] %v406_v62  ;;  %409 = vst [vmem:[%s8883_s26 + $0x1fc] sm:$0xf] %v408_v63  ;;  %v410_v0 = vld [vmem:[%s8879_s25 + $0x800] sm:$0xf] }
  0x69   : > { %v412_v1 = vld [vmem:[%s8879_s25 + $0x810] sm:$0xf]  ;;  %v414_v2 = vld [vmem:[%s8879_s25 + $0x820] sm:$0xf]  ;;  %411 = vst [vmem:[%s8883_s26 + $0x200] sm:$0xf] %v410_v0 }
  0x6a   : > { %413 = vst [vmem:[%s8883_s26 + $0x204] sm:$0xf] %v412_v1  ;;  %415 = vst [vmem:[%s8883_s26 + $0x208] sm:$0xf] %v414_v2  ;;  %v416_v3 = vld [vmem:[%s8879_s25 + $0x830] sm:$0xf] }
  0x6b   : > { %v418_v4 = vld [vmem:[%s8879_s25 + $0x840] sm:$0xf]  ;;  %v420_v5 = vld [vmem:[%s8879_s25 + $0x850] sm:$0xf]  ;;  %417 = vst [vmem:[%s8883_s26 + $0x20c] sm:$0xf] %v416_v3 }
  0x6c   : > { %419 = vst [vmem:[%s8883_s26 + $0x210] sm:$0xf] %v418_v4  ;;  %421 = vst [vmem:[%s8883_s26 + $0x214] sm:$0xf] %v420_v5  ;;  %v422_v6 = vld [vmem:[%s8879_s25 + $0x860] sm:$0xf] }
  0x6d   : > { %v424_v7 = vld [vmem:[%s8879_s25 + $0x870] sm:$0xf]  ;;  %v426_v8 = vld [vmem:[%s8879_s25 + $0x880] sm:$0xf]  ;;  %423 = vst [vmem:[%s8883_s26 + $0x218] sm:$0xf] %v422_v6 }
  0x6e   : > { %425 = vst [vmem:[%s8883_s26 + $0x21c] sm:$0xf] %v424_v7  ;;  %427 = vst [vmem:[%s8883_s26 + $0x220] sm:$0xf] %v426_v8  ;;  %v428_v9 = vld [vmem:[%s8879_s25 + $0x890] sm:$0xf] }
  0x6f   : > { %v430_v10 = vld [vmem:[%s8879_s25 + $0x8a0] sm:$0xf]  ;;  %v432_v11 = vld [vmem:[%s8879_s25 + $0x8b0] sm:$0xf]  ;;  %429 = vst [vmem:[%s8883_s26 + $0x224] sm:$0xf] %v428_v9 }
  0x70   : > { %431 = vst [vmem:[%s8883_s26 + $0x228] sm:$0xf] %v430_v10  ;;  %433 = vst [vmem:[%s8883_s26 + $0x22c] sm:$0xf] %v432_v11  ;;  %v434_v12 = vld [vmem:[%s8879_s25 + $0x8c0] sm:$0xf] }
  0x71   : > { %v436_v13 = vld [vmem:[%s8879_s25 + $0x8d0] sm:$0xf]  ;;  %v438_v14 = vld [vmem:[%s8879_s25 + $0x8e0] sm:$0xf]  ;;  %435 = vst [vmem:[%s8883_s26 + $0x230] sm:$0xf] %v434_v12 }
  0x72   : > { %437 = vst [vmem:[%s8883_s26 + $0x234] sm:$0xf] %v436_v13  ;;  %439 = vst [vmem:[%s8883_s26 + $0x238] sm:$0xf] %v438_v14  ;;  %v440_v15 = vld [vmem:[%s8879_s25 + $0x8f0] sm:$0xf] }
  0x73   : > { %v442_v16 = vld [vmem:[%s8879_s25 + $0x900] sm:$0xf]  ;;  %v444_v17 = vld [vmem:[%s8879_s25 + $0x910] sm:$0xf]  ;;  %441 = vst [vmem:[%s8883_s26 + $0x23c] sm:$0xf] %v440_v15 }
  0x74   : > { %443 = vst [vmem:[%s8883_s26 + $0x240] sm:$0xf] %v442_v16  ;;  %445 = vst [vmem:[%s8883_s26 + $0x244] sm:$0xf] %v444_v17  ;;  %v446_v18 = vld [vmem:[%s8879_s25 + $0x920] sm:$0xf] }
  0x75   : > { %v448_v19 = vld [vmem:[%s8879_s25 + $0x930] sm:$0xf]  ;;  %v450_v20 = vld [vmem:[%s8879_s25 + $0x940] sm:$0xf]  ;;  %447 = vst [vmem:[%s8883_s26 + $0x248] sm:$0xf] %v446_v18 }
  0x76   : > { %449 = vst [vmem:[%s8883_s26 + $0x24c] sm:$0xf] %v448_v19  ;;  %451 = vst [vmem:[%s8883_s26 + $0x250] sm:$0xf] %v450_v20  ;;  %v452_v21 = vld [vmem:[%s8879_s25 + $0x950] sm:$0xf] }
  0x77   : > { %v454_v22 = vld [vmem:[%s8879_s25 + $0x960] sm:$0xf]  ;;  %v456_v23 = vld [vmem:[%s8879_s25 + $0x970] sm:$0xf]  ;;  %453 = vst [vmem:[%s8883_s26 + $0x254] sm:$0xf] %v452_v21 }
  0x78   : > { %455 = vst [vmem:[%s8883_s26 + $0x258] sm:$0xf] %v454_v22  ;;  %457 = vst [vmem:[%s8883_s26 + $0x25c] sm:$0xf] %v456_v23  ;;  %v458_v24 = vld [vmem:[%s8879_s25 + $0x980] sm:$0xf] }
  0x79   : > { %v460_v25 = vld [vmem:[%s8879_s25 + $0x990] sm:$0xf]  ;;  %v462_v26 = vld [vmem:[%s8879_s25 + $0x9a0] sm:$0xf]  ;;  %459 = vst [vmem:[%s8883_s26 + $0x260] sm:$0xf] %v458_v24 }
  0x7a   : > { %461 = vst [vmem:[%s8883_s26 + $0x264] sm:$0xf] %v460_v25  ;;  %463 = vst [vmem:[%s8883_s26 + $0x268] sm:$0xf] %v462_v26  ;;  %v464_v27 = vld [vmem:[%s8879_s25 + $0x9b0] sm:$0xf] }
  0x7b   : > { %v466_v28 = vld [vmem:[%s8879_s25 + $0x9c0] sm:$0xf]  ;;  %v468_v29 = vld [vmem:[%s8879_s25 + $0x9d0] sm:$0xf]  ;;  %465 = vst [vmem:[%s8883_s26 + $0x26c] sm:$0xf] %v464_v27 }
  0x7c   : > { %467 = vst [vmem:[%s8883_s26 + $0x270] sm:$0xf] %v466_v28  ;;  %469 = vst [vmem:[%s8883_s26 + $0x274] sm:$0xf] %v468_v29  ;;  %v470_v30 = vld [vmem:[%s8879_s25 + $0x9e0] sm:$0xf] }
  0x7d   : > { %v472_v31 = vld [vmem:[%s8879_s25 + $0x9f0] sm:$0xf]  ;;  %v474_v32 = vld [vmem:[%s8879_s25 + $0xa00] sm:$0xf]  ;;  %471 = vst [vmem:[%s8883_s26 + $0x278] sm:$0xf] %v470_v30 }
  0x7e   : > { %473 = vst [vmem:[%s8883_s26 + $0x27c] sm:$0xf] %v472_v31  ;;  %475 = vst [vmem:[%s8883_s26 + $0x280] sm:$0xf] %v474_v32  ;;  %v476_v33 = vld [vmem:[%s8879_s25 + $0xa10] sm:$0xf] }
  0x7f   : > { %v478_v34 = vld [vmem:[%s8879_s25 + $0xa20] sm:$0xf]  ;;  %v480_v35 = vld [vmem:[%s8879_s25 + $0xa30] sm:$0xf]  ;;  %477 = vst [vmem:[%s8883_s26 + $0x284] sm:$0xf] %v476_v33 }
  0x80   : > { %479 = vst [vmem:[%s8883_s26 + $0x288] sm:$0xf] %v478_v34  ;;  %481 = vst [vmem:[%s8883_s26 + $0x28c] sm:$0xf] %v480_v35  ;;  %v482_v36 = vld [vmem:[%s8879_s25 + $0xa40] sm:$0xf] }
  0x81   : > { %v484_v37 = vld [vmem:[%s8879_s25 + $0xa50] sm:$0xf]  ;;  %v486_v38 = vld [vmem:[%s8879_s25 + $0xa60] sm:$0xf]  ;;  %483 = vst [vmem:[%s8883_s26 + $0x290] sm:$0xf] %v482_v36 }
  0x82   : > { %485 = vst [vmem:[%s8883_s26 + $0x294] sm:$0xf] %v484_v37  ;;  %487 = vst [vmem:[%s8883_s26 + $0x298] sm:$0xf] %v486_v38  ;;  %v488_v39 = vld [vmem:[%s8879_s25 + $0xa70] sm:$0xf] }
  0x83   : > { %v490_v40 = vld [vmem:[%s8879_s25 + $0xa80] sm:$0xf]  ;;  %v492_v41 = vld [vmem:[%s8879_s25 + $0xa90] sm:$0xf]  ;;  %489 = vst [vmem:[%s8883_s26 + $0x29c] sm:$0xf] %v488_v39 }
  0x84   : > { %491 = vst [vmem:[%s8883_s26 + $0x2a0] sm:$0xf] %v490_v40  ;;  %493 = vst [vmem:[%s8883_s26 + $0x2a4] sm:$0xf] %v492_v41  ;;  %v494_v42 = vld [vmem:[%s8879_s25 + $0xaa0] sm:$0xf] }
  0x85   : > { %v496_v43 = vld [vmem:[%s8879_s25 + $0xab0] sm:$0xf]  ;;  %v498_v44 = vld [vmem:[%s8879_s25 + $0xac0] sm:$0xf]  ;;  %495 = vst [vmem:[%s8883_s26 + $0x2a8] sm:$0xf] %v494_v42 }
  0x86   : > { %497 = vst [vmem:[%s8883_s26 + $0x2ac] sm:$0xf] %v496_v43  ;;  %499 = vst [vmem:[%s8883_s26 + $0x2b0] sm:$0xf] %v498_v44  ;;  %v500_v45 = vld [vmem:[%s8879_s25 + $0xad0] sm:$0xf] }
  0x87   : > { %v502_v46 = vld [vmem:[%s8879_s25 + $0xae0] sm:$0xf]  ;;  %v504_v47 = vld [vmem:[%s8879_s25 + $0xaf0] sm:$0xf]  ;;  %501 = vst [vmem:[%s8883_s26 + $0x2b4] sm:$0xf] %v500_v45 }
  0x88   : > { %503 = vst [vmem:[%s8883_s26 + $0x2b8] sm:$0xf] %v502_v46  ;;  %505 = vst [vmem:[%s8883_s26 + $0x2bc] sm:$0xf] %v504_v47  ;;  %v506_v48 = vld [vmem:[%s8879_s25 + $0xb00] sm:$0xf] }
  0x89   : > { %v508_v49 = vld [vmem:[%s8879_s25 + $0xb10] sm:$0xf]  ;;  %v510_v50 = vld [vmem:[%s8879_s25 + $0xb20] sm:$0xf]  ;;  %507 = vst [vmem:[%s8883_s26 + $0x2c0] sm:$0xf] %v506_v48 }
  0x8a   : > { %509 = vst [vmem:[%s8883_s26 + $0x2c4] sm:$0xf] %v508_v49  ;;  %511 = vst [vmem:[%s8883_s26 + $0x2c8] sm:$0xf] %v510_v50  ;;  %v512_v51 = vld [vmem:[%s8879_s25 + $0xb30] sm:$0xf] }
  0x8b   : > { %v514_v52 = vld [vmem:[%s8879_s25 + $0xb40] sm:$0xf]  ;;  %v516_v53 = vld [vmem:[%s8879_s25 + $0xb50] sm:$0xf]  ;;  %513 = vst [vmem:[%s8883_s26 + $0x2cc] sm:$0xf] %v512_v51 }
  0x8c   : > { %515 = vst [vmem:[%s8883_s26 + $0x2d0] sm:$0xf] %v514_v52  ;;  %517 = vst [vmem:[%s8883_s26 + $0x2d4] sm:$0xf] %v516_v53  ;;  %v518_v54 = vld [vmem:[%s8879_s25 + $0xb60] sm:$0xf] }
  0x8d   : > { %v520_v55 = vld [vmem:[%s8879_s25 + $0xb70] sm:$0xf]  ;;  %v522_v56 = vld [vmem:[%s8879_s25 + $0xb80] sm:$0xf]  ;;  %519 = vst [vmem:[%s8883_s26 + $0x2d8] sm:$0xf] %v518_v54 }
  0x8e   : > { %521 = vst [vmem:[%s8883_s26 + $0x2dc] sm:$0xf] %v520_v55  ;;  %523 = vst [vmem:[%s8883_s26 + $0x2e0] sm:$0xf] %v522_v56  ;;  %v524_v57 = vld [vmem:[%s8879_s25 + $0xb90] sm:$0xf] }
  0x8f   : > { %v526_v58 = vld [vmem:[%s8879_s25 + $0xba0] sm:$0xf]  ;;  %v528_v59 = vld [vmem:[%s8879_s25 + $0xbb0] sm:$0xf]  ;;  %525 = vst [vmem:[%s8883_s26 + $0x2e4] sm:$0xf] %v524_v57 }
  0x90   : > { %527 = vst [vmem:[%s8883_s26 + $0x2e8] sm:$0xf] %v526_v58  ;;  %529 = vst [vmem:[%s8883_s26 + $0x2ec] sm:$0xf] %v528_v59  ;;  %v530_v60 = vld [vmem:[%s8879_s25 + $0xbc0] sm:$0xf] }
  0x91   : > { %v532_v61 = vld [vmem:[%s8879_s25 + $0xbd0] sm:$0xf]  ;;  %v534_v62 = vld [vmem:[%s8879_s25 + $0xbe0] sm:$0xf]  ;;  %531 = vst [vmem:[%s8883_s26 + $0x2f0] sm:$0xf] %v530_v60 }
  0x92   : > { %533 = vst [vmem:[%s8883_s26 + $0x2f4] sm:$0xf] %v532_v61  ;;  %535 = vst [vmem:[%s8883_s26 + $0x2f8] sm:$0xf] %v534_v62  ;;  %v536_v63 = vld [vmem:[%s8879_s25 + $0xbf0] sm:$0xf] }
  0x93   : > { %v538_v0 = vld [vmem:[%s8879_s25 + $0xc00] sm:$0xf]  ;;  %v540_v1 = vld [vmem:[%s8879_s25 + $0xc10] sm:$0xf]  ;;  %537 = vst [vmem:[%s8883_s26 + $0x2fc] sm:$0xf] %v536_v63 }
  0x94   : > { %539 = vst [vmem:[%s8883_s26 + $0x300] sm:$0xf] %v538_v0  ;;  %541 = vst [vmem:[%s8883_s26 + $0x304] sm:$0xf] %v540_v1  ;;  %v542_v2 = vld [vmem:[%s8879_s25 + $0xc20] sm:$0xf] }
  0x95   : > { %v544_v3 = vld [vmem:[%s8879_s25 + $0xc30] sm:$0xf]  ;;  %v546_v4 = vld [vmem:[%s8879_s25 + $0xc40] sm:$0xf]  ;;  %543 = vst [vmem:[%s8883_s26 + $0x308] sm:$0xf] %v542_v2 }
  0x96   : > { %545 = vst [vmem:[%s8883_s26 + $0x30c] sm:$0xf] %v544_v3  ;;  %547 = vst [vmem:[%s8883_s26 + $0x310] sm:$0xf] %v546_v4  ;;  %v548_v5 = vld [vmem:[%s8879_s25 + $0xc50] sm:$0xf] }
  0x97   : > { %v550_v6 = vld [vmem:[%s8879_s25 + $0xc60] sm:$0xf]  ;;  %v552_v7 = vld [vmem:[%s8879_s25 + $0xc70] sm:$0xf]  ;;  %549 = vst [vmem:[%s8883_s26 + $0x314] sm:$0xf] %v548_v5 }
  0x98   : > { %551 = vst [vmem:[%s8883_s26 + $0x318] sm:$0xf] %v550_v6  ;;  %553 = vst [vmem:[%s8883_s26 + $0x31c] sm:$0xf] %v552_v7  ;;  %v554_v8 = vld [vmem:[%s8879_s25 + $0xc80] sm:$0xf] }
  0x99   : > { %v556_v9 = vld [vmem:[%s8879_s25 + $0xc90] sm:$0xf]  ;;  %v558_v10 = vld [vmem:[%s8879_s25 + $0xca0] sm:$0xf]  ;;  %555 = vst [vmem:[%s8883_s26 + $0x320] sm:$0xf] %v554_v8 }
  0x9a   : > { %557 = vst [vmem:[%s8883_s26 + $0x324] sm:$0xf] %v556_v9  ;;  %559 = vst [vmem:[%s8883_s26 + $0x328] sm:$0xf] %v558_v10  ;;  %v560_v11 = vld [vmem:[%s8879_s25 + $0xcb0] sm:$0xf] }
  0x9b   : > { %v562_v12 = vld [vmem:[%s8879_s25 + $0xcc0] sm:$0xf]  ;;  %v564_v13 = vld [vmem:[%s8879_s25 + $0xcd0] sm:$0xf]  ;;  %561 = vst [vmem:[%s8883_s26 + $0x32c] sm:$0xf] %v560_v11 }
  0x9c   : > { %563 = vst [vmem:[%s8883_s26 + $0x330] sm:$0xf] %v562_v12  ;;  %565 = vst [vmem:[%s8883_s26 + $0x334] sm:$0xf] %v564_v13  ;;  %v566_v14 = vld [vmem:[%s8879_s25 + $0xce0] sm:$0xf] }
  0x9d   : > { %v568_v15 = vld [vmem:[%s8879_s25 + $0xcf0] sm:$0xf]  ;;  %v570_v16 = vld [vmem:[%s8879_s25 + $0xd00] sm:$0xf]  ;;  %567 = vst [vmem:[%s8883_s26 + $0x338] sm:$0xf] %v566_v14 }
  0x9e   : > { %569 = vst [vmem:[%s8883_s26 + $0x33c] sm:$0xf] %v568_v15  ;;  %571 = vst [vmem:[%s8883_s26 + $0x340] sm:$0xf] %v570_v16  ;;  %v572_v17 = vld [vmem:[%s8879_s25 + $0xd10] sm:$0xf] }
  0x9f   : > { %v574_v18 = vld [vmem:[%s8879_s25 + $0xd20] sm:$0xf]  ;;  %v576_v19 = vld [vmem:[%s8879_s25 + $0xd30] sm:$0xf]  ;;  %573 = vst [vmem:[%s8883_s26 + $0x344] sm:$0xf] %v572_v17 }
  0xa0   : > { %575 = vst [vmem:[%s8883_s26 + $0x348] sm:$0xf] %v574_v18  ;;  %577 = vst [vmem:[%s8883_s26 + $0x34c] sm:$0xf] %v576_v19  ;;  %v578_v20 = vld [vmem:[%s8879_s25 + $0xd40] sm:$0xf] }
  0xa1   : > { %v580_v21 = vld [vmem:[%s8879_s25 + $0xd50] sm:$0xf]  ;;  %v582_v22 = vld [vmem:[%s8879_s25 + $0xd60] sm:$0xf]  ;;  %579 = vst [vmem:[%s8883_s26 + $0x350] sm:$0xf] %v578_v20 }
  0xa2   : > { %581 = vst [vmem:[%s8883_s26 + $0x354] sm:$0xf] %v580_v21  ;;  %583 = vst [vmem:[%s8883_s26 + $0x358] sm:$0xf] %v582_v22  ;;  %v584_v23 = vld [vmem:[%s8879_s25 + $0xd70] sm:$0xf] }
  0xa3   : > { %v586_v24 = vld [vmem:[%s8879_s25 + $0xd80] sm:$0xf]  ;;  %v588_v25 = vld [vmem:[%s8879_s25 + $0xd90] sm:$0xf]  ;;  %585 = vst [vmem:[%s8883_s26 + $0x35c] sm:$0xf] %v584_v23 }
  0xa4   : > { %587 = vst [vmem:[%s8883_s26 + $0x360] sm:$0xf] %v586_v24  ;;  %589 = vst [vmem:[%s8883_s26 + $0x364] sm:$0xf] %v588_v25  ;;  %v590_v26 = vld [vmem:[%s8879_s25 + $0xda0] sm:$0xf] }
  0xa5   : > { %v592_v27 = vld [vmem:[%s8879_s25 + $0xdb0] sm:$0xf]  ;;  %v594_v28 = vld [vmem:[%s8879_s25 + $0xdc0] sm:$0xf]  ;;  %591 = vst [vmem:[%s8883_s26 + $0x368] sm:$0xf] %v590_v26 }
  0xa6   : > { %593 = vst [vmem:[%s8883_s26 + $0x36c] sm:$0xf] %v592_v27  ;;  %595 = vst [vmem:[%s8883_s26 + $0x370] sm:$0xf] %v594_v28  ;;  %v596_v29 = vld [vmem:[%s8879_s25 + $0xdd0] sm:$0xf] }
  0xa7   : > { %v598_v30 = vld [vmem:[%s8879_s25 + $0xde0] sm:$0xf]  ;;  %v600_v31 = vld [vmem:[%s8879_s25 + $0xdf0] sm:$0xf]  ;;  %597 = vst [vmem:[%s8883_s26 + $0x374] sm:$0xf] %v596_v29 }
  0xa8   : > { %599 = vst [vmem:[%s8883_s26 + $0x378] sm:$0xf] %v598_v30  ;;  %601 = vst [vmem:[%s8883_s26 + $0x37c] sm:$0xf] %v600_v31  ;;  %v602_v32 = vld [vmem:[%s8879_s25 + $0xe00] sm:$0xf] }
  0xa9   : > { %v604_v33 = vld [vmem:[%s8879_s25 + $0xe10] sm:$0xf]  ;;  %v606_v34 = vld [vmem:[%s8879_s25 + $0xe20] sm:$0xf]  ;;  %603 = vst [vmem:[%s8883_s26 + $0x380] sm:$0xf] %v602_v32 }
  0xaa   : > { %605 = vst [vmem:[%s8883_s26 + $0x384] sm:$0xf] %v604_v33  ;;  %607 = vst [vmem:[%s8883_s26 + $0x388] sm:$0xf] %v606_v34  ;;  %v608_v35 = vld [vmem:[%s8879_s25 + $0xe30] sm:$0xf] }
  0xab   : > { %v610_v36 = vld [vmem:[%s8879_s25 + $0xe40] sm:$0xf]  ;;  %v612_v37 = vld [vmem:[%s8879_s25 + $0xe50] sm:$0xf]  ;;  %609 = vst [vmem:[%s8883_s26 + $0x38c] sm:$0xf] %v608_v35 }
  0xac   : > { %611 = vst [vmem:[%s8883_s26 + $0x390] sm:$0xf] %v610_v36  ;;  %613 = vst [vmem:[%s8883_s26 + $0x394] sm:$0xf] %v612_v37  ;;  %v614_v38 = vld [vmem:[%s8879_s25 + $0xe60] sm:$0xf] }
  0xad   : > { %v616_v39 = vld [vmem:[%s8879_s25 + $0xe70] sm:$0xf]  ;;  %v618_v40 = vld [vmem:[%s8879_s25 + $0xe80] sm:$0xf]  ;;  %615 = vst [vmem:[%s8883_s26 + $0x398] sm:$0xf] %v614_v38 }
  0xae   : > { %617 = vst [vmem:[%s8883_s26 + $0x39c] sm:$0xf] %v616_v39  ;;  %619 = vst [vmem:[%s8883_s26 + $0x3a0] sm:$0xf] %v618_v40  ;;  %v620_v41 = vld [vmem:[%s8879_s25 + $0xe90] sm:$0xf] }
  0xaf   : > { %v622_v42 = vld [vmem:[%s8879_s25 + $0xea0] sm:$0xf]  ;;  %v624_v43 = vld [vmem:[%s8879_s25 + $0xeb0] sm:$0xf]  ;;  %621 = vst [vmem:[%s8883_s26 + $0x3a4] sm:$0xf] %v620_v41 }
  0xb0   : > { %623 = vst [vmem:[%s8883_s26 + $0x3a8] sm:$0xf] %v622_v42  ;;  %625 = vst [vmem:[%s8883_s26 + $0x3ac] sm:$0xf] %v624_v43  ;;  %v626_v44 = vld [vmem:[%s8879_s25 + $0xec0] sm:$0xf] }
  0xb1   : > { %v628_v45 = vld [vmem:[%s8879_s25 + $0xed0] sm:$0xf]  ;;  %v630_v46 = vld [vmem:[%s8879_s25 + $0xee0] sm:$0xf]  ;;  %627 = vst [vmem:[%s8883_s26 + $0x3b0] sm:$0xf] %v626_v44 }
  0xb2   : > { %629 = vst [vmem:[%s8883_s26 + $0x3b4] sm:$0xf] %v628_v45  ;;  %631 = vst [vmem:[%s8883_s26 + $0x3b8] sm:$0xf] %v630_v46  ;;  %v632_v47 = vld [vmem:[%s8879_s25 + $0xef0] sm:$0xf] }
  0xb3   : > { %v634_v48 = vld [vmem:[%s8879_s25 + $0xf00] sm:$0xf]  ;;  %v636_v49 = vld [vmem:[%s8879_s25 + $0xf10] sm:$0xf]  ;;  %633 = vst [vmem:[%s8883_s26 + $0x3bc] sm:$0xf] %v632_v47 }
  0xb4   : > { %635 = vst [vmem:[%s8883_s26 + $0x3c0] sm:$0xf] %v634_v48  ;;  %637 = vst [vmem:[%s8883_s26 + $0x3c4] sm:$0xf] %v636_v49  ;;  %v638_v50 = vld [vmem:[%s8879_s25 + $0xf20] sm:$0xf] }
  0xb5   : > { %v640_v51 = vld [vmem:[%s8879_s25 + $0xf30] sm:$0xf]  ;;  %v642_v52 = vld [vmem:[%s8879_s25 + $0xf40] sm:$0xf]  ;;  %639 = vst [vmem:[%s8883_s26 + $0x3c8] sm:$0xf] %v638_v50 }
  0xb6   : > { %641 = vst [vmem:[%s8883_s26 + $0x3cc] sm:$0xf] %v640_v51  ;;  %643 = vst [vmem:[%s8883_s26 + $0x3d0] sm:$0xf] %v642_v52  ;;  %v644_v53 = vld [vmem:[%s8879_s25 + $0xf50] sm:$0xf] }
  0xb7   : > { %v646_v54 = vld [vmem:[%s8879_s25 + $0xf60] sm:$0xf]  ;;  %v648_v55 = vld [vmem:[%s8879_s25 + $0xf70] sm:$0xf]  ;;  %645 = vst [vmem:[%s8883_s26 + $0x3d4] sm:$0xf] %v644_v53 }
  0xb8   : > { %647 = vst [vmem:[%s8883_s26 + $0x3d8] sm:$0xf] %v646_v54  ;;  %649 = vst [vmem:[%s8883_s26 + $0x3dc] sm:$0xf] %v648_v55  ;;  %v650_v56 = vld [vmem:[%s8879_s25 + $0xf80] sm:$0xf] }
  0xb9   : > { %v652_v57 = vld [vmem:[%s8879_s25 + $0xf90] sm:$0xf]  ;;  %v654_v58 = vld [vmem:[%s8879_s25 + $0xfa0] sm:$0xf]  ;;  %651 = vst [vmem:[%s8883_s26 + $0x3e0] sm:$0xf] %v650_v56 }
  0xba   : > { %653 = vst [vmem:[%s8883_s26 + $0x3e4] sm:$0xf] %v652_v57  ;;  %655 = vst [vmem:[%s8883_s26 + $0x3e8] sm:$0xf] %v654_v58  ;;  %v656_v59 = vld [vmem:[%s8879_s25 + $0xfb0] sm:$0xf] }
  0xbb   : > { %v658_v60 = vld [vmem:[%s8879_s25 + $0xfc0] sm:$0xf]  ;;  %v660_v61 = vld [vmem:[%s8879_s25 + $0xfd0] sm:$0xf]  ;;  %657 = vst [vmem:[%s8883_s26 + $0x3ec] sm:$0xf] %v656_v59 }
  0xbc   : > { %659 = vst [vmem:[%s8883_s26 + $0x3f0] sm:$0xf] %v658_v60  ;;  %661 = vst [vmem:[%s8883_s26 + $0x3f4] sm:$0xf] %v660_v61  ;;  %v662_v62 = vld [vmem:[%s8879_s25 + $0xfe0] sm:$0xf] }
  0xbd   : > { %v664_v63 = vld [vmem:[%s8879_s25 + $0xff0] sm:$0xf]  ;;  %v666_v0 = vld [vmem:[%s8879_s25 + $0x1000] sm:$0xf]  ;;  %663 = vst [vmem:[%s8883_s26 + $0x3f8] sm:$0xf] %v662_v62 }
  0xbe   : > { %665 = vst [vmem:[%s8883_s26 + $0x3fc] sm:$0xf] %v664_v63  ;;  %667 = vst [vmem:[%s8883_s26 + $0x400] sm:$0xf] %v666_v0  ;;  %v668_v1 = vld [vmem:[%s8879_s25 + $0x1010] sm:$0xf] }
  0xbf   : > { %v670_v2 = vld [vmem:[%s8879_s25 + $0x1020] sm:$0xf]  ;;  %v672_v3 = vld [vmem:[%s8879_s25 + $0x1030] sm:$0xf]  ;;  %669 = vst [vmem:[%s8883_s26 + $0x404] sm:$0xf] %v668_v1 }
  0xc0   : > { %671 = vst [vmem:[%s8883_s26 + $0x408] sm:$0xf] %v670_v2  ;;  %673 = vst [vmem:[%s8883_s26 + $0x40c] sm:$0xf] %v672_v3  ;;  %v674_v4 = vld [vmem:[%s8879_s25 + $0x1040] sm:$0xf] }
  0xc1   : > { %v676_v5 = vld [vmem:[%s8879_s25 + $0x1050] sm:$0xf]  ;;  %v678_v6 = vld [vmem:[%s8879_s25 + $0x1060] sm:$0xf]  ;;  %675 = vst [vmem:[%s8883_s26 + $0x410] sm:$0xf] %v674_v4 }
  0xc2   : > { %677 = vst [vmem:[%s8883_s26 + $0x414] sm:$0xf] %v676_v5  ;;  %679 = vst [vmem:[%s8883_s26 + $0x418] sm:$0xf] %v678_v6  ;;  %v680_v7 = vld [vmem:[%s8879_s25 + $0x1070] sm:$0xf] }
  0xc3   : > { %v682_v8 = vld [vmem:[%s8879_s25 + $0x1080] sm:$0xf]  ;;  %v684_v9 = vld [vmem:[%s8879_s25 + $0x1090] sm:$0xf]  ;;  %681 = vst [vmem:[%s8883_s26 + $0x41c] sm:$0xf] %v680_v7 }
  0xc4   : > { %683 = vst [vmem:[%s8883_s26 + $0x420] sm:$0xf] %v682_v8  ;;  %685 = vst [vmem:[%s8883_s26 + $0x424] sm:$0xf] %v684_v9  ;;  %v686_v10 = vld [vmem:[%s8879_s25 + $0x10a0] sm:$0xf] }
  0xc5   : > { %v688_v11 = vld [vmem:[%s8879_s25 + $0x10b0] sm:$0xf]  ;;  %v690_v12 = vld [vmem:[%s8879_s25 + $0x10c0] sm:$0xf]  ;;  %687 = vst [vmem:[%s8883_s26 + $0x428] sm:$0xf] %v686_v10 }
  0xc6   : > { %689 = vst [vmem:[%s8883_s26 + $0x42c] sm:$0xf] %v688_v11  ;;  %691 = vst [vmem:[%s8883_s26 + $0x430] sm:$0xf] %v690_v12  ;;  %v692_v13 = vld [vmem:[%s8879_s25 + $0x10d0] sm:$0xf] }
  0xc7   : > { %v694_v14 = vld [vmem:[%s8879_s25 + $0x10e0] sm:$0xf]  ;;  %v696_v15 = vld [vmem:[%s8879_s25 + $0x10f0] sm:$0xf]  ;;  %693 = vst [vmem:[%s8883_s26 + $0x434] sm:$0xf] %v692_v13 }
  0xc8   : > { %695 = vst [vmem:[%s8883_s26 + $0x438] sm:$0xf] %v694_v14  ;;  %697 = vst [vmem:[%s8883_s26 + $0x43c] sm:$0xf] %v696_v15  ;;  %v698_v16 = vld [vmem:[%s8879_s25 + $0x1100] sm:$0xf] }
  0xc9   : > { %v700_v17 = vld [vmem:[%s8879_s25 + $0x1110] sm:$0xf]  ;;  %v702_v18 = vld [vmem:[%s8879_s25 + $0x1120] sm:$0xf]  ;;  %699 = vst [vmem:[%s8883_s26 + $0x440] sm:$0xf] %v698_v16 }
  0xca   : > { %701 = vst [vmem:[%s8883_s26 + $0x444] sm:$0xf] %v700_v17  ;;  %703 = vst [vmem:[%s8883_s26 + $0x448] sm:$0xf] %v702_v18  ;;  %v704_v19 = vld [vmem:[%s8879_s25 + $0x1130] sm:$0xf] }
  0xcb   : > { %v706_v20 = vld [vmem:[%s8879_s25 + $0x1140] sm:$0xf]  ;;  %v708_v21 = vld [vmem:[%s8879_s25 + $0x1150] sm:$0xf]  ;;  %705 = vst [vmem:[%s8883_s26 + $0x44c] sm:$0xf] %v704_v19 }
  0xcc   : > { %707 = vst [vmem:[%s8883_s26 + $0x450] sm:$0xf] %v706_v20  ;;  %709 = vst [vmem:[%s8883_s26 + $0x454] sm:$0xf] %v708_v21  ;;  %v710_v22 = vld [vmem:[%s8879_s25 + $0x1160] sm:$0xf] }
  0xcd   : > { %v712_v23 = vld [vmem:[%s8879_s25 + $0x1170] sm:$0xf]  ;;  %v714_v24 = vld [vmem:[%s8879_s25 + $0x1180] sm:$0xf]  ;;  %711 = vst [vmem:[%s8883_s26 + $0x458] sm:$0xf] %v710_v22 }
  0xce   : > { %713 = vst [vmem:[%s8883_s26 + $0x45c] sm:$0xf] %v712_v23  ;;  %715 = vst [vmem:[%s8883_s26 + $0x460] sm:$0xf] %v714_v24  ;;  %v716_v25 = vld [vmem:[%s8879_s25 + $0x1190] sm:$0xf] }
  0xcf   : > { %v718_v26 = vld [vmem:[%s8879_s25 + $0x11a0] sm:$0xf]  ;;  %v720_v27 = vld [vmem:[%s8879_s25 + $0x11b0] sm:$0xf]  ;;  %717 = vst [vmem:[%s8883_s26 + $0x464] sm:$0xf] %v716_v25 }
  0xd0   : > { %719 = vst [vmem:[%s8883_s26 + $0x468] sm:$0xf] %v718_v26  ;;  %721 = vst [vmem:[%s8883_s26 + $0x46c] sm:$0xf] %v720_v27  ;;  %v722_v28 = vld [vmem:[%s8879_s25 + $0x11c0] sm:$0xf] }
  0xd1   : > { %v724_v29 = vld [vmem:[%s8879_s25 + $0x11d0] sm:$0xf]  ;;  %v726_v30 = vld [vmem:[%s8879_s25 + $0x11e0] sm:$0xf]  ;;  %723 = vst [vmem:[%s8883_s26 + $0x470] sm:$0xf] %v722_v28 }
  0xd2   : > { %725 = vst [vmem:[%s8883_s26 + $0x474] sm:$0xf] %v724_v29  ;;  %727 = vst [vmem:[%s8883_s26 + $0x478] sm:$0xf] %v726_v30  ;;  %v728_v31 = vld [vmem:[%s8879_s25 + $0x11f0] sm:$0xf] }
  0xd3   : > { %v730_v32 = vld [vmem:[%s8879_s25 + $0x1200] sm:$0xf]  ;;  %v732_v33 = vld [vmem:[%s8879_s25 + $0x1210] sm:$0xf]  ;;  %729 = vst [vmem:[%s8883_s26 + $0x47c] sm:$0xf] %v728_v31 }
  0xd4   : > { %731 = vst [vmem:[%s8883_s26 + $0x480] sm:$0xf] %v730_v32  ;;  %733 = vst [vmem:[%s8883_s26 + $0x484] sm:$0xf] %v732_v33  ;;  %v734_v34 = vld [vmem:[%s8879_s25 + $0x1220] sm:$0xf] }
  0xd5   : > { %v736_v35 = vld [vmem:[%s8879_s25 + $0x1230] sm:$0xf]  ;;  %v738_v36 = vld [vmem:[%s8879_s25 + $0x1240] sm:$0xf]  ;;  %735 = vst [vmem:[%s8883_s26 + $0x488] sm:$0xf] %v734_v34 }
  0xd6   : > { %737 = vst [vmem:[%s8883_s26 + $0x48c] sm:$0xf] %v736_v35  ;;  %739 = vst [vmem:[%s8883_s26 + $0x490] sm:$0xf] %v738_v36  ;;  %v740_v37 = vld [vmem:[%s8879_s25 + $0x1250] sm:$0xf] }
  0xd7   : > { %v742_v38 = vld [vmem:[%s8879_s25 + $0x1260] sm:$0xf]  ;;  %v744_v39 = vld [vmem:[%s8879_s25 + $0x1270] sm:$0xf]  ;;  %741 = vst [vmem:[%s8883_s26 + $0x494] sm:$0xf] %v740_v37 }
  0xd8   : > { %743 = vst [vmem:[%s8883_s26 + $0x498] sm:$0xf] %v742_v38  ;;  %745 = vst [vmem:[%s8883_s26 + $0x49c] sm:$0xf] %v744_v39  ;;  %v746_v40 = vld [vmem:[%s8879_s25 + $0x1280] sm:$0xf] }
  0xd9   : > { %v748_v41 = vld [vmem:[%s8879_s25 + $0x1290] sm:$0xf]  ;;  %v750_v42 = vld [vmem:[%s8879_s25 + $0x12a0] sm:$0xf]  ;;  %747 = vst [vmem:[%s8883_s26 + $0x4a0] sm:$0xf] %v746_v40 }
  0xda   : > { %749 = vst [vmem:[%s8883_s26 + $0x4a4] sm:$0xf] %v748_v41  ;;  %751 = vst [vmem:[%s8883_s26 + $0x4a8] sm:$0xf] %v750_v42  ;;  %v752_v43 = vld [vmem:[%s8879_s25 + $0x12b0] sm:$0xf] }
  0xdb   : > { %v754_v44 = vld [vmem:[%s8879_s25 + $0x12c0] sm:$0xf]  ;;  %v756_v45 = vld [vmem:[%s8879_s25 + $0x12d0] sm:$0xf]  ;;  %753 = vst [vmem:[%s8883_s26 + $0x4ac] sm:$0xf] %v752_v43 }
  0xdc   : > { %755 = vst [vmem:[%s8883_s26 + $0x4b0] sm:$0xf] %v754_v44  ;;  %757 = vst [vmem:[%s8883_s26 + $0x4b4] sm:$0xf] %v756_v45  ;;  %v758_v46 = vld [vmem:[%s8879_s25 + $0x12e0] sm:$0xf] }
  0xdd   : > { %v760_v47 = vld [vmem:[%s8879_s25 + $0x12f0] sm:$0xf]  ;;  %v762_v48 = vld [vmem:[%s8879_s25 + $0x1300] sm:$0xf]  ;;  %759 = vst [vmem:[%s8883_s26 + $0x4b8] sm:$0xf] %v758_v46 }
  0xde   : > { %761 = vst [vmem:[%s8883_s26 + $0x4bc] sm:$0xf] %v760_v47  ;;  %763 = vst [vmem:[%s8883_s26 + $0x4c0] sm:$0xf] %v762_v48  ;;  %v764_v49 = vld [vmem:[%s8879_s25 + $0x1310] sm:$0xf] }
  0xdf   : > { %v766_v50 = vld [vmem:[%s8879_s25 + $0x1320] sm:$0xf]  ;;  %v768_v51 = vld [vmem:[%s8879_s25 + $0x1330] sm:$0xf]  ;;  %765 = vst [vmem:[%s8883_s26 + $0x4c4] sm:$0xf] %v764_v49 }
  0xe0   : > { %767 = vst [vmem:[%s8883_s26 + $0x4c8] sm:$0xf] %v766_v50  ;;  %769 = vst [vmem:[%s8883_s26 + $0x4cc] sm:$0xf] %v768_v51  ;;  %v770_v52 = vld [vmem:[%s8879_s25 + $0x1340] sm:$0xf] }
  0xe1   : > { %v772_v53 = vld [vmem:[%s8879_s25 + $0x1350] sm:$0xf]  ;;  %v774_v54 = vld [vmem:[%s8879_s25 + $0x1360] sm:$0xf]  ;;  %771 = vst [vmem:[%s8883_s26 + $0x4d0] sm:$0xf] %v770_v52 }
  0xe2   : > { %773 = vst [vmem:[%s8883_s26 + $0x4d4] sm:$0xf] %v772_v53  ;;  %775 = vst [vmem:[%s8883_s26 + $0x4d8] sm:$0xf] %v774_v54  ;;  %v776_v55 = vld [vmem:[%s8879_s25 + $0x1370] sm:$0xf] }
  0xe3   : > { %v778_v56 = vld [vmem:[%s8879_s25 + $0x1380] sm:$0xf]  ;;  %v780_v57 = vld [vmem:[%s8879_s25 + $0x1390] sm:$0xf]  ;;  %777 = vst [vmem:[%s8883_s26 + $0x4dc] sm:$0xf] %v776_v55 }
  0xe4   : > { %779 = vst [vmem:[%s8883_s26 + $0x4e0] sm:$0xf] %v778_v56  ;;  %781 = vst [vmem:[%s8883_s26 + $0x4e4] sm:$0xf] %v780_v57  ;;  %v782_v58 = vld [vmem:[%s8879_s25 + $0x13a0] sm:$0xf] }
  0xe5   : > { %v784_v59 = vld [vmem:[%s8879_s25 + $0x13b0] sm:$0xf]  ;;  %v786_v60 = vld [vmem:[%s8879_s25 + $0x13c0] sm:$0xf]  ;;  %783 = vst [vmem:[%s8883_s26 + $0x4e8] sm:$0xf] %v782_v58 }
  0xe6   : > { %785 = vst [vmem:[%s8883_s26 + $0x4ec] sm:$0xf] %v784_v59  ;;  %787 = vst [vmem:[%s8883_s26 + $0x4f0] sm:$0xf] %v786_v60  ;;  %v788_v61 = vld [vmem:[%s8879_s25 + $0x13d0] sm:$0xf] }
  0xe7   : > { %v790_v62 = vld [vmem:[%s8879_s25 + $0x13e0] sm:$0xf]  ;;  %v792_v63 = vld [vmem:[%s8879_s25 + $0x13f0] sm:$0xf]  ;;  %789 = vst [vmem:[%s8883_s26 + $0x4f4] sm:$0xf] %v788_v61 }
  0xe8   : > { %791 = vst [vmem:[%s8883_s26 + $0x4f8] sm:$0xf] %v790_v62  ;;  %793 = vst [vmem:[%s8883_s26 + $0x4fc] sm:$0xf] %v792_v63  ;;  %v794_v0 = vld [vmem:[%s8879_s25 + $0x1400] sm:$0xf] }
  0xe9   : > { %v796_v1 = vld [vmem:[%s8879_s25 + $0x1410] sm:$0xf]  ;;  %v798_v2 = vld [vmem:[%s8879_s25 + $0x1420] sm:$0xf]  ;;  %795 = vst [vmem:[%s8883_s26 + $0x500] sm:$0xf] %v794_v0 }
  0xea   : > { %797 = vst [vmem:[%s8883_s26 + $0x504] sm:$0xf] %v796_v1  ;;  %799 = vst [vmem:[%s8883_s26 + $0x508] sm:$0xf] %v798_v2  ;;  %v800_v3 = vld [vmem:[%s8879_s25 + $0x1430] sm:$0xf] }
  0xeb   : > { %v802_v4 = vld [vmem:[%s8879_s25 + $0x1440] sm:$0xf]  ;;  %v804_v5 = vld [vmem:[%s8879_s25 + $0x1450] sm:$0xf]  ;;  %801 = vst [vmem:[%s8883_s26 + $0x50c] sm:$0xf] %v800_v3 }
  0xec   : > { %803 = vst [vmem:[%s8883_s26 + $0x510] sm:$0xf] %v802_v4  ;;  %805 = vst [vmem:[%s8883_s26 + $0x514] sm:$0xf] %v804_v5  ;;  %v806_v6 = vld [vmem:[%s8879_s25 + $0x1460] sm:$0xf] }
  0xed   : > { %v808_v7 = vld [vmem:[%s8879_s25 + $0x1470] sm:$0xf]  ;;  %v810_v8 = vld [vmem:[%s8879_s25 + $0x1480] sm:$0xf]  ;;  %807 = vst [vmem:[%s8883_s26 + $0x518] sm:$0xf] %v806_v6 }
  0xee   : > { %809 = vst [vmem:[%s8883_s26 + $0x51c] sm:$0xf] %v808_v7  ;;  %811 = vst [vmem:[%s8883_s26 + $0x520] sm:$0xf] %v810_v8  ;;  %v812_v9 = vld [vmem:[%s8879_s25 + $0x1490] sm:$0xf] }
  0xef   : > { %v814_v10 = vld [vmem:[%s8879_s25 + $0x14a0] sm:$0xf]  ;;  %v816_v11 = vld [vmem:[%s8879_s25 + $0x14b0] sm:$0xf]  ;;  %813 = vst [vmem:[%s8883_s26 + $0x524] sm:$0xf] %v812_v9 }
  0xf0   : > { %815 = vst [vmem:[%s8883_s26 + $0x528] sm:$0xf] %v814_v10  ;;  %817 = vst [vmem:[%s8883_s26 + $0x52c] sm:$0xf] %v816_v11  ;;  %v818_v12 = vld [vmem:[%s8879_s25 + $0x14c0] sm:$0xf] }
  0xf1   : > { %v820_v13 = vld [vmem:[%s8879_s25 + $0x14d0] sm:$0xf]  ;;  %v822_v14 = vld [vmem:[%s8879_s25 + $0x14e0] sm:$0xf]  ;;  %819 = vst [vmem:[%s8883_s26 + $0x530] sm:$0xf] %v818_v12 }
  0xf2   : > { %821 = vst [vmem:[%s8883_s26 + $0x534] sm:$0xf] %v820_v13  ;;  %823 = vst [vmem:[%s8883_s26 + $0x538] sm:$0xf] %v822_v14  ;;  %v824_v15 = vld [vmem:[%s8879_s25 + $0x14f0] sm:$0xf] }
  0xf3   : > { %v826_v16 = vld [vmem:[%s8879_s25 + $0x1500] sm:$0xf]  ;;  %v828_v17 = vld [vmem:[%s8879_s25 + $0x1510] sm:$0xf]  ;;  %825 = vst [vmem:[%s8883_s26 + $0x53c] sm:$0xf] %v824_v15 }
  0xf4   : > { %827 = vst [vmem:[%s8883_s26 + $0x540] sm:$0xf] %v826_v16  ;;  %829 = vst [vmem:[%s8883_s26 + $0x544] sm:$0xf] %v828_v17  ;;  %v830_v18 = vld [vmem:[%s8879_s25 + $0x1520] sm:$0xf] }
  0xf5   : > { %v832_v19 = vld [vmem:[%s8879_s25 + $0x1530] sm:$0xf]  ;;  %v834_v20 = vld [vmem:[%s8879_s25 + $0x1540] sm:$0xf]  ;;  %831 = vst [vmem:[%s8883_s26 + $0x548] sm:$0xf] %v830_v18 }
  0xf6   : > { %833 = vst [vmem:[%s8883_s26 + $0x54c] sm:$0xf] %v832_v19  ;;  %835 = vst [vmem:[%s8883_s26 + $0x550] sm:$0xf] %v834_v20  ;;  %v836_v21 = vld [vmem:[%s8879_s25 + $0x1550] sm:$0xf] }
  0xf7   : > { %v838_v22 = vld [vmem:[%s8879_s25 + $0x1560] sm:$0xf]  ;;  %v840_v23 = vld [vmem:[%s8879_s25 + $0x1570] sm:$0xf]  ;;  %837 = vst [vmem:[%s8883_s26 + $0x554] sm:$0xf] %v836_v21 }
  0xf8   : > { %839 = vst [vmem:[%s8883_s26 + $0x558] sm:$0xf] %v838_v22  ;;  %841 = vst [vmem:[%s8883_s26 + $0x55c] sm:$0xf] %v840_v23  ;;  %v842_v24 = vld [vmem:[%s8879_s25 + $0x1580] sm:$0xf] }
  0xf9   : > { %v844_v25 = vld [vmem:[%s8879_s25 + $0x1590] sm:$0xf]  ;;  %v846_v26 = vld [vmem:[%s8879_s25 + $0x15a0] sm:$0xf]  ;;  %843 = vst [vmem:[%s8883_s26 + $0x560] sm:$0xf] %v842_v24 }
  0xfa   : > { %845 = vst [vmem:[%s8883_s26 + $0x564] sm:$0xf] %v844_v25  ;;  %847 = vst [vmem:[%s8883_s26 + $0x568] sm:$0xf] %v846_v26  ;;  %v848_v27 = vld [vmem:[%s8879_s25 + $0x15b0] sm:$0xf] }
  0xfb   : > { %v850_v28 = vld [vmem:[%s8879_s25 + $0x15c0] sm:$0xf]  ;;  %v852_v29 = vld [vmem:[%s8879_s25 + $0x15d0] sm:$0xf]  ;;  %849 = vst [vmem:[%s8883_s26 + $0x56c] sm:$0xf] %v848_v27 }
  0xfc   : > { %851 = vst [vmem:[%s8883_s26 + $0x570] sm:$0xf] %v850_v28  ;;  %853 = vst [vmem:[%s8883_s26 + $0x574] sm:$0xf] %v852_v29  ;;  %v854_v30 = vld [vmem:[%s8879_s25 + $0x15e0] sm:$0xf] }
  0xfd   : > { %v856_v31 = vld [vmem:[%s8879_s25 + $0x15f0] sm:$0xf]  ;;  %v858_v32 = vld [vmem:[%s8879_s25 + $0x1600] sm:$0xf]  ;;  %855 = vst [vmem:[%s8883_s26 + $0x578] sm:$0xf] %v854_v30 }
  0xfe   : > { %857 = vst [vmem:[%s8883_s26 + $0x57c] sm:$0xf] %v856_v31  ;;  %859 = vst [vmem:[%s8883_s26 + $0x580] sm:$0xf] %v858_v32  ;;  %v860_v33 = vld [vmem:[%s8879_s25 + $0x1610] sm:$0xf] }
  0xff   : > { %v862_v34 = vld [vmem:[%s8879_s25 + $0x1620] sm:$0xf]  ;;  %v864_v35 = vld [vmem:[%s8879_s25 + $0x1630] sm:$0xf]  ;;  %861 = vst [vmem:[%s8883_s26 + $0x584] sm:$0xf] %v860_v33 }
 0x100   : > { %863 = vst [vmem:[%s8883_s26 + $0x588] sm:$0xf] %v862_v34  ;;  %865 = vst [vmem:[%s8883_s26 + $0x58c] sm:$0xf] %v864_v35  ;;  %v866_v36 = vld [vmem:[%s8879_s25 + $0x1640] sm:$0xf] }
 0x101   : > { %v868_v37 = vld [vmem:[%s8879_s25 + $0x1650] sm:$0xf]  ;;  %v870_v38 = vld [vmem:[%s8879_s25 + $0x1660] sm:$0xf]  ;;  %867 = vst [vmem:[%s8883_s26 + $0x590] sm:$0xf] %v866_v36 }
 0x102   : > { %869 = vst [vmem:[%s8883_s26 + $0x594] sm:$0xf] %v868_v37  ;;  %871 = vst [vmem:[%s8883_s26 + $0x598] sm:$0xf] %v870_v38  ;;  %v872_v39 = vld [vmem:[%s8879_s25 + $0x1670] sm:$0xf] }
 0x103   : > { %v874_v40 = vld [vmem:[%s8879_s25 + $0x1680] sm:$0xf]  ;;  %v876_v41 = vld [vmem:[%s8879_s25 + $0x1690] sm:$0xf]  ;;  %873 = vst [vmem:[%s8883_s26 + $0x59c] sm:$0xf] %v872_v39 }
 0x104   : > { %875 = vst [vmem:[%s8883_s26 + $0x5a0] sm:$0xf] %v874_v40  ;;  %877 = vst [vmem:[%s8883_s26 + $0x5a4] sm:$0xf] %v876_v41  ;;  %v878_v42 = vld [vmem:[%s8879_s25 + $0x16a0] sm:$0xf] }
 0x105   : > { %v880_v43 = vld [vmem:[%s8879_s25 + $0x16b0] sm:$0xf]  ;;  %v882_v44 = vld [vmem:[%s8879_s25 + $0x16c0] sm:$0xf]  ;;  %879 = vst [vmem:[%s8883_s26 + $0x5a8] sm:$0xf] %v878_v42 }
 0x106   : > { %881 = vst [vmem:[%s8883_s26 + $0x5ac] sm:$0xf] %v880_v43  ;;  %883 = vst [vmem:[%s8883_s26 + $0x5b0] sm:$0xf] %v882_v44  ;;  %v884_v45 = vld [vmem:[%s8879_s25 + $0x16d0] sm:$0xf] }
 0x107   : > { %v886_v46 = vld [vmem:[%s8879_s25 + $0x16e0] sm:$0xf]  ;;  %v888_v47 = vld [vmem:[%s8879_s25 + $0x16f0] sm:$0xf]  ;;  %885 = vst [vmem:[%s8883_s26 + $0x5b4] sm:$0xf] %v884_v45 }
 0x108   : > { %887 = vst [vmem:[%s8883_s26 + $0x5b8] sm:$0xf] %v886_v46  ;;  %889 = vst [vmem:[%s8883_s26 + $0x5bc] sm:$0xf] %v888_v47  ;;  %v890_v48 = vld [vmem:[%s8879_s25 + $0x1700] sm:$0xf] }
 0x109   : > { %v892_v49 = vld [vmem:[%s8879_s25 + $0x1710] sm:$0xf]  ;;  %v894_v50 = vld [vmem:[%s8879_s25 + $0x1720] sm:$0xf]  ;;  %891 = vst [vmem:[%s8883_s26 + $0x5c0] sm:$0xf] %v890_v48 }
 0x10a   : > { %893 = vst [vmem:[%s8883_s26 + $0x5c4] sm:$0xf] %v892_v49  ;;  %895 = vst [vmem:[%s8883_s26 + $0x5c8] sm:$0xf] %v894_v50  ;;  %v896_v51 = vld [vmem:[%s8879_s25 + $0x1730] sm:$0xf] }
 0x10b   : > { %v898_v52 = vld [vmem:[%s8879_s25 + $0x1740] sm:$0xf]  ;;  %v900_v53 = vld [vmem:[%s8879_s25 + $0x1750] sm:$0xf]  ;;  %897 = vst [vmem:[%s8883_s26 + $0x5cc] sm:$0xf] %v896_v51 }
 0x10c   : > { %899 = vst [vmem:[%s8883_s26 + $0x5d0] sm:$0xf] %v898_v52  ;;  %901 = vst [vmem:[%s8883_s26 + $0x5d4] sm:$0xf] %v900_v53  ;;  %v902_v54 = vld [vmem:[%s8879_s25 + $0x1760] sm:$0xf] }
 0x10d   : > { %v904_v55 = vld [vmem:[%s8879_s25 + $0x1770] sm:$0xf]  ;;  %v906_v56 = vld [vmem:[%s8879_s25 + $0x1780] sm:$0xf]  ;;  %903 = vst [vmem:[%s8883_s26 + $0x5d8] sm:$0xf] %v902_v54 }
 0x10e   : > { %905 = vst [vmem:[%s8883_s26 + $0x5dc] sm:$0xf] %v904_v55  ;;  %907 = vst [vmem:[%s8883_s26 + $0x5e0] sm:$0xf] %v906_v56  ;;  %v908_v57 = vld [vmem:[%s8879_s25 + $0x1790] sm:$0xf] }
 0x10f   : > { %v910_v58 = vld [vmem:[%s8879_s25 + $0x17a0] sm:$0xf]  ;;  %v912_v59 = vld [vmem:[%s8879_s25 + $0x17b0] sm:$0xf]  ;;  %909 = vst [vmem:[%s8883_s26 + $0x5e4] sm:$0xf] %v908_v57 }
 0x110   : > { %911 = vst [vmem:[%s8883_s26 + $0x5e8] sm:$0xf] %v910_v58  ;;  %913 = vst [vmem:[%s8883_s26 + $0x5ec] sm:$0xf] %v912_v59  ;;  %v914_v60 = vld [vmem:[%s8879_s25 + $0x17c0] sm:$0xf] }
 0x111   : > { %v916_v61 = vld [vmem:[%s8879_s25 + $0x17d0] sm:$0xf]  ;;  %v918_v62 = vld [vmem:[%s8879_s25 + $0x17e0] sm:$0xf]  ;;  %915 = vst [vmem:[%s8883_s26 + $0x5f0] sm:$0xf] %v914_v60 }
 0x112   : > { %917 = vst [vmem:[%s8883_s26 + $0x5f4] sm:$0xf] %v916_v61  ;;  %919 = vst [vmem:[%s8883_s26 + $0x5f8] sm:$0xf] %v918_v62  ;;  %v920_v63 = vld [vmem:[%s8879_s25 + $0x17f0] sm:$0xf] }
 0x113   : > { %v922_v0 = vld [vmem:[%s8879_s25 + $0x1800] sm:$0xf]  ;;  %v924_v1 = vld [vmem:[%s8879_s25 + $0x1810] sm:$0xf]  ;;  %921 = vst [vmem:[%s8883_s26 + $0x5fc] sm:$0xf] %v920_v63 }
 0x114   : > { %923 = vst [vmem:[%s8883_s26 + $0x600] sm:$0xf] %v922_v0  ;;  %925 = vst [vmem:[%s8883_s26 + $0x604] sm:$0xf] %v924_v1  ;;  %v926_v2 = vld [vmem:[%s8879_s25 + $0x1820] sm:$0xf] }
 0x115   : > { %v928_v3 = vld [vmem:[%s8879_s25 + $0x1830] sm:$0xf]  ;;  %v930_v4 = vld [vmem:[%s8879_s25 + $0x1840] sm:$0xf]  ;;  %927 = vst [vmem:[%s8883_s26 + $0x608] sm:$0xf] %v926_v2 }
 0x116   : > { %929 = vst [vmem:[%s8883_s26 + $0x60c] sm:$0xf] %v928_v3  ;;  %931 = vst [vmem:[%s8883_s26 + $0x610] sm:$0xf] %v930_v4  ;;  %v932_v5 = vld [vmem:[%s8879_s25 + $0x1850] sm:$0xf] }
 0x117   : > { %v934_v6 = vld [vmem:[%s8879_s25 + $0x1860] sm:$0xf]  ;;  %v936_v7 = vld [vmem:[%s8879_s25 + $0x1870] sm:$0xf]  ;;  %933 = vst [vmem:[%s8883_s26 + $0x614] sm:$0xf] %v932_v5 }
 0x118   : > { %935 = vst [vmem:[%s8883_s26 + $0x618] sm:$0xf] %v934_v6  ;;  %937 = vst [vmem:[%s8883_s26 + $0x61c] sm:$0xf] %v936_v7  ;;  %v938_v8 = vld [vmem:[%s8879_s25 + $0x1880] sm:$0xf] }
 0x119   : > { %v940_v9 = vld [vmem:[%s8879_s25 + $0x1890] sm:$0xf]  ;;  %v942_v10 = vld [vmem:[%s8879_s25 + $0x18a0] sm:$0xf]  ;;  %939 = vst [vmem:[%s8883_s26 + $0x620] sm:$0xf] %v938_v8 }
 0x11a   : > { %941 = vst [vmem:[%s8883_s26 + $0x624] sm:$0xf] %v940_v9  ;;  %943 = vst [vmem:[%s8883_s26 + $0x628] sm:$0xf] %v942_v10  ;;  %v944_v11 = vld [vmem:[%s8879_s25 + $0x18b0] sm:$0xf] }
 0x11b   : > { %v946_v12 = vld [vmem:[%s8879_s25 + $0x18c0] sm:$0xf]  ;;  %v948_v13 = vld [vmem:[%s8879_s25 + $0x18d0] sm:$0xf]  ;;  %945 = vst [vmem:[%s8883_s26 + $0x62c] sm:$0xf] %v944_v11 }
 0x11c   : > { %947 = vst [vmem:[%s8883_s26 + $0x630] sm:$0xf] %v946_v12  ;;  %949 = vst [vmem:[%s8883_s26 + $0x634] sm:$0xf] %v948_v13  ;;  %v950_v14 = vld [vmem:[%s8879_s25 + $0x18e0] sm:$0xf] }
 0x11d   : > { %v952_v15 = vld [vmem:[%s8879_s25 + $0x18f0] sm:$0xf]  ;;  %v954_v16 = vld [vmem:[%s8879_s25 + $0x1900] sm:$0xf]  ;;  %951 = vst [vmem:[%s8883_s26 + $0x638] sm:$0xf] %v950_v14 }
 0x11e   : > { %953 = vst [vmem:[%s8883_s26 + $0x63c] sm:$0xf] %v952_v15  ;;  %955 = vst [vmem:[%s8883_s26 + $0x640] sm:$0xf] %v954_v16  ;;  %v956_v17 = vld [vmem:[%s8879_s25 + $0x1910] sm:$0xf] }
 0x11f   : > { %v958_v18 = vld [vmem:[%s8879_s25 + $0x1920] sm:$0xf]  ;;  %v960_v19 = vld [vmem:[%s8879_s25 + $0x1930] sm:$0xf]  ;;  %957 = vst [vmem:[%s8883_s26 + $0x644] sm:$0xf] %v956_v17 }
 0x120   : > { %959 = vst [vmem:[%s8883_s26 + $0x648] sm:$0xf] %v958_v18  ;;  %961 = vst [vmem:[%s8883_s26 + $0x64c] sm:$0xf] %v960_v19  ;;  %v962_v20 = vld [vmem:[%s8879_s25 + $0x1940] sm:$0xf] }
 0x121   : > { %v964_v21 = vld [vmem:[%s8879_s25 + $0x1950] sm:$0xf]  ;;  %v966_v22 = vld [vmem:[%s8879_s25 + $0x1960] sm:$0xf]  ;;  %963 = vst [vmem:[%s8883_s26 + $0x650] sm:$0xf] %v962_v20 }
 0x122   : > { %965 = vst [vmem:[%s8883_s26 + $0x654] sm:$0xf] %v964_v21  ;;  %967 = vst [vmem:[%s8883_s26 + $0x658] sm:$0xf] %v966_v22  ;;  %v968_v23 = vld [vmem:[%s8879_s25 + $0x1970] sm:$0xf] }
 0x123   : > { %v970_v24 = vld [vmem:[%s8879_s25 + $0x1980] sm:$0xf]  ;;  %v972_v25 = vld [vmem:[%s8879_s25 + $0x1990] sm:$0xf]  ;;  %969 = vst [vmem:[%s8883_s26 + $0x65c] sm:$0xf] %v968_v23 }
 0x124   : > { %971 = vst [vmem:[%s8883_s26 + $0x660] sm:$0xf] %v970_v24  ;;  %973 = vst [vmem:[%s8883_s26 + $0x664] sm:$0xf] %v972_v25  ;;  %v974_v26 = vld [vmem:[%s8879_s25 + $0x19a0] sm:$0xf] }
 0x125   : > { %v976_v27 = vld [vmem:[%s8879_s25 + $0x19b0] sm:$0xf]  ;;  %v978_v28 = vld [vmem:[%s8879_s25 + $0x19c0] sm:$0xf]  ;;  %975 = vst [vmem:[%s8883_s26 + $0x668] sm:$0xf] %v974_v26 }
 0x126   : > { %977 = vst [vmem:[%s8883_s26 + $0x66c] sm:$0xf] %v976_v27  ;;  %979 = vst [vmem:[%s8883_s26 + $0x670] sm:$0xf] %v978_v28  ;;  %v980_v29 = vld [vmem:[%s8879_s25 + $0x19d0] sm:$0xf] }
 0x127   : > { %v982_v30 = vld [vmem:[%s8879_s25 + $0x19e0] sm:$0xf]  ;;  %v984_v31 = vld [vmem:[%s8879_s25 + $0x19f0] sm:$0xf]  ;;  %981 = vst [vmem:[%s8883_s26 + $0x674] sm:$0xf] %v980_v29 }
 0x128   : > { %983 = vst [vmem:[%s8883_s26 + $0x678] sm:$0xf] %v982_v30  ;;  %985 = vst [vmem:[%s8883_s26 + $0x67c] sm:$0xf] %v984_v31  ;;  %v986_v32 = vld [vmem:[%s8879_s25 + $0x1a00] sm:$0xf] }
 0x129   : > { %v988_v33 = vld [vmem:[%s8879_s25 + $0x1a10] sm:$0xf]  ;;  %v990_v34 = vld [vmem:[%s8879_s25 + $0x1a20] sm:$0xf]  ;;  %987 = vst [vmem:[%s8883_s26 + $0x680] sm:$0xf] %v986_v32 }
 0x12a   : > { %989 = vst [vmem:[%s8883_s26 + $0x684] sm:$0xf] %v988_v33  ;;  %991 = vst [vmem:[%s8883_s26 + $0x688] sm:$0xf] %v990_v34  ;;  %v992_v35 = vld [vmem:[%s8879_s25 + $0x1a30] sm:$0xf] }
 0x12b   : > { %v994_v36 = vld [vmem:[%s8879_s25 + $0x1a40] sm:$0xf]  ;;  %v996_v37 = vld [vmem:[%s8879_s25 + $0x1a50] sm:$0xf]  ;;  %993 = vst [vmem:[%s8883_s26 + $0x68c] sm:$0xf] %v992_v35 }
 0x12c   : > { %995 = vst [vmem:[%s8883_s26 + $0x690] sm:$0xf] %v994_v36  ;;  %997 = vst [vmem:[%s8883_s26 + $0x694] sm:$0xf] %v996_v37  ;;  %v998_v38 = vld [vmem:[%s8879_s25 + $0x1a60] sm:$0xf] }
 0x12d   : > { %v1000_v39 = vld [vmem:[%s8879_s25 + $0x1a70] sm:$0xf]  ;;  %v1002_v40 = vld [vmem:[%s8879_s25 + $0x1a80] sm:$0xf]  ;;  %999 = vst [vmem:[%s8883_s26 + $0x698] sm:$0xf] %v998_v38 }
 0x12e   : > { %1001 = vst [vmem:[%s8883_s26 + $0x69c] sm:$0xf] %v1000_v39  ;;  %1003 = vst [vmem:[%s8883_s26 + $0x6a0] sm:$0xf] %v1002_v40  ;;  %v1004_v41 = vld [vmem:[%s8879_s25 + $0x1a90] sm:$0xf] }
 0x12f   : > { %v1006_v42 = vld [vmem:[%s8879_s25 + $0x1aa0] sm:$0xf]  ;;  %v1008_v43 = vld [vmem:[%s8879_s25 + $0x1ab0] sm:$0xf]  ;;  %1005 = vst [vmem:[%s8883_s26 + $0x6a4] sm:$0xf] %v1004_v41 }
 0x130   : > { %1007 = vst [vmem:[%s8883_s26 + $0x6a8] sm:$0xf] %v1006_v42  ;;  %1009 = vst [vmem:[%s8883_s26 + $0x6ac] sm:$0xf] %v1008_v43  ;;  %v1010_v44 = vld [vmem:[%s8879_s25 + $0x1ac0] sm:$0xf] }
 0x131   : > { %v1012_v45 = vld [vmem:[%s8879_s25 + $0x1ad0] sm:$0xf]  ;;  %v1014_v46 = vld [vmem:[%s8879_s25 + $0x1ae0] sm:$0xf]  ;;  %1011 = vst [vmem:[%s8883_s26 + $0x6b0] sm:$0xf] %v1010_v44 }
 0x132   : > { %1013 = vst [vmem:[%s8883_s26 + $0x6b4] sm:$0xf] %v1012_v45  ;;  %1015 = vst [vmem:[%s8883_s26 + $0x6b8] sm:$0xf] %v1014_v46  ;;  %v1016_v47 = vld [vmem:[%s8879_s25 + $0x1af0] sm:$0xf] }
 0x133   : > { %v1018_v48 = vld [vmem:[%s8879_s25 + $0x1b00] sm:$0xf]  ;;  %v1020_v49 = vld [vmem:[%s8879_s25 + $0x1b10] sm:$0xf]  ;;  %1017 = vst [vmem:[%s8883_s26 + $0x6bc] sm:$0xf] %v1016_v47 }
 0x134   : > { %1019 = vst [vmem:[%s8883_s26 + $0x6c0] sm:$0xf] %v1018_v48  ;;  %1021 = vst [vmem:[%s8883_s26 + $0x6c4] sm:$0xf] %v1020_v49  ;;  %v1022_v50 = vld [vmem:[%s8879_s25 + $0x1b20] sm:$0xf] }
 0x135   : > { %v1024_v51 = vld [vmem:[%s8879_s25 + $0x1b30] sm:$0xf]  ;;  %v1026_v52 = vld [vmem:[%s8879_s25 + $0x1b40] sm:$0xf]  ;;  %1023 = vst [vmem:[%s8883_s26 + $0x6c8] sm:$0xf] %v1022_v50 }
 0x136   : > { %1025 = vst [vmem:[%s8883_s26 + $0x6cc] sm:$0xf] %v1024_v51  ;;  %1027 = vst [vmem:[%s8883_s26 + $0x6d0] sm:$0xf] %v1026_v52  ;;  %v1028_v53 = vld [vmem:[%s8879_s25 + $0x1b50] sm:$0xf] }
 0x137   : > { %v1030_v54 = vld [vmem:[%s8879_s25 + $0x1b60] sm:$0xf]  ;;  %v1032_v55 = vld [vmem:[%s8879_s25 + $0x1b70] sm:$0xf]  ;;  %1029 = vst [vmem:[%s8883_s26 + $0x6d4] sm:$0xf] %v1028_v53 }
 0x138   : > { %1031 = vst [vmem:[%s8883_s26 + $0x6d8] sm:$0xf] %v1030_v54  ;;  %1033 = vst [vmem:[%s8883_s26 + $0x6dc] sm:$0xf] %v1032_v55  ;;  %v1034_v56 = vld [vmem:[%s8879_s25 + $0x1b80] sm:$0xf] }
 0x139   : > { %v1036_v57 = vld [vmem:[%s8879_s25 + $0x1b90] sm:$0xf]  ;;  %v1038_v58 = vld [vmem:[%s8879_s25 + $0x1ba0] sm:$0xf]  ;;  %1035 = vst [vmem:[%s8883_s26 + $0x6e0] sm:$0xf] %v1034_v56 }
 0x13a   : > { %1037 = vst [vmem:[%s8883_s26 + $0x6e4] sm:$0xf] %v1036_v57  ;;  %1039 = vst [vmem:[%s8883_s26 + $0x6e8] sm:$0xf] %v1038_v58  ;;  %v1040_v59 = vld [vmem:[%s8879_s25 + $0x1bb0] sm:$0xf] }
 0x13b   : > { %v1042_v60 = vld [vmem:[%s8879_s25 + $0x1bc0] sm:$0xf]  ;;  %v1044_v61 = vld [vmem:[%s8879_s25 + $0x1bd0] sm:$0xf]  ;;  %1041 = vst [vmem:[%s8883_s26 + $0x6ec] sm:$0xf] %v1040_v59 }
 0x13c   : > { %1043 = vst [vmem:[%s8883_s26 + $0x6f0] sm:$0xf] %v1042_v60  ;;  %1045 = vst [vmem:[%s8883_s26 + $0x6f4] sm:$0xf] %v1044_v61  ;;  %v1046_v62 = vld [vmem:[%s8879_s25 + $0x1be0] sm:$0xf] }
 0x13d   : > { %v1048_v63 = vld [vmem:[%s8879_s25 + $0x1bf0] sm:$0xf]  ;;  %v1050_v0 = vld [vmem:[%s8879_s25 + $0x1c00] sm:$0xf]  ;;  %1047 = vst [vmem:[%s8883_s26 + $0x6f8] sm:$0xf] %v1046_v62 }
 0x13e   : > { %1049 = vst [vmem:[%s8883_s26 + $0x6fc] sm:$0xf] %v1048_v63  ;;  %1051 = vst [vmem:[%s8883_s26 + $0x700] sm:$0xf] %v1050_v0  ;;  %v1052_v1 = vld [vmem:[%s8879_s25 + $0x1c10] sm:$0xf] }
 0x13f   : > { %v1054_v2 = vld [vmem:[%s8879_s25 + $0x1c20] sm:$0xf]  ;;  %v1056_v3 = vld [vmem:[%s8879_s25 + $0x1c30] sm:$0xf]  ;;  %1053 = vst [vmem:[%s8883_s26 + $0x704] sm:$0xf] %v1052_v1 }
 0x140   : > { %1055 = vst [vmem:[%s8883_s26 + $0x708] sm:$0xf] %v1054_v2  ;;  %1057 = vst [vmem:[%s8883_s26 + $0x70c] sm:$0xf] %v1056_v3  ;;  %v1058_v4 = vld [vmem:[%s8879_s25 + $0x1c40] sm:$0xf] }
 0x141   : > { %v1060_v5 = vld [vmem:[%s8879_s25 + $0x1c50] sm:$0xf]  ;;  %v1062_v6 = vld [vmem:[%s8879_s25 + $0x1c60] sm:$0xf]  ;;  %1059 = vst [vmem:[%s8883_s26 + $0x710] sm:$0xf] %v1058_v4 }
 0x142   : > { %1061 = vst [vmem:[%s8883_s26 + $0x714] sm:$0xf] %v1060_v5  ;;  %1063 = vst [vmem:[%s8883_s26 + $0x718] sm:$0xf] %v1062_v6  ;;  %v1064_v7 = vld [vmem:[%s8879_s25 + $0x1c70] sm:$0xf] }
 0x143   : > { %v1066_v8 = vld [vmem:[%s8879_s25 + $0x1c80] sm:$0xf]  ;;  %v1068_v9 = vld [vmem:[%s8879_s25 + $0x1c90] sm:$0xf]  ;;  %1065 = vst [vmem:[%s8883_s26 + $0x71c] sm:$0xf] %v1064_v7 }
 0x144   : > { %1067 = vst [vmem:[%s8883_s26 + $0x720] sm:$0xf] %v1066_v8  ;;  %1069 = vst [vmem:[%s8883_s26 + $0x724] sm:$0xf] %v1068_v9  ;;  %v1070_v10 = vld [vmem:[%s8879_s25 + $0x1ca0] sm:$0xf] }
 0x145   : > { %v1072_v11 = vld [vmem:[%s8879_s25 + $0x1cb0] sm:$0xf]  ;;  %v1074_v12 = vld [vmem:[%s8879_s25 + $0x1cc0] sm:$0xf]  ;;  %1071 = vst [vmem:[%s8883_s26 + $0x728] sm:$0xf] %v1070_v10 }
 0x146   : > { %1073 = vst [vmem:[%s8883_s26 + $0x72c] sm:$0xf] %v1072_v11  ;;  %1075 = vst [vmem:[%s8883_s26 + $0x730] sm:$0xf] %v1074_v12  ;;  %v1076_v13 = vld [vmem:[%s8879_s25 + $0x1cd0] sm:$0xf] }
 0x147   : > { %v1078_v14 = vld [vmem:[%s8879_s25 + $0x1ce0] sm:$0xf]  ;;  %v1080_v15 = vld [vmem:[%s8879_s25 + $0x1cf0] sm:$0xf]  ;;  %1077 = vst [vmem:[%s8883_s26 + $0x734] sm:$0xf] %v1076_v13 }
 0x148   : > { %1079 = vst [vmem:[%s8883_s26 + $0x738] sm:$0xf] %v1078_v14  ;;  %1081 = vst [vmem:[%s8883_s26 + $0x73c] sm:$0xf] %v1080_v15  ;;  %v1082_v16 = vld [vmem:[%s8879_s25 + $0x1d00] sm:$0xf] }
 0x149   : > { %v1084_v17 = vld [vmem:[%s8879_s25 + $0x1d10] sm:$0xf]  ;;  %v1086_v18 = vld [vmem:[%s8879_s25 + $0x1d20] sm:$0xf]  ;;  %1083 = vst [vmem:[%s8883_s26 + $0x740] sm:$0xf] %v1082_v16 }
 0x14a   : > { %1085 = vst [vmem:[%s8883_s26 + $0x744] sm:$0xf] %v1084_v17  ;;  %1087 = vst [vmem:[%s8883_s26 + $0x748] sm:$0xf] %v1086_v18  ;;  %v1088_v19 = vld [vmem:[%s8879_s25 + $0x1d30] sm:$0xf] }
 0x14b   : > { %v1090_v20 = vld [vmem:[%s8879_s25 + $0x1d40] sm:$0xf]  ;;  %v1092_v21 = vld [vmem:[%s8879_s25 + $0x1d50] sm:$0xf]  ;;  %1089 = vst [vmem:[%s8883_s26 + $0x74c] sm:$0xf] %v1088_v19 }
 0x14c   : > { %1091 = vst [vmem:[%s8883_s26 + $0x750] sm:$0xf] %v1090_v20  ;;  %1093 = vst [vmem:[%s8883_s26 + $0x754] sm:$0xf] %v1092_v21  ;;  %v1094_v22 = vld [vmem:[%s8879_s25 + $0x1d60] sm:$0xf] }
 0x14d   : > { %v1096_v23 = vld [vmem:[%s8879_s25 + $0x1d70] sm:$0xf]  ;;  %v1098_v24 = vld [vmem:[%s8879_s25 + $0x1d80] sm:$0xf]  ;;  %1095 = vst [vmem:[%s8883_s26 + $0x758] sm:$0xf] %v1094_v22 }
 0x14e   : > { %1097 = vst [vmem:[%s8883_s26 + $0x75c] sm:$0xf] %v1096_v23  ;;  %1099 = vst [vmem:[%s8883_s26 + $0x760] sm:$0xf] %v1098_v24  ;;  %v1100_v25 = vld [vmem:[%s8879_s25 + $0x1d90] sm:$0xf] }
 0x14f   : > { %v1102_v26 = vld [vmem:[%s8879_s25 + $0x1da0] sm:$0xf]  ;;  %v1104_v27 = vld [vmem:[%s8879_s25 + $0x1db0] sm:$0xf]  ;;  %1101 = vst [vmem:[%s8883_s26 + $0x764] sm:$0xf] %v1100_v25 }
 0x150   : > { %1103 = vst [vmem:[%s8883_s26 + $0x768] sm:$0xf] %v1102_v26  ;;  %1105 = vst [vmem:[%s8883_s26 + $0x76c] sm:$0xf] %v1104_v27  ;;  %v1106_v28 = vld [vmem:[%s8879_s25 + $0x1dc0] sm:$0xf] }
 0x151   : > { %v1108_v29 = vld [vmem:[%s8879_s25 + $0x1dd0] sm:$0xf]  ;;  %v1110_v30 = vld [vmem:[%s8879_s25 + $0x1de0] sm:$0xf]  ;;  %1107 = vst [vmem:[%s8883_s26 + $0x770] sm:$0xf] %v1106_v28 }
 0x152   : > { %1109 = vst [vmem:[%s8883_s26 + $0x774] sm:$0xf] %v1108_v29  ;;  %1111 = vst [vmem:[%s8883_s26 + $0x778] sm:$0xf] %v1110_v30  ;;  %v1112_v31 = vld [vmem:[%s8879_s25 + $0x1df0] sm:$0xf] }
 0x153   : > { %v1114_v32 = vld [vmem:[%s8879_s25 + $0x1e00] sm:$0xf]  ;;  %v1116_v33 = vld [vmem:[%s8879_s25 + $0x1e10] sm:$0xf]  ;;  %1113 = vst [vmem:[%s8883_s26 + $0x77c] sm:$0xf] %v1112_v31 }
 0x154   : > { %1115 = vst [vmem:[%s8883_s26 + $0x780] sm:$0xf] %v1114_v32  ;;  %1117 = vst [vmem:[%s8883_s26 + $0x784] sm:$0xf] %v1116_v33  ;;  %v1118_v34 = vld [vmem:[%s8879_s25 + $0x1e20] sm:$0xf] }
 0x155   : > { %v1120_v35 = vld [vmem:[%s8879_s25 + $0x1e30] sm:$0xf]  ;;  %v1122_v36 = vld [vmem:[%s8879_s25 + $0x1e40] sm:$0xf]  ;;  %1119 = vst [vmem:[%s8883_s26 + $0x788] sm:$0xf] %v1118_v34 }
 0x156   : > { %1121 = vst [vmem:[%s8883_s26 + $0x78c] sm:$0xf] %v1120_v35  ;;  %1123 = vst [vmem:[%s8883_s26 + $0x790] sm:$0xf] %v1122_v36  ;;  %v1124_v37 = vld [vmem:[%s8879_s25 + $0x1e50] sm:$0xf] }
 0x157   : > { %v1126_v38 = vld [vmem:[%s8879_s25 + $0x1e60] sm:$0xf]  ;;  %v1128_v39 = vld [vmem:[%s8879_s25 + $0x1e70] sm:$0xf]  ;;  %1125 = vst [vmem:[%s8883_s26 + $0x794] sm:$0xf] %v1124_v37 }
 0x158   : > { %1127 = vst [vmem:[%s8883_s26 + $0x798] sm:$0xf] %v1126_v38  ;;  %1129 = vst [vmem:[%s8883_s26 + $0x79c] sm:$0xf] %v1128_v39  ;;  %v1130_v40 = vld [vmem:[%s8879_s25 + $0x1e80] sm:$0xf] }
 0x159   : > { %v1132_v41 = vld [vmem:[%s8879_s25 + $0x1e90] sm:$0xf]  ;;  %v1134_v42 = vld [vmem:[%s8879_s25 + $0x1ea0] sm:$0xf]  ;;  %1131 = vst [vmem:[%s8883_s26 + $0x7a0] sm:$0xf] %v1130_v40 }
 0x15a   : > { %1133 = vst [vmem:[%s8883_s26 + $0x7a4] sm:$0xf] %v1132_v41  ;;  %1135 = vst [vmem:[%s8883_s26 + $0x7a8] sm:$0xf] %v1134_v42  ;;  %v1136_v43 = vld [vmem:[%s8879_s25 + $0x1eb0] sm:$0xf] }
 0x15b   : > { %v1138_v44 = vld [vmem:[%s8879_s25 + $0x1ec0] sm:$0xf]  ;;  %v1140_v45 = vld [vmem:[%s8879_s25 + $0x1ed0] sm:$0xf]  ;;  %1137 = vst [vmem:[%s8883_s26 + $0x7ac] sm:$0xf] %v1136_v43 }
 0x15c   : > { %1139 = vst [vmem:[%s8883_s26 + $0x7b0] sm:$0xf] %v1138_v44  ;;  %1141 = vst [vmem:[%s8883_s26 + $0x7b4] sm:$0xf] %v1140_v45  ;;  %v1142_v46 = vld [vmem:[%s8879_s25 + $0x1ee0] sm:$0xf] }
 0x15d   : > { %v1144_v47 = vld [vmem:[%s8879_s25 + $0x1ef0] sm:$0xf]  ;;  %v1146_v48 = vld [vmem:[%s8879_s25 + $0x1f00] sm:$0xf]  ;;  %1143 = vst [vmem:[%s8883_s26 + $0x7b8] sm:$0xf] %v1142_v46 }
 0x15e   : > { %1145 = vst [vmem:[%s8883_s26 + $0x7bc] sm:$0xf] %v1144_v47  ;;  %1147 = vst [vmem:[%s8883_s26 + $0x7c0] sm:$0xf] %v1146_v48  ;;  %v1148_v49 = vld [vmem:[%s8879_s25 + $0x1f10] sm:$0xf] }
 0x15f   : > { %v1150_v50 = vld [vmem:[%s8879_s25 + $0x1f20] sm:$0xf]  ;;  %v1152_v51 = vld [vmem:[%s8879_s25 + $0x1f30] sm:$0xf]  ;;  %1149 = vst [vmem:[%s8883_s26 + $0x7c4] sm:$0xf] %v1148_v49 }
 0x160   : > { %1151 = vst [vmem:[%s8883_s26 + $0x7c8] sm:$0xf] %v1150_v50  ;;  %1153 = vst [vmem:[%s8883_s26 + $0x7cc] sm:$0xf] %v1152_v51  ;;  %v1154_v52 = vld [vmem:[%s8879_s25 + $0x1f40] sm:$0xf] }
 0x161   : > { %v1156_v53 = vld [vmem:[%s8879_s25 + $0x1f50] sm:$0xf]  ;;  %v1158_v54 = vld [vmem:[%s8879_s25 + $0x1f60] sm:$0xf]  ;;  %1155 = vst [vmem:[%s8883_s26 + $0x7d0] sm:$0xf] %v1154_v52 }
 0x162   : > { %1157 = vst [vmem:[%s8883_s26 + $0x7d4] sm:$0xf] %v1156_v53  ;;  %1159 = vst [vmem:[%s8883_s26 + $0x7d8] sm:$0xf] %v1158_v54  ;;  %v1160_v55 = vld [vmem:[%s8879_s25 + $0x1f70] sm:$0xf] }
 0x163   : > { %v1162_v56 = vld [vmem:[%s8879_s25 + $0x1f80] sm:$0xf]  ;;  %v1164_v57 = vld [vmem:[%s8879_s25 + $0x1f90] sm:$0xf]  ;;  %1161 = vst [vmem:[%s8883_s26 + $0x7dc] sm:$0xf] %v1160_v55 }
 0x164   : > { %1163 = vst [vmem:[%s8883_s26 + $0x7e0] sm:$0xf] %v1162_v56  ;;  %1165 = vst [vmem:[%s8883_s26 + $0x7e4] sm:$0xf] %v1164_v57  ;;  %v1166_v58 = vld [vmem:[%s8879_s25 + $0x1fa0] sm:$0xf] }
 0x165   : > { %v1168_v59 = vld [vmem:[%s8879_s25 + $0x1fb0] sm:$0xf]  ;;  %v1170_v60 = vld [vmem:[%s8879_s25 + $0x1fc0] sm:$0xf]  ;;  %1167 = vst [vmem:[%s8883_s26 + $0x7e8] sm:$0xf] %v1166_v58 }
 0x166   : > { %1169 = vst [vmem:[%s8883_s26 + $0x7ec] sm:$0xf] %v1168_v59  ;;  %1171 = vst [vmem:[%s8883_s26 + $0x7f0] sm:$0xf] %v1170_v60  ;;  %v1172_v61 = vld [vmem:[%s8879_s25 + $0x1fd0] sm:$0xf] }
 0x167   : > { %v1174_v62 = vld [vmem:[%s8879_s25 + $0x1fe0] sm:$0xf]  ;;  %v1176_v63 = vld [vmem:[%s8879_s25 + $0x1ff0] sm:$0xf]  ;;  %1173 = vst [vmem:[%s8883_s26 + $0x7f4] sm:$0xf] %v1172_v61 }
 0x168   : > { %1175 = vst [vmem:[%s8883_s26 + $0x7f8] sm:$0xf] %v1174_v62  ;;  %1177 = vst [vmem:[%s8883_s26 + $0x7fc] sm:$0xf] %v1176_v63 }
 0x169 PF: > { %p7663_p8 = scmp.ge.s32.totalorder %s8814_s13, 1  ;;  %p4302_p9 = scmp.lt.s32.totalorder %s8814_s13, 5 }
 0x16b   : > { %p4303_p10 = pnand %p7663_p8, %p4302_p9 }
 0x16c   : > { %s4309_s27 = sand.u32 (!%p4303_p10), 1, %s8798_s9  }
 0x16d   : > { %4306 = sbr.rel (%p4303_p10) target bundleno = 858 (0x35a), region = 76  ;;  %s7664_s6 = sshll.u32 (!%p4303_p10), %s4309_s27, 11 }
 0x16e   : > { %s9936_s15 = scalar_lea.vmem (!%p4303_p10), [#allocation2], %s7664_s6  ;;  %s8447_s6 = smul.u32 (!%p4303_p10), 12, %s4309_s27 }
 0x170   : > { %s4334_s9 = scalar_lea.vmem (!%p4303_p10), [#allocation3], %s8447_s6 }
 0x172   : > { %v9913_v0 = vld [vmem:[%s10370_s0] sm:$0xff]  ;;  %v9923_v2 = vld [vmem:[%s10370_s0 + $0x8] sm:$0xff]  ;;  %v8488_v6 = vld [vmem:[%s9936_s15 + $0x78] sm:$0xff]   ;;  %s7988_s27 = sshll.u32 (%p8866_p6), %s8806_s11, 2 }
 0x173   : > { %v9918_v1 = vld [vmem:[%s10370_s0 + $0x80] sm:$0xff]  ;;  %v9932_v4 = vld [vmem:[%s10370_s0 + $0x88] sm:$0xff]  ;;  %v8489_v7 = vld [vmem:[%s9936_s15 + $0xf8] sm:$0xff]   ;;  %7999 = vmatprep.subr.bf16.mxu0 %v8488_v6  ;;  %s7516_s16 = scalar_lea.vmem (%p8866_p6), %s10372_s2, %s7988_s27 }
 0x174   : > { %v7666_v3 = vcombine.high %v9913_v0, %v9918_v1  ;;  %v7668_v5 = vcombine.high %v9923_v2, %v9932_v4  ;;  %v8490_v8 = vld [vmem:[%s9936_s15 + $0x38] sm:$0xff]   ;;  %8027 = vmatprep.subr.bf16.mxu1 %v8489_v7  ;;  %v8492_v10 = vld [vmem:[%s9936_s15 + $0x70] sm:$0xff]   ;;  %v8496_v14 = vld [vmem:[%s9936_s15 + $0x68] sm:$0xff]   ;;  %v7665_v40 = vcombine.low %v9913_v0, %v9918_v1  ;;  %v7667_v41 = vcombine.low %v9923_v2, %v9932_v4 }
 0x175   : > { %v8491_v9 = vld [vmem:[%s9936_s15 + $0xb8] sm:$0xff]   ;;  %8000 = vmatpush3.bf16.msra.mxu0 %v8490_v8  ;;  %v8493_v11 = vld [vmem:[%s9936_s15 + $0xf0] sm:$0xff]   ;;  %v8497_v15 = vld [vmem:[%s9936_s15 + $0xe8] sm:$0xff]  }
 0x176   : > { %6744 = vmatprep.mubr.bf16.mxu0 %v7666_v3  ;;  %6792 = vmatprep.mubr.bf16.mxu1 %v7668_v5  ;;  %v8494_v12 = vld [vmem:[%s9936_s15 + $0x30] sm:$0xff]   ;;  %v8498_v16 = vld [vmem:[%s9936_s15 + $0x28] sm:$0xff]   ;;  %v8500_v18 = vld [vmem:[%s9936_s15 + $0x60] sm:$0xff]  }
 0x177   : > { %8028 = vmatpush3.bf16.msra.mxu1 %v8491_v9  ;;  %8001 = vmatprep.subr.bf16.mxu0 %v8492_v10  ;;  %v8495_v13 = vld [vmem:[%s9936_s15 + $0xb0] sm:$0xff]   ;;  %v8499_v17 = vld [vmem:[%s9936_s15 + $0xa8] sm:$0xff]   ;;  %v8501_v19 = vld [vmem:[%s9936_s15 + $0xe0] sm:$0xff]  }
 0x178   : > { %8029 = vmatprep.subr.bf16.mxu1 %v8493_v11  ;;  %v8502_v20 = vld [vmem:[%s9936_s15 + $0x20] sm:$0xff]   ;;  %v8504_v22 = vld [vmem:[%s9936_s15 + $0x58] sm:$0xff]   ;;  %v8508_v26 = vld [vmem:[%s9936_s15 + $0x50] sm:$0xff]  }
 0x179   : > { %8002 = vmatpush3.bf16.msra.mxu0 %v8494_v12  ;;  %v8503_v21 = vld [vmem:[%s9936_s15 + $0xa0] sm:$0xff]   ;;  %v8505_v23 = vld [vmem:[%s9936_s15 + $0xd8] sm:$0xff]   ;;  %v8509_v27 = vld [vmem:[%s9936_s15 + $0xd0] sm:$0xff]  }
 0x17a   : > { %8003 = vmatprep.subr.bf16.mxu0 %v8496_v14  ;;  %v8506_v24 = vld [vmem:[%s9936_s15 + $0x18] sm:$0xff]   ;;  %v8510_v28 = vld [vmem:[%s9936_s15 + $0x10] sm:$0xff]   ;;  %v8512_v30 = vld [vmem:[%s9936_s15 + $0x48] sm:$0xff]  }
 0x17b   : > { %8030 = vmatpush3.bf16.msra.mxu1 %v8495_v13  ;;  %v8507_v25 = vld [vmem:[%s9936_s15 + $0x98] sm:$0xff]   ;;  %v8511_v29 = vld [vmem:[%s9936_s15 + $0x90] sm:$0xff]   ;;  %v8513_v31 = vld [vmem:[%s9936_s15 + $0xc8] sm:$0xff]  }
 0x17c   : > { %8031 = vmatprep.subr.bf16.mxu1 %v8497_v15  ;;  %v8514_v32 = vld [vmem:[%s9936_s15 + $0x8] sm:$0xff]   ;;  %v8516_v34 = vld [vmem:[%s9936_s15 + $0x40] sm:$0xff]   ;;  %v8520_v42 = vld [vmem:[%s9936_s15 + $0x178] sm:$0xff]  }
 0x17d   : > { %8004 = vmatpush3.bf16.msra.mxu0 %v8498_v16  ;;  %v8515_v33 = vld [vmem:[%s9936_s15 + $0x88] sm:$0xff]   ;;  %v4376_v35 = vld [vmem:[%s10370_s0 + $0x100] sm:$0x11]  ;;  %v8521_v43 = vld [vmem:[%s9936_s15 + $0x1f8] sm:$0xff]  }
 0x17e   : > { %8005 = vmatprep.subr.bf16.mxu0 %v8500_v18  ;;  %v8517_v36 = vld [vmem:[%s9936_s15 + $0xc0] sm:$0xff]   ;;  %v4377_v37 = vld [vmem:[%s10370_s0 + $0x108] sm:$0x11]  ;;  %v7698_v44 = vcombine.high %v4376_v35, %v4376_v35  ;;  %v8522_v45 = vld [vmem:[%s9936_s15 + $0x138] sm:$0xff]   ;;  %v7697_v54 = vcombine.low %v4376_v35, %v4376_v35 }
 0x17f   : > { %8032 = vmatpush3.bf16.msra.mxu1 %v8499_v17  ;;  %v8518_v38 = vld [vmem:[%s9936_s15] sm:$0xff]   ;;  %v7700_v46 = vcombine.high %v4377_v37, %v4377_v37  ;;  %v8523_v47 = vld [vmem:[%s9936_s15 + $0x1b8] sm:$0xff]   ;;  %v8524_v48 = vld [vmem:[%s9936_s15 + $0x170] sm:$0xff]   ;;  %v7699_v56 = vcombine.low %v4377_v37, %v4377_v37 }
 0x180   : > { %8033 = vmatprep.subr.bf16.mxu1 %v8501_v19  ;;  %v8519_v39 = vld [vmem:[%s9936_s15 + $0x80] sm:$0xff]   ;;  %v9988_v49 = vld [vmem:[%s10370_s0 + $0x10] sm:$0xff]  ;;  %v8528_v55 = vld [vmem:[%s9936_s15 + $0x168] sm:$0xff]  }
 0x181   : > { %8006 = vmatpush3.bf16.msra.mxu0 %v8502_v20  ;;  %v9993_v50 = vld [vmem:[%s10370_s0 + $0x90] sm:$0xff]  ;;  %v8529_v57 = vld [vmem:[%s9936_s15 + $0x1e8] sm:$0xff]   ;;  %v8532_v61 = vld [vmem:[%s9936_s15 + $0x160] sm:$0xff]  }
 0x182   : > { %8007 = vmatprep.subr.bf16.mxu0 %v8504_v22  ;;  %v8525_v51 = vld [vmem:[%s9936_s15 + $0x1f0] sm:$0xff]   ;;  %v7670_v58 = vcombine.high %v9988_v49, %v9993_v50  ;;  %v8530_v59 = vld [vmem:[%s9936_s15 + $0x128] sm:$0xff]   ;;  %v8533_v62 = vld [vmem:[%s9936_s15 + $0x1e0] sm:$0xff]   ;;  %v7669_v18 = vcombine.low %v9988_v49, %v9993_v50 }
 0x183   : > { %8034 = vmatpush3.bf16.msra.mxu1 %v8503_v21  ;;  %v8526_v52 = vld [vmem:[%s9936_s15 + $0x130] sm:$0xff]   ;;  %v8531_v60 = vld [vmem:[%s9936_s15 + $0x1a8] sm:$0xff]   ;;  %v8534_v63 = vld [vmem:[%s9936_s15 + $0x120] sm:$0xff]  }
 0x184   : > { %8035 = vmatprep.subr.bf16.mxu1 %v8505_v23  ;;  %v8527_v53 = vld [vmem:[%s9936_s15 + $0x1b0] sm:$0xff]   ;;  %v8535_v0 = vld [vmem:[%s9936_s15 + $0x1a0] sm:$0xff]   ;;  %v8536_v1 = vld [vmem:[%s9936_s15 + $0x158] sm:$0xff]  }
 0x185   : > { %8008 = vmatpush3.bf16.msra.mxu0 %v8506_v24  ;;  %v8537_v2 = vld [vmem:[%s9936_s15 + $0x1d8] sm:$0xff]   ;;  %v8543_v5 = vld [vmem:[%s9936_s15 + $0x150] sm:$0xff]   ;;  %v8548_v9 = vld [vmem:[%s9936_s15 + $0x148] sm:$0xff]  }
 0x186   : > { %8009 = vmatprep.subr.bf16.mxu0 %v8508_v26  ;;  %v8538_v3 = vld [vmem:[%s9936_s15 + $0x118] sm:$0xff]   ;;  %v8544_v6 = vld [vmem:[%s9936_s15 + $0x1d0] sm:$0xff]   ;;  %v8549_v10 = vld [vmem:[%s9936_s15 + $0x1c8] sm:$0xff]  }
 0x187   : > { %8036 = vmatpush3.bf16.msra.mxu1 %v8507_v25  ;;  %v8539_v4 = vld [vmem:[%s9936_s15 + $0x198] sm:$0xff]   ;;  %v8546_v7 = vld [vmem:[%s9936_s15 + $0x110] sm:$0xff]   ;;  %v8550_v11 = vld [vmem:[%s9936_s15 + $0x108] sm:$0xff]  }
 0x188   : > { %8037 = vmatprep.subr.bf16.mxu1 %v8509_v27  ;;  %v8547_v8 = vld [vmem:[%s9936_s15 + $0x190] sm:$0xff]   ;;  %v8551_v12 = vld [vmem:[%s9936_s15 + $0x188] sm:$0xff]   ;;  %v8552_v13 = vld [vmem:[%s9936_s15 + $0x140] sm:$0xff]  }
 0x189   : > { %8010 = vmatpush3.bf16.msra.mxu0 %v8510_v28  ;;  %v4347_v14 = vld [vmem:[%s10370_s0 + $0x18] sm:$0xff]  ;;  %v8553_v15 = vld [vmem:[%s9936_s15 + $0x1c0] sm:$0xff]   ;;  %v8560_v26 = vld [vmem:[%s9936_s15 + $0x270] sm:$0xff]  }
 0x18a   : > { %8011 = vmatprep.subr.bf16.mxu0 %v8512_v30  ;;  %v8554_v16 = vld [vmem:[%s9936_s15 + $0x100] sm:$0xff]   ;;  %v4363_v19 = vld [vmem:[%s10370_s0 + $0x98] sm:$0xff]  ;;  %v8561_v27 = vld [vmem:[%s9936_s15 + $0x2f0] sm:$0xff]  }
 0x18b   : > { %8038 = vmatpush3.bf16.msra.mxu1 %v8511_v29  ;;  %v8555_v17 = vld [vmem:[%s9936_s15 + $0x180] sm:$0xff]   ;;  %v7671_v20 = vcombine.low %v4347_v14, %v4363_v19  ;;  %v7672_v21 = vcombine.high %v4347_v14, %v4363_v19  ;;  %v8556_v22 = vld [vmem:[%s9936_s15 + $0x278] sm:$0xff]   ;;  %v8562_v28 = vld [vmem:[%s9936_s15 + $0x230] sm:$0xff]  }
 0x18c   : > { %8039 = vmatprep.subr.bf16.mxu1 %v8513_v31  ;;  %v8557_v23 = vld [vmem:[%s9936_s15 + $0x2f8] sm:$0xff]   ;;  %v8563_v29 = vld [vmem:[%s9936_s15 + $0x2b0] sm:$0xff]   ;;  %v8569_v37 = vld [vmem:[%s9936_s15 + $0x228] sm:$0xff]  }
 0x18d   : > { %8012 = vmatpush3.bf16.msra.mxu0 %v8514_v32  ;;  %v8558_v24 = vld [vmem:[%s9936_s15 + $0x238] sm:$0xff]   ;;  %v4378_v30 = vld [vmem:[%s10370_s0 + $0x110] sm:$0x11]  ;;  %v8605_v19 = vld [vmem:[%s9936_s15 + $0x328] sm:$0xff]  }
 0x18e   : > { %8013 = vmatprep.subr.bf16.mxu0 %v8516_v34  ;;  %v8559_v25 = vld [vmem:[%s9936_s15 + $0x2b8] sm:$0xff]   ;;  %v7702_v31 = vcombine.high %v4378_v30, %v4378_v30  ;;  %v7701_v32 = vcombine.low %v4378_v30, %v4378_v30  ;;  %v8567_v34 = vld [vmem:[%s9936_s15 + $0x2e8] sm:$0xff]   ;;  %v8581_v49 = vld [vmem:[%s9936_s15 + $0x2d0] sm:$0xff]  }
 0x18f   : > { %8040 = vmatpush3.bf16.msra.mxu1 %v8515_v33  ;;  %v8566_v33 = vld [vmem:[%s9936_s15 + $0x268] sm:$0xff]   ;;  %v4379_v35 = vld [vmem:[%s10370_s0 + $0x118] sm:$0x11]  ;;  %v8582_v50 = vld [vmem:[%s9936_s15 + $0x210] sm:$0xff]  }
 0x190   : > { %8041 = vmatprep.subr.bf16.mxu1 %v8517_v36  ;;  %v7704_v36 = vcombine.high %v4379_v35, %v4379_v35  ;;  %v8616_v30 = vld [vmem:[%s9936_s15 + $0x350] sm:$0xff]  }
 0x191   : > { %8014 = vmatpush3.bf16.msra.mxu0 %v8518_v38  ;;  %v7703_v38 = vcombine.low %v4379_v35, %v4379_v35  ;;  %v8621_v35 = vld [vmem:[%s9936_s15 + $0x3c8] sm:$0xff]  }
 0x192   : > { %8055 = vmatprep.subr.bf16.mxu0 %v8520_v42  ;;  %v8574_v42 = vld [vmem:[%s9936_s15 + $0x220] sm:$0xff]  }
 0x193   : > { %8042 = vmatpush3.bf16.msra.mxu1 %v8519_v39  ;;  %v8570_v39 = vld [vmem:[%s9936_s15 + $0x2a8] sm:$0xff]  }
 0x194   : > { %6745 = vmatmul.mubr.bf16.vlgmr.msra.gmra.mxu0 %v7665_v40  ;;  %8083 = vmatprep.subr.bf16.mxu1 %v8521_v43  ;;  %v8572_v40 = vld [vmem:[%s9936_s15 + $0x260] sm:$0xff]  }
 0x195   : > { %8056 = vmatpush3.bf16.msra.mxu0 %v8522_v45  ;;  %6752 = vmatprep.mubr.bf16.mxu0 %v7698_v44  ;;  %v8575_v43 = vld [vmem:[%s9936_s15 + $0x2a0] sm:$0xff]   ;;  %v8576_v44 = vld [vmem:[%s9936_s15 + $0x258] sm:$0xff]  }
 0x196   : > { %6793 = vmatmul.mubr.bf16.vlgmr.msra.gmra.mxu1 %v7667_v41  ;;  %8057 = vmatprep.subr.bf16.mxu0 %v8524_v48  ;;  %v8573_v41 = vld [vmem:[%s9936_s15 + $0x2e0] sm:$0xff]   ;;  %v8577_v45 = vld [vmem:[%s9936_s15 + $0x2d8] sm:$0xff]   ;;  %v8580_v48 = vld [vmem:[%s9936_s15 + $0x250] sm:$0xff]  }
 0x197   : > { %8084 = vmatpush3.bf16.msra.mxu1 %v8523_v47  ;;  %6800 = vmatprep.mubr.bf16.mxu1 %v7700_v46  ;;  %v8578_v46 = vld [vmem:[%s9936_s15 + $0x218] sm:$0xff]  }
 0x198   : > { %8085 = vmatprep.subr.bf16.mxu1 %v8525_v51  ;;  %v8579_v47 = vld [vmem:[%s9936_s15 + $0x298] sm:$0xff]   ;;  %v8583_v51 = vld [vmem:[%s9936_s15 + $0x290] sm:$0xff]  }
 0x199   : > { %8058 = vmatpush3.bf16.msra.mxu0 %v8526_v52  ;;  %v8584_v52 = vld [vmem:[%s9936_s15 + $0x248] sm:$0xff]  }
 0x19a   : > { %8059 = vmatprep.subr.bf16.mxu0 %v8528_v55  ;;  %v8587_v55 = vld [vmem:[%s9936_s15 + $0x288] sm:$0xff]  }
 0x19b   : > { %8086 = vmatpush3.bf16.msra.mxu1 %v8527_v53  ;;  %v8585_v53 = vld [vmem:[%s9936_s15 + $0x2c8] sm:$0xff]  }
 0x19c   : > { %8087 = vmatprep.subr.bf16.mxu1 %v8529_v57  ;;  %6753 = vmatmul.mubr.bf16.gmra.mxu0 %v7697_v54  ;;  %v8586_v54 = vld [vmem:[%s9936_s15 + $0x208] sm:$0xff]   ;;  %v8589_v57 = vld [vmem:[%s9936_s15 + $0x2c0] sm:$0xff]  }
 0x19d   : > { %8060 = vmatpush3.bf16.msra.mxu0 %v8530_v59  ;;  %6840 = vmatprep.mubr.bf16.mxu0 %v7670_v58  ;;  %v8590_v58 = vld [vmem:[%s9936_s15 + $0x200] sm:$0xff]  }
 0x19e   : > { %6801 = vmatmul.mubr.bf16.gmra.mxu1 %v7699_v56  ;;  %8061 = vmatprep.subr.bf16.mxu0 %v8532_v61  ;;  %v8588_v56 = vld [vmem:[%s9936_s15 + $0x240] sm:$0xff]  }
 0x19f   : > { %8088 = vmatpush3.bf16.msra.mxu1 %v8531_v60  ;;  %6888 = vmatprep.mubr.bf16.mxu1 %v7672_v21  ;;  %v8591_v59 = vld [vmem:[%s9936_s15 + $0x280] sm:$0xff]   ;;  %v8606_v21 = vld [vmem:[%s9936_s15 + $0x3a8] sm:$0xff]  }
 0x1a0   : > { %8089 = vmatprep.subr.bf16.mxu1 %v8533_v62  ;;  %v4348_v60 = vld [vmem:[%s10370_s0 + $0x20] sm:$0xff]  ;;  %v4349_v62 = vld [vmem:[%s10370_s0 + $0x28] sm:$0xff] }
 0x1a1   : > { %8062 = vmatpush3.bf16.msra.mxu0 %v8534_v63  ;;  %v4364_v61 = vld [vmem:[%s10370_s0 + $0xa0] sm:$0xff] }
 0x1a2   : > { %8063 = vmatprep.subr.bf16.mxu0 %v8536_v1  ;;  %v7673_v63 = vcombine.low %v4348_v60, %v4364_v61  ;;  %v4365_v1 = vld [vmem:[%s10370_s0 + $0xa8] sm:$0xff] }
 0x1a3   : > { %8090 = vmatpush3.bf16.msra.mxu1 %v8535_v0  ;;  %v7674_v0 = vcombine.high %v4348_v60, %v4364_v61  ;;  %v8638_v61 = vld [vmem:[%s9936_s15 + $0x468] sm:$0xff]  }
 0x1a4   : > { %8091 = vmatprep.subr.bf16.mxu1 %v8537_v2  ;;  %v7675_v2 = vcombine.low %v4349_v62, %v4365_v1 }
 0x1a5   : > { %8064 = vmatpush3.bf16.msra.mxu0 %v8538_v3  ;;  %v7676_v3 = vcombine.high %v4349_v62, %v4365_v1  ;;  %v8639_v62 = vld [vmem:[%s9936_s15 + $0x4e8] sm:$0xff]  }
 0x1a6   : > { %8065 = vmatprep.subr.bf16.mxu0 %v8543_v5  ;;  %v8593_v5 = vld [vmem:[%s9936_s15 + $0x3f8] sm:$0xff]   ;;  %v8641_v1 = vld [vmem:[%s9936_s15 + $0x428] sm:$0xff]  }
 0x1a7   : > { %8092 = vmatpush3.bf16.msra.mxu1 %v8539_v4  ;;  %v8592_v4 = vld [vmem:[%s9936_s15 + $0x378] sm:$0xff]  }
 0x1a8   : > { %8093 = vmatprep.subr.bf16.mxu1 %v8544_v6  ;;  %v8594_v6 = vld [vmem:[%s9936_s15 + $0x338] sm:$0xff]  }
 0x1a9   : > { %8066 = vmatpush3.bf16.msra.mxu0 %v8546_v7  ;;  %v8595_v7 = vld [vmem:[%s9936_s15 + $0x3b8] sm:$0xff]  }
 0x1aa   : > { %8067 = vmatprep.subr.bf16.mxu0 %v8548_v9  ;;  %v8597_v9 = vld [vmem:[%s9936_s15 + $0x3f0] sm:$0xff]  }
 0x1ab   : > { %8094 = vmatpush3.bf16.msra.mxu1 %v8547_v8  ;;  %v8596_v8 = vld [vmem:[%s9936_s15 + $0x370] sm:$0xff]  }
 0x1ac   : > { %8095 = vmatprep.subr.bf16.mxu1 %v8549_v10  ;;  %v8598_v10 = vld [vmem:[%s9936_s15 + $0x330] sm:$0xff]  }
 0x1ad   : > { %8068 = vmatpush3.bf16.msra.mxu0 %v8550_v11  ;;  %v8599_v11 = vld [vmem:[%s9936_s15 + $0x3b0] sm:$0xff]  }
 0x1ae   : > { %8069 = vmatprep.subr.bf16.mxu0 %v8552_v13 }
 0x1af   : > { %8096 = vmatpush3.bf16.msra.mxu1 %v8551_v12  ;;  %v4380_v12 = vld [vmem:[%s10370_s0 + $0x120] sm:$0x11] }
 0x1b0   : > { %8097 = vmatprep.subr.bf16.mxu1 %v8553_v15  ;;  %v7706_v13 = vcombine.high %v4380_v12, %v4380_v12  ;;  %v7705_v14 = vcombine.low %v4380_v12, %v4380_v12  ;;  %v8602_v15 = vld [vmem:[%s9936_s15 + $0x368] sm:$0xff]   ;;  %v8652_v12 = vld [vmem:[%s9936_s15 + $0x450] sm:$0xff]  }
 0x1b1   : > { %8070 = vmatpush3.bf16.msra.mxu0 %v8554_v16  ;;  %v8603_v16 = vld [vmem:[%s9936_s15 + $0x3e8] sm:$0xff]  }
 0x1b2   : > { %8111 = vmatprep.subr.bf16.mxu0 %v8556_v22  ;;  %v8608_v22 = vld [vmem:[%s9936_s15 + $0x360] sm:$0xff]  }
 0x1b3   : > { %8098 = vmatpush3.bf16.msra.mxu1 %v8555_v17  ;;  %v4381_v17 = vld [vmem:[%s10370_s0 + $0x128] sm:$0x11] }
 0x1b4   : > { %6841 = vmatmul.mubr.bf16.vlgmr.msra.gmra.mxu0 %v7669_v18  ;;  %8139 = vmatprep.subr.bf16.mxu1 %v8557_v23  ;;  %v7708_v18 = vcombine.high %v4381_v17, %v4381_v17  ;;  %v8609_v23 = vld [vmem:[%s9936_s15 + $0x3e0] sm:$0xff]  }
 0x1b5   : > { %8112 = vmatpush3.bf16.msra.mxu0 %v8558_v24  ;;  %6848 = vmatprep.mubr.bf16.mxu0 %v7702_v31  ;;  %v8610_v24 = vld [vmem:[%s9936_s15 + $0x320] sm:$0xff]   ;;  %v8617_v31 = vld [vmem:[%s9936_s15 + $0x3d0] sm:$0xff]  }
 0x1b6   : > { %6889 = vmatmul.mubr.bf16.vlgmr.msra.gmra.mxu1 %v7671_v20  ;;  %8113 = vmatprep.subr.bf16.mxu0 %v8560_v26  ;;  %v7707_v20 = vcombine.low %v4381_v17, %v4381_v17  ;;  %v8612_v26 = vld [vmem:[%s9936_s15 + $0x358] sm:$0xff]   ;;  %v8657_v17 = vld [vmem:[%s9936_s15 + $0x4c8] sm:$0xff]  }
 0x1b7   : > { %8140 = vmatpush3.bf16.msra.mxu1 %v8559_v25  ;;  %6896 = vmatprep.mubr.bf16.mxu1 %v7704_v36  ;;  %v8611_v25 = vld [vmem:[%s9936_s15 + $0x3a0] sm:$0xff]   ;;  %v8622_v36 = vld [vmem:[%s9936_s15 + $0x308] sm:$0xff]  }
 0x1b8   : > { %8141 = vmatprep.subr.bf16.mxu1 %v8561_v27  ;;  %v8613_v27 = vld [vmem:[%s9936_s15 + $0x3d8] sm:$0xff]  }
 0x1b9   : > { %8114 = vmatpush3.bf16.msra.mxu0 %v8562_v28  ;;  %v8614_v28 = vld [vmem:[%s9936_s15 + $0x318] sm:$0xff]  }
 0x1ba   : > { %8115 = vmatprep.subr.bf16.mxu0 %v8566_v33  ;;  %v8619_v33 = vld [vmem:[%s9936_s15 + $0x390] sm:$0xff]  }
 0x1bb   : > { %8142 = vmatpush3.bf16.msra.mxu1 %v8563_v29  ;;  %v8615_v29 = vld [vmem:[%s9936_s15 + $0x398] sm:$0xff]  }
 0x1bc   : > { %6849 = vmatmul.mubr.bf16.gmra.mxu0 %v7701_v32  ;;  %8143 = vmatprep.subr.bf16.mxu1 %v8567_v34  ;;  %v8618_v32 = vld [vmem:[%s9936_s15 + $0x310] sm:$0xff]   ;;  %v8620_v34 = vld [vmem:[%s9936_s15 + $0x348] sm:$0xff]  }
 0x1bd   : > { %8116 = vmatpush3.bf16.msra.mxu0 %v8569_v37  ;;  %6936 = vmatprep.mubr.bf16.mxu0 %v7674_v0  ;;  %v8623_v37 = vld [vmem:[%s9936_s15 + $0x388] sm:$0xff]  }
 0x1be   : > { %6897 = vmatmul.mubr.bf16.gmra.mxu1 %v7703_v38  ;;  %8117 = vmatprep.subr.bf16.mxu0 %v8572_v40  ;;  %v8624_v38 = vld [vmem:[%s9936_s15 + $0x340] sm:$0xff]  }
 0x1bf   : > { %8144 = vmatpush3.bf16.msra.mxu1 %v8570_v39  ;;  %6984 = vmatprep.mubr.bf16.mxu1 %v7676_v3  ;;  %v8625_v39 = vld [vmem:[%s9936_s15 + $0x3c0] sm:$0xff]   ;;  %v8642_v3 = vld [vmem:[%s9936_s15 + $0x4a8] sm:$0xff]  }
 0x1c0   : > { %8145 = vmatprep.subr.bf16.mxu1 %v8573_v41  ;;  %v8626_v40 = vld [vmem:[%s9936_s15 + $0x300] sm:$0xff]  }
 0x1c1   : > { %8118 = vmatpush3.bf16.msra.mxu0 %v8574_v42  ;;  %v8627_v41 = vld [vmem:[%s9936_s15 + $0x380] sm:$0xff]   ;;  %v4350_v42 = vld [vmem:[%s10370_s0 + $0x30] sm:$0xff] }
 0x1c2   : > { %8119 = vmatprep.subr.bf16.mxu0 %v8576_v44  ;;  %v4351_v44 = vld [vmem:[%s10370_s0 + $0x38] sm:$0xff] }
 0x1c3   : > { %8146 = vmatpush3.bf16.msra.mxu1 %v8575_v43  ;;  %v4366_v43 = vld [vmem:[%s10370_s0 + $0xb0] sm:$0xff] }
 0x1c4   : > { %8147 = vmatprep.subr.bf16.mxu1 %v8577_v45  ;;  %v7677_v45 = vcombine.low %v4350_v42, %v4366_v43 }
 0x1c5   : > { %8120 = vmatpush3.bf16.msra.mxu0 %v8578_v46  ;;  %v7678_v46 = vcombine.high %v4350_v42, %v4366_v43  ;;  %v8674_v43 = vld [vmem:[%s9936_s15 + $0x568] sm:$0xff]  }
 0x1c6   : > { %8121 = vmatprep.subr.bf16.mxu0 %v8580_v48 }
 0x1c7   : > { %8148 = vmatpush3.bf16.msra.mxu1 %v8579_v47  ;;  %v4367_v47 = vld [vmem:[%s10370_s0 + $0xb8] sm:$0xff] }
 0x1c8   : > { %8149 = vmatprep.subr.bf16.mxu1 %v8581_v49  ;;  %v7679_v48 = vcombine.low %v4351_v44, %v4367_v47  ;;  %v7680_v49 = vcombine.high %v4351_v44, %v4367_v47  ;;  %v8675_v44 = vld [vmem:[%s9936_s15 + $0x5e8] sm:$0xff]  }
 0x1c9   : > { %8122 = vmatpush3.bf16.msra.mxu0 %v8582_v50  ;;  %v8628_v50 = vld [vmem:[%s9936_s15 + $0x478] sm:$0xff]   ;;  %v8677_v47 = vld [vmem:[%s9936_s15 + $0x528] sm:$0xff]  }
 0x1ca   : > { %8123 = vmatprep.subr.bf16.mxu0 %v8584_v52  ;;  %v8630_v52 = vld [vmem:[%s9936_s15 + $0x438] sm:$0xff]  }
 0x1cb   : > { %8150 = vmatpush3.bf16.msra.mxu1 %v8583_v51  ;;  %v8629_v51 = vld [vmem:[%s9936_s15 + $0x4f8] sm:$0xff]  }
 0x1cc   : > { %8151 = vmatprep.subr.bf16.mxu1 %v8585_v53  ;;  %v8631_v53 = vld [vmem:[%s9936_s15 + $0x4b8] sm:$0xff]  }
 0x1cd   : > { %8124 = vmatpush3.bf16.msra.mxu0 %v8586_v54  ;;  %v8632_v54 = vld [vmem:[%s9936_s15 + $0x470] sm:$0xff]  }
 0x1ce   : > { %8125 = vmatprep.subr.bf16.mxu0 %v8588_v56  ;;  %v8634_v56 = vld [vmem:[%s9936_s15 + $0x430] sm:$0xff]  }
 0x1cf   : > { %8152 = vmatpush3.bf16.msra.mxu1 %v8587_v55  ;;  %v8633_v55 = vld [vmem:[%s9936_s15 + $0x4f0] sm:$0xff]  }
 0x1d0   : > { %8153 = vmatprep.subr.bf16.mxu1 %v8589_v57  ;;  %v8635_v57 = vld [vmem:[%s9936_s15 + $0x4b0] sm:$0xff]  }
 0x1d1   : > { %8126 = vmatpush3.bf16.msra.mxu0 %v8590_v58  ;;  %v4382_v58 = vld [vmem:[%s10370_s0 + $0x130] sm:$0x11] }
 0x1d2   : > { %8167 = vmatprep.subr.bf16.mxu0 %v8592_v4  ;;  %v7709_v60 = vcombine.low %v4382_v58, %v4382_v58  ;;  %v8644_v4 = vld [vmem:[%s9936_s15 + $0x460] sm:$0xff]  }
 0x1d3   : > { %8154 = vmatpush3.bf16.msra.mxu1 %v8591_v59  ;;  %v7710_v59 = vcombine.high %v4382_v58, %v4382_v58  ;;  %v8688_v58 = vld [vmem:[%s9936_s15 + $0x550] sm:$0xff]  }
 0x1d4   : > { %6937 = vmatmul.mubr.bf16.vlgmr.msra.gmra.mxu0 %v7673_v63  ;;  %8195 = vmatprep.subr.bf16.mxu1 %v8593_v5  ;;  %v4383_v63 = vld [vmem:[%s10370_s0 + $0x138] sm:$0x11]  ;;  %v8645_v5 = vld [vmem:[%s9936_s15 + $0x4e0] sm:$0xff]  }
 0x1d5   : > { %8168 = vmatpush3.bf16.msra.mxu0 %v8594_v6  ;;  %6944 = vmatprep.mubr.bf16.mxu0 %v7706_v13  ;;  %v7712_v0 = vcombine.high %v4383_v63, %v4383_v63  ;;  %v8646_v6 = vld [vmem:[%s9936_s15 + $0x420] sm:$0xff]   ;;  %v8653_v13 = vld [vmem:[%s9936_s15 + $0x4d0] sm:$0xff]  }
 0x1d6   : > { %6985 = vmatmul.mubr.bf16.vlgmr.msra.gmra.mxu1 %v7675_v2  ;;  %8169 = vmatprep.subr.bf16.mxu0 %v8596_v8  ;;  %v7711_v2 = vcombine.low %v4383_v63, %v4383_v63  ;;  %v8648_v8 = vld [vmem:[%s9936_s15 + $0x458] sm:$0xff]   ;;  %v8693_v63 = vld [vmem:[%s9936_s15 + $0x5c8] sm:$0xff]  }
 0x1d7   : > { %8196 = vmatpush3.bf16.msra.mxu1 %v8595_v7  ;;  %6992 = vmatprep.mubr.bf16.mxu1 %v7708_v18  ;;  %v8647_v7 = vld [vmem:[%s9936_s15 + $0x4a0] sm:$0xff]   ;;  %v8658_v18 = vld [vmem:[%s9936_s15 + $0x408] sm:$0xff]  }
 0x1d8   : > { %8197 = vmatprep.subr.bf16.mxu1 %v8597_v9  ;;  %v8649_v9 = vld [vmem:[%s9936_s15 + $0x4d8] sm:$0xff]  }
 0x1d9   : > { %8170 = vmatpush3.bf16.msra.mxu0 %v8598_v10  ;;  %v8650_v10 = vld [vmem:[%s9936_s15 + $0x418] sm:$0xff]  }
 0x1da   : > { %8171 = vmatprep.subr.bf16.mxu0 %v8602_v15  ;;  %v8655_v15 = vld [vmem:[%s9936_s15 + $0x490] sm:$0xff]  }
 0x1db   : > { %8198 = vmatpush3.bf16.msra.mxu1 %v8599_v11  ;;  %v8651_v11 = vld [vmem:[%s9936_s15 + $0x498] sm:$0xff]  }
 0x1dc   : > { %6945 = vmatmul.mubr.bf16.gmra.mxu0 %v7705_v14  ;;  %8199 = vmatprep.subr.bf16.mxu1 %v8603_v16  ;;  %v8654_v14 = vld [vmem:[%s9936_s15 + $0x410] sm:$0xff]   ;;  %v8656_v16 = vld [vmem:[%s9936_s15 + $0x448] sm:$0xff]  }
 0x1dd   : > { %8172 = vmatpush3.bf16.msra.mxu0 %v8605_v19  ;;  %7032 = vmatprep.mubr.bf16.mxu0 %v7678_v46  ;;  %v8659_v19 = vld [vmem:[%s9936_s15 + $0x488] sm:$0xff]  }
 0x1de   : > { %6993 = vmatmul.mubr.bf16.gmra.mxu1 %v7707_v20  ;;  %8173 = vmatprep.subr.bf16.mxu0 %v8608_v22  ;;  %v8660_v20 = vld [vmem:[%s9936_s15 + $0x440] sm:$0xff]  }
 0x1df   : > { %8200 = vmatpush3.bf16.msra.mxu1 %v8606_v21  ;;  %7080 = vmatprep.mubr.bf16.mxu1 %v7680_v49  ;;  %v8661_v21 = vld [vmem:[%s9936_s15 + $0x4c0] sm:$0xff]   ;;  %v8678_v49 = vld [vmem:[%s9936_s15 + $0x5a8] sm:$0xff]  }
 0x1e0   : > { %8201 = vmatprep.subr.bf16.mxu1 %v8609_v23  ;;  %v8662_v22 = vld [vmem:[%s9936_s15 + $0x400] sm:$0xff]  }
 0x1e1   : > { %8174 = vmatpush3.bf16.msra.mxu0 %v8610_v24  ;;  %v8663_v23 = vld [vmem:[%s9936_s15 + $0x480] sm:$0xff]  }
 0x1e2   : > { %8175 = vmatprep.subr.bf16.mxu0 %v8612_v26  ;;  %v4352_v24 = vld [vmem:[%s10370_s0 + $0x40] sm:$0xff]  ;;  %v4353_v26 = vld [vmem:[%s10370_s0 + $0x48] sm:$0xff] }
 0x1e3   : > { %8202 = vmatpush3.bf16.msra.mxu1 %v8611_v25  ;;  %v4368_v25 = vld [vmem:[%s10370_s0 + $0xc0] sm:$0xff] }
 0x1e4   : > { %8203 = vmatprep.subr.bf16.mxu1 %v8613_v27  ;;  %v7681_v27 = vcombine.low %v4352_v24, %v4368_v25 }
 0x1e5   : > { %8176 = vmatpush3.bf16.msra.mxu0 %v8614_v28  ;;  %v7682_v28 = vcombine.high %v4352_v24, %v4368_v25  ;;  %v8710_v25 = vld [vmem:[%s9936_s15 + $0x668] sm:$0xff]  }
 0x1e6   : > { %8177 = vmatprep.subr.bf16.mxu0 %v8616_v30 }
 0x1e7   : > { %8204 = vmatpush3.bf16.msra.mxu1 %v8615_v29  ;;  %v4369_v29 = vld [vmem:[%s10370_s0 + $0xc8] sm:$0xff] }
 0x1e8   : > { %8205 = vmatprep.subr.bf16.mxu1 %v8617_v31  ;;  %v7683_v30 = vcombine.low %v4353_v26, %v4369_v29  ;;  %v7684_v31 = vcombine.high %v4353_v26, %v4369_v29  ;;  %v8711_v26 = vld [vmem:[%s9936_s15 + $0x6e8] sm:$0xff]  }
 0x1e9   : > { %8178 = vmatpush3.bf16.msra.mxu0 %v8618_v32  ;;  %v8664_v32 = vld [vmem:[%s9936_s15 + $0x578] sm:$0xff]   ;;  %v8713_v29 = vld [vmem:[%s9936_s15 + $0x628] sm:$0xff]  }
 0x1ea   : > { %8179 = vmatprep.subr.bf16.mxu0 %v8620_v34  ;;  %v8666_v34 = vld [vmem:[%s9936_s15 + $0x538] sm:$0xff]  }
 0x1eb   : > { %8206 = vmatpush3.bf16.msra.mxu1 %v8619_v33  ;;  %v8665_v33 = vld [vmem:[%s9936_s15 + $0x5f8] sm:$0xff]  }
 0x1ec   : > { %8207 = vmatprep.subr.bf16.mxu1 %v8621_v35  ;;  %v8667_v35 = vld [vmem:[%s9936_s15 + $0x5b8] sm:$0xff]  }
 0x1ed   : > { %8180 = vmatpush3.bf16.msra.mxu0 %v8622_v36  ;;  %v8668_v36 = vld [vmem:[%s9936_s15 + $0x570] sm:$0xff]  }
 0x1ee   : > { %8181 = vmatprep.subr.bf16.mxu0 %v8624_v38  ;;  %v8670_v38 = vld [vmem:[%s9936_s15 + $0x530] sm:$0xff]  }
 0x1ef   : > { %8208 = vmatpush3.bf16.msra.mxu1 %v8623_v37  ;;  %v8669_v37 = vld [vmem:[%s9936_s15 + $0x5f0] sm:$0xff]  }
 0x1f0   : > { %8209 = vmatprep.subr.bf16.mxu1 %v8625_v39  ;;  %v8671_v39 = vld [vmem:[%s9936_s15 + $0x5b0] sm:$0xff]  }
 0x1f1   : > { %8182 = vmatpush3.bf16.msra.mxu0 %v8626_v40  ;;  %v4384_v40 = vld [vmem:[%s10370_s0 + $0x140] sm:$0x11] }
 0x1f2   : > { %8223 = vmatprep.subr.bf16.mxu0 %v8628_v50  ;;  %v7713_v42 = vcombine.low %v4384_v40, %v4384_v40  ;;  %v8680_v50 = vld [vmem:[%s9936_s15 + $0x560] sm:$0xff]  }
 0x1f3   : > { %8210 = vmatpush3.bf16.msra.mxu1 %v8627_v41  ;;  %v7714_v41 = vcombine.high %v4384_v40, %v4384_v40  ;;  %v8724_v40 = vld [vmem:[%s9936_s15 + $0x650] sm:$0xff]  }
 0x1f4   : > { %7033 = vmatmul.mubr.bf16.vlgmr.msra.gmra.mxu0 %v7677_v45  ;;  %8251 = vmatprep.subr.bf16.mxu1 %v8629_v51  ;;  %v4385_v45 = vld [vmem:[%s10370_s0 + $0x148] sm:$0x11]  ;;  %v8681_v51 = vld [vmem:[%s9936_s15 + $0x5e0] sm:$0xff]  }
 0x1f5   : > { %8224 = vmatpush3.bf16.msra.mxu0 %v8630_v52  ;;  %7040 = vmatprep.mubr.bf16.mxu0 %v7710_v59  ;;  %v7716_v46 = vcombine.high %v4385_v45, %v4385_v45  ;;  %v8682_v52 = vld [vmem:[%s9936_s15 + $0x520] sm:$0xff]   ;;  %v8689_v59 = vld [vmem:[%s9936_s15 + $0x5d0] sm:$0xff]  }
 0x1f6   : > { %7081 = vmatmul.mubr.bf16.vlgmr.msra.gmra.mxu1 %v7679_v48  ;;  %8225 = vmatprep.subr.bf16.mxu0 %v8632_v54  ;;  %v7715_v48 = vcombine.low %v4385_v45, %v4385_v45  ;;  %v8684_v54 = vld [vmem:[%s9936_s15 + $0x558] sm:$0xff]   ;;  %v8729_v45 = vld [vmem:[%s9936_s15 + $0x6c8] sm:$0xff]  }
 0x1f7   : > { %8252 = vmatpush3.bf16.msra.mxu1 %v8631_v53  ;;  %7088 = vmatprep.mubr.bf16.mxu1 %v7712_v0  ;;  %v8683_v53 = vld [vmem:[%s9936_s15 + $0x5a0] sm:$0xff]   ;;  %v8694_v0 = vld [vmem:[%s9936_s15 + $0x508] sm:$0xff]  }
 0x1f8   : > { %8253 = vmatprep.subr.bf16.mxu1 %v8633_v55  ;;  %v8685_v55 = vld [vmem:[%s9936_s15 + $0x5d8] sm:$0xff]  }
 0x1f9   : > { %8226 = vmatpush3.bf16.msra.mxu0 %v8634_v56  ;;  %v8686_v56 = vld [vmem:[%s9936_s15 + $0x518] sm:$0xff]  }
 0x1fa   : > { %8227 = vmatprep.subr.bf16.mxu0 %v8638_v61  ;;  %v8691_v61 = vld [vmem:[%s9936_s15 + $0x590] sm:$0xff]  }
 0x1fb   : > { %8254 = vmatpush3.bf16.msra.mxu1 %v8635_v57  ;;  %v8687_v57 = vld [vmem:[%s9936_s15 + $0x598] sm:$0xff]  }
 0x1fc   : > { %7041 = vmatmul.mubr.bf16.gmra.mxu0 %v7709_v60  ;;  %8255 = vmatprep.subr.bf16.mxu1 %v8639_v62  ;;  %v8690_v60 = vld [vmem:[%s9936_s15 + $0x510] sm:$0xff]   ;;  %v8692_v62 = vld [vmem:[%s9936_s15 + $0x548] sm:$0xff]  }
 0x1fd   : > { %8228 = vmatpush3.bf16.msra.mxu0 %v8641_v1  ;;  %7128 = vmatprep.mubr.bf16.mxu0 %v7682_v28  ;;  %v8695_v1 = vld [vmem:[%s9936_s15 + $0x588] sm:$0xff]  }
 0x1fe   : > { %7089 = vmatmul.mubr.bf16.gmra.mxu1 %v7711_v2  ;;  %8229 = vmatprep.subr.bf16.mxu0 %v8644_v4  ;;  %v8696_v2 = vld [vmem:[%s9936_s15 + $0x540] sm:$0xff]  }
 0x1ff   : > { %8256 = vmatpush3.bf16.msra.mxu1 %v8642_v3  ;;  %7176 = vmatprep.mubr.bf16.mxu1 %v7684_v31  ;;  %v8697_v3 = vld [vmem:[%s9936_s15 + $0x5c0] sm:$0xff]   ;;  %v8714_v31 = vld [vmem:[%s9936_s15 + $0x6a8] sm:$0xff]  }
 0x200   : > { %8257 = vmatprep.subr.bf16.mxu1 %v8645_v5  ;;  %v8698_v4 = vld [vmem:[%s9936_s15 + $0x500] sm:$0xff]  }
 0x201   : > { %8230 = vmatpush3.bf16.msra.mxu0 %v8646_v6  ;;  %v8699_v5 = vld [vmem:[%s9936_s15 + $0x580] sm:$0xff]   ;;  %v4354_v6 = vld [vmem:[%s10370_s0 + $0x50] sm:$0xff] }
 0x202   : > { %8231 = vmatprep.subr.bf16.mxu0 %v8648_v8  ;;  %v4355_v8 = vld [vmem:[%s10370_s0 + $0x58] sm:$0xff] }
 0x203   : > { %8258 = vmatpush3.bf16.msra.mxu1 %v8647_v7  ;;  %v4370_v7 = vld [vmem:[%s10370_s0 + $0xd0] sm:$0xff] }
 0x204   : > { %8259 = vmatprep.subr.bf16.mxu1 %v8649_v9  ;;  %v7685_v9 = vcombine.low %v4354_v6, %v4370_v7 }
 0x205   : > { %8232 = vmatpush3.bf16.msra.mxu0 %v8650_v10  ;;  %v7686_v10 = vcombine.high %v4354_v6, %v4370_v7 }
 0x206   : > { %8233 = vmatprep.subr.bf16.mxu0 %v8652_v12 }
 0x207   : > { %8260 = vmatpush3.bf16.msra.mxu1 %v8651_v11  ;;  %v4371_v11 = vld [vmem:[%s10370_s0 + $0xd8] sm:$0xff] }
 0x208   : > { %8261 = vmatprep.subr.bf16.mxu1 %v8653_v13  ;;  %v7687_v12 = vcombine.low %v4355_v8, %v4371_v11  ;;  %v7688_v13 = vcombine.high %v4355_v8, %v4371_v11  ;;  %v8736_v8 = vld [vmem:[%s9936_s15 + $0x778] sm:$0xff]  }
 0x209   : > { %8234 = vmatpush3.bf16.msra.mxu0 %v8654_v14  ;;  %v8700_v14 = vld [vmem:[%s9936_s15 + $0x678] sm:$0xff]  }
 0x20a   : > { %8235 = vmatprep.subr.bf16.mxu0 %v8656_v16  ;;  %v8702_v16 = vld [vmem:[%s9936_s15 + $0x638] sm:$0xff]  }
 0x20b   : > { %8262 = vmatpush3.bf16.msra.mxu1 %v8655_v15  ;;  %v8701_v15 = vld [vmem:[%s9936_s15 + $0x6f8] sm:$0xff]  }
 0x20c   : > { %8263 = vmatprep.subr.bf16.mxu1 %v8657_v17  ;;  %v8703_v17 = vld [vmem:[%s9936_s15 + $0x6b8] sm:$0xff]  }
 0x20d   : > { %8236 = vmatpush3.bf16.msra.mxu0 %v8658_v18  ;;  %v8704_v18 = vld [vmem:[%s9936_s15 + $0x670] sm:$0xff]   ;;  %v8737_v11 = vld [vmem:[%s9936_s15 + $0x7f8] sm:$0xff]  }
 0x20e   : > { %8237 = vmatprep.subr.bf16.mxu0 %v8660_v20  ;;  %v8706_v20 = vld [vmem:[%s9936_s15 + $0x630] sm:$0xff]  }
 0x20f   : > { %8264 = vmatpush3.bf16.msra.mxu1 %v8659_v19  ;;  %v8705_v19 = vld [vmem:[%s9936_s15 + $0x6f0] sm:$0xff]  }
 0x210   : > { %8265 = vmatprep.subr.bf16.mxu1 %v8661_v21  ;;  %v8707_v21 = vld [vmem:[%s9936_s15 + $0x6b0] sm:$0xff]  }
 0x211   : > { %8238 = vmatpush3.bf16.msra.mxu0 %v8662_v22  ;;  %v4386_v22 = vld [vmem:[%s10370_s0 + $0x150] sm:$0x11] }
 0x212   : > { %8279 = vmatprep.subr.bf16.mxu0 %v8664_v32  ;;  %v7717_v24 = vcombine.low %v4386_v22, %v4386_v22  ;;  %v8716_v32 = vld [vmem:[%s9936_s15 + $0x660] sm:$0xff]  }
 0x213   : > { %8266 = vmatpush3.bf16.msra.mxu1 %v8663_v23  ;;  %v7718_v23 = vcombine.high %v4386_v22, %v4386_v22  ;;  %v8741_v22 = vld [vmem:[%s9936_s15 + $0x7f0] sm:$0xff]  }
 0x214   : > { %7129 = vmatmul.mubr.bf16.vlgmr.msra.gmra.mxu0 %v7681_v27  ;;  %8307 = vmatprep.subr.bf16.mxu1 %v8665_v33  ;;  %v4387_v27 = vld [vmem:[%s10370_s0 + $0x158] sm:$0x11]  ;;  %v8717_v33 = vld [vmem:[%s9936_s15 + $0x6e0] sm:$0xff]  }
 0x215   : > { %8280 = vmatpush3.bf16.msra.mxu0 %v8666_v34  ;;  %7136 = vmatprep.mubr.bf16.mxu0 %v7714_v41  ;;  %v7720_v28 = vcombine.high %v4387_v27, %v4387_v27  ;;  %v8718_v34 = vld [vmem:[%s9936_s15 + $0x620] sm:$0xff]   ;;  %v8725_v41 = vld [vmem:[%s9936_s15 + $0x6d0] sm:$0xff]  }
 0x216   : > { %7177 = vmatmul.mubr.bf16.vlgmr.msra.gmra.mxu1 %v7683_v30  ;;  %8281 = vmatprep.subr.bf16.mxu0 %v8668_v36  ;;  %v7719_v30 = vcombine.low %v4387_v27, %v4387_v27  ;;  %v8720_v36 = vld [vmem:[%s9936_s15 + $0x658] sm:$0xff]   ;;  %v8743_v27 = vld [vmem:[%s9936_s15 + $0x7b0] sm:$0xff]  }
 0x217   : > { %8308 = vmatpush3.bf16.msra.mxu1 %v8667_v35  ;;  %7184 = vmatprep.mubr.bf16.mxu1 %v7716_v46  ;;  %v8719_v35 = vld [vmem:[%s9936_s15 + $0x6a0] sm:$0xff]   ;;  %v8730_v46 = vld [vmem:[%s9936_s15 + $0x608] sm:$0xff]  }
 0x218   : > { %8309 = vmatprep.subr.bf16.mxu1 %v8669_v37  ;;  %v8721_v37 = vld [vmem:[%s9936_s15 + $0x6d8] sm:$0xff]  }
 0x219   : > { %8282 = vmatpush3.bf16.msra.mxu0 %v8670_v38  ;;  %v8722_v38 = vld [vmem:[%s9936_s15 + $0x618] sm:$0xff]  }
 0x21a   : > { %8283 = vmatprep.subr.bf16.mxu0 %v8674_v43  ;;  %v8727_v43 = vld [vmem:[%s9936_s15 + $0x690] sm:$0xff]  }
 0x21b   : > { %8310 = vmatpush3.bf16.msra.mxu1 %v8671_v39  ;;  %v8723_v39 = vld [vmem:[%s9936_s15 + $0x698] sm:$0xff]  }
 0x21c   : > { %7137 = vmatmul.mubr.bf16.gmra.mxu0 %v7713_v42  ;;  %8311 = vmatprep.subr.bf16.mxu1 %v8675_v44  ;;  %v8726_v42 = vld [vmem:[%s9936_s15 + $0x610] sm:$0xff]   ;;  %v8728_v44 = vld [vmem:[%s9936_s15 + $0x648] sm:$0xff]  }
 0x21d   : > { %8284 = vmatpush3.bf16.msra.mxu0 %v8677_v47  ;;  %7224 = vmatprep.mubr.bf16.mxu0 %v7686_v10 }
 0x21e   : > { %7185 = vmatmul.mubr.bf16.gmra.mxu1 %v7715_v48  ;;  %8285 = vmatprep.subr.bf16.mxu0 %v8680_v50  ;;  %v8731_v48 = vld [vmem:[%s9936_s15 + $0x688] sm:$0xff]   ;;  %v8732_v50 = vld [vmem:[%s9936_s15 + $0x640] sm:$0xff]  }
 0x21f   : > { %8312 = vmatpush3.bf16.msra.mxu1 %v8678_v49  ;;  %7272 = vmatprep.mubr.bf16.mxu1 %v7688_v13  ;;  %v8738_v13 = vld [vmem:[%s9936_s15 + $0x738] sm:$0xff]  }
 0x220   : > { %8313 = vmatprep.subr.bf16.mxu1 %v8681_v51 }
 0x221   : > { %8286 = vmatpush3.bf16.msra.mxu0 %v8682_v52  ;;  %v8733_v52 = vld [vmem:[%s9936_s15 + $0x6c0] sm:$0xff]  }
 0x222   : > { %8287 = vmatprep.subr.bf16.mxu0 %v8684_v54 }
 0x223   : > { %8314 = vmatpush3.bf16.msra.mxu1 %v8683_v53 }
 0x224   : > { %8315 = vmatprep.subr.bf16.mxu1 %v8685_v55  ;;  %v8734_v55 = vld [vmem:[%s9936_s15 + $0x600] sm:$0xff]  }
 0x225   : > { %8288 = vmatpush3.bf16.msra.mxu0 %v8686_v56 }
 0x226   : > { %8289 = vmatprep.subr.bf16.mxu0 %v8688_v58  ;;  %v8735_v58 = vld [vmem:[%s9936_s15 + $0x680] sm:$0xff]  }
 0x227   : > { %8316 = vmatpush3.bf16.msra.mxu1 %v8687_v57 }
 0x228   : > { %8317 = vmatprep.subr.bf16.mxu1 %v8689_v59 }
 0x229   : > { %8290 = vmatpush3.bf16.msra.mxu0 %v8690_v60  ;;  %v4356_v60 = vld [vmem:[%s10370_s0 + $0x60] sm:$0xff] }
 0x22a   : > { %8291 = vmatprep.subr.bf16.mxu0 %v8692_v62  ;;  %v4357_v62 = vld [vmem:[%s10370_s0 + $0x68] sm:$0xff] }
 0x22b   : > { %8318 = vmatpush3.bf16.msra.mxu1 %v8691_v61  ;;  %v4372_v61 = vld [vmem:[%s10370_s0 + $0xe0] sm:$0xff] }
 0x22c   : > { %8319 = vmatprep.subr.bf16.mxu1 %v8693_v63 }
 0x22d   : > { %8292 = vmatpush3.bf16.msra.mxu0 %v8694_v0 }
 0x22e   : > { %8293 = vmatprep.subr.bf16.mxu0 %v8696_v2  ;;  %v7690_v2 = vcombine.high %v4356_v60, %v4372_v61 }
 0x22f   : > { %8320 = vmatpush3.bf16.msra.mxu1 %v8695_v1  ;;  %v7689_v1 = vcombine.low %v4356_v60, %v4372_v61  ;;  %v8768_v60 = vld [vmem:[%s9936_s15 + $0x740] sm:$0xff]  }
 0x230   : > { %8321 = vmatprep.subr.bf16.mxu1 %v8697_v3  ;;  %v4373_v3 = vld [vmem:[%s10370_s0 + $0xe8] sm:$0xff] }
 0x231   : > { %8294 = vmatpush3.bf16.msra.mxu0 %v8698_v4  ;;  %v7691_v6 = vcombine.low %v4357_v62, %v4373_v3  ;;  %v7692_v7 = vcombine.high %v4357_v62, %v4373_v3  ;;  %v8770_v3 = vld [vmem:[%s9936_s15 + $0x700] sm:$0xff]  }
 0x232   : > { %8335 = vmatprep.subr.bf16.mxu0 %v8700_v14 }
 0x233   : > { %8322 = vmatpush3.bf16.msra.mxu1 %v8699_v5 }
 0x234   : > { %7225 = vmatmul.mubr.bf16.vlgmr.msra.gmra.mxu0 %v7685_v9  ;;  %8363 = vmatprep.subr.bf16.mxu1 %v8701_v15 }
 0x235   : > { %8336 = vmatpush3.bf16.msra.mxu0 %v8702_v16  ;;  %7232 = vmatprep.mubr.bf16.mxu0 %v7718_v23  ;;  %v8739_v16 = vld [vmem:[%s9936_s15 + $0x7b8] sm:$0xff]  }
 0x236   : > { %7273 = vmatmul.mubr.bf16.vlgmr.msra.gmra.mxu1 %v7687_v12  ;;  %8337 = vmatprep.subr.bf16.mxu0 %v8704_v18 }
 0x237   : > { %8364 = vmatpush3.bf16.msra.mxu1 %v8703_v17  ;;  %7280 = vmatprep.mubr.bf16.mxu1 %v7720_v28  ;;  %v4388_v28 = vld [vmem:[%s10370_s0 + $0x160] sm:$0x11] }
 0x238   : > { %8365 = vmatprep.subr.bf16.mxu1 %v8705_v19  ;;  %v8740_v19 = vld [vmem:[%s9936_s15 + $0x770] sm:$0xff]  }
 0x239   : > { %8338 = vmatpush3.bf16.msra.mxu0 %v8706_v20 }
 0x23a   : > { %8339 = vmatprep.subr.bf16.mxu0 %v8710_v25 }
 0x23b   : > { %8366 = vmatpush3.bf16.msra.mxu1 %v8707_v21 }
 0x23c   : > { %7233 = vmatmul.mubr.bf16.gmra.mxu0 %v7717_v24  ;;  %8367 = vmatprep.subr.bf16.mxu1 %v8711_v26  ;;  %v8742_v24 = vld [vmem:[%s9936_s15 + $0x730] sm:$0xff]  }
 0x23d   : > { %8340 = vmatpush3.bf16.msra.mxu0 %v8713_v29  ;;  %7320 = vmatprep.mubr.bf16.mxu0 %v7690_v2 }
 0x23e   : > { %7281 = vmatmul.mubr.bf16.gmra.mxu1 %v7719_v30  ;;  %8341 = vmatprep.subr.bf16.mxu0 %v8716_v32  ;;  %v7722_v30 = vcombine.high %v4388_v28, %v4388_v28  ;;  %v8746_v32 = vld [vmem:[%s9936_s15 + $0x768] sm:$0xff]  }
 0x23f   : > { %8368 = vmatpush3.bf16.msra.mxu1 %v8714_v31  ;;  %7368 = vmatprep.mubr.bf16.mxu1 %v7692_v7  ;;  %v7721_v31 = vcombine.low %v4388_v28, %v4388_v28 }
 0x240   : > { %8369 = vmatprep.subr.bf16.mxu1 %v8717_v33  ;;  %v8747_v33 = vld [vmem:[%s9936_s15 + $0x7e8] sm:$0xff]  }
 0x241   : > { %8342 = vmatpush3.bf16.msra.mxu0 %v8718_v34  ;;  %v4389_v34 = vld [vmem:[%s10370_s0 + $0x168] sm:$0x11] }
 0x242   : > { %8343 = vmatprep.subr.bf16.mxu0 %v8720_v36  ;;  %v8749_v36 = vld [vmem:[%s9936_s15 + $0x728] sm:$0xff]  }
 0x243   : > { %8370 = vmatpush3.bf16.msra.mxu1 %v8719_v35  ;;  %v7724_v35 = vcombine.high %v4389_v34, %v4389_v34 }
 0x244   : > { %8371 = vmatprep.subr.bf16.mxu1 %v8721_v37  ;;  %v7723_v37 = vcombine.low %v4389_v34, %v4389_v34 }
 0x245   : > { %8344 = vmatpush3.bf16.msra.mxu0 %v8722_v38  ;;  %v8750_v38 = vld [vmem:[%s9936_s15 + $0x7a8] sm:$0xff]  }
 0x246   : > { %8345 = vmatprep.subr.bf16.mxu0 %v8724_v40  ;;  %v8753_v40 = vld [vmem:[%s9936_s15 + $0x7e0] sm:$0xff]  }
 0x247   : > { %8372 = vmatpush3.bf16.msra.mxu1 %v8723_v39  ;;  %v8752_v39 = vld [vmem:[%s9936_s15 + $0x760] sm:$0xff]  }
 0x248   : > { %8373 = vmatprep.subr.bf16.mxu1 %v8725_v41  ;;  %v8754_v41 = vld [vmem:[%s9936_s15 + $0x720] sm:$0xff]  }
 0x249   : > { %8346 = vmatpush3.bf16.msra.mxu0 %v8726_v42  ;;  %v8755_v42 = vld [vmem:[%s9936_s15 + $0x7a0] sm:$0xff]  }
 0x24a   : > { %8347 = vmatprep.subr.bf16.mxu0 %v8728_v44  ;;  %v8757_v44 = vld [vmem:[%s9936_s15 + $0x7d8] sm:$0xff]  }
 0x24b   : > { %8374 = vmatpush3.bf16.msra.mxu1 %v8727_v43  ;;  %v8756_v43 = vld [vmem:[%s9936_s15 + $0x758] sm:$0xff]  }
 0x24c   : > { %8375 = vmatprep.subr.bf16.mxu1 %v8729_v45  ;;  %v8758_v45 = vld [vmem:[%s9936_s15 + $0x718] sm:$0xff]  }
 0x24d   : > { %8348 = vmatpush3.bf16.msra.mxu0 %v8730_v46  ;;  %v8759_v46 = vld [vmem:[%s9936_s15 + $0x798] sm:$0xff]  }
 0x24e   : > { %8349 = vmatprep.subr.bf16.mxu0 %v8732_v50  ;;  %v8763_v50 = vld [vmem:[%s9936_s15 + $0x790] sm:$0xff]  }
 0x24f   : > { %8376 = vmatpush3.bf16.msra.mxu1 %v8731_v48  ;;  %v8761_v48 = vld [vmem:[%s9936_s15 + $0x7d0] sm:$0xff]  }
 0x250   : > { %8377 = vmatprep.subr.bf16.mxu1 %v8733_v52 }
 0x251   : > { %8350 = vmatpush3.bf16.msra.mxu0 %v8734_v55  ;;  %v8766_v55 = vld [vmem:[%s9936_s15 + $0x708] sm:$0xff]  }
 0x252   : > { %8391 = vmatprep.subr.bf16.mxu0 %v8736_v8 }
 0x253   : > { %8378 = vmatpush3.bf16.msra.mxu1 %v8735_v58 }
 0x254   : > { %v8015_v47 = vpop.f32.mrf.mxu0  ;;  %7321 = vmatmul.mubr.bf16.vlgmr.msra.gmra.mxu0 %v7689_v1  ;;  %8419 = vmatprep.subr.bf16.mxu1 %v8737_v11 }
 0x255   : > { %8392 = vmatpush3.bf16.msra.mxu0 %v8738_v13  ;;  %7328 = vmatprep.mubr.bf16.mxu0 %v7722_v30 }
 0x256   : > { %v8043_v49 = vpop.f32.mrf.mxu1  ;;  %v8016_v51 = vpop.f32.mrf.mxu0  ;;  %7369 = vmatmul.mubr.bf16.vlgmr.msra.gmra.mxu1 %v7691_v6  ;;  %8393 = vmatprep.subr.bf16.mxu0 %v8740_v19 }
 0x257   : > { %v8017_v53 = vadd.f32 %v8016_v51, %v8015_v47  ;;  %8420 = vmatpush3.bf16.msra.mxu1 %v8739_v16  ;;  %7376 = vmatprep.mubr.bf16.mxu1 %v7724_v35  ;;  %v8760_v47 = vld [vmem:[%s9936_s15 + $0x750] sm:$0xff]   ;;  %v8764_v51 = vld [vmem:[%s9936_s15 + $0x748] sm:$0xff]  }
 0x258   : > { %v8044_v54 = vpop.f32.mrf.mxu1  ;;  %v8018_v57 = vpop.f32.mrf.mxu0  ;;  %8421 = vmatprep.subr.bf16.mxu1 %v8741_v22 }
 0x259   : > { %v8045_v56 = vadd.f32 %v8044_v54, %v8043_v49  ;;  %8394 = vmatpush3.bf16.msra.mxu0 %v8742_v24  ;;  %v8762_v49 = vld [vmem:[%s9936_s15 + $0x710] sm:$0xff]  }
 0x25a   : > { %v8046_v59 = vpop.f32.mrf.mxu1  ;;  %v8019_v0 = vpop.f32.mrf.mxu0  ;;  %8395 = vmatprep.subr.bf16.mxu0 %v8746_v32 }
 0x25b   : > { %v10279_v63 = vadd.f32 %v8045_v56, %v8017_v53  ;;  %v8020_v4 = vadd.f32 %v8019_v0, %v8018_v57  ;;  %8422 = vmatpush3.bf16.msra.mxu1 %v8743_v27  ;;  %v8765_v53 = vld [vmem:[%s9936_s15 + $0x7c8] sm:$0xff]   ;;  %v8769_v0 = vld [vmem:[%s9936_s15 + $0x7c0] sm:$0xff]  }
 0x25c   : > { %v8047_v5 = vpop.f32.mrf.mxu1  ;;  %v8021_v10 = vpop.f32.mrf.mxu0  ;;  %7329 = vmatmul.mubr.bf16.gmra.mxu0 %v7721_v31  ;;  %8423 = vmatprep.subr.bf16.mxu1 %v8747_v33  ;;  %v8767_v57 = vld [vmem:[%s9936_s15 + $0x788] sm:$0xff]  }
 0x25d   : > { %v8048_v9 = vadd.f32 %v8047_v5, %v8046_v59  ;;  %8396 = vmatpush3.bf16.msra.mxu0 %v8749_v36  ;;  %v8771_v5 = vld [vmem:[%s9936_s15 + $0x780] sm:$0xff]  }
 0x25e   : > { %v8049_v12 = vpop.f32.mrf.mxu1  ;;  %v8022_v15 = vpop.f32.mrf.mxu0  ;;  %7377 = vmatmul.mubr.bf16.gmra.mxu1 %v7723_v37  ;;  %8397 = vmatprep.subr.bf16.mxu0 %v8752_v39 }
 0x25f   : > { %v10287_v14 = vadd.f32 %v8048_v9, %v8020_v4  ;;  %v8023_v17 = vadd.f32 %v8022_v15, %v8021_v10  ;;  %8424 = vmatpush3.bf16.msra.mxu1 %v8750_v38  ;;  %v4358_v9 = vld [vmem:[%s10370_s0 + $0x70] sm:$0xff]  ;;  %v4375_v15 = vld [vmem:[%s10370_s0 + $0xf8] sm:$0xff] }
 0x260   : > { %v8050_v18 = vpop.f32.mrf.mxu1  ;;  %v8024_v20 = vpop.f32.mrf.mxu0  ;;  %8425 = vmatprep.subr.bf16.mxu1 %v8753_v40  ;;  %v4374_v10 = vld [vmem:[%s10370_s0 + $0xf0] sm:$0xff] }
 0x261   : > { %v8051_v21 = vadd.f32 %v8050_v18, %v8049_v12  ;;  %8398 = vmatpush3.bf16.msra.mxu0 %v8754_v41  ;;  %v7693_v12 = vcombine.low %v4358_v9, %v4374_v10  ;;  %v7694_v13 = vcombine.high %v4358_v9, %v4374_v10  ;;  %v4391_v18 = vld [vmem:[%s10370_s0 + $0x178] sm:$0x11] }
 0x262   : > { %v8052_v23 = vpop.f32.mrf.mxu1  ;;  %v8025_v26 = vpop.f32.mrf.mxu0  ;;  %8399 = vmatprep.subr.bf16.mxu0 %v8756_v43  ;;  %v7727_v35 = vcombine.low %v4391_v18, %v4391_v18 }
 0x263   : > { %v10293_v25 = vadd.f32 %v8051_v21, %v8023_v17  ;;  %8426 = vmatpush3.bf16.msra.mxu1 %v8755_v42  ;;  %v4390_v17 = vld [vmem:[%s10370_s0 + $0x170] sm:$0x11]  ;;  %v7728_v23 = vcombine.high %v4391_v18, %v4391_v18  ;;  %7416 = vmatprep.mubr.bf16.mxu0 %v7694_v13 }
 0x264   : > { %v8053_v29 = vpop.f32.mrf.mxu1  ;;  %8427 = vmatprep.subr.bf16.mxu1 %v8757_v44  ;;  %v7726_v22 = vcombine.high %v4390_v17, %v4390_v17  ;;  %v7725_v33 = vcombine.low %v4390_v17, %v4390_v17 }
 0x265   : > { %8400 = vmatpush3.bf16.msra.mxu0 %v8758_v45 }
 0x266   : > { %8401 = vmatprep.subr.bf16.mxu0 %v8760_v47 }
 0x267   : > { %8428 = vmatpush3.bf16.msra.mxu1 %v8759_v46 }
 0x268   : > { %8429 = vmatprep.subr.bf16.mxu1 %v8761_v48 }
 0x269   : > { %8402 = vmatpush3.bf16.msra.mxu0 %v8762_v49 }
 0x26a   : > { %8403 = vmatprep.subr.bf16.mxu0 %v8764_v51 }
 0x26b   : > { %8430 = vmatpush3.bf16.msra.mxu1 %v8763_v50 }
 0x26c   : > { %8431 = vmatprep.subr.bf16.mxu1 %v8765_v53 }
 0x26d   : > { %8404 = vmatpush3.bf16.msra.mxu0 %v8766_v55 }
 0x26e   : > { %8405 = vmatprep.subr.bf16.mxu0 %v8768_v60 }
 0x26f   : > { %8432 = vmatpush3.bf16.msra.mxu1 %v8767_v57 }
 0x270   : > { %8433 = vmatprep.subr.bf16.mxu1 %v8769_v0 }
 0x271   : > { %8406 = vmatpush3.bf16.msra.mxu0 %v8770_v3 }
 0x273   : > { %8434 = vmatpush3.bf16.msra.mxu1 %v8771_v5 }
 0x274   : > { %v8071_v52 = vpop.f32.mrf.mxu0  ;;  %7417 = vmatmul.mubr.bf16.vlgmr.msra.gmra.mxu0 %v7693_v12 }
 0x275   : > { %7424 = vmatprep.mubr.bf16.mxu0 %v7726_v22 }
 0x276   : > { %v8099_v54 = vpop.f32.mrf.mxu1  ;;  %v8072_v56 = vpop.f32.mrf.mxu0 }
 0x277   : > { %v8073_v58 = vadd.f32 %v8072_v56, %v8071_v52 }
 0x278   : > { %v8100_v59 = vpop.f32.mrf.mxu1  ;;  %v8074_v62 = vpop.f32.mrf.mxu0 }
 0x279   : > { %v8101_v61 = vadd.f32 %v8100_v59, %v8099_v54  ;;  %v6843_v1 = vadd.f32 %v8073_v58, %v10279_v63  ;;  %v4359_v63 = vld [vmem:[%s10370_s0 + $0x78] sm:$0xff] }
 0x27a   : > { %v8102_v2 = vpop.f32.mrf.mxu1  ;;  %v8075_v4 = vpop.f32.mrf.mxu0  ;;  %v7695_v20 = vcombine.low %v4359_v63, %v4375_v15  ;;  %v7696_v21 = vcombine.high %v4359_v63, %v4375_v15 }
 0x27b   : > { %v6891_v6 = vadd.f32 %v8101_v61, %v6843_v1  ;;  %v8076_v7 = vadd.f32 %v8075_v4, %v8074_v62 }
 0x27c   : > { %v8103_v8 = vpop.f32.mrf.mxu1  ;;  %v8077_v19 = vpop.f32.mrf.mxu0  ;;  %7464 = vmatprep.mubr.bf16.mxu1 %v7696_v21  ;;  %7425 = vmatmul.mubr.bf16.gmra.mxu0 %v7725_v33 }
 0x27d   : > { %v8104_v11 = vadd.f32 %v8103_v8, %v8102_v2  ;;  %v6846_v16 = vadd.f32 %v8076_v7, %v10287_v14  ;;  %7465 = vmatmul.mubr.bf16.vlgmr.msra.gmra.mxu1 %v7695_v20 }
 0x27e   : > { %v8078_v26 = vpop.f32.mrf.mxu0  ;;  %v8105_v14 = vpop.f32.mrf.mxu1  ;;  %7472 = vmatprep.mubr.bf16.mxu1 %v7728_v23 }
 0x27f   : > { %v6894_v24 = vadd.f32 %v8104_v11, %v6846_v16  ;;  %v8079_v27 = vadd.f32 %v8078_v26, %v8077_v19 }
 0x280   : > { %v8080_v28 = vpop.f32.mrf.mxu0  ;;  %v8106_v30 = vpop.f32.mrf.mxu1 }
 0x281   : > { %v6851_v29 = vadd.f32 %v8079_v27, %v10293_v25  ;;  %v8107_v31 = vadd.f32 %v8106_v30, %v8105_v14 }
 0x282   : > { %v8081_v32 = vpop.f32.mrf.mxu0  ;;  %v8108_v34 = vpop.f32.mrf.mxu1 }
 0x283   : > { %v6899_v36 = vadd.f32 %v8107_v31, %v6851_v29 }
 0x284   : > { %v8109_v37 = vpop.f32.mrf.mxu1 }
 0x285   : > { %7473 = vmatmul.mubr.bf16.gmra.mxu1 %v7727_v35 }
 0x294   : > { %v8127_v38 = vpop.f32.mrf.mxu0 }
 0x296   : > { %v8155_v39 = vpop.f32.mrf.mxu1  ;;  %v8128_v40 = vpop.f32.mrf.mxu0 }
 0x297   : > { %v8129_v41 = vadd.f32 %v8128_v40, %v8127_v38 }
 0x298   : > { %v8156_v42 = vpop.f32.mrf.mxu1  ;;  %v8130_v44 = vpop.f32.mrf.mxu0 }
 0x299   : > { %v8157_v43 = vadd.f32 %v8156_v42, %v8155_v39  ;;  %v6939_v45 = vadd.f32 %v8129_v41, %v6891_v6 }
 0x29a   : > { %v8158_v46 = vpop.f32.mrf.mxu1  ;;  %v8131_v25 = vpop.f32.mrf.mxu0 }
 0x29b   : > { %v6987_v47 = vadd.f32 %v8157_v43, %v6939_v45  ;;  %v8132_v48 = vadd.f32 %v8131_v25, %v8130_v44 }
 0x29c   : > { %v8159_v49 = vpop.f32.mrf.mxu1  ;;  %v8133_v52 = vpop.f32.mrf.mxu0 }
 0x29d   : > { %v8160_v50 = vadd.f32 %v8159_v49, %v8158_v46  ;;  %v6942_v51 = vadd.f32 %v8132_v48, %v6894_v24 }
 0x29e   : > { %v8134_v54 = vpop.f32.mrf.mxu0  ;;  %v8161_v56 = vpop.f32.mrf.mxu1 }
 0x29f   : > { %v6990_v53 = vadd.f32 %v8160_v50, %v6942_v51  ;;  %v8135_v55 = vadd.f32 %v8134_v54, %v8133_v52 }
 0x2a0   : > { %v8136_v57 = vpop.f32.mrf.mxu0  ;;  %v8162_v59 = vpop.f32.mrf.mxu1 }
 0x2a1   : > { %v6947_v58 = vadd.f32 %v8135_v55, %v6899_v36  ;;  %v8163_v60 = vadd.f32 %v8162_v59, %v8161_v56 }
 0x2a2   : > { %v8137_v61 = vpop.f32.mrf.mxu0  ;;  %v8164_v62 = vpop.f32.mrf.mxu1 }
 0x2a3   : > { %v6995_v0 = vadd.f32 %v8163_v60, %v6947_v58 }
 0x2a4   : > { %v8165_v1 = vpop.f32.mrf.mxu1 }
 0x2b4   : > { %v8183_v2 = vpop.f32.mrf.mxu0 }
 0x2b6   : > { %v8211_v3 = vpop.f32.mrf.mxu1  ;;  %v8184_v4 = vpop.f32.mrf.mxu0 }
 0x2b7   : > { %v8185_v5 = vadd.f32 %v8184_v4, %v8183_v2 }
 0x2b8   : > { %v8212_v6 = vpop.f32.mrf.mxu1  ;;  %v8186_v8 = vpop.f32.mrf.mxu0 }
 0x2b9   : > { %v8213_v7 = vadd.f32 %v8212_v6, %v8211_v3  ;;  %v7035_v9 = vadd.f32 %v8185_v5, %v6987_v47 }
 0x2ba   : > { %v8214_v10 = vpop.f32.mrf.mxu1  ;;  %v8187_v63 = vpop.f32.mrf.mxu0 }
 0x2bb   : > { %v7083_v11 = vadd.f32 %v8213_v7, %v7035_v9  ;;  %v8188_v12 = vadd.f32 %v8187_v63, %v8186_v8 }
 0x2bc   : > { %v8215_v13 = vpop.f32.mrf.mxu1  ;;  %v8189_v17 = vpop.f32.mrf.mxu0 }
 0x2bd   : > { %v8216_v15 = vadd.f32 %v8215_v13, %v8214_v10  ;;  %v7038_v16 = vadd.f32 %v8188_v12, %v6990_v53 }
 0x2be   : > { %v8190_v19 = vpop.f32.mrf.mxu0  ;;  %v8217_v21 = vpop.f32.mrf.mxu1 }
 0x2bf   : > { %v7086_v18 = vadd.f32 %v8216_v15, %v7038_v16  ;;  %v8191_v20 = vadd.f32 %v8190_v19, %v8189_v17 }
 0x2c0   : > { %v8192_v22 = vpop.f32.mrf.mxu0  ;;  %v8218_v24 = vpop.f32.mrf.mxu1 }
 0x2c1   : > { %v7043_v23 = vadd.f32 %v8191_v20, %v6995_v0  ;;  %v8219_v26 = vadd.f32 %v8218_v24, %v8217_v21 }
 0x2c2   : > { %v8193_v27 = vpop.f32.mrf.mxu0  ;;  %v8220_v14 = vpop.f32.mrf.mxu1 }
 0x2c3   : > { %v7091_v28 = vadd.f32 %v8219_v26, %v7043_v23 }
 0x2c4   : > { %v8221_v29 = vpop.f32.mrf.mxu1 }
 0x2d4   : > { %v8239_v30 = vpop.f32.mrf.mxu0 }
 0x2d6   : > { %v8267_v31 = vpop.f32.mrf.mxu1  ;;  %v8240_v32 = vpop.f32.mrf.mxu0 }
 0x2d7   : > { %v8241_v33 = vadd.f32 %v8240_v32, %v8239_v30 }
 0x2d8   : > { %v8268_v34 = vpop.f32.mrf.mxu1  ;;  %v8242_v36 = vpop.f32.mrf.mxu0 }
 0x2d9   : > { %v8269_v35 = vadd.f32 %v8268_v34, %v8267_v31  ;;  %v7131_v37 = vadd.f32 %v8241_v33, %v7083_v11 }
 0x2da   : > { %v8270_v38 = vpop.f32.mrf.mxu1  ;;  %v8243_v39 = vpop.f32.mrf.mxu0 }
 0x2db   : > { %v7179_v40 = vadd.f32 %v8269_v35, %v7131_v37  ;;  %v8244_v41 = vadd.f32 %v8243_v39, %v8242_v36 }
 0x2dc   : > { %v8271_v42 = vpop.f32.mrf.mxu1  ;;  %v8245_v45 = vpop.f32.mrf.mxu0 }
 0x2dd   : > { %v8272_v43 = vadd.f32 %v8271_v42, %v8270_v38  ;;  %v7134_v44 = vadd.f32 %v8244_v41, %v7086_v18 }
 0x2de   : > { %v8246_v25 = vpop.f32.mrf.mxu0  ;;  %v8273_v48 = vpop.f32.mrf.mxu1 }
 0x2df   : > { %v7182_v46 = vadd.f32 %v8272_v43, %v7134_v44  ;;  %v8247_v47 = vadd.f32 %v8246_v25, %v8245_v45 }
 0x2e0   : > { %v8248_v49 = vpop.f32.mrf.mxu0  ;;  %v8274_v51 = vpop.f32.mrf.mxu1 }
 0x2e1   : > { %v7139_v50 = vadd.f32 %v8247_v47, %v7091_v28  ;;  %v8275_v52 = vadd.f32 %v8274_v51, %v8273_v48 }
 0x2e2   : > { %v8249_v53 = vpop.f32.mrf.mxu0  ;;  %v8276_v54 = vpop.f32.mrf.mxu1 }
 0x2e3   : > { %v7187_v55 = vadd.f32 %v8275_v52, %v7139_v50 }
 0x2e4   : > { %v8277_v56 = vpop.f32.mrf.mxu1 }
 0x2f4   : > { %v8295_v57 = vpop.f32.mrf.mxu0 }
 0x2f6   : > { %v8323_v58 = vpop.f32.mrf.mxu1  ;;  %v8296_v59 = vpop.f32.mrf.mxu0 }
 0x2f7   : > { %v8297_v60 = vadd.f32 %v8296_v59, %v8295_v57 }
 0x2f8   : > { %v8324_v61 = vpop.f32.mrf.mxu1  ;;  %v8298_v0 = vpop.f32.mrf.mxu0 }
 0x2f9   : > { %v8325_v62 = vadd.f32 %v8324_v61, %v8323_v58  ;;  %v7227_v1 = vadd.f32 %v8297_v60, %v7179_v40 }
 0x2fa   : > { %v8326_v2 = vpop.f32.mrf.mxu1  ;;  %v8299_v3 = vpop.f32.mrf.mxu0 }
 0x2fb   : > { %v7275_v4 = vadd.f32 %v8325_v62, %v7227_v1  ;;  %v8300_v30 = vadd.f32 %v8299_v3, %v8298_v0 }
 0x2fc   : > { %v8301_v5 = vpop.f32.mrf.mxu0  ;;  %v8327_v6 = vpop.f32.mrf.mxu1 }
 0x2fd   : > { %v7230_v32 = vadd.f32 %v8300_v30, %v7182_v46  ;;  %v8328_v34 = vadd.f32 %v8327_v6, %v8326_v2 }
 0x2fe   : > { %v8302_v7 = vpop.f32.mrf.mxu0  ;;  %v8329_v8 = vpop.f32.mrf.mxu1 }
 0x2ff   : > { %v8303_v33 = vadd.f32 %v8302_v7, %v8301_v5  ;;  %v7278_v38 = vadd.f32 %v8328_v34, %v7230_v32 }
 0x300   : > { %v8304_v9 = vpop.f32.mrf.mxu0  ;;  %v8330_v10 = vpop.f32.mrf.mxu1 }
 0x301   : > { %v7235_v40 = vadd.f32 %v8303_v33, %v7187_v55  ;;  %v8331_v41 = vadd.f32 %v8330_v10, %v8329_v8 }
 0x302   : > { %v8305_v63 = vpop.f32.mrf.mxu0  ;;  %v8332_v11 = vpop.f32.mrf.mxu1 }
 0x303   : > { %v7283_v51 = vadd.f32 %v8331_v41, %v7235_v40 }
 0x304   : > { %v8333_v12 = vpop.f32.mrf.mxu1 }
 0x314   : > { %v8351_v13 = vpop.f32.mrf.mxu0 }
 0x316   : > { %v8379_v15 = vpop.f32.mrf.mxu1  ;;  %v8352_v16 = vpop.f32.mrf.mxu0 }
 0x317   : > { %v8353_v31 = vadd.f32 %v8352_v16, %v8351_v13 }
 0x318   : > { %v8380_v17 = vpop.f32.mrf.mxu1  ;;  %v8354_v18 = vpop.f32.mrf.mxu0 }
 0x319   : > { %v7323_v36 = vadd.f32 %v8353_v31, %v7275_v4  ;;  %v8381_v37 = vadd.f32 %v8380_v17, %v8379_v15 }
 0x31a   : > { %v8382_v19 = vpop.f32.mrf.mxu1  ;;  %v8355_v20 = vpop.f32.mrf.mxu0 }
 0x31b   : > { %v8356_v35 = vadd.f32 %v8355_v20, %v8354_v18  ;;  %v7371_v45 = vadd.f32 %v8381_v37, %v7323_v36 }
 0x31c   : > { %v8357_v21 = vpop.f32.mrf.mxu0  ;;  %v8383_v22 = vpop.f32.mrf.mxu1 }
 0x31d   : > { %v7326_v43 = vadd.f32 %v8356_v35, %v7278_v38  ;;  %v8384_v49 = vadd.f32 %v8383_v22, %v8382_v19 }
 0x31e   : > { %v8358_v23 = vpop.f32.mrf.mxu0  ;;  %v8385_v24 = vpop.f32.mrf.mxu1 }
 0x31f   : > { %v8359_v25 = vadd.f32 %v8358_v23, %v8357_v21  ;;  %v7374_v54 = vadd.f32 %v8384_v49, %v7326_v43 }
 0x320   : > { %v8360_v26 = vpop.f32.mrf.mxu0  ;;  %v8386_v27 = vpop.f32.mrf.mxu1 }
 0x321   : > { %v7331_v57 = vadd.f32 %v8359_v25, %v7283_v51  ;;  %v8387_v58 = vadd.f32 %v8386_v27, %v8385_v24 }
 0x322   : > { %v8361_v14 = vpop.f32.mrf.mxu0  ;;  %v8388_v28 = vpop.f32.mrf.mxu1 }
 0x323   : > { %v7379_v3 = vadd.f32 %v8387_v58, %v7331_v57 }
 0x324   : > { %v8389_v29 = vpop.f32.mrf.mxu1 }
 0x334   : > { %v8407_v39 = vpop.f32.mrf.mxu0 }
 0x336   : > { %v8408_v44 = vpop.f32.mrf.mxu0 }
 0x337   : > { %v8409_v47 = vadd.f32 %v8408_v44, %v8407_v39 }
 0x338   : > { %v8410_v50 = vpop.f32.mrf.mxu0 }
 0x339   : > { %v7419_v46 = vadd.f32 %v8409_v47, %v7371_v45 }
 0x33a   : > { %v8411_v56 = vpop.f32.mrf.mxu0 }
 0x33b   : > { %v8412_v59 = vadd.f32 %v8411_v56, %v8410_v50 }
 0x33c   : > { %v8413_v61 = vpop.f32.mrf.mxu0 }
 0x33d   : > { %v8435_v42 = vpop.f32.mrf.mxu1  ;;  %v7422_v62 = vadd.f32 %v8412_v59, %v7374_v54 }
 0x33e   : > { %v8414_v2 = vpop.f32.mrf.mxu0 }
 0x33f   : > { %v8436_v48 = vpop.f32.mrf.mxu1  ;;  %v8415_v6 = vadd.f32 %v8414_v2, %v8413_v61 }
 0x340   : > { %v8437_v52 = vadd.f32 %v8436_v48, %v8435_v42  ;;  %v8416_v8 = vpop.f32.mrf.mxu0 }
 0x341   : > { %v8438_v53 = vpop.f32.mrf.mxu1  ;;  %v7427_v10 = vadd.f32 %v8415_v6, %v7379_v3 }
 0x342   : > { %v7467_v55 = vadd.f32 %v8437_v52, %v7419_v46  ;;  %v8417_v12 = vpop.f32.mrf.mxu0 }
 0x343   : > { %v8439_v60 = vpop.f32.mrf.mxu1 }
 0x344   : > { %v8440_v0 = vadd.f32 %v8439_v60, %v8438_v53  ;;  %v7483_v4 = vmul.f32 0.2, %v7467_v55  ;;  %vm7480_vm0 = vcmp.ge.f32.partialorder %v7467_v55, 0.0 }
 0x345   : > { %v8441_v1 = vpop.f32.mrf.mxu1 }
 0x346   : > { %v7470_v5 = vadd.f32 %v8440_v0, %v7422_v62  ;;  %v7486_v13 = vsel %vm7480_vm0, %v7467_v55, %v7483_v4 }
 0x347   : > { %v8442_v7 = vpop.f32.mrf.mxu1 }
 0x348   : > { %vm7481_vm1 = vcmp.ge.f32.partialorder %v7470_v5, 0.0  ;;  %v7484_v9 = vmul.f32 0.2, %v7470_v5  ;;  %v8443_v63 = vadd.f32 %v8442_v7, %v8441_v1 }
 0x349   : > { %v8444_v11 = vpop.f32.mrf.mxu1 }
 0x34a   : > { %v7487_v15 = vsel %vm7481_vm1, %v7470_v5, %v7484_v9  ;;  %v7475_v16 = vadd.f32 %v8443_v63, %v7427_v10 }
 0x34b   : > { %v8445_v17 = vpop.f32.mrf.mxu1  ;;  %v7997_v18 = vpack.c.bf16 %v7487_v15, %v7486_v13 }
 0x34c   : > { %vm7482_vm2 = vcmp.ge.f32.partialorder %v7475_v16, 0.0  ;;  %v7485_v19 = vmul.f32 0.2, %v7475_v16 }
 0x34d   : > { %7998 = vst [vmem:[%s4334_s9] sm:$0xff] %v7997_v18   ;;  %7511 = sbr.rel (!%p8866_p6) target bundleno = 858 (0x35a), region = 84 }
 0x34e   : > { %v7488_v20 = vsel %vm7482_vm2, %v7475_v16, %v7485_v19 }
 0x34f   : > { %v7993_v21 = vpack.c.bf16 %v7488_v20, %v7488_v20 }
 0x351   : > { %7504 = vst [vmem:[%s4334_s9 + $0x8] sm:$0x1] %v7993_v21 }
 0x354   : > { %v7533_v22 = vld [vmem:[%s4334_s9] sm:$0xf]  ;;  %v7535_v23 = vld [vmem:[%s4334_s9 + $0x4] sm:$0xf] }
 0x355   : > { %7534 = vst [vmem:[%s7516_s16] sm:$0xf] %v7533_v22  ;;  %7536 = vst [vmem:[%s7516_s16 + $0x10] sm:$0xf] %v7535_v23 }
 0x358   : > { %v7537_v24 = vld [vmem:[%s4334_s9 + $0x8] sm:$0xf] }
 0x359   : > { %7538 = vst [vmem:[%s7516_s16 + $0x20] sm:$0xf] %v7537_v24 }
 0x35a PF: > { %s12_s13 = sadd.s32 1, %s8814_s13   ;;  %s10374_s9 = smov %s8802_s10 }
 0x35b   : > { %p9_p11 = scmp.ge.s32.totalorder %s12_s13, 6   ;;  %s10375_s10 = smov %s8871_s19 }
 0x35c   : > { %s10376_s11 = smov %s8810_s12  ;;  %s10377_s12 = smov %s10379_s14 }
 0x35d   :  { %11 = sbr.rel (!%p9_p11) target bundleno = 3 (0x3), region = 163 }

</bundles_post_ra>
